<compile_context>
chip_gen: v7x
topology: tpu7x:2x2x1
jax: 0.10.0
libtpu: 0.0.40
codegen_flags: <defaults>
</compile_context>

<pallas_src>
import functools
import math

import jax
import jax.numpy as jnp
from jax.experimental import pallas as pl
from jax.experimental.pallas import tpu as pltpu
from jax.scipy.linalg import block_diag


# ----------------------------- Pallas kernels -------------------------------

def _edge_mlp_kernel(ea_ref, w1_ref, b1_ref, a1_ref, w2_ref, b2_ref, a2_ref,
                     w3_ref, b3_ref, a3_ref, w4_ref, b4_ref, o_ref):
    # All 20 edge MLPs fused: hidden weights are block-diagonal, biases/alphas
    # lane-packed.  out[e, :] = [Wr_0(e) | Wi_0(e) | Wr_1(e) | Wi_1(e) | ...]
    h = jnp.dot(ea_ref[...], w1_ref[...], preferred_element_type=jnp.float32) + b1_ref[...]
    h = jnp.where(h >= 0.0, h, a1_ref[...] * h)
    h = jnp.dot(h, w2_ref[...], preferred_element_type=jnp.float32) + b2_ref[...]
    h = jnp.where(h >= 0.0, h, a2_ref[...] * h)
    h = jnp.dot(h, w3_ref[...], preferred_element_type=jnp.float32) + b3_ref[...]
    h = jnp.where(h >= 0.0, h, a3_ref[...] * h)
    o_ref[...] = jnp.dot(h, w4_ref[...], preferred_element_type=jnp.float32) + b4_ref[...]


def _mlp2_kernel(x_ref, w1_ref, b1_ref, a1_ref, w2_ref, b2_ref, a2_ref, o_ref):
    # PReLU(PReLU(x@W1+b1)@W2+b2) with real/imag packed along lanes
    # (block-diagonal weights, lane-packed biases / PReLU alphas).
    h = jnp.dot(x_ref[...], w1_ref[...], preferred_element_type=jnp.float32) + b1_ref[...]
    h = jnp.where(h >= 0.0, h, a1_ref[...] * h)
    y = jnp.dot(h, w2_ref[...], preferred_element_type=jnp.float32) + b2_ref[...]
    o_ref[...] = jnp.where(y >= 0.0, y, a2_ref[...] * y)


def _cv_layer_kernel(x_ref, g_ref, s_ref, w_ref, erep_ref, rpack_ref,
                     wroot_ref, broot_ref, alpha_ref, o_ref, *, C):
    # One full CVNeuralOpKernel layer, everything in VMEM:
    #   out_r = PReLU(rr - ii), out_i = PReLU(ri + ir)  with NNConv(mean).
    # x      : [N, 2C]  = [xr | xi]
    # g      : [E, N]   one-hot gather matrix  (x_src = G @ x)
    # s      : [N, E]   scatter-mean matrix
    # w      : [E, 2*C*C] per-edge weights [Wr(e) | Wi(e)], row-major (cin*C+cout)
    # erep   : [C, C*C]  channel-expansion  (x @ erep)[e, c*C+o] = x[e, c]
    # rpack  : [2*C*C, 2C] block-diag "sum over cin" reduction matrix
    # wroot  : [2C, 2C]  [[Wr, Wi], [-Wi, Wr]]   broot: [b_r - b_i | b_r + b_i]
    CC = C * C
    x = x_ref[...]                                                          # [N, 2C]
    x_src = jnp.dot(g_ref[...], x, preferred_element_type=jnp.float32)      # [E, 2C]
    erep = erep_ref[...]
    xr_e = jnp.dot(x_src[:, :C], erep, preferred_element_type=jnp.float32)  # [E, CC]
    xi_e = jnp.dot(x_src[:, C:], erep, preferred_element_type=jnp.float32)  # [E, CC]
    w = w_ref[...]
    wr = w[:, :CC]
    wi = w[:, CC:]
    # complex per-edge message, packed: [m_rr - m_ii | m_ri + m_ir]
    prod = jnp.concatenate([xr_e * wr - xi_e * wi,
                            xi_e * wr + xr_e * wi], axis=1)                 # [E, 2*CC]
    msg = jnp.dot(prod, rpack_ref[...], preferred_element_type=jnp.float32)  # [E, 2C]
    agg = jnp.dot(s_ref[...], msg, preferred_element_type=jnp.float32)       # [N, 2C]
    y = jnp.dot(x, wroot_ref[...], preferred_element_type=jnp.float32) \
        + broot_ref[...] + agg
    o_ref[...] = jnp.where(y >= 0.0, y, alpha_ref[...] * y)


# ----------------------------- kernel wrappers -------------------------------

def _full(a):
    return pl.BlockSpec(a.shape, lambda i: (0, 0))


def _edge_mlp_call(edge_attr, em):
    E, F = edge_attr.shape
    O = em["w4"].shape[1]
    # Split edges across two grid steps when aligned -> the two TensorCores on
    # v7x each take half the edges ("parallel"); no effect on v5e/v6e.
    TE = E // 2 if (E % 16 == 0) else E
    return pl.pallas_call(
        _edge_mlp_kernel,
        out_shape=jax.ShapeDtypeStruct((E, O), jnp.float32),
        grid=(E // TE,),
        in_specs=[
            pl.BlockSpec((TE, F), lambda i: (i, 0)),
            _full(em["w1"]), _full(em["b1"]), _full(em["a1"]),
            _full(em["w2"]), _full(em["b2"]), _full(em["a2"]),
            _full(em["w3"]), _full(em["b3"]), _full(em["a3"]),
            _full(em["w4"]), _full(em["b4"]),
        ],
        out_specs=pl.BlockSpec((TE, O), lambda i: (i, 0)),
        compiler_params=pltpu.CompilerParams(dimension_semantics=("parallel",)),
    )(edge_attr, em["w1"], em["b1"], em["a1"], em["w2"], em["b2"], em["a2"],
      em["w3"], em["b3"], em["a3"], em["w4"], em["b4"])


def _mlp2_call(x, w1, b1, a1, w2, b2, a2):
    N = x.shape[0]
    O = w2.shape[1]
    return pl.pallas_call(
        _mlp2_kernel,
        out_shape=jax.ShapeDtypeStruct((N, O), jnp.float32),
        grid=(1,),
        in_specs=[_full(x), _full(w1), _full(b1), _full(a1),
                  _full(w2), _full(b2), _full(a2)],
        out_specs=pl.BlockSpec((N, O), lambda i: (0, 0)),
        compiler_params=pltpu.CompilerParams(dimension_semantics=("arbitrary",)),
    )(x, w1, b1, a1, w2, b2, a2)


def _cv_layer_call(x, g, s, w_edge, erep, rpack, wroot, broot, alpha):
    N, C2 = x.shape
    C = C2 // 2
    return pl.pallas_call(
        functools.partial(_cv_layer_kernel, C=C),
        out_shape=jax.ShapeDtypeStruct((N, C2), jnp.float32),
        grid=(1,),
        in_specs=[_full(x), _full(g), _full(s), _full(w_edge), _full(erep),
                  _full(rpack), _full(wroot), _full(broot), _full(alpha)],
        out_specs=pl.BlockSpec((N, C2), lambda i: (0, 0)),
        # TODO(synk): at realistic sizes give this kernel a node-tile grid axis
        # marked "parallel" so v7x's second TensorCore takes half the nodes.
        compiler_params=pltpu.CompilerParams(dimension_semantics=("arbitrary",)),
    )(x, g, s, w_edge, erep, rpack, wroot, broot, alpha)


# ----------------------------- parameter init --------------------------------

def _init_linear(key, fan_in, fan_out):
    kw_, kb = jax.random.split(key)
    bound = 1.0 / math.sqrt(fan_in)
    w = jax.random.uniform(kw_, (fan_in, fan_out), jnp.float32, -bound, bound)
    b = jax.random.uniform(kb, (1, fan_out), jnp.float32, -bound, bound)
    return w, b


def _init_aggr(key, edgefeasize, ker_width, C):
    keys = jax.random.split(key, 4)
    dims = [(edgefeasize, ker_width), (ker_width, ker_width),
            (ker_width, ker_width), (ker_width, C * C)]
    layers = [_init_linear(k, i, o) for k, (i, o) in zip(keys, dims)]
    alphas = [jnp.full((1, 1), 0.25, jnp.float32) for _ in range(3)]
    return {"layers": layers, "alphas": alphas}


def _init_cvkernel(key, C, ker_width, edgefeasize):
    k = jax.random.split(key, 4)
    return {
        "real_aggr": _init_aggr(k[0], edgefeasize, ker_width, C),
        "imag_aggr": _init_aggr(k[1], edgefeasize, ker_width, C),
        "real_root": _init_linear(k[2], C, C),   # NNConv root weight + bias
        "imag_root": _init_linear(k[3], C, C),
        "alpha_r": jnp.full((1, 1), 0.25, jnp.float32),
        "alpha_i": jnp.full((1, 1), 0.25, jnp.float32),
    }


def init_cvneuralop(key, inchannel, transchannel, outchannel, ker_width, edgefeasize):
    keys = jax.random.split(key, 18)
    half = transchannel // 2
    p = {
        "fcup1r": _init_linear(keys[0], inchannel, half),
        "fcup1i": _init_linear(keys[1], inchannel, half),
        "fcup2r": _init_linear(keys[2], half, transchannel),
        "fcup2i": _init_linear(keys[3], half, transchannel),
        "fcdown1r": _init_linear(keys[4], transchannel, half),
        "fcdown1i": _init_linear(keys[5], transchannel, half),
        "fcdown2r": _init_linear(keys[6], half, outchannel),
        "fcdown2i": _init_linear(keys[7], half, outchannel),
        "layers": [_init_cvkernel(keys[8 + i], transchannel, ker_width, edgefeasize)
                   for i in range(10)],
    }
    for name in ("a_up1r", "a_up1i", "a_up2r", "a_up2i",
                 "a_down1r", "a_down1i", "a_down2r", "a_down2i"):
        p[name] = jnp.full((1, 1), 0.25, jnp.float32)
    return p


# ------------------------ parameter packing (one-time) ------------------------

def pack_params(params):
    """Rearrange PyTorch-style params into lane-packed / block-diagonal tensors
    consumed by the fused kernels.  Pure data movement, done once up front."""
    C = params["layers"][0]["real_root"][0].shape[0]
    half = params["fcup1r"][0].shape[1]
    outch = params["fcdown2r"][0].shape[1]
    kw = params["layers"][0]["real_aggr"]["layers"][0][0].shape[1]
    CC = C * C

    bd = lambda mats: block_diag(*mats)
    cat = lambda arrs: jnp.concatenate(arrs, axis=1)
    avec = lambda a, n: jnp.broadcast_to(a.reshape(1, 1), (1, n))

    fcup = {
        "w1": bd([params["fcup1r"][0], params["fcup1i"][0]]),
        "b1": cat([params["fcup1r"][1], params["fcup1i"][1]]),
        "a1": cat([avec(params["a_up1r"], half), avec(params["a_up1i"], half)]),
        "w2": bd([params["fcup2r"][0], params["fcup2i"][0]]),
        "b2": cat([params["fcup2r"][1], params["fcup2i"][1]]),
        "a2": cat([avec(params["a_up2r"], C), avec(params["a_up2i"], C)]),
    }
    fcdown = {
        "w1": bd([params["fcdown1r"][0], params["fcdown1i"][0]]),
        "b1": cat([params["fcdown1r"][1], params["fcdown1i"][1]]),
        "a1": cat([avec(params["a_down1r"], half), avec(params["a_down1i"], half)]),
        "w2": bd([params["fcdown2r"][0], params["fcdown2i"][0]]),
        "b2": cat([params["fcdown2r"][1], params["fcdown2i"][1]]),
        "a2": cat([avec(params["a_down2r"], outch), avec(params["a_down2i"], outch)]),
    }

    # All 20 edge MLPs batched; heads interleaved [real_0, imag_0, real_1, ...]
    heads = []
    for lp in params["layers"]:
        heads += [lp["real_aggr"], lp["imag_aggr"]]
    em = {
        "w1": cat([h["layers"][0][0] for h in heads]),
        "b1": cat([h["layers"][0][1] for h in heads]),
        "a1": cat([avec(h["alphas"][0], kw) for h in heads]),
        "w2": bd([h["layers"][1][0] for h in heads]),
        "b2": cat([h["layers"][1][1] for h in heads]),
        "a2": cat([avec(h["alphas"][1], kw) for h in heads]),
        "w3": bd([h["layers"][2][0] for h in heads]),
        "b3": cat([h["layers"][2][1] for h in heads]),
        "a3": cat([avec(h["alphas"][2], kw) for h in heads]),
        "w4": bd([h["layers"][3][0] for h in heads]),        # [20*kw, 20*C*C]
        "b4": cat([h["layers"][3][1] for h in heads]),
    }

    layers_pk = []
    for lp in params["layers"]:
        wr_r, br = lp["real_root"]
        wi_r, bi = lp["imag_root"]
        wroot = jnp.concatenate(
            [jnp.concatenate([wr_r, wi_r], axis=1),
             jnp.concatenate([-wi_r, wr_r], axis=1)], axis=0)             # [2C, 2C]
        broot = jnp.concatenate([br - bi, br + bi], axis=1)               # [1, 2C]
        alpha = cat([avec(lp["alpha_r"], C), avec(lp["alpha_i"], C)])
        layers_pk.append({"wroot": wroot, "broot": broot, "alpha": alpha})

    eye = jnp.eye(C, dtype=jnp.float32)
    erep = jnp.repeat(eye, C, axis=1)                                     # [C, C*C]
    rsum = jnp.tile(eye, (C, 1))                                          # [C*C, C]
    rpack = bd([rsum, rsum])                                              # [2*C*C, 2C]

    return {"fcup": fcup, "fcdown": fcdown, "edge_mlp": em,
            "layers": layers_pk, "erep": erep, "rpack": rpack}


# ------------------------------- forward pass --------------------------------

@jax.jit
def cvneuralop_forward(packed, xr, xi, edge_index, edge_attr):
    C = packed["erep"].shape[0]
    CC = C * C
    src, tgt = edge_index[0], edge_index[1]
    n_nodes = xr.shape[0]

    # Gather / scatter-mean as dense one-hot operators, consumed on the MXU
    # inside the fused layer kernel.
    # TODO(synk): at realistic graph sizes replace with a scalar-prefetched
    # segment-sum / pl.Element row-gather instead of O(N*E) dense matrices.
    node_ids = jnp.arange(n_nodes)
    G = (src[:, None] == node_ids[None, :]).astype(jnp.float32)           # [E, N]
    T = (tgt[:, None] == node_ids[None, :]).astype(jnp.float32)           # [E, N]
    deg = T.sum(axis=0, keepdims=True)
    S = (T / jnp.maximum(deg, 1.0)).T                                     # [N, E]

    # lift (real/imag lane-packed, block-diagonal weights): 1 pallas_call
    x = jnp.concatenate([xr, xi], axis=1)
    fu = packed["fcup"]
    x = _mlp2_call(x, fu["w1"], fu["b1"], fu["a1"], fu["w2"], fu["b2"], fu["a2"])

    # all 20 edge MLPs at once (layer-invariant): 1 pallas_call
    edge_w = _edge_mlp_call(edge_attr, packed["edge_mlp"])                # [E, 20*C*C]

    # 10 fused CVNeuralOpKernel layers: 1 pallas_call each
    for l, lp in enumerate(packed["layers"]):
        w_l = edge_w[:, 2 * l * CC:2 * (l + 1) * CC]                      # [E, 2*C*C]
        x = _cv_layer_call(x, G, S, w_l, packed["erep"], packed["rpack"],
                           lp["wroot"], lp["broot"], lp["alpha"])

    # project down: 1 pallas_call
    fd = packed["fcdown"]
    y = _mlp2_call(x, fd["w1"], fd["b1"], fd["a1"], fd["w2"], fd["b2"], fd["a2"])
    outch = y.shape[1] // 2
    return y[:, :outch], y[:, outch:]


# ----------------------------------- main -------------------------------------

if __name__ == "__main__":
    N_NODES, N_EDGES = 32, 128
    INCH, TRANSCH, OUTCH, KERW, EDGEF = 2, 8, 2, 32, 4

    key = jax.random.PRNGKey(0)
    kp, kx1, kx2, ke1, ke2, ka = jax.random.split(key, 6)
    params = init_cvneuralop(kp, INCH, TRANSCH, OUTCH, KERW, EDGEF)
    packed = pack_params(params)          # one-time repack, outside the jit

    xr = jax.random.normal(kx1, (N_NODES, INCH), jnp.float32)
    xi = jax.random.normal(kx2, (N_NODES, INCH), jnp.float32)
    src = jax.random.randint(ke1, (N_EDGES,), 0, N_NODES)
    tgt = jax.random.randint(ke2, (N_EDGES,), 0, N_NODES)
    edge_index = jnp.stack([src, tgt], axis=0)                 # [2, E], row0=src, row1=tgt
    edge_attr = jax.random.normal(ka, (N_EDGES, EDGEF), jnp.float32)

    out_r, out_i = cvneuralop_forward(packed, xr, xi, edge_index, edge_attr)
    jax.block_until_ready((out_r, out_i))
    assert out_r.shape == (N_NODES, OUTCH) and out_i.shape == (N_NODES, OUTCH)
    assert out_r.dtype == jnp.float32 and out_i.dtype == jnp.float32
    print("KERNEL_OK")
</pallas_src>

<mosaic_0001>
module attributes {stable_mosaic.version = 11 : i64} {
  func.func @_edge_mlp_kernel(%arg0: i32, %arg1: memref<64x4xf32, #tpu.memory_space<vmem>>, %arg2: memref<4x640xf32, #tpu.memory_space<vmem>>, %arg3: memref<1x640xf32, #tpu.memory_space<vmem>>, %arg4: memref<1x640xf32, #tpu.memory_space<vmem>>, %arg5: memref<640x640xf32, #tpu.memory_space<vmem>>, %arg6: memref<1x640xf32, #tpu.memory_space<vmem>>, %arg7: memref<1x640xf32, #tpu.memory_space<vmem>>, %arg8: memref<640x640xf32, #tpu.memory_space<vmem>>, %arg9: memref<1x640xf32, #tpu.memory_space<vmem>>, %arg10: memref<1x640xf32, #tpu.memory_space<vmem>>, %arg11: memref<640x1280xf32, #tpu.memory_space<vmem>>, %arg12: memref<1x1280xf32, #tpu.memory_space<vmem>>, %arg13: memref<64x1280xf32, #tpu.memory_space<vmem>>) attributes {dimension_semantics = [#tpu.dimension_semantics<parallel>], iteration_bounds = array<i64: 2>, scalar_prefetch = 0 : i64, scratch_operands = 0 : i64, tpu.core_type = #tpu.core_type<tc>, window_params = [{transform_indices = @transform_0, window_bounds = array<i64: 64, 4>}, {pipeline_mode = #tpu.pipeline_mode<synchronous>, transform_indices = @transform_1, window_bounds = array<i64: 4, 640>}, {pipeline_mode = #tpu.pipeline_mode<synchronous>, transform_indices = @transform_2, window_bounds = array<i64: 1, 640>}, {pipeline_mode = #tpu.pipeline_mode<synchronous>, transform_indices = @transform_3, window_bounds = array<i64: 1, 640>}, {pipeline_mode = #tpu.pipeline_mode<synchronous>, transform_indices = @transform_4, window_bounds = array<i64: 640, 640>}, {pipeline_mode = #tpu.pipeline_mode<synchronous>, transform_indices = @transform_5, window_bounds = array<i64: 1, 640>}, {pipeline_mode = #tpu.pipeline_mode<synchronous>, transform_indices = @transform_6, window_bounds = array<i64: 1, 640>}, {pipeline_mode = #tpu.pipeline_mode<synchronous>, transform_indices = @transform_7, window_bounds = array<i64: 640, 640>}, {pipeline_mode = #tpu.pipeline_mode<synchronous>, transform_indices = @transform_8, window_bounds = array<i64: 1, 640>}, {pipeline_mode = #tpu.pipeline_mode<synchronous>, transform_indices = @transform_9, window_bounds = array<i64: 1, 640>}, {pipeline_mode = #tpu.pipeline_mode<synchronous>, transform_indices = @transform_10, window_bounds = array<i64: 640, 1280>}, {pipeline_mode = #tpu.pipeline_mode<synchronous>, transform_indices = @transform_11, window_bounds = array<i64: 1, 1280>}, {transform_indices = @transform_12, window_bounds = array<i64: 64, 1280>}]} {
    %c0 = arith.constant 0 : index
    %c0_0 = arith.constant 0 : index
    %0 = vector.load %arg1[%c0, %c0_0] : memref<64x4xf32, #tpu.memory_space<vmem>>, vector<64x4xf32>
    %c0_1 = arith.constant 0 : index
    %c0_2 = arith.constant 0 : index
    %1 = vector.load %arg2[%c0_1, %c0_2] : memref<4x640xf32, #tpu.memory_space<vmem>>, vector<4x640xf32>
    %cst = arith.constant dense<0.000000e+00> : vector<64x640xf32>
    %2 = tpu.matmul %0, %1, %cst {dimension_numbers = #tpu.dot_dimension_numbers<[1], [0], [0], [1], [0, 0, 1, 1], [], []>} : vector<64x4xf32>, vector<4x640xf32>, vector<64x640xf32> -> vector<64x640xf32>
    %c0_3 = arith.constant 0 : index
    %c0_4 = arith.constant 0 : index
    %3 = vector.load %arg3[%c0_3, %c0_4] : memref<1x640xf32, #tpu.memory_space<vmem>>, vector<1x640xf32>
    %4 = vector.broadcast %3 : vector<1x640xf32> to vector<64x640xf32>
    %5 = arith.addf %2, %4 : vector<64x640xf32>
    %cst_5 = arith.constant 0.000000e+00 : f32
    %6 = vector.broadcast %cst_5 : f32 to vector<64x640xf32>
    %7 = arith.cmpf oge, %5, %6 : vector<64x640xf32>
    %c0_6 = arith.constant 0 : index
    %c0_7 = arith.constant 0 : index
    %8 = vector.load %arg4[%c0_6, %c0_7] : memref<1x640xf32, #tpu.memory_space<vmem>>, vector<1x640xf32>
    %9 = vector.broadcast %8 : vector<1x640xf32> to vector<64x640xf32>
    %10 = arith.mulf %9, %5 : vector<64x640xf32>
    %11 = arith.select %7, %5, %10 : vector<64x640xi1>, vector<64x640xf32>
    %c0_8 = arith.constant 0 : index
    %c0_9 = arith.constant 0 : index
    %12 = vector.load %arg5[%c0_8, %c0_9] : memref<640x640xf32, #tpu.memory_space<vmem>>, vector<640x640xf32>
    %cst_10 = arith.constant dense<0.000000e+00> : vector<64x640xf32>
    %13 = tpu.matmul %11, %12, %cst_10 {dimension_numbers = #tpu.dot_dimension_numbers<[1], [0], [0], [1], [0, 0, 1, 1], [], []>} : vector<64x640xf32>, vector<640x640xf32>, vector<64x640xf32> -> vector<64x640xf32>
    %c0_11 = arith.constant 0 : index
    %c0_12 = arith.constant 0 : index
    %14 = vector.load %arg6[%c0_11, %c0_12] : memref<1x640xf32, #tpu.memory_space<vmem>>, vector<1x640xf32>
    %15 = vector.broadcast %14 : vector<1x640xf32> to vector<64x640xf32>
    %16 = arith.addf %13, %15 : vector<64x640xf32>
    %cst_13 = arith.constant 0.000000e+00 : f32
    %17 = vector.broadcast %cst_13 : f32 to vector<64x640xf32>
    %18 = arith.cmpf oge, %16, %17 : vector<64x640xf32>
    %c0_14 = arith.constant 0 : index
    %c0_15 = arith.constant 0 : index
    %19 = vector.load %arg7[%c0_14, %c0_15] : memref<1x640xf32, #tpu.memory_space<vmem>>, vector<1x640xf32>
    %20 = vector.broadcast %19 : vector<1x640xf32> to vector<64x640xf32>
    %21 = arith.mulf %20, %16 : vector<64x640xf32>
    %22 = arith.select %18, %16, %21 : vector<64x640xi1>, vector<64x640xf32>
    %c0_16 = arith.constant 0 : index
    %c0_17 = arith.constant 0 : index
    %23 = vector.load %arg8[%c0_16, %c0_17] : memref<640x640xf32, #tpu.memory_space<vmem>>, vector<640x640xf32>
    %cst_18 = arith.constant dense<0.000000e+00> : vector<64x640xf32>
    %24 = tpu.matmul %22, %23, %cst_18 {dimension_numbers = #tpu.dot_dimension_numbers<[1], [0], [0], [1], [0, 0, 1, 1], [], []>} : vector<64x640xf32>, vector<640x640xf32>, vector<64x640xf32> -> vector<64x640xf32>
    %c0_19 = arith.constant 0 : index
    %c0_20 = arith.constant 0 : index
    %25 = vector.load %arg9[%c0_19, %c0_20] : memref<1x640xf32, #tpu.memory_space<vmem>>, vector<1x640xf32>
    %26 = vector.broadcast %25 : vector<1x640xf32> to vector<64x640xf32>
    %27 = arith.addf %24, %26 : vector<64x640xf32>
    %cst_21 = arith.constant 0.000000e+00 : f32
    %28 = vector.broadcast %cst_21 : f32 to vector<64x640xf32>
    %29 = arith.cmpf oge, %27, %28 : vector<64x640xf32>
    %c0_22 = arith.constant 0 : index
    %c0_23 = arith.constant 0 : index
    %30 = vector.load %arg10[%c0_22, %c0_23] : memref<1x640xf32, #tpu.memory_space<vmem>>, vector<1x640xf32>
    %31 = vector.broadcast %30 : vector<1x640xf32> to vector<64x640xf32>
    %32 = arith.mulf %31, %27 : vector<64x640xf32>
    %33 = arith.select %29, %27, %32 : vector<64x640xi1>, vector<64x640xf32>
    %c0_24 = arith.constant 0 : index
    %c0_25 = arith.constant 0 : index
    %34 = vector.load %arg11[%c0_24, %c0_25] : memref<640x1280xf32, #tpu.memory_space<vmem>>, vector<640x1280xf32>
    %cst_26 = arith.constant dense<0.000000e+00> : vector<64x1280xf32>
    %35 = tpu.matmul %33, %34, %cst_26 {dimension_numbers = #tpu.dot_dimension_numbers<[1], [0], [0], [1], [0, 0, 1, 1], [], []>} : vector<64x640xf32>, vector<640x1280xf32>, vector<64x1280xf32> -> vector<64x1280xf32>
    %c0_27 = arith.constant 0 : index
    %c0_28 = arith.constant 0 : index
    %36 = vector.load %arg12[%c0_27, %c0_28] : memref<1x1280xf32, #tpu.memory_space<vmem>>, vector<1x1280xf32>
    %37 = vector.broadcast %36 : vector<1x1280xf32> to vector<64x1280xf32>
    %38 = arith.addf %35, %37 : vector<64x1280xf32>
    %c0_29 = arith.constant 0 : index
    %c0_30 = arith.constant 0 : index
    %39 = vector.load %arg13[%c0_29, %c0_30] : memref<64x1280xf32, #tpu.memory_space<vmem>>, vector<64x1280xf32>
    tpu.vector_store %arg13[%c0_29, %c0_30], %38 {strides = array<i32>} : memref<64x1280xf32, #tpu.memory_space<vmem>>, vector<64x1280xf32>,
    return
  }
  func.func @transform_0(%arg0: i32) -> (i32, i32) {
    %c0_i32 = arith.constant 0 : i32
    %c0_i32_0 = arith.constant 0 : i32
    return %arg0, %c0_i32 : i32, i32
  }
  func.func @transform_1(%arg0: i32) -> (i32, i32) {
    %c0_i32 = arith.constant 0 : i32
    %c0_i32_0 = arith.constant 0 : i32
    %c0_i32_1 = arith.constant 0 : i32
    return %c0_i32, %c0_i32_0 : i32, i32
  }
  func.func @transform_2(%arg0: i32) -> (i32, i32) {
    %c0_i32 = arith.constant 0 : i32
    %c0_i32_0 = arith.constant 0 : i32
    %c0_i32_1 = arith.constant 0 : i32
    return %c0_i32, %c0_i32_0 : i32, i32
  }
  func.func @transform_3(%arg0: i32) -> (i32, i32) {
    %c0_i32 = arith.constant 0 : i32
    %c0_i32_0 = arith.constant 0 : i32
    %c0_i32_1 = arith.constant 0 : i32
    return %c0_i32, %c0_i32_0 : i32, i32
  }
  func.func @transform_4(%arg0: i32) -> (i32, i32) {
    %c0_i32 = arith.constant 0 : i32
    %c0_i32_0 = arith.constant 0 : i32
    %c0_i32_1 = arith.constant 0 : i32
    return %c0_i32, %c0_i32_0 : i32, i32
  }
  func.func @transform_5(%arg0: i32) -> (i32, i32) {
    %c0_i32 = arith.constant 0 : i32
    %c0_i32_0 = arith.constant 0 : i32
    %c0_i32_1 = arith.constant 0 : i32
    return %c0_i32, %c0_i32_0 : i32, i32
  }
  func.func @transform_6(%arg0: i32) -> (i32, i32) {
    %c0_i32 = arith.constant 0 : i32
    %c0_i32_0 = arith.constant 0 : i32
    %c0_i32_1 = arith.constant 0 : i32
    return %c0_i32, %c0_i32_0 : i32, i32
  }
  func.func @transform_7(%arg0: i32) -> (i32, i32) {
    %c0_i32 = arith.constant 0 : i32
    %c0_i32_0 = arith.constant 0 : i32
    %c0_i32_1 = arith.constant 0 : i32
    return %c0_i32, %c0_i32_0 : i32, i32
  }
  func.func @transform_8(%arg0: i32) -> (i32, i32) {
    %c0_i32 = arith.constant 0 : i32
    %c0_i32_0 = arith.constant 0 : i32
    %c0_i32_1 = arith.constant 0 : i32
    return %c0_i32, %c0_i32_0 : i32, i32
  }
  func.func @transform_9(%arg0: i32) -> (i32, i32) {
    %c0_i32 = arith.constant 0 : i32
    %c0_i32_0 = arith.constant 0 : i32
    %c0_i32_1 = arith.constant 0 : i32
    return %c0_i32, %c0_i32_0 : i32, i32
  }
  func.func @transform_10(%arg0: i32) -> (i32, i32) {
    %c0_i32 = arith.constant 0 : i32
    %c0_i32_0 = arith.constant 0 : i32
    %c0_i32_1 = arith.constant 0 : i32
    return %c0_i32, %c0_i32_0 : i32, i32
  }
  func.func @transform_11(%arg0: i32) -> (i32, i32) {
    %c0_i32 = arith.constant 0 : i32
    %c0_i32_0 = arith.constant 0 : i32
    %c0_i32_1 = arith.constant 0 : i32
    return %c0_i32, %c0_i32_0 : i32, i32
  }
  func.func @transform_12(%arg0: i32) -> (i32, i32) {
    %c0_i32 = arith.constant 0 : i32
    %c0_i32_0 = arith.constant 0 : i32
    return %arg0, %c0_i32 : i32, i32
  }
}

module attributes {stable_mosaic.version = 11 : i64} {
  func.func @_mlp2_kernel(%arg0: i32, %arg1: memref<32x4xf32, #tpu.memory_space<vmem>>, %arg2: memref<4x8xf32, #tpu.memory_space<vmem>>, %arg3: memref<1x8xf32, #tpu.memory_space<vmem>>, %arg4: memref<1x8xf32, #tpu.memory_space<vmem>>, %arg5: memref<8x16xf32, #tpu.memory_space<vmem>>, %arg6: memref<1x16xf32, #tpu.memory_space<vmem>>, %arg7: memref<1x16xf32, #tpu.memory_space<vmem>>, %arg8: memref<32x16xf32, #tpu.memory_space<vmem>>) attributes {dimension_semantics = [#tpu.dimension_semantics<arbitrary>], iteration_bounds = array<i64: 1>, scalar_prefetch = 0 : i64, scratch_operands = 0 : i64, tpu.core_type = #tpu.core_type<tc>, window_params = [{pipeline_mode = #tpu.pipeline_mode<synchronous>, transform_indices = @transform_0, window_bounds = array<i64: 32, 4>}, {pipeline_mode = #tpu.pipeline_mode<synchronous>, transform_indices = @transform_1, window_bounds = array<i64: 4, 8>}, {pipeline_mode = #tpu.pipeline_mode<synchronous>, transform_indices = @transform_2, window_bounds = array<i64: 1, 8>}, {pipeline_mode = #tpu.pipeline_mode<synchronous>, transform_indices = @transform_3, window_bounds = array<i64: 1, 8>}, {pipeline_mode = #tpu.pipeline_mode<synchronous>, transform_indices = @transform_4, window_bounds = array<i64: 8, 16>}, {pipeline_mode = #tpu.pipeline_mode<synchronous>, transform_indices = @transform_5, window_bounds = array<i64: 1, 16>}, {pipeline_mode = #tpu.pipeline_mode<synchronous>, transform_indices = @transform_6, window_bounds = array<i64: 1, 16>}, {pipeline_mode = #tpu.pipeline_mode<synchronous>, transform_indices = @transform_7, window_bounds = array<i64: 32, 16>}]} {
    %c0 = arith.constant 0 : index
    %c0_0 = arith.constant 0 : index
    %0 = vector.load %arg1[%c0, %c0_0] : memref<32x4xf32, #tpu.memory_space<vmem>>, vector<32x4xf32>
    %c0_1 = arith.constant 0 : index
    %c0_2 = arith.constant 0 : index
    %1 = vector.load %arg2[%c0_1, %c0_2] : memref<4x8xf32, #tpu.memory_space<vmem>>, vector<4x8xf32>
    %cst = arith.constant dense<0.000000e+00> : vector<32x8xf32>
    %2 = tpu.matmul %0, %1, %cst {dimension_numbers = #tpu.dot_dimension_numbers<[1], [0], [0], [1], [0, 0, 1, 1], [], []>} : vector<32x4xf32>, vector<4x8xf32>, vector<32x8xf32> -> vector<32x8xf32>
    %c0_3 = arith.constant 0 : index
    %c0_4 = arith.constant 0 : index
    %3 = vector.load %arg3[%c0_3, %c0_4] : memref<1x8xf32, #tpu.memory_space<vmem>>, vector<1x8xf32>
    %4 = vector.broadcast %3 : vector<1x8xf32> to vector<32x8xf32>
    %5 = arith.addf %2, %4 : vector<32x8xf32>
    %cst_5 = arith.constant 0.000000e+00 : f32
    %6 = vector.broadcast %cst_5 : f32 to vector<32x8xf32>
    %7 = arith.cmpf oge, %5, %6 : vector<32x8xf32>
    %c0_6 = arith.constant 0 : index
    %c0_7 = arith.constant 0 : index
    %8 = vector.load %arg4[%c0_6, %c0_7] : memref<1x8xf32, #tpu.memory_space<vmem>>, vector<1x8xf32>
    %9 = vector.broadcast %8 : vector<1x8xf32> to vector<32x8xf32>
    %10 = arith.mulf %9, %5 : vector<32x8xf32>
    %11 = arith.select %7, %5, %10 : vector<32x8xi1>, vector<32x8xf32>
    %c0_8 = arith.constant 0 : index
    %c0_9 = arith.constant 0 : index
    %12 = vector.load %arg5[%c0_8, %c0_9] : memref<8x16xf32, #tpu.memory_space<vmem>>, vector<8x16xf32>
    %cst_10 = arith.constant dense<0.000000e+00> : vector<32x16xf32>
    %13 = tpu.matmul %11, %12, %cst_10 {dimension_numbers = #tpu.dot_dimension_numbers<[1], [0], [0], [1], [0, 0, 1, 1], [], []>} : vector<32x8xf32>, vector<8x16xf32>, vector<32x16xf32> -> vector<32x16xf32>
    %c0_11 = arith.constant 0 : index
    %c0_12 = arith.constant 0 : index
    %14 = vector.load %arg6[%c0_11, %c0_12] : memref<1x16xf32, #tpu.memory_space<vmem>>, vector<1x16xf32>
    %15 = vector.broadcast %14 : vector<1x16xf32> to vector<32x16xf32>
    %16 = arith.addf %13, %15 : vector<32x16xf32>
    %cst_13 = arith.constant 0.000000e+00 : f32
    %17 = vector.broadcast %cst_13 : f32 to vector<32x16xf32>
    %18 = arith.cmpf oge, %16, %17 : vector<32x16xf32>
    %c0_14 = arith.constant 0 : index
    %c0_15 = arith.constant 0 : index
    %19 = vector.load %arg7[%c0_14, %c0_15] : memref<1x16xf32, #tpu.memory_space<vmem>>, vector<1x16xf32>
    %20 = vector.broadcast %19 : vector<1x16xf32> to vector<32x16xf32>
    %21 = arith.mulf %20, %16 : vector<32x16xf32>
    %22 = arith.select %18, %16, %21 : vector<32x16xi1>, vector<32x16xf32>
    %c0_16 = arith.constant 0 : index
    %c0_17 = arith.constant 0 : index
    %23 = vector.load %arg8[%c0_16, %c0_17] : memref<32x16xf32, #tpu.memory_space<vmem>>, vector<32x16xf32>
    tpu.vector_store %arg8[%c0_16, %c0_17], %22 {strides = array<i32>} : memref<32x16xf32, #tpu.memory_space<vmem>>, vector<32x16xf32>,
    return
  }
  func.func @transform_0(%arg0: i32) -> (i32, i32) {
    %c0_i32 = arith.constant 0 : i32
    %c0_i32_0 = arith.constant 0 : i32
    %c0_i32_1 = arith.constant 0 : i32
    return %c0_i32, %c0_i32_0 : i32, i32
  }
  func.func @transform_1(%arg0: i32) -> (i32, i32) {
    %c0_i32 = arith.constant 0 : i32
    %c0_i32_0 = arith.constant 0 : i32
    %c0_i32_1 = arith.constant 0 : i32
    return %c0_i32, %c0_i32_0 : i32, i32
  }
  func.func @transform_2(%arg0: i32) -> (i32, i32) {
    %c0_i32 = arith.constant 0 : i32
    %c0_i32_0 = arith.constant 0 : i32
    %c0_i32_1 = arith.constant 0 : i32
    return %c0_i32, %c0_i32_0 : i32, i32
  }
  func.func @transform_3(%arg0: i32) -> (i32, i32) {
    %c0_i32 = arith.constant 0 : i32
    %c0_i32_0 = arith.constant 0 : i32
    %c0_i32_1 = arith.constant 0 : i32
    return %c0_i32, %c0_i32_0 : i32, i32
  }
  func.func @transform_4(%arg0: i32) -> (i32, i32) {
    %c0_i32 = arith.constant 0 : i32
    %c0_i32_0 = arith.constant 0 : i32
    %c0_i32_1 = arith.constant 0 : i32
    return %c0_i32, %c0_i32_0 : i32, i32
  }
  func.func @transform_5(%arg0: i32) -> (i32, i32) {
    %c0_i32 = arith.constant 0 : i32
    %c0_i32_0 = arith.constant 0 : i32
    %c0_i32_1 = arith.constant 0 : i32
    return %c0_i32, %c0_i32_0 : i32, i32
  }
  func.func @transform_6(%arg0: i32) -> (i32, i32) {
    %c0_i32 = arith.constant 0 : i32
    %c0_i32_0 = arith.constant 0 : i32
    %c0_i32_1 = arith.constant 0 : i32
    return %c0_i32, %c0_i32_0 : i32, i32
  }
  func.func @transform_7(%arg0: i32) -> (i32, i32) {
    %c0_i32 = arith.constant 0 : i32
    %c0_i32_0 = arith.constant 0 : i32
    %c0_i32_1 = arith.constant 0 : i32
    return %c0_i32, %c0_i32_0 : i32, i32
  }
}

module attributes {stable_mosaic.version = 11 : i64} {
  func.func @_cv_layer_kernel(%arg0: i32, %arg1: memref<32x16xf32, #tpu.memory_space<vmem>>, %arg2: memref<128x32xf32, #tpu.memory_space<vmem>>, %arg3: memref<32x128xf32, #tpu.memory_space<vmem>>, %arg4: memref<128x128xf32, #tpu.memory_space<vmem>>, %arg5: memref<8x64xf32, #tpu.memory_space<vmem>>, %arg6: memref<128x16xf32, #tpu.memory_space<vmem>>, %arg7: memref<16x16xf32, #tpu.memory_space<vmem>>, %arg8: memref<1x16xf32, #tpu.memory_space<vmem>>, %arg9: memref<1x16xf32, #tpu.memory_space<vmem>>, %arg10: memref<32x16xf32, #tpu.memory_space<vmem>>) attributes {dimension_semantics = [#tpu.dimension_semantics<arbitrary>], iteration_bounds = array<i64: 1>, scalar_prefetch = 0 : i64, scratch_operands = 0 : i64, tpu.core_type = #tpu.core_type<tc>, window_params = [{pipeline_mode = #tpu.pipeline_mode<synchronous>, transform_indices = @transform_0, window_bounds = array<i64: 32, 16>}, {pipeline_mode = #tpu.pipeline_mode<synchronous>, transform_indices = @transform_1, window_bounds = array<i64: 128, 32>}, {pipeline_mode = #tpu.pipeline_mode<synchronous>, transform_indices = @transform_2, window_bounds = array<i64: 32, 128>}, {pipeline_mode = #tpu.pipeline_mode<synchronous>, transform_indices = @transform_3, window_bounds = array<i64: 128, 128>}, {pipeline_mode = #tpu.pipeline_mode<synchronous>, transform_indices = @transform_4, window_bounds = array<i64: 8, 64>}, {pipeline_mode = #tpu.pipeline_mode<synchronous>, transform_indices = @transform_5, window_bounds = array<i64: 128, 16>}, {pipeline_mode = #tpu.pipeline_mode<synchronous>, transform_indices = @transform_6, window_bounds = array<i64: 16, 16>}, {pipeline_mode = #tpu.pipeline_mode<synchronous>, transform_indices = @transform_7, window_bounds = array<i64: 1, 16>}, {pipeline_mode = #tpu.pipeline_mode<synchronous>, transform_indices = @transform_8, window_bounds = array<i64: 1, 16>}, {pipeline_mode = #tpu.pipeline_mode<synchronous>, transform_indices = @transform_9, window_bounds = array<i64: 32, 16>}]} {
    %c0 = arith.constant 0 : index
    %c0_0 = arith.constant 0 : index
    %0 = vector.load %arg1[%c0, %c0_0] : memref<32x16xf32, #tpu.memory_space<vmem>>, vector<32x16xf32>
    %c0_1 = arith.constant 0 : index
    %c0_2 = arith.constant 0 : index
    %1 = vector.load %arg2[%c0_1, %c0_2] : memref<128x32xf32, #tpu.memory_space<vmem>>, vector<128x32xf32>
    %cst = arith.constant dense<0.000000e+00> : vector<128x16xf32>
    %2 = tpu.matmul %1, %0, %cst {dimension_numbers = #tpu.dot_dimension_numbers<[1], [0], [0], [1], [0, 0, 1, 1], [], []>} : vector<128x32xf32>, vector<32x16xf32>, vector<128x16xf32> -> vector<128x16xf32>
    %c0_3 = arith.constant 0 : index
    %c0_4 = arith.constant 0 : index
    %3 = vector.load %arg5[%c0_3, %c0_4] : memref<8x64xf32, #tpu.memory_space<vmem>>, vector<8x64xf32>
    %4 = vector.extract_strided_slice %2 {offsets = [0, 0], sizes = [128, 8], strides = [1, 1]} : vector<128x16xf32> to vector<128x8xf32>
    %cst_5 = arith.constant dense<0.000000e+00> : vector<128x64xf32>
    %5 = tpu.matmul %4, %3, %cst_5 {dimension_numbers = #tpu.dot_dimension_numbers<[1], [0], [0], [1], [0, 0, 1, 1], [], []>} : vector<128x8xf32>, vector<8x64xf32>, vector<128x64xf32> -> vector<128x64xf32>
    %6 = vector.extract_strided_slice %2 {offsets = [0, 8], sizes = [128, 8], strides = [1, 1]} : vector<128x16xf32> to vector<128x8xf32>
    %cst_6 = arith.constant dense<0.000000e+00> : vector<128x64xf32>
    %7 = tpu.matmul %6, %3, %cst_6 {dimension_numbers = #tpu.dot_dimension_numbers<[1], [0], [0], [1], [0, 0, 1, 1], [], []>} : vector<128x8xf32>, vector<8x64xf32>, vector<128x64xf32> -> vector<128x64xf32>
    %c0_7 = arith.constant 0 : index
    %c0_8 = arith.constant 0 : index
    %8 = vector.load %arg4[%c0_7, %c0_8] : memref<128x128xf32, #tpu.memory_space<vmem>>, vector<128x128xf32>
    %9 = vector.extract_strided_slice %8 {offsets = [0, 0], sizes = [128, 64], strides = [1, 1]} : vector<128x128xf32> to vector<128x64xf32>
    %10 = vector.extract_strided_slice %8 {offsets = [0, 64], sizes = [128, 64], strides = [1, 1]} : vector<128x128xf32> to vector<128x64xf32>
    %11 = arith.mulf %5, %9 : vector<128x64xf32>
    %12 = arith.mulf %7, %10 : vector<128x64xf32>
    %13 = arith.subf %11, %12 : vector<128x64xf32>
    %14 = arith.mulf %7, %9 : vector<128x64xf32>
    %15 = arith.mulf %5, %10 : vector<128x64xf32>
    %16 = arith.addf %14, %15 : vector<128x64xf32>
    %17 = tpu.concatenate %13, %16 in 1 : vector<128x64xf32>, vector<128x64xf32> -> vector<128x128xf32>
    %c0_9 = arith.constant 0 : index
    %c0_10 = arith.constant 0 : index
    %18 = vector.load %arg6[%c0_9, %c0_10] : memref<128x16xf32, #tpu.memory_space<vmem>>, vector<128x16xf32>
    %cst_11 = arith.constant dense<0.000000e+00> : vector<128x16xf32>
    %19 = tpu.matmul %17, %18, %cst_11 {dimension_numbers = #tpu.dot_dimension_numbers<[1], [0], [0], [1], [0, 0, 1, 1], [], []>} : vector<128x128xf32>, vector<128x16xf32>, vector<128x16xf32> -> vector<128x16xf32>
    %c0_12 = arith.constant 0 : index
    %c0_13 = arith.constant 0 : index
    %20 = vector.load %arg3[%c0_12, %c0_13] : memref<32x128xf32, #tpu.memory_space<vmem>>, vector<32x128xf32>
    %cst_14 = arith.constant dense<0.000000e+00> : vector<32x16xf32>
    %21 = tpu.matmul %20, %19, %cst_14 {dimension_numbers = #tpu.dot_dimension_numbers<[1], [0], [0], [1], [0, 0, 1, 1], [], []>} : vector<32x128xf32>, vector<128x16xf32>, vector<32x16xf32> -> vector<32x16xf32>
    %c0_15 = arith.constant 0 : index
    %c0_16 = arith.constant 0 : index
    %22 = vector.load %arg7[%c0_15, %c0_16] : memref<16x16xf32, #tpu.memory_space<vmem>>, vector<16x16xf32>
    %cst_17 = arith.constant dense<0.000000e+00> : vector<32x16xf32>
    %23 = tpu.matmul %0, %22, %cst_17 {dimension_numbers = #tpu.dot_dimension_numbers<[1], [0], [0], [1], [0, 0, 1, 1], [], []>} : vector<32x16xf32>, vector<16x16xf32>, vector<32x16xf32> -> vector<32x16xf32>
    %c0_18 = arith.constant 0 : index
    %c0_19 = arith.constant 0 : index
    %24 = vector.load %arg8[%c0_18, %c0_19] : memref<1x16xf32, #tpu.memory_space<vmem>>, vector<1x16xf32>
    %25 = vector.broadcast %24 : vector<1x16xf32> to vector<32x16xf32>
    %26 = arith.addf %23, %25 : vector<32x16xf32>
    %27 = arith.addf %26, %21 : vector<32x16xf32>
    %cst_20 = arith.constant 0.000000e+00 : f32
    %28 = vector.broadcast %cst_20 : f32 to vector<32x16xf32>
    %29 = arith.cmpf oge, %27, %28 : vector<32x16xf32>
    %c0_21 = arith.constant 0 : index
    %c0_22 = arith.constant 0 : index
    %30 = vector.load %arg9[%c0_21, %c0_22] : memref<1x16xf32, #tpu.memory_space<vmem>>, vector<1x16xf32>
    %31 = vector.broadcast %30 : vector<1x16xf32> to vector<32x16xf32>
    %32 = arith.mulf %31, %27 : vector<32x16xf32>
    %33 = arith.select %29, %27, %32 : vector<32x16xi1>, vector<32x16xf32>
    %c0_23 = arith.constant 0 : index
    %c0_24 = arith.constant 0 : index
    %34 = vector.load %arg10[%c0_23, %c0_24] : memref<32x16xf32, #tpu.memory_space<vmem>>, vector<32x16xf32>
    tpu.vector_store %arg10[%c0_23, %c0_24], %33 {strides = array<i32>} : memref<32x16xf32, #tpu.memory_space<vmem>>, vector<32x16xf32>,
    return
  }
  func.func @transform_0(%arg0: i32) -> (i32, i32) {
    %c0_i32 = arith.constant 0 : i32
    %c0_i32_0 = arith.constant 0 : i32
    %c0_i32_1 = arith.constant 0 : i32
    return %c0_i32, %c0_i32_0 : i32, i32
  }
  func.func @transform_1(%arg0: i32) -> (i32, i32) {
    %c0_i32 = arith.constant 0 : i32
    %c0_i32_0 = arith.constant 0 : i32
    %c0_i32_1 = arith.constant 0 : i32
    return %c0_i32, %c0_i32_0 : i32, i32
  }
  func.func @transform_2(%arg0: i32) -> (i32, i32) {
    %c0_i32 = arith.constant 0 : i32
    %c0_i32_0 = arith.constant 0 : i32
    %c0_i32_1 = arith.constant 0 : i32
    return %c0_i32, %c0_i32_0 : i32, i32
  }
  func.func @transform_3(%arg0: i32) -> (i32, i32) {
    %c0_i32 = arith.constant 0 : i32
    %c0_i32_0 = arith.constant 0 : i32
    %c0_i32_1 = arith.constant 0 : i32
    return %c0_i32, %c0_i32_0 : i32, i32
  }
  func.func @transform_4(%arg0: i32) -> (i32, i32) {
    %c0_i32 = arith.constant 0 : i32
    %c0_i32_0 = arith.constant 0 : i32
    %c0_i32_1 = arith.constant 0 : i32
    return %c0_i32, %c0_i32_0 : i32, i32
  }
  func.func @transform_5(%arg0: i32) -> (i32, i32) {
    %c0_i32 = arith.constant 0 : i32
    %c0_i32_0 = arith.constant 0 : i32
    %c0_i32_1 = arith.constant 0 : i32
    return %c0_i32, %c0_i32_0 : i32, i32
  }
  func.func @transform_6(%arg0: i32) -> (i32, i32) {
    %c0_i32 = arith.constant 0 : i32
    %c0_i32_0 = arith.constant 0 : i32
    %c0_i32_1 = arith.constant 0 : i32
    return %c0_i32, %c0_i32_0 : i32, i32
  }
  func.func @transform_7(%arg0: i32) -> (i32, i32) {
    %c0_i32 = arith.constant 0 : i32
    %c0_i32_0 = arith.constant 0 : i32
    %c0_i32_1 = arith.constant 0 : i32
    return %c0_i32, %c0_i32_0 : i32, i32
  }
  func.func @transform_8(%arg0: i32) -> (i32, i32) {
    %c0_i32 = arith.constant 0 : i32
    %c0_i32_0 = arith.constant 0 : i32
    %c0_i32_1 = arith.constant 0 : i32
    return %c0_i32, %c0_i32_0 : i32, i32
  }
  func.func @transform_9(%arg0: i32) -> (i32, i32) {
    %c0_i32 = arith.constant 0 : i32
    %c0_i32_0 = arith.constant 0 : i32
    %c0_i32_1 = arith.constant 0 : i32
    return %c0_i32, %c0_i32_0 : i32, i32
  }
}

module attributes {stable_mosaic.version = 11 : i64} {
  func.func @_mlp2_kernel(%arg0: i32, %arg1: memref<32x16xf32, #tpu.memory_space<vmem>>, %arg2: memref<16x8xf32, #tpu.memory_space<vmem>>, %arg3: memref<1x8xf32, #tpu.memory_space<vmem>>, %arg4: memref<1x8xf32, #tpu.memory_space<vmem>>, %arg5: memref<8x4xf32, #tpu.memory_space<vmem>>, %arg6: memref<1x4xf32, #tpu.memory_space<vmem>>, %arg7: memref<1x4xf32, #tpu.memory_space<vmem>>, %arg8: memref<32x4xf32, #tpu.memory_space<vmem>>) attributes {dimension_semantics = [#tpu.dimension_semantics<arbitrary>], iteration_bounds = array<i64: 1>, scalar_prefetch = 0 : i64, scratch_operands = 0 : i64, tpu.core_type = #tpu.core_type<tc>, window_params = [{pipeline_mode = #tpu.pipeline_mode<synchronous>, transform_indices = @transform_0, window_bounds = array<i64: 32, 16>}, {pipeline_mode = #tpu.pipeline_mode<synchronous>, transform_indices = @transform_1, window_bounds = array<i64: 16, 8>}, {pipeline_mode = #tpu.pipeline_mode<synchronous>, transform_indices = @transform_2, window_bounds = array<i64: 1, 8>}, {pipeline_mode = #tpu.pipeline_mode<synchronous>, transform_indices = @transform_3, window_bounds = array<i64: 1, 8>}, {pipeline_mode = #tpu.pipeline_mode<synchronous>, transform_indices = @transform_4, window_bounds = array<i64: 8, 4>}, {pipeline_mode = #tpu.pipeline_mode<synchronous>, transform_indices = @transform_5, window_bounds = array<i64: 1, 4>}, {pipeline_mode = #tpu.pipeline_mode<synchronous>, transform_indices = @transform_6, window_bounds = array<i64: 1, 4>}, {pipeline_mode = #tpu.pipeline_mode<synchronous>, transform_indices = @transform_7, window_bounds = array<i64: 32, 4>}]} {
    %c0 = arith.constant 0 : index
    %c0_0 = arith.constant 0 : index
    %0 = vector.load %arg1[%c0, %c0_0] : memref<32x16xf32, #tpu.memory_space<vmem>>, vector<32x16xf32>
    %c0_1 = arith.constant 0 : index
    %c0_2 = arith.constant 0 : index
    %1 = vector.load %arg2[%c0_1, %c0_2] : memref<16x8xf32, #tpu.memory_space<vmem>>, vector<16x8xf32>
    %cst = arith.constant dense<0.000000e+00> : vector<32x8xf32>
    %2 = tpu.matmul %0, %1, %cst {dimension_numbers = #tpu.dot_dimension_numbers<[1], [0], [0], [1], [0, 0, 1, 1], [], []>} : vector<32x16xf32>, vector<16x8xf32>, vector<32x8xf32> -> vector<32x8xf32>
    %c0_3 = arith.constant 0 : index
    %c0_4 = arith.constant 0 : index
    %3 = vector.load %arg3[%c0_3, %c0_4] : memref<1x8xf32, #tpu.memory_space<vmem>>, vector<1x8xf32>
    %4 = vector.broadcast %3 : vector<1x8xf32> to vector<32x8xf32>
    %5 = arith.addf %2, %4 : vector<32x8xf32>
    %cst_5 = arith.constant 0.000000e+00 : f32
    %6 = vector.broadcast %cst_5 : f32 to vector<32x8xf32>
    %7 = arith.cmpf oge, %5, %6 : vector<32x8xf32>
    %c0_6 = arith.constant 0 : index
    %c0_7 = arith.constant 0 : index
    %8 = vector.load %arg4[%c0_6, %c0_7] : memref<1x8xf32, #tpu.memory_space<vmem>>, vector<1x8xf32>
    %9 = vector.broadcast %8 : vector<1x8xf32> to vector<32x8xf32>
    %10 = arith.mulf %9, %5 : vector<32x8xf32>
    %11 = arith.select %7, %5, %10 : vector<32x8xi1>, vector<32x8xf32>
    %c0_8 = arith.constant 0 : index
    %c0_9 = arith.constant 0 : index
    %12 = vector.load %arg5[%c0_8, %c0_9] : memref<8x4xf32, #tpu.memory_space<vmem>>, vector<8x4xf32>
    %cst_10 = arith.constant dense<0.000000e+00> : vector<32x4xf32>
    %13 = tpu.matmul %11, %12, %cst_10 {dimension_numbers = #tpu.dot_dimension_numbers<[1], [0], [0], [1], [0, 0, 1, 1], [], []>} : vector<32x8xf32>, vector<8x4xf32>, vector<32x4xf32> -> vector<32x4xf32>
    %c0_11 = arith.constant 0 : index
    %c0_12 = arith.constant 0 : index
    %14 = vector.load %arg6[%c0_11, %c0_12] : memref<1x4xf32, #tpu.memory_space<vmem>>, vector<1x4xf32>
    %15 = vector.broadcast %14 : vector<1x4xf32> to vector<32x4xf32>
    %16 = arith.addf %13, %15 : vector<32x4xf32>
    %cst_13 = arith.constant 0.000000e+00 : f32
    %17 = vector.broadcast %cst_13 : f32 to vector<32x4xf32>
    %18 = arith.cmpf oge, %16, %17 : vector<32x4xf32>
    %c0_14 = arith.constant 0 : index
    %c0_15 = arith.constant 0 : index
    %19 = vector.load %arg7[%c0_14, %c0_15] : memref<1x4xf32, #tpu.memory_space<vmem>>, vector<1x4xf32>
    %20 = vector.broadcast %19 : vector<1x4xf32> to vector<32x4xf32>
    %21 = arith.mulf %20, %16 : vector<32x4xf32>
    %22 = arith.select %18, %16, %21 : vector<32x4xi1>, vector<32x4xf32>
    %c0_16 = arith.constant 0 : index
    %c0_17 = arith.constant 0 : index
    %23 = vector.load %arg8[%c0_16, %c0_17] : memref<32x4xf32, #tpu.memory_space<vmem>>, vector<32x4xf32>
    tpu.vector_store %arg8[%c0_16, %c0_17], %22 {strides = array<i32>} : memref<32x4xf32, #tpu.memory_space<vmem>>, vector<32x4xf32>,
    return
  }
  func.func @transform_0(%arg0: i32) -> (i32, i32) {
    %c0_i32 = arith.constant 0 : i32
    %c0_i32_0 = arith.constant 0 : i32
    %c0_i32_1 = arith.constant 0 : i32
    return %c0_i32, %c0_i32_0 : i32, i32
  }
  func.func @transform_1(%arg0: i32) -> (i32, i32) {
    %c0_i32 = arith.constant 0 : i32
    %c0_i32_0 = arith.constant 0 : i32
    %c0_i32_1 = arith.constant 0 : i32
    return %c0_i32, %c0_i32_0 : i32, i32
  }
  func.func @transform_2(%arg0: i32) -> (i32, i32) {
    %c0_i32 = arith.constant 0 : i32
    %c0_i32_0 = arith.constant 0 : i32
    %c0_i32_1 = arith.constant 0 : i32
    return %c0_i32, %c0_i32_0 : i32, i32
  }
  func.func @transform_3(%arg0: i32) -> (i32, i32) {
    %c0_i32 = arith.constant 0 : i32
    %c0_i32_0 = arith.constant 0 : i32
    %c0_i32_1 = arith.constant 0 : i32
    return %c0_i32, %c0_i32_0 : i32, i32
  }
  func.func @transform_4(%arg0: i32) -> (i32, i32) {
    %c0_i32 = arith.constant 0 : i32
    %c0_i32_0 = arith.constant 0 : i32
    %c0_i32_1 = arith.constant 0 : i32
    return %c0_i32, %c0_i32_0 : i32, i32
  }
  func.func @transform_5(%arg0: i32) -> (i32, i32) {
    %c0_i32 = arith.constant 0 : i32
    %c0_i32_0 = arith.constant 0 : i32
    %c0_i32_1 = arith.constant 0 : i32
    return %c0_i32, %c0_i32_0 : i32, i32
  }
  func.func @transform_6(%arg0: i32) -> (i32, i32) {
    %c0_i32 = arith.constant 0 : i32
    %c0_i32_0 = arith.constant 0 : i32
    %c0_i32_1 = arith.constant 0 : i32
    return %c0_i32, %c0_i32_0 : i32, i32
  }
  func.func @transform_7(%arg0: i32) -> (i32, i32) {
    %c0_i32 = arith.constant 0 : i32
    %c0_i32_0 = arith.constant 0 : i32
    %c0_i32_1 = arith.constant 0 : i32
    return %c0_i32, %c0_i32_0 : i32, i32
  }
}

</mosaic_0001>

<bundles_post_ra>
// kernel: cvneuralop_forward.25
= control target key start
LH: loop header
LB: loop body
LE: loop exit
PB: predicated region body
PF: predicated region fallthrough
CT: control target
= control target key end

     0   :  { %vm39_vm0 = vcmask 130048   ;;  %vm164_vm3 = vcmask 64512   ;;  %vm281_vm7 = vcmask 31744   ;;  %s424_s1 = inlined_call_operand.vmem [shape: f32[16,8], index: 1, kind: input, shape index: {}]   ;;  %s425_s0 = inlined_call_operand.vmem [shape: f32[32,16], index: 0, kind: input, shape index: {}]   ;;  %s426_s4 = inlined_call_operand.vmem [shape: f32[8,4], index: 4, kind: input, shape index: {}]   ;;  %s427_s2 = inlined_call_operand.vmem [shape: f32[1,8], index: 2, kind: input, shape index: {}]   ;;  %s428_s3 = inlined_call_operand.vmem [shape: f32[1,8], index: 3, kind: input, shape index: {}]   ;;  %s429_s5 = inlined_call_operand.vmem [shape: f32[1,4], index: 5, kind: input, shape index: {}]   ;;  %s430_s6 = inlined_call_operand.vmem [shape: f32[1,4], index: 6, kind: input, shape index: {}]   ;;  %s431_s7 = inlined_call_operand.vmem [shape: f32[32,4], index: 7, kind: output, shape index: {}]  }
   0x1   :  { %v30_v0 = vld [vmem:[%s424_s1] sm:$0xff]  ;;  %v31_v1 = vld [vmem:[%s424_s1 + $0x8] sm:$0xff]  ;;  %v28_v5 = vld [vmem:[%s425_s0 + $0x10] sm:$0xff] }
   0x2   :  { %v26_v2 = vld [vmem:[%s425_s0] sm:$0xff]  ;;  %v331_v3 = vpack.c.bf16 %v31_v1, %v30_v0  ;;  %v27_v4 = vld [vmem:[%s425_s0 + $0x8] sm:$0xff]  ;;  %v29_v6 = vld [vmem:[%s425_s0 + $0x18] sm:$0xff] }
   0x3   :  { %317 = vmatprep.mubr.msk.f32.mxu0 %vm39_vm0, %v26_v2  ;;  %v156_v7 = vld [vmem:[%s426_s4] sm:$0xff] }
   0x4   :  { %332 = vmatprep.subr.bf16.mxu0 %v331_v3  ;;  %323 = vmatprep.subr.mxu1 %v156_v7  ;;  %v290_v8 = vld [vmem:[%s427_s2] ss:$0 sm:$0xff] }
   0x5   :  { %334 = vmatpush3.bf16.msra.mxu0 %v331_v3  ;;  %324 = vmatpush3.msra.mxu1 %v156_v7  ;;  %v295_v10 = vld [vmem:[%s428_s3] ss:$0 sm:$0xff] }
   0x6   :  { %v296_v26 = vld [vmem:[%s429_s5] ss:$0 sm:$0xff] }
   0x7   :  { %v301_v28 = vld [vmem:[%s430_s6] ss:$0 sm:$0xff] }
   0x8   :  { %318 = vmatmul.mubr.msk.f32.vlgmr.msra.gmra.mrb[0].mxu0 %vm39_vm0, %v27_v4 }
   0x9   :  { %320 = vmatprep.mubr.msk.f32.mxu0 %vm39_vm0, %v28_v5 }
   0xc   :  { %321 = vmatmul.mubr.msk.f32.gmra.mrb[2].mxu0 %vm39_vm0, %v29_v6 }
  0xdb   :  { %v319_v9 = vpop.f32.mrb[0].mxu0 }
  0xdc   :  { %v124_v11 = vadd.f32 %v319_v9, %v290_v8  ;;  %v118_v12 = vpop.f32.mrb[1].mxu0 }
  0xdd   :  { %v119_v13 = vadd.f32 %v290_v8, %v118_v12 }
  0xde   :  { %v149_v14 = vmul.f32 %v295_v10, %v124_v11  ;;  %vm138_vm1 = vcmp.ge.f32.partialorder %v124_v11, 0.0 }
  0xdf   :  { %v322_v15 = vpop.f32.mrb[2].mxu0  ;;  %vm137_vm2 = vcmp.ge.f32.partialorder %v119_v13, 0.0  ;;  %v148_v16 = vmul.f32 %v295_v10, %v119_v13 }
  0xe0   :  { %v134_v17 = vadd.f32 %v322_v15, %v290_v8  ;;  %v128_v18 = vpop.f32.mrb[3].mxu0  ;;  %v153_v22 = vsel %vm138_vm1, %v124_v11, %v149_v14 }
  0xe1   :  { %v129_v19 = vadd.f32 %v290_v8, %v128_v18  ;;  %v152_v20 = vsel %vm137_vm2, %v119_v13, %v148_v16 }
  0xe2   :  { %v151_v21 = vmul.f32 %v295_v10, %v134_v17  ;;  %325 = vmatprep.mubr.msk.f32.mxu1 %vm164_vm3, %v152_v20  ;;  %vm140_vm4 = vcmp.ge.f32.partialorder %v134_v17, 0.0 }
  0xe3   :  { %vm139_vm5 = vcmp.ge.f32.partialorder %v129_v19, 0.0  ;;  %v150_v23 = vmul.f32 %v295_v10, %v129_v19  ;;  %326 = vmatmul.mubr.msk.f32.vlgmr.msra.gmra.mrb[0].mxu1 %vm164_vm3, %v153_v22 }
  0xe4   :  { %v155_v25 = vsel %vm140_vm4, %v134_v17, %v151_v21 }
  0xe5   :  { %v154_v24 = vsel %vm139_vm5, %v129_v19, %v150_v23 }
  0xe6   :  { %328 = vmatprep.mubr.msk.f32.mxu1 %vm164_vm3, %v154_v24 }
  0xe7   :  { %329 = vmatmul.mubr.msk.f32.gmra.mrb[2].mxu1 %vm164_vm3, %v155_v25 }
 0x1b6   :  { %v327_v27 = vpop.f32.mrb[0].mxu1 }
 0x1b7   :  { %v249_v29 = vadd.f32 %v327_v27, %v296_v26  ;;  %v243_v30 = vpop.f32.mrb[1].mxu1 }
 0x1b8   :  { %v244_v31 = vadd.f32 %v296_v26, %v243_v30 }
 0x1b9   :  { %vm263_vm6 = vcmp.ge.f32.partialorder %v249_v29, 0.0  ;;  %v274_v32 = vmul.f32 %v301_v28, %v249_v29 }
 0x1ba   :  { %vm262_vm8 = vcmp.ge.f32.partialorder %v244_v31, 0.0  ;;  %v273_v33 = vmul.f32 %v301_v28, %v244_v31  ;;  %v330_v34 = vpop.f32.mrb[2].mxu1 }
 0x1bb   :  { %v278_v35 = vsel %vm263_vm6, %v249_v29, %v274_v32  ;;  %v259_v36 = vadd.f32 %v330_v34, %v296_v26  ;;  %v253_v37 = vpop.f32.mrb[3].mxu1 }
 0x1bc   :  { %283 = vst.msk [vmem:[%s431_s7 + $0x8] sm:$0xff] %vm281_vm7, %v278_v35  ;;  %v277_v38 = vsel %vm262_vm8, %v244_v31, %v273_v33  ;;  %v254_v39 = vadd.f32 %v296_v26, %v253_v37 }
 0x1bd   :  { %282 = vst.msk [vmem:[%s431_s7] sm:$0xff] %vm281_vm7, %v277_v38  ;;  %vm265_vm9 = vcmp.ge.f32.partialorder %v259_v36, 0.0  ;;  %v276_v40 = vmul.f32 %v301_v28, %v259_v36 }
 0x1be   :  { %vm264_vm10 = vcmp.ge.f32.partialorder %v254_v39, 0.0  ;;  %v275_v41 = vmul.f32 %v301_v28, %v254_v39 }
 0x1bf   :  { %v280_v42 = vsel %vm265_vm9, %v259_v36, %v276_v40 }
 0x1c0   :  { %285 = vst.msk [vmem:[%s431_s7 + $0x18] sm:$0xff] %vm281_vm7, %v280_v42  ;;  %v279_v43 = vsel %vm264_vm10, %v254_v39, %v275_v41 }
 0x1c1   :  { %284 = vst.msk [vmem:[%s431_s7 + $0x10] sm:$0xff] %vm281_vm7, %v279_v43 }

// kernel: cvneuralop_forward.13
= control target key start
LH: loop header
LB: loop body
LE: loop exit
PB: predicated region body
PF: predicated region fallthrough
CT: control target
= control target key end

     0   :  { %vm51_vm0 = vcmask 1043456   ;;  %vm38_vm1 = vcmask 31744   ;;  %vm167_vm4 = vcmask 64512   ;;  %vm284_vm8 = vcmask 130048   ;;  %s418_s1 = inlined_call_operand.vmem [shape: f32[4,8], index: 1, kind: input, shape index: {}]   ;;  %s419_s0 = inlined_call_operand.vmem [shape: f32[32,4], index: 0, kind: input, shape index: {}]   ;;  %s420_s4 = inlined_call_operand.vmem [shape: f32[8,16], index: 4, kind: input, shape index: {}]   ;;  %s421_s2 = inlined_call_operand.vmem [shape: f32[1,8], index: 2, kind: input, shape index: {}]   ;;  %s422_s3 = inlined_call_operand.vmem [shape: f32[1,8], index: 3, kind: input, shape index: {}]   ;;  %s423_s5 = inlined_call_operand.vmem [shape: f32[1,16], index: 5, kind: input, shape index: {}]   ;;  %s424_s6 = inlined_call_operand.vmem [shape: f32[1,16], index: 6, kind: input, shape index: {}]   ;;  %s425_s7 = inlined_call_operand.vmem [shape: f32[32,16], index: 7, kind: output, shape index: {}]  }
   0x1   :  { %v30_v0 = vld [vmem:[%s418_s1] sm:$0xf]  ;;  %v27_v2 = vld [vmem:[%s419_s0 + $0x8] sm:$0xff]  ;;  %v28_v3 = vld [vmem:[%s419_s0 + $0x10] sm:$0xff] }
   0x2   :  { %v26_v1 = vld [vmem:[%s419_s0] sm:$0xff]  ;;  %316 = vmatprep.subr.msk.mxu0 %vm51_vm0, %v30_v0  ;;  %v29_v4 = vld [vmem:[%s419_s0 + $0x18] sm:$0xff] }
   0x3   :  { %318 = vmatprep.mubr.msk.f32.mxu0 %vm38_vm1, %v26_v1  ;;  %317 = vmatpush3.msk.msra.mxu0 %vm51_vm0, %v30_v0  ;;  %v159_v5 = vld [vmem:[%s420_s4] sm:$0xff] }
   0x4   :  { %319 = vmatmul.mubr.msk.f32.vlgmr.msra.gmra.mrb[0].mxu0 %vm38_vm1, %v27_v2  ;;  %324 = vmatprep.subr.mxu1 %v159_v5  ;;  %v293_v6 = vld [vmem:[%s421_s2] ss:$0 sm:$0xff] }
   0x5   :  { %321 = vmatprep.mubr.msk.f32.mxu0 %vm38_vm1, %v28_v3  ;;  %325 = vmatpush3.msra.mxu1 %v159_v5  ;;  %v299_v8 = vld [vmem:[%s422_s3] ss:$0 sm:$0xff] }
   0x6   :  { %v300_v24 = vld [vmem:[%s423_s5] ss:$0 sm:$0xff] }
   0x7   :  { %v305_v26 = vld [vmem:[%s424_s6] ss:$0 sm:$0xff] }
   0x8   :  { %322 = vmatmul.mubr.msk.f32.gmra.mrb[2].mxu0 %vm38_vm1, %v29_v4 }
  0xd7   :  { %v320_v7 = vpop.f32.mrb[0].mxu0 }
  0xd8   :  { %v127_v9 = vadd.f32 %v320_v7, %v293_v6  ;;  %v121_v10 = vpop.f32.mrb[1].mxu0 }
  0xd9   :  { %v122_v11 = vadd.f32 %v293_v6, %v121_v10 }
  0xda   :  { %v152_v12 = vmul.f32 %v299_v8, %v127_v9  ;;  %vm141_vm2 = vcmp.ge.f32.partialorder %v127_v9, 0.0 }
  0xdb   :  { %v323_v13 = vpop.f32.mrb[2].mxu0  ;;  %vm140_vm3 = vcmp.ge.f32.partialorder %v122_v11, 0.0  ;;  %v151_v14 = vmul.f32 %v299_v8, %v122_v11 }
  0xdc   :  { %v137_v15 = vadd.f32 %v323_v13, %v293_v6  ;;  %v131_v16 = vpop.f32.mrb[3].mxu0  ;;  %v156_v20 = vsel %vm141_vm2, %v127_v9, %v152_v12 }
  0xdd   :  { %v132_v17 = vadd.f32 %v293_v6, %v131_v16  ;;  %v155_v18 = vsel %vm140_vm3, %v122_v11, %v151_v14 }
  0xde   :  { %v154_v19 = vmul.f32 %v299_v8, %v137_v15  ;;  %326 = vmatprep.mubr.msk.f32.mxu1 %vm167_vm4, %v155_v18  ;;  %vm143_vm5 = vcmp.ge.f32.partialorder %v137_v15, 0.0 }
  0xdf   :  { %vm142_vm6 = vcmp.ge.f32.partialorder %v132_v17, 0.0  ;;  %v153_v21 = vmul.f32 %v299_v8, %v132_v17  ;;  %327 = vmatmul.mubr.msk.f32.vlgmr.msra.gmra.mrb[0].mxu1 %vm167_vm4, %v156_v20 }
  0xe0   :  { %v158_v23 = vsel %vm143_vm5, %v137_v15, %v154_v19 }
  0xe1   :  { %v157_v22 = vsel %vm142_vm6, %v132_v17, %v153_v21 }
  0xe2   :  { %329 = vmatprep.mubr.msk.f32.mxu1 %vm167_vm4, %v157_v22 }
  0xe3   :  { %330 = vmatmul.mubr.msk.f32.gmra.mrb[2].mxu1 %vm167_vm4, %v158_v23 }
 0x1b2   :  { %v328_v25 = vpop.f32.mrb[0].mxu1 }
 0x1b3   :  { %v252_v27 = vadd.f32 %v328_v25, %v300_v24  ;;  %v246_v28 = vpop.f32.mrb[1].mxu1 }
 0x1b4   :  { %v247_v29 = vadd.f32 %v300_v24, %v246_v28 }
 0x1b5   :  { %vm266_vm7 = vcmp.ge.f32.partialorder %v252_v27, 0.0  ;;  %v277_v30 = vmul.f32 %v305_v26, %v252_v27 }
 0x1b6   :  { %vm265_vm9 = vcmp.ge.f32.partialorder %v247_v29, 0.0  ;;  %v276_v31 = vmul.f32 %v305_v26, %v247_v29  ;;  %v331_v32 = vpop.f32.mrb[2].mxu1 }
 0x1b7   :  { %v281_v33 = vsel %vm266_vm7, %v252_v27, %v277_v30  ;;  %v262_v34 = vadd.f32 %v331_v32, %v300_v24  ;;  %v256_v35 = vpop.f32.mrb[3].mxu1 }
 0x1b8   :  { %286 = vst.msk [vmem:[%s425_s7 + $0x8] sm:$0xff] %vm284_vm8, %v281_v33  ;;  %v280_v36 = vsel %vm265_vm9, %v247_v29, %v276_v31  ;;  %v257_v37 = vadd.f32 %v300_v24, %v256_v35 }
 0x1b9   :  { %285 = vst.msk [vmem:[%s425_s7] sm:$0xff] %vm284_vm8, %v280_v36  ;;  %vm268_vm10 = vcmp.ge.f32.partialorder %v262_v34, 0.0  ;;  %v279_v38 = vmul.f32 %v305_v26, %v262_v34 }
 0x1ba   :  { %vm267_vm11 = vcmp.ge.f32.partialorder %v257_v37, 0.0  ;;  %v278_v39 = vmul.f32 %v305_v26, %v257_v37 }
 0x1bb   :  { %v283_v40 = vsel %vm268_vm10, %v262_v34, %v279_v38 }
 0x1bc   :  { %288 = vst.msk [vmem:[%s425_s7 + $0x18] sm:$0xff] %vm284_vm8, %v283_v40  ;;  %v282_v41 = vsel %vm267_vm11, %v257_v37, %v278_v39 }
 0x1bd   :  { %287 = vst.msk [vmem:[%s425_s7 + $0x10] sm:$0xff] %vm284_vm8, %v282_v41 }

// kernel: cvneuralop_forward.15
= control target key start
LH: loop header
LB: loop body
LE: loop exit
PB: predicated region body
PF: predicated region fallthrough
CT: control target
= control target key end

     0   :  { %vm52_vm0 = vcmask 261120   ;;  %vm247_vm1 = vcmask 64512   ;;  %s1791_s28 = smov 120   ;;  %s1792_s10 = smov 64   ;;  %vm890_vm2 = vcmask 523264   ;;  %vm1166_vm3 = vcmask 130048   ;;  %s2448_s0 = inlined_call_operand.vmem [shape: f32[32,16], index: 0, kind: input, shape index: {}]   ;;  %s2449_s1 = inlined_call_operand.vmem [shape: f32[128,32], index: 1, kind: input, shape index: {}]   ;;  %s2450_s4 = inlined_call_operand.vmem [shape: f32[8,64], index: 4, kind: input, shape index: {}]   ;;  %s2451_s3 = inlined_call_operand.vmem [shape: f32[128,128], index: 3, kind: input, shape index: {}]   ;;  %s2452_s5 = inlined_call_operand.vmem [shape: f32[128,16], index: 5, kind: input, shape index: {}]   ;;  %s2453_s2 = inlined_call_operand.vmem [shape: f32[32,128], index: 2, kind: input, shape index: {}]   ;;  %s2454_s6 = inlined_call_operand.vmem [shape: f32[16,16], index: 6, kind: input, shape index: {}]   ;;  %s2455_s7 = inlined_call_operand.vmem [shape: f32[1,16], index: 7, kind: input, shape index: {}]   ;;  %s2456_s8 = inlined_call_operand.vmem [shape: f32[1,16], index: 8, kind: input, shape index: {}]   ;;  %s2457_s9 = inlined_call_operand.vmem [shape: f32[32,16], index: 9, kind: output, shape index: {}]  }
   0x1   :  { %v1846_v0 = vld [vmem:[%s2448_s0] sm:$0xff]  ;;  %v1851_v1 = vld [vmem:[%s2448_s0 + $0x8] sm:$0xff]  ;;  %v1856_v2 = vld [vmem:[%s2448_s0 + $0x10] sm:$0xff] }
   0x2   :  { %v1649_v3 = vpack.c.bf16 %v1851_v1, %v1846_v0  ;;  %v1863_v4 = vld [vmem:[%s2448_s0 + $0x18] sm:$0xff]  ;;  %v36_v5 = vld [vmem:[%s2449_s1] sm:$0xff]  ;;  %v37_v7 = vld [vmem:[%s2449_s1 + $0x8] sm:$0xff] }
   0x3   :  { %v1653_v6 = vpack.c.bf16 %v1863_v4, %v1856_v2  ;;  %1469 = vmatprep.mubr.msk.f32.mxu0 %vm52_vm0, %v36_v5  ;;  %v38_v8 = vld [vmem:[%s2449_s1 + $0x10] sm:$0xff]  ;;  %v39_v9 = vld [vmem:[%s2449_s1 + $0x18] sm:$0xff]  ;;  %v40_v10 = vld [vmem:[%s2449_s1 + $0x20] sm:$0xff] }
   0x4   :  { %1650 = vmatprep.subr.bf16.mxu0 %v1649_v3  ;;  %v41_v11 = vld [vmem:[%s2449_s1 + $0x28] sm:$0xff]  ;;  %v42_v12 = vld [vmem:[%s2449_s1 + $0x30] sm:$0xff]  ;;  %v43_v13 = vld [vmem:[%s2449_s1 + $0x38] sm:$0xff] }
   0x5   :  { %1652 = vmatpush3.bf16.msra.mxu0 %v1649_v3  ;;  %v44_v14 = vld [vmem:[%s2449_s1 + $0x40] sm:$0xff]  ;;  %v45_v15 = vld [vmem:[%s2449_s1 + $0x48] sm:$0xff]  ;;  %v46_v16 = vld [vmem:[%s2449_s1 + $0x50] sm:$0xff] }
   0x6   :  { %1654 = vmatprep.subr.bf16.mxu0 %v1653_v6  ;;  %v47_v17 = vld [vmem:[%s2449_s1 + $0x58] sm:$0xff]  ;;  %v48_v18 = vld [vmem:[%s2449_s1 + $0x60] sm:$0xff]  ;;  %v49_v19 = vld [vmem:[%s2449_s1 + $0x68] sm:$0xff] }
   0x7   :  { %v50_v20 = vld [vmem:[%s2449_s1 + $0x70] sm:$0xff]  ;;  %v51_v21 = vld [vmem:[%s2449_s1 + $0x78] sm:$0xff]  ;;  %v246_v22 = vld [vmem:[%s2450_s4] sm:$0xff] }
   0x8   :  { %1493 = vmatprep.subr.mxu1 %v246_v22  ;;  %v1968_v39 = vld [vmem:[%s2451_s3] sm:$0xff]  ;;  %v1974_v40 = vld [vmem:[%s2451_s3 + $0x8] sm:$0xff]  ;;  %v1981_v41 = vld [vmem:[%s2451_s3 + $0x10] sm:$0xff] }
   0x9   :  { %1656 = vmatpush3.bf16.msra.mxu0 %v1653_v6  ;;  %1494 = vmatpush3.msra.mxu1 %v246_v22  ;;  %v1988_v42 = vld [vmem:[%s2451_s3 + $0x18] sm:$0xff]  ;;  %v1995_v43 = vld [vmem:[%s2451_s3 + $0x20] sm:$0xff]  ;;  %v2002_v44 = vld [vmem:[%s2451_s3 + $0x28] sm:$0xff] }
   0xa   :  { %1519 = vmatprep.subr.mxu1 %v246_v22  ;;  %v2009_v45 = vld [vmem:[%s2451_s3 + $0x30] sm:$0xff]  ;;  %v2016_v46 = vld [vmem:[%s2451_s3 + $0x38] sm:$0xff]  ;;  %v2023_v47 = vld [vmem:[%s2451_s3 + $0x40] sm:$0xff] }
   0xb   :  { %v2030_v48 = vld [vmem:[%s2451_s3 + $0x48] sm:$0xff]  ;;  %v2037_v49 = vld [vmem:[%s2451_s3 + $0x50] sm:$0xff]  ;;  %v2044_v50 = vld [vmem:[%s2451_s3 + $0x58] sm:$0xff] }
   0xc   :  { %1470 = vmatmul.mubr.msk.f32.vlgmr.msra.gmra.mrb[0].mxu0 %vm52_vm0, %v37_v7  ;;  %v2051_v51 = vld [vmem:[%s2451_s3 + $0x60] sm:$0xff]  ;;  %v2058_v52 = vld [vmem:[%s2451_s3 + $0x68] sm:$0xff]  ;;  %v2065_v53 = vld [vmem:[%s2451_s3 + $0x70] sm:$0xff] }
   0xd   :  { %1472 = vmatprep.mubr.msk.f32.mxu0 %vm52_vm0, %v38_v8  ;;  %v2072_v54 = vld [vmem:[%s2451_s3 + $0x78] sm:$0xff] }
  0x10   :  { %1473 = vmatmul.mubr.msk.f32.gmra.mrb[2].mxu0 %vm52_vm0, %v39_v9 }
  0x11   :  { %1475 = vmatprep.mubr.msk.f32.mxu0 %vm52_vm0, %v40_v10 }
  0x14   :  { %1476 = vmatmul.mubr.msk.f32.gmra.mrb[4].mxu0 %vm52_vm0, %v41_v11 }
  0x15   :  { %1478 = vmatprep.mubr.msk.f32.mxu0 %vm52_vm0, %v42_v12 }
  0x18   :  { %1479 = vmatmul.mubr.msk.f32.gmra.mrb[6].mxu0 %vm52_vm0, %v43_v13 }
  0x19   :  { %1481 = vmatprep.mubr.msk.f32.mxu0 %vm52_vm0, %v44_v14 }
  0x1c   :  { %1482 = vmatmul.mubr.msk.f32.gmra.mrb[8].mxu0 %vm52_vm0, %v45_v15 }
  0x1d   :  { %1484 = vmatprep.mubr.msk.f32.mxu0 %vm52_vm0, %v46_v16 }
  0x20   :  { %1485 = vmatmul.mubr.msk.f32.gmra.mrb[10].mxu0 %vm52_vm0, %v47_v17 }
  0x21   :  { %1487 = vmatprep.mubr.msk.f32.mxu0 %vm52_vm0, %v48_v18 }
  0x24   :  { %1488 = vmatmul.mubr.msk.f32.gmra.mrb[12].mxu0 %vm52_vm0, %v49_v19 }
  0x25   :  { %1490 = vmatprep.mubr.msk.f32.mxu0 %vm52_vm0, %v50_v20 }
  0x28   :  { %1491 = vmatmul.mubr.msk.f32.gmra.mrb[14].mxu0 %vm52_vm0, %v51_v21 }
  0xdf   :  { %v1471_v23 = vpop.f32.mrb[0].mxu0 }
  0xe0   :  { %v167_v24 = vpop.f32.mrb[1].mxu0 }
  0xe1   :  { %441 = vrot.lane.b32.xlu0 %v167_v24, %s1791_s28  ;;  %1495 = vmatprep.mubr.msk.f32.mxu1 %vm247_vm1, %v167_v24 }
  0xe2   :  { %1496 = vmatmul.mubr.msk.f32.vlgmr.msra.gmra.mrb[0].mxu1 %vm247_vm1, %v1471_v23 }
  0xe3   :  { %v1474_v25 = vpop.f32.mrb[2].mxu0  ;;  %1520 = vmatpush3.msra.mxu1 %v246_v22 }
  0xe4   :  { %v177_v26 = vpop.f32.mrb[3].mxu0 }
  0xe5   :  { %443 = vrot.lane.b32.xlu0 %v1471_v23, %s1791_s28  ;;  %445 = vrot.lane.b32.xlu1 %v177_v26, %s1791_s28 }
  0xe6   :  { %1498 = vmatprep.mubr.msk.f32.mxu1 %vm247_vm1, %v177_v26  ;;  %v908_v26 = vld [vmem:[%s2452_s5 + $0x8] sm:$0xff] }
  0xe7   :  { %1499 = vmatmul.mubr.msk.f32.gmra.mrb[2].mxu1 %vm247_vm1, %v1474_v25  ;;  %v1477_v27 = vpop.f32.mrb[4].mxu0 }
  0xe8   :  { %v187_v28 = vpop.f32.mrb[5].mxu0 }
  0xe9   :  { %447 = vrot.lane.b32.xlu1 %v1474_v25, %s1791_s28  ;;  %1501 = vmatprep.mubr.msk.f32.mxu1 %vm247_vm1, %v187_v28  ;;  %v907_v25 = vld [vmem:[%s2452_s5] sm:$0xff] }
  0xea   :  { %449 = vrot.lane.b32.xlu0 %v187_v28, %s1791_s28  ;;  %v1657_v28 = vpack.c.bf16 %v908_v26, %v907_v25 }
  0xeb   :  { %1502 = vmatmul.mubr.msk.f32.gmra.mrb[4].mxu1 %vm247_vm1, %v1477_v27  ;;  %v1480_v29 = vpop.f32.mrb[6].mxu0 }
  0xec   :  { %v197_v30 = vpop.f32.mrb[7].mxu0  ;;  %1658 = vmatprep.subr.bf16.mxu0 %v1657_v28 }
  0xed   :  { %451 = vrot.lane.b32.xlu1 %v1477_v27, %s1791_s28  ;;  %1504 = vmatprep.mubr.msk.f32.mxu1 %vm247_vm1, %v197_v30  ;;  %v909_v27 = vld [vmem:[%s2452_s5 + $0x10] sm:$0xff] }
  0xee   :  { %453 = vrot.lane.b32.xlu0 %v197_v30, %s1791_s28  ;;  %1660 = vmatpush3.bf16.msra.mxu0 %v1657_v28 }
  0xef   :  { %1505 = vmatmul.mubr.msk.f32.gmra.mrb[6].mxu1 %vm247_vm1, %v1480_v29  ;;  %v1483_v31 = vpop.f32.mrb[8].mxu0 }
  0xf0   :  { %v207_v32 = vpop.f32.mrb[9].mxu0 }
  0xf1   :  { %455 = vrot.lane.b32.xlu1 %v1480_v29, %s1791_s28  ;;  %1507 = vmatprep.mubr.msk.f32.mxu1 %vm247_vm1, %v207_v32  ;;  %v910_v29 = vld [vmem:[%s2452_s5 + $0x18] sm:$0xff] }
  0xf2   :  { %457 = vrot.lane.b32.xlu0 %v207_v32, %s1791_s28  ;;  %v911_v32 = vld [vmem:[%s2452_s5 + $0x20] sm:$0xff] }
  0xf3   :  { %1508 = vmatmul.mubr.msk.f32.gmra.mrb[8].mxu1 %vm247_vm1, %v1483_v31  ;;  %v1486_v33 = vpop.f32.mrb[10].mxu0 }
  0xf4   :  { %v217_v34 = vpop.f32.mrb[11].mxu0 }
  0xf5   :  { %459 = vrot.lane.b32.xlu1 %v1483_v31, %s1791_s28  ;;  %1510 = vmatprep.mubr.msk.f32.mxu1 %vm247_vm1, %v217_v34  ;;  %v1661_v31 = vpack.c.bf16 %v910_v29, %v909_v27 }
  0xf6   :  { %461 = vrot.lane.b32.xlu0 %v217_v34, %s1791_s28 }
  0xf7   :  { %1511 = vmatmul.mubr.msk.f32.gmra.mrb[10].mxu1 %vm247_vm1, %v1486_v33  ;;  %v1489_v35 = vpop.f32.mrb[12].mxu0  ;;  %1662 = vmatprep.subr.bf16.mxu0 %v1661_v31 }
  0xf8   :  { %v227_v36 = vpop.f32.mrb[13].mxu0  ;;  %1664 = vmatpush3.bf16.msra.mxu0 %v1661_v31 }
  0xf9   :  { %463 = vrot.lane.b32.xlu1 %v1486_v33, %s1791_s28  ;;  %1513 = vmatprep.mubr.msk.f32.mxu1 %vm247_vm1, %v227_v36  ;;  %v912_v33 = vld [vmem:[%s2452_s5 + $0x28] sm:$0xff] }
  0xfa   :  { %465 = vrot.lane.b32.xlu0 %v227_v36, %s1791_s28  ;;  %v913_v36 = vld [vmem:[%s2452_s5 + $0x30] sm:$0xff] }
  0xfb   :  { %1514 = vmatmul.mubr.msk.f32.gmra.mrb[12].mxu1 %vm247_vm1, %v1489_v35  ;;  %v1492_v37 = vpop.f32.mrb[14].mxu0 }
  0xfc   :  { %v237_v38 = vpop.f32.mrb[15].mxu0 }
  0xfd   :  { %467 = vrot.lane.b32.xlu1 %v1489_v35, %s1791_s28  ;;  %1516 = vmatprep.mubr.msk.f32.mxu1 %vm247_vm1, %v237_v38  ;;  %v1665_v35 = vpack.c.bf16 %v912_v33, %v911_v32 }
  0xfe   :  { %469 = vrot.lane.b32.xlu0 %v237_v38, %s1791_s28 }
  0xff   :  { %1517 = vmatmul.mubr.msk.f32.gmra.mrb[14].mxu1 %vm247_vm1, %v1492_v37  ;;  %1666 = vmatprep.subr.bf16.mxu0 %v1665_v35 }
 0x100   :  { %1668 = vmatpush3.bf16.msra.mxu0 %v1665_v35 }
 0x101   :  { %471 = vrot.lane.b32.xlu1 %v1492_v37, %s1791_s28  ;;  %v914_v37 = vld [vmem:[%s2452_s5 + $0x38] sm:$0xff] }
 0x102   :  { %698 = vrot.lane.b32.xlu0 %v1968_v39, %s1792_s10  ;;  %v1669_v38 = vpack.c.bf16 %v914_v37, %v913_v36 }
 0x104   :  { %1670 = vmatprep.subr.bf16.mxu0 %v1669_v38 }
 0x105   :  { %700 = vrot.lane.b32.xlu1 %v1974_v40, %s1792_s10  ;;  %1672 = vmatpush3.bf16.msra.mxu0 %v1669_v38 }
 0x106   :  { %702 = vrot.lane.b32.xlu0 %v1981_v41, %s1792_s10 }
 0x109   :  { %704 = vrot.lane.b32.xlu1 %v1988_v42, %s1792_s10 }
 0x10a   :  { %706 = vrot.lane.b32.xlu0 %v1995_v43, %s1792_s10 }
 0x10d   :  { %708 = vrot.lane.b32.xlu1 %v2002_v44, %s1792_s10 }
 0x10e   :  { %710 = vrot.lane.b32.xlu0 %v2009_v45, %s1792_s10 }
 0x111   :  { %712 = vrot.lane.b32.xlu1 %v2016_v46, %s1792_s10 }
 0x112   :  { %714 = vrot.lane.b32.xlu0 %v2023_v47, %s1792_s10 }
 0x115   :  { %716 = vrot.lane.b32.xlu1 %v2030_v48, %s1792_s10 }
 0x116   :  { %718 = vrot.lane.b32.xlu0 %v2037_v49, %s1792_s10 }
 0x119   :  { %720 = vrot.lane.b32.xlu1 %v2044_v50, %s1792_s10 }
 0x11a   :  { %722 = vrot.lane.b32.xlu0 %v2051_v51, %s1792_s10 }
 0x11d   :  { %724 = vrot.lane.b32.xlu1 %v2058_v52, %s1792_s10 }
 0x11e   :  { %726 = vrot.lane.b32.xlu0 %v2065_v53, %s1792_s10 }
 0x121   :  { %728 = vrot.lane.b32.xlu1 %v2072_v54, %s1792_s10 }
 0x153   :  { %v442_v55 = vpop.permute.xlu0 %441 }
 0x154   :  { %1521 = vmatprep.mubr.msk.f32.mxu1 %vm247_vm1, %v442_v55  ;;  %v915_v55 = vld [vmem:[%s2452_s5 + $0x40] sm:$0xff] }
 0x157   :  { %v444_v56 = vpop.permute.xlu0 %443  ;;  %v446_v57 = vpop.permute.xlu1 %445 }
 0x158   :  { %1522 = vmatmul.mubr.msk.f32.vlgmr.msra.gmra.mrb[16].mxu1 %vm247_vm1, %v444_v56  ;;  %v916_v56 = vld [vmem:[%s2452_s5 + $0x48] sm:$0xff] }
 0x159   :  { %1524 = vmatprep.mubr.msk.f32.mxu1 %vm247_vm1, %v446_v57  ;;  %v1673_v57 = vpack.c.bf16 %v916_v56, %v915_v55 }
 0x15b   :  { %v448_v58 = vpop.permute.xlu1 %447  ;;  %1674 = vmatprep.subr.bf16.mxu0 %v1673_v57 }
 0x15c   :  { %1525 = vmatmul.mubr.msk.f32.gmra.mrb[18].mxu1 %vm247_vm1, %v448_v58  ;;  %v450_v59 = vpop.permute.xlu0 %449  ;;  %v917_v58 = vld [vmem:[%s2452_s5 + $0x50] sm:$0xff]  ;;  %1676 = vmatpush3.bf16.msra.mxu0 %v1673_v57 }
 0x15d   :  { %1527 = vmatprep.mubr.msk.f32.mxu1 %vm247_vm1, %v450_v59  ;;  %v918_v59 = vld [vmem:[%s2452_s5 + $0x58] sm:$0xff] }
 0x15f   :  { %v452_v60 = vpop.permute.xlu1 %451 }
 0x160   :  { %1528 = vmatmul.mubr.msk.f32.gmra.mrb[20].mxu1 %vm247_vm1, %v452_v60  ;;  %v454_v61 = vpop.permute.xlu0 %453  ;;  %v1677_v60 = vpack.c.bf16 %v918_v59, %v917_v58 }
 0x161   :  { %1530 = vmatprep.mubr.msk.f32.mxu1 %vm247_vm1, %v454_v61  ;;  %v919_v61 = vld [vmem:[%s2452_s5 + $0x60] sm:$0xff] }
 0x162   :  { %1678 = vmatprep.subr.bf16.mxu0 %v1677_v60 }
 0x163   :  { %v456_v62 = vpop.permute.xlu1 %455  ;;  %1680 = vmatpush3.bf16.msra.mxu0 %v1677_v60 }
 0x164   :  { %1531 = vmatmul.mubr.msk.f32.gmra.mrb[22].mxu1 %vm247_vm1, %v456_v62  ;;  %v458_v63 = vpop.permute.xlu0 %457  ;;  %v920_v62 = vld [vmem:[%s2452_s5 + $0x68] sm:$0xff] }
 0x165   :  { %1533 = vmatprep.mubr.msk.f32.mxu1 %vm247_vm1, %v458_v63  ;;  %v1681_v63 = vpack.c.bf16 %v920_v62, %v919_v61 }
 0x167   :  { %v460_v3 = vpop.permute.xlu1 %459  ;;  %1682 = vmatprep.subr.bf16.mxu0 %v1681_v63 }
 0x168   :  { %1534 = vmatmul.mubr.msk.f32.gmra.mrb[24].mxu1 %vm247_vm1, %v460_v3  ;;  %v462_v5 = vpop.permute.xlu0 %461  ;;  %1684 = vmatpush3.bf16.msra.mxu0 %v1681_v63 }
 0x169   :  { %1536 = vmatprep.mubr.msk.f32.mxu1 %vm247_vm1, %v462_v5 }
 0x16b   :  { %v464_v6 = vpop.permute.xlu1 %463 }
 0x16c   :  { %1537 = vmatmul.mubr.msk.f32.gmra.mrb[26].mxu1 %vm247_vm1, %v464_v6  ;;  %v466_v7 = vpop.permute.xlu0 %465 }
 0x16d   :  { %1539 = vmatprep.mubr.msk.f32.mxu1 %vm247_vm1, %v466_v7 }
 0x16f   :  { %v468_v8 = vpop.permute.xlu1 %467 }
 0x170   :  { %1540 = vmatmul.mubr.msk.f32.gmra.mrb[28].mxu1 %vm247_vm1, %v468_v8  ;;  %v470_v9 = vpop.permute.xlu0 %469  ;;  %v921_v8 = vld [vmem:[%s2452_s5 + $0x70] sm:$0xff] }
 0x171   :  { %1542 = vmatprep.mubr.msk.f32.mxu1 %vm247_vm1, %v470_v9  ;;  %v922_v9 = vld [vmem:[%s2452_s5 + $0x78] sm:$0xff] }
 0x173   :  { %v472_v10 = vpop.permute.xlu1 %471 }
 0x174   :  { %1543 = vmatmul.mubr.msk.f32.gmra.mrb[30].mxu1 %vm247_vm1, %v472_v10  ;;  %v699_v5 = vpop.permute.xlu0 %698  ;;  %v1685_v10 = vpack.c.bf16 %v922_v9, %v921_v8 }
 0x176   :  { %1686 = vmatprep.subr.bf16.mxu0 %v1685_v10 }
 0x177   :  { %v701_v3 = vpop.permute.xlu1 %700  ;;  %1688 = vmatpush3.bf16.msra.mxu0 %v1685_v10 }
 0x178   :  { %v703_v7 = vpop.permute.xlu0 %702 }
 0x17b   :  { %v705_v6 = vpop.permute.xlu1 %704 }
 0x17c   :  { %v707_v26 = vpop.permute.xlu0 %706 }
 0x17f   :  { %v709_v25 = vpop.permute.xlu1 %708 }
 0x180   :  { %v711_v56 = vpop.permute.xlu0 %710 }
 0x183   :  { %v713_v37 = vpop.permute.xlu1 %712 }
 0x1b5   :  { %v2094_v11 = vpop.f32.mrb[0].mxu1 }
 0x1b6   :  { %v2096_v12 = vpop.f32.mrb[1].mxu1  ;;  %v2176_v28 = vmul.f32 %v2094_v11, %v1974_v40  ;;  %v795_v29 = vmul.f32 %v2094_v11, %v701_v3 }
 0x1b7   :  { %v2184_v35 = vmul.f32 %v1968_v39, %v2096_v12  ;;  %v794_v36 = vmul.f32 %v699_v5, %v2096_v12 }
 0x1ba   :  { %v2098_v13 = vpop.f32.mrb[2].mxu1 }
 0x1bb   :  { %v2100_v14 = vpop.f32.mrb[3].mxu1  ;;  %v797_v12 = vmul.f32 %v2098_v13, %v705_v6 }
 0x1bc   :  { %v2201_v61 = vmul.f32 %v1981_v41, %v2100_v14 }
 0x1be   :  { %v2102_v15 = vpop.f32.mrb[4].mxu1 }
 0x1bf   :  { %v2104_v16 = vpop.f32.mrb[5].mxu1 }
 0x1c2   :  { %v2106_v17 = vpop.f32.mrb[6].mxu1 }
 0x1c3   :  { %v2108_v18 = vpop.f32.mrb[7].mxu1 }
 0x1c6   :  { %v2110_v19 = vpop.f32.mrb[8].mxu1 }
 0x1c7   :  { %v2112_v20 = vpop.f32.mrb[9].mxu1 }
 0x1ca   :  { %v2114_v21 = vpop.f32.mrb[10].mxu1 }
 0x1cb   :  { %v2116_v22 = vpop.f32.mrb[11].mxu1 }
 0x1ce   :  { %v2118_v23 = vpop.f32.mrb[12].mxu1 }
 0x1cf   :  { %v2120_v24 = vpop.f32.mrb[13].mxu1 }
 0x1d2   :  { %v2134_v30 = vpop.f32.mrb[14].mxu1 }
 0x1d3   :  { %v2142_v34 = vpop.f32.mrb[15].mxu1 }
 0x22b   :  { %v1523_v27 = vpop.f32.mrb[16].mxu1 }
 0x22c   :  { %v2179_v31 = vmul.f32 %v1523_v27, %v701_v3  ;;  %v779_v32 = vmul.f32 %v1523_v27, %v1974_v40  ;;  %v571_v33 = vpop.f32.mrb[17].mxu1  ;;  %v2194_v40 = vmul.f32 %v2098_v13, %v1988_v42  ;;  %v796_v3 = vmul.f32 %v703_v7, %v2100_v14 }
 0x22d   :  { %v2187_v38 = vmul.f32 %v699_v5, %v571_v33  ;;  %v778_v55 = vmul.f32 %v1968_v39, %v571_v33  ;;  %v2214_v27 = vmul.f32 %v2102_v15, %v2002_v44 }
 0x22e   :  { %v763_v11 = vsub.f32 %v2176_v28, %v2179_v31  ;;  %v811_v57 = vadd.f32 %v795_v29, %v779_v32  ;;  %v715_v32 = vpop.permute.xlu0 %714 }
 0x22f   :  { %v762_v58 = vsub.f32 %v2184_v35, %v2187_v38  ;;  %v810_v59 = vadd.f32 %v794_v36, %v778_v55  ;;  %v1526_v60 = vpop.f32.mrb[18].mxu1 }
 0x230   :  { %v2203_v39 = vmul.f32 %v1526_v60, %v705_v6  ;;  %v781_v62 = vmul.f32 %v1526_v60, %v1988_v42  ;;  %v581_v63 = vpop.f32.mrb[19].mxu1  ;;  %v717_v6 = vpop.permute.xlu1 %716 }
 0x231   :  { %v2207_v5 = vmul.f32 %v703_v7, %v581_v63  ;;  %v780_v8 = vmul.f32 %v1981_v41, %v581_v63  ;;  %v1751_v9 = vpack.i.bf16 %v811_v57, %v810_v59  ;;  %v2221_v41 = vmul.f32 %v1995_v43, %v2104_v16 }
 0x232   :  { %v765_v10 = vsub.f32 %v2194_v40, %v2203_v39  ;;  %v813_v13 = vadd.f32 %v797_v12, %v781_v62  ;;  %v799_v7 = vmul.f32 %v2102_v15, %v709_v25  ;;  %v798_v57 = vmul.f32 %v707_v26, %v2104_v16 }
 0x233   :  { %v764_v42 = vsub.f32 %v2201_v61, %v2207_v5  ;;  %v812_v29 = vadd.f32 %v796_v3, %v780_v8  ;;  %1752 = vrot.lane.b32.xlu0 %v1751_v9, %s1792_s10  ;;  %v1529_v14 = vpop.f32.mrb[20].mxu1  ;;  %v2235_v15 = vmul.f32 %v2106_v17, %v2016_v46 }
 0x234   :  { %v2224_v33 = vmul.f32 %v1529_v14, %v709_v25  ;;  %v783_v36 = vmul.f32 %v1529_v14, %v2002_v44  ;;  %v591_v55 = vpop.f32.mrb[21].mxu1 }
 0x235   :  { %v2228_v59 = vmul.f32 %v707_v26, %v591_v55  ;;  %v782_v60 = vmul.f32 %v1995_v43, %v591_v55  ;;  %v1756_v12 = vpack.i.bf16 %v813_v13, %v812_v29  ;;  %v2242_v26 = vmul.f32 %v2009_v45, %v2108_v18  ;;  %v721_v29 = vpop.permute.xlu1 %720  ;;  %v719_v55 = vpop.permute.xlu0 %718 }
 0x236   :  { %v767_v62 = vsub.f32 %v2214_v27, %v2224_v33  ;;  %v815_v63 = vadd.f32 %v799_v7, %v783_v36  ;;  %v801_v43 = vmul.f32 %v2106_v17, %v713_v37  ;;  %v800_v13 = vmul.f32 %v711_v56, %v2108_v18 }
 0x237   :  { %v766_v25 = vsub.f32 %v2221_v41, %v2228_v59  ;;  %v814_v44 = vadd.f32 %v798_v57, %v782_v60  ;;  %1757 = vrot.lane.b32.xlu1 %v1756_v12, %s1792_s10  ;;  %v1532_v16 = vpop.f32.mrb[22].mxu1  ;;  %v2256_v17 = vmul.f32 %v2110_v19, %v2030_v48 }
 0x238   :  { %v2245_v3 = vmul.f32 %v1532_v16, %v713_v37  ;;  %v785_v8 = vmul.f32 %v1532_v16, %v2016_v46  ;;  %v601_v9 = vpop.f32.mrb[23].mxu1  ;;  %v802_v16 = vmul.f32 %v715_v32, %v2112_v20 }
 0x239   :  { %v2249_v14 = vmul.f32 %v711_v56, %v601_v9  ;;  %v784_v7 = vmul.f32 %v2009_v45, %v601_v9  ;;  %v1761_v36 = vpack.i.bf16 %v815_v63, %v814_v44  ;;  %v2263_v45 = vmul.f32 %v2023_v47, %v2112_v20 }
 0x23a   :  { %v769_v57 = vsub.f32 %v2235_v15, %v2245_v3  ;;  %v817_v60 = vadd.f32 %v801_v43, %v785_v8  ;;  %v803_v56 = vmul.f32 %v2110_v19, %v717_v6  ;;  %v725_v19 = vpop.permute.xlu1 %724 }
 0x23b   :  { %v768_v46 = vsub.f32 %v2242_v26, %v2249_v14  ;;  %v816_v37 = vadd.f32 %v800_v13, %v784_v7  ;;  %1762 = vrot.lane.b32.xlu0 %v1761_v36, %s1792_s10  ;;  %v1535_v18 = vpop.f32.mrb[24].mxu1  ;;  %v2277_v36 = vmul.f32 %v2114_v21, %v2044_v50 }
 0x23c   :  { %v2266_v12 = vmul.f32 %v1535_v18, %v717_v6  ;;  %v787_v63 = vmul.f32 %v1535_v18, %v2030_v48  ;;  %v611_v44 = vpop.f32.mrb[25].mxu1 }
 0x23d   :  { %v2270_v43 = vmul.f32 %v715_v32, %v611_v44  ;;  %v786_v8 = vmul.f32 %v2023_v47, %v611_v44  ;;  %v1766_v9 = vpack.i.bf16 %v817_v60, %v816_v37  ;;  %v2284_v47 = vmul.f32 %v2037_v49, %v2116_v22  ;;  %v723_v60 = vpop.permute.xlu0 %722 }
 0x23e   :  { %v819_v7 = vadd.f32 %v803_v56, %v787_v63  ;;  %v805_v32 = vmul.f32 %v2114_v21, %v721_v29  ;;  %v804_v63 = vmul.f32 %v719_v55, %v2116_v22  ;;  %v2298_v21 = vmul.f32 %v2118_v23, %v2058_v52 }
 0x23f   :  { %v770_v48 = vsub.f32 %v2263_v45, %v2270_v43  ;;  %v818_v6 = vadd.f32 %v802_v16, %v786_v8  ;;  %1767 = vrot.lane.b32.xlu1 %v1766_v9, %s1792_s10  ;;  %v1538_v20 = vpop.f32.mrb[26].mxu1  ;;  %v2458_v59 = vsub.f32 %v2256_v17, %v2266_v12 }
 0x240   :  { %v2287_v37 = vmul.f32 %v1538_v20, %v721_v29  ;;  %v789_v18 = vmul.f32 %v1538_v20, %v2044_v50  ;;  %v621_v56 = vpop.f32.mrb[27].mxu1 }
 0x241   :  { %v2291_v44 = vmul.f32 %v719_v55, %v621_v56  ;;  %v788_v16 = vmul.f32 %v2037_v49, %v621_v56  ;;  %v1771_v8 = vpack.i.bf16 %v819_v7, %v818_v6  ;;  %v2305_v55 = vmul.f32 %v2051_v51, %v2120_v24 }
 0x242   :  { %v821_v13 = vadd.f32 %v805_v32, %v789_v18  ;;  %v807_v49 = vmul.f32 %v2118_v23, %v725_v19  ;;  %v806_v32 = vmul.f32 %v723_v60, %v2120_v24  ;;  %v729_v18 = vpop.permute.xlu1 %728  ;;  %v2319_v23 = vmul.f32 %v2134_v30, %v2072_v54 }
 0x243   :  { %v820_v50 = vadd.f32 %v804_v63, %v788_v16  ;;  %1772 = vrot.lane.b32.xlu0 %v1771_v8, %s1792_s10  ;;  %v1541_v22 = vpop.f32.mrb[28].mxu1  ;;  %v727_v8 = vpop.permute.xlu0 %726  ;;  %v2459_v3 = vsub.f32 %v2284_v47, %v2291_v44 }
 0x244   :  { %v2308_v7 = vmul.f32 %v1541_v22, %v725_v19  ;;  %v791_v6 = vmul.f32 %v1541_v22, %v2058_v52  ;;  %v631_v20 = vpop.f32.mrb[29].mxu1 }
 0x245   :  { %v2312_v56 = vmul.f32 %v723_v60, %v631_v20  ;;  %v790_v63 = vmul.f32 %v2051_v51, %v631_v20  ;;  %v1776_v16 = vpack.i.bf16 %v821_v13, %v820_v50  ;;  %v809_v60 = vmul.f32 %v2134_v30, %v729_v18 }
 0x246   :  { %v823_v29 = vadd.f32 %v807_v49, %v791_v6  ;;  %v2327_v51 = vmul.f32 %v2065_v53, %v2142_v34  ;;  %v808_v49 = vmul.f32 %v727_v8, %v2142_v34 }
 0x247   :  { %v774_v52 = vsub.f32 %v2305_v55, %v2312_v56  ;;  %v822_v19 = vadd.f32 %v806_v32, %v790_v63  ;;  %1777 = vrot.lane.b32.xlu1 %v1776_v16, %s1792_s10  ;;  %v1544_v24 = vpop.f32.mrb[30].mxu1  ;;  %v1070_v55 = vld [vmem:[%s2453_s2 + $0x10] sm:$0xff] }
 0x248   :  { %v2329_v13 = vmul.f32 %v1544_v24, %v729_v18  ;;  %v793_v50 = vmul.f32 %v1544_v24, %v2072_v54  ;;  %v641_v22 = vpop.f32.mrb[31].mxu1  ;;  %1636 = vmatprep.mubr.f32.mxu1 %v1070_v55 }
 0x249   :  { %v2333_v6 = vmul.f32 %v727_v8, %v641_v22  ;;  %v792_v20 = vmul.f32 %v2065_v53, %v641_v22  ;;  %v1781_v32 = vpack.i.bf16 %v823_v29, %v822_v19 }
 0x24a   :  { %v777_v63 = vsub.f32 %v2319_v23, %v2329_v13  ;;  %v825_v30 = vadd.f32 %v809_v60, %v793_v50 }
 0x24b   :  { %v776_v16 = vsub.f32 %v2327_v51, %v2333_v6  ;;  %v824_v9 = vadd.f32 %v808_v49, %v792_v20  ;;  %1782 = vrot.lane.b32.xlu0 %v1781_v32, %s1792_s10 }
 0x24d   :  { %v1786_v18 = vpack.i.bf16 %v825_v30, %v824_v9 }
 0x24f   :  { %1787 = vrot.lane.b32.xlu1 %v1786_v18, %s1792_s10 }
 0x2a5   :  { %v1753_v54 = vpop.permute.xlu0 %1752 }
 0x2a6   :  { %v1755_v34 = vunpack.i.h.bf16 %v1753_v54  ;;  %v1754_v8 = vunpack.i.l.bf16 %v1753_v54 }
 0x2a8   :  { %v891_v53 = vsel %vm890_vm2, %v762_v58, %v1754_v8  ;;  %v892_v29 = vsel %vm890_vm2, %v763_v11, %v1755_v34 }
 0x2a9   :  { %1577 = vmatprep.mubr.f32.mxu0 %v891_v53  ;;  %v1758_v23 = vpop.permute.xlu1 %1757 }
 0x2aa   :  { %v1760_v19 = vunpack.i.h.bf16 %v1758_v23  ;;  %v1759_v9 = vunpack.i.l.bf16 %v1758_v23  ;;  %1578 = vmatmul.mubr.f32.vlgmr.msra.gmra.mrb[16].mxu0 %v892_v29 }
 0x2ac   :  { %v893_v24 = vsel %vm890_vm2, %v764_v42, %v1759_v9  ;;  %v894_v35 = vsel %vm890_vm2, %v765_v10, %v1760_v19  ;;  %v1157_v9 = vld [vmem:[%s2454_s6] sm:$0xff] }
 0x2ad   :  { %1580 = vmatprep.mubr.f32.mxu0 %v893_v24  ;;  %v1763_v38 = vpop.permute.xlu0 %1762  ;;  %v1158_v24 = vld [vmem:[%s2454_s6 + $0x8] sm:$0xff] }
 0x2ae   :  { %v1765_v28 = vunpack.i.h.bf16 %v1763_v38  ;;  %v1764_v31 = vunpack.i.l.bf16 %v1763_v38  ;;  %1581 = vmatmul.mubr.f32.gmra.mrb[18].mxu0 %v894_v35 }
 0x2b0   :  { %v895_v11 = vsel %vm890_vm2, %v766_v25, %v1764_v31  ;;  %v896_v58 = vsel %vm890_vm2, %v767_v62, %v1765_v28  ;;  %v1721_v31 = vpack.c.bf16 %v1158_v24, %v1157_v9 }
 0x2b1   :  { %1583 = vmatprep.mubr.f32.mxu0 %v895_v11  ;;  %v1768_v61 = vpop.permute.xlu1 %1767  ;;  %v1071_v11 = vld [vmem:[%s2453_s2 + $0x18] sm:$0xff] }
 0x2b2   :  { %v1770_v40 = vunpack.i.h.bf16 %v1768_v61  ;;  %v1769_v39 = vunpack.i.l.bf16 %v1768_v61  ;;  %1584 = vmatmul.mubr.f32.gmra.mrb[20].mxu0 %v896_v58  ;;  %v1069_v58 = vld [vmem:[%s2453_s2 + $0x8] sm:$0xff] }
 0x2b4   :  { %v897_v5 = vsel %vm890_vm2, %v768_v46, %v1769_v39  ;;  %v898_v10 = vsel %vm890_vm2, %v769_v57, %v1770_v40  ;;  %v2460_v57 = vsub.f32 %v2277_v36, %v2287_v37 }
 0x2b5   :  { %1586 = vmatprep.mubr.f32.mxu0 %v897_v5  ;;  %v1773_v42 = vpop.permute.xlu0 %1772  ;;  %v1343_v5 = vld [vmem:[%s2455_s7] ss:$0 sm:$0xff] }
 0x2b6   :  { %v1775_v27 = vunpack.i.h.bf16 %v1773_v42  ;;  %v1774_v41 = vunpack.i.l.bf16 %v1773_v42  ;;  %1587 = vmatmul.mubr.f32.gmra.mrb[22].mxu0 %v898_v10 }
 0x2b8   :  { %v899_v33 = vsel %vm890_vm2, %v770_v48, %v1774_v41  ;;  %v900_v62 = vsel %vm890_vm2, %v2458_v59, %v1775_v27  ;;  %v2461_v48 = vsub.f32 %v2298_v21, %v2308_v7  ;;  %v1068_v21 = vld [vmem:[%s2453_s2] sm:$0xff] }
 0x2b9   :  { %1589 = vmatprep.mubr.f32.mxu0 %v899_v33  ;;  %v1778_v25 = vpop.permute.xlu1 %1777 }
 0x2ba   :  { %v1780_v15 = vunpack.i.h.bf16 %v1778_v25  ;;  %v1779_v26 = vunpack.i.l.bf16 %v1778_v25  ;;  %1590 = vmatmul.mubr.f32.gmra.mrb[24].mxu0 %v900_v62 }
 0x2bc   :  { %v901_v14 = vsel %vm890_vm2, %v2459_v3, %v1779_v26  ;;  %v902_v46 = vsel %vm890_vm2, %v2460_v57, %v1780_v15 }
 0x2bd   :  { %1592 = vmatprep.mubr.f32.mxu0 %v901_v14  ;;  %v1783_v45 = vpop.permute.xlu0 %1782 }
 0x2be   :  { %v1785_v17 = vunpack.i.h.bf16 %v1783_v45  ;;  %v1784_v12 = vunpack.i.l.bf16 %v1783_v45  ;;  %1593 = vmatmul.mubr.f32.gmra.mrb[26].mxu0 %v902_v46 }
 0x2c0   :  { %v903_v43 = vsel %vm890_vm2, %v774_v52, %v1784_v12  ;;  %v904_v47 = vsel %vm890_vm2, %v2461_v48, %v1785_v17 }
 0x2c1   :  { %1595 = vmatprep.mubr.f32.mxu0 %v903_v43  ;;  %v1788_v44 = vpop.permute.xlu1 %1787 }
 0x2c2   :  { %v1790_v36 = vunpack.i.h.bf16 %v1788_v44  ;;  %v1789_v37 = vunpack.i.l.bf16 %v1788_v44  ;;  %1596 = vmatmul.mubr.f32.gmra.mrb[28].mxu0 %v904_v47 }
 0x2c4   :  { %v905_v60 = vsel %vm890_vm2, %v776_v16, %v1789_v37  ;;  %v906_v51 = vsel %vm890_vm2, %v777_v63, %v1790_v36 }
 0x2c5   :  { %1598 = vmatprep.mubr.f32.mxu0 %v905_v60 }
 0x2c6   :  { %1599 = vmatmul.mubr.f32.gmra.mrb[30].mxu0 %v906_v51 }
 0x2c7   :  { %1633 = vmatprep.mubr.f32.mxu0 %v1068_v21 }
 0x37d   :  { %v1579_v7 = vpop.f32.mrb[16].mxu0 }
 0x37e   :  { %v989_v56 = vpop.f32.mrb[17].mxu0 }
 0x37f   :  { %v1689_v52 = vpack.c.bf16 %v1579_v7, %v989_v56 }
 0x381   :  { %v1582_v13 = vpop.f32.mrb[18].mxu0  ;;  %1690 = vmatprep.subr.bf16.mxu0 %v1689_v52  ;;  %1725 = vmatprep.subr.bf16.mxu1 %v1689_v52 }
 0x382   :  { %v999_v50 = vpop.f32.mrb[19].mxu0  ;;  %1692 = vmatpush3.bf16.msra.mxu0 %v1689_v52  ;;  %1733 = vmatpush3.bf16.msra.mxu1 %v1689_v52 }
 0x383   :  { %v1693_v22 = vpack.c.bf16 %v1582_v13, %v999_v50 }
 0x385   :  { %v1585_v49 = vpop.f32.mrb[20].mxu0  ;;  %1694 = vmatprep.subr.bf16.mxu0 %v1693_v22  ;;  %1726 = vmatprep.subr.bf16.mxu1 %v1693_v22 }
 0x386   :  { %v1009_v6 = vpop.f32.mrb[21].mxu0  ;;  %1696 = vmatpush3.bf16.msra.mxu0 %v1693_v22  ;;  %1734 = vmatpush3.bf16.msra.mxu1 %v1693_v22 }
 0x387   :  { %v1697_v20 = vpack.c.bf16 %v1585_v49, %v1009_v6 }
 0x389   :  { %v1588_v32 = vpop.f32.mrb[22].mxu0  ;;  %1698 = vmatprep.subr.bf16.mxu0 %v1697_v20  ;;  %1727 = vmatprep.subr.bf16.mxu1 %v1697_v20 }
 0x38a   :  { %v1019_v63 = vpop.f32.mrb[23].mxu0  ;;  %1700 = vmatpush3.bf16.msra.mxu0 %v1697_v20  ;;  %1735 = vmatpush3.bf16.msra.mxu1 %v1697_v20 }
 0x38b   :  { %v1701_v30 = vpack.c.bf16 %v1588_v32, %v1019_v63 }
 0x38d   :  { %v1591_v16 = vpop.f32.mrb[24].mxu0  ;;  %1702 = vmatprep.subr.bf16.mxu0 %v1701_v30  ;;  %1728 = vmatprep.subr.bf16.mxu1 %v1701_v30 }
 0x38e   :  { %v1029_v18 = vpop.f32.mrb[25].mxu0  ;;  %1704 = vmatpush3.bf16.msra.mxu0 %v1701_v30  ;;  %1736 = vmatpush3.bf16.msra.mxu1 %v1701_v30 }
 0x38f   :  { %v1705_v54 = vpack.c.bf16 %v1591_v16, %v1029_v18 }
 0x391   :  { %v1594_v34 = vpop.f32.mrb[26].mxu0  ;;  %1706 = vmatprep.subr.bf16.mxu0 %v1705_v54  ;;  %1729 = vmatprep.subr.bf16.mxu1 %v1705_v54 }
 0x392   :  { %v1039_v8 = vpop.f32.mrb[27].mxu0  ;;  %1708 = vmatpush3.bf16.msra.mxu0 %v1705_v54  ;;  %1737 = vmatpush3.bf16.msra.mxu1 %v1705_v54 }
 0x393   :  { %v1709_v53 = vpack.c.bf16 %v1594_v34, %v1039_v8 }
 0x395   :  { %v1597_v29 = vpop.f32.mrb[28].mxu0  ;;  %1710 = vmatprep.subr.bf16.mxu0 %v1709_v53  ;;  %1730 = vmatprep.subr.bf16.mxu1 %v1709_v53 }
 0x396   :  { %v1049_v23 = vpop.f32.mrb[29].mxu0  ;;  %1712 = vmatpush3.bf16.msra.mxu0 %v1709_v53  ;;  %1738 = vmatpush3.bf16.msra.mxu1 %v1709_v53 }
 0x397   :  { %v1713_v19 = vpack.c.bf16 %v1597_v29, %v1049_v23 }
 0x399   :  { %v1600_v35 = vpop.f32.mrb[30].mxu0  ;;  %1714 = vmatprep.subr.bf16.mxu0 %v1713_v19  ;;  %1731 = vmatprep.subr.bf16.mxu1 %v1713_v19 }
 0x39a   :  { %v1059_v38 = vpop.f32.mrb[31].mxu0  ;;  %1716 = vmatpush3.bf16.msra.mxu0 %v1713_v19  ;;  %1739 = vmatpush3.bf16.msra.mxu1 %v1713_v19 }
 0x39b   :  { %v1717_v28 = vpack.c.bf16 %v1600_v35, %v1059_v38 }
 0x39d   :  { %1718 = vmatprep.subr.bf16.mxu0 %v1717_v28  ;;  %1732 = vmatprep.subr.bf16.mxu1 %v1717_v28 }
 0x39e   :  { %1720 = vmatpush3.bf16.msra.mxu0 %v1717_v28  ;;  %1740 = vmatpush3.bf16.msra.mxu1 %v1717_v28 }
 0x39f   :  { %1722 = vmatprep.subr.bf16.mxu1 %v1721_v31 }
 0x3a1   :  { %1637 = vmatmul.mubr.f32.vlgmr.msra.gmra.mrb[32].mxu1 %v1071_v11  ;;  %1634 = vmatmul.mubr.f32.vlgmr.msra.gmra.mrb[32].mxu0 %v1069_v58 }
 0x3a2   :  { %1724 = vmatpush3.bf16.msra.mxu1 %v1721_v31  ;;  %1643 = vmatprep.mubr.msk.f32.mxu1 %vm1166_vm3, %v1846_v0  ;;  %v1348_v0 = vld [vmem:[%s2456_s8] ss:$0 sm:$0xff] }
 0x3a5   :  { %1644 = vmatmul.mubr.msk.f32.vlgmr.msra.gmra.mrb[34].mxu1 %vm1166_vm3, %v1851_v1 }
 0x3a6   :  { %1646 = vmatprep.mubr.msk.f32.mxu1 %vm1166_vm3, %v1856_v2 }
 0x3a9   :  { %1647 = vmatmul.mubr.msk.f32.gmra.mrb[32].mxu1 %vm1166_vm3, %v1863_v4 }
 0x474   :  { %v1635_v61 = vpop.f32.mrb[32].mxu0 }
 0x475   :  { %v1138_v40 = vpop.f32.mrb[33].mxu0 }
 0x478   :  { %v1645_v39 = vpop.f32.mrb[34].mxu1 }
 0x479   :  { %v1741_v10 = vadd.f32 %v1645_v39, %v1635_v61  ;;  %v1245_v42 = vpop.f32.mrb[35].mxu1 }
 0x47a   :  { %v1743_v1 = vadd.f32 %v1245_v42, %v1138_v40 }
 0x47b   :  { %v1742_v27 = vadd.f32 %v1741_v10, %v1343_v5 }
 0x47c   :  { %v1744_v41 = vadd.f32 %v1743_v1, %v1343_v5  ;;  %v1648_v2 = vpop.f32.mrb[32].mxu1 }
 0x47d   :  { %vm1269_vm4 = vcmp.ge.f32.partialorder %v1742_v27, 0.0  ;;  %v1280_v33 = vmul.f32 %v1742_v27, %v1348_v0  ;;  %v1261_v4 = vadd.f32 %v1648_v2, %v1343_v5  ;;  %v1255_v59 = vpop.f32.mrb[33].mxu1 }
 0x47e   :  { %vm1268_vm5 = vcmp.ge.f32.partialorder %v1744_v41, 0.0  ;;  %v1279_v62 = vmul.f32 %v1744_v41, %v1348_v0  ;;  %v1256_v25 = vadd.f32 %v1343_v5, %v1255_v59 }
 0x47f   :  { %v1284_v15 = vsel %vm1269_vm4, %v1742_v27, %v1280_v33  ;;  %vm1271_vm6 = vcmp.ge.f32.partialorder %v1261_v4, 0.0  ;;  %v1282_v26 = vmul.f32 %v1348_v0, %v1261_v4 }
 0x480   :  { %1288 = vst.msk [vmem:[%s2457_s9 + $0x8] sm:$0xff] %vm1166_vm3, %v1284_v15  ;;  %v1283_v3 = vsel %vm1268_vm5, %v1744_v41, %v1279_v62  ;;  %vm1270_vm7 = vcmp.ge.f32.partialorder %v1256_v25, 0.0  ;;  %v1281_v14 = vmul.f32 %v1348_v0, %v1256_v25 }
 0x481   :  { %1287 = vst.msk [vmem:[%s2457_s9] sm:$0xff] %vm1166_vm3, %v1283_v3  ;;  %v1286_v57 = vsel %vm1271_vm6, %v1261_v4, %v1282_v26 }
 0x482   :  { %1290 = vst.msk [vmem:[%s2457_s9 + $0x18] sm:$0xff] %vm1166_vm3, %v1286_v57  ;;  %v1285_v46 = vsel %vm1270_vm7, %v1256_v25, %v1281_v14 }
 0x483   :  { %1289 = vst.msk [vmem:[%s2457_s9 + $0x10] sm:$0xff] %vm1166_vm3, %v1285_v46 }

// kernel: cvneuralop_forward.14
= control target key start
LH: loop header
LB: loop body
LE: loop exit
PB: predicated region body
PF: predicated region fallthrough
CT: control target
= control target key end

     0   :  { %s12597_s0 = inlined_call_operand.vmem [shape: f32[128,4], index: 0, kind: input, shape index: {}]   ;;  %s12598_s1 = inlined_call_operand.hbm [shape: f32[4,640], index: 1, kind: input, shape index: {}]   ;;  %s12599_s2 = inlined_call_operand.hbm [shape: f32[1,640], index: 2, kind: input, shape index: {}]   ;;  %s12600_s3 = inlined_call_operand.hbm [shape: f32[1,640], index: 3, kind: input, shape index: {}]   ;;  %s12601_s4 = inlined_call_operand.hbm [shape: f32[640,640], index: 4, kind: input, shape index: {}]   ;;  %s12602_s5 = inlined_call_operand.hbm [shape: f32[1,640], index: 5, kind: input, shape index: {}]   ;;  %s12603_s6 = inlined_call_operand.hbm [shape: f32[1,640], index: 6, kind: input, shape index: {}]   ;;  %s12604_s7 = inlined_call_operand.hbm [shape: f32[640,640], index: 7, kind: input, shape index: {}]   ;;  %s12605_s8 = inlined_call_operand.hbm [shape: f32[1,640], index: 8, kind: input, shape index: {}]   ;;  %s12606_s9 = inlined_call_operand.hbm [shape: f32[1,640], index: 9, kind: input, shape index: {}]   ;;  %s12607_s10 = inlined_call_operand.hbm [shape: f32[640,1280], index: 10, kind: input, shape index: {}]   ;;  %s12608_s11 = inlined_call_operand.hbm [shape: f32[1,1280], index: 11, kind: input, shape index: {}]   ;;  %s12609_s12 = inlined_call_operand.vmem [shape: f32[128,1280], index: 12, kind: output, shape index: {}]  }
   0x1   :  { %12714 = sst [smem:[#allocation60_spill]] %s12599_s2 }
   0x2   :  { %17 = vsyncpa [#allocation3], 0 }
   0x3   :  { %18 = vsyncpa [#allocation5], 0 }
   0x4   :  { %19 = vsyncpa [#allocation8], 0 }
   0x5   :  { %20 = vsyncpa [#allocation11], 0 }
   0x6   :  { %21 = vsyncpa [#allocation14], 0 }
   0x7   :  { %22 = vsyncpa [#allocation17], 0  ;;  %s10108_s21 = smov 0  }
   0x8 LB: > { %s10027_s22 = smov [#allocation4]   ;;  %s12610_s24 = sadd.s32 4294967295, %s10025_s21   ;;  %s10025_s21 = sphi %s10108_s21, %s28_s21  }
   0x9   : > { %s340_s23 = sshll.u32 %s10027_s22, 4  ;;  %p7050_p0 = scmp.ge.s32.totalorder %s10025_s21, 1  ;;  %s10122_s23 = int_to_ptr.vmem [resolvable:$true] %s340_s23 }
   0xa   : > { %p316_p1 = scmp.lt.s32.totalorder %s10025_s21, 3  ;;  %p10118_p2 = scmp.eq.s32.totalorder %s12610_s24, 0 }
   0xb   : > { %s10028_s27 = smov [#allocation7]   ;;  %s10029_s30 = smov [#allocation10]  }
   0xc   : > { %s12715_s25 = scalar_select %p10118_p2, 1, 0 }
   0xd   : > { %p10124_p3 = pnand %p7050_p0, %p316_p1  ;;  %s361_s28 = sshll.u32 %s10028_s27, 4  ;;  %s10130_s28 = int_to_ptr.vmem [resolvable:$true] %s361_s28 }
   0xe   : > { %s386_s13 = sshll.u32 %s10029_s30, 4  ;;  %s10030_s14 = smov [#allocation13]   ;;  %s10138_s13 = int_to_ptr.vmem [resolvable:$true] %s386_s13 }
   0xf   : > { %s12716_s26 = scalar_select %p10124_p3, 1, 0 }
  0x10   : > { %p9602_p4 = pneg %p10124_p3  ;;  %s10140_s15 = sshll.u32 %s10030_s14, 4  ;;  %s411_s15 = int_to_ptr.vmem [resolvable:$true] %s10140_s15 }
  0x11   : > { %s12718_s2 = sld [smem:[#allocation60_spill]] }
  0x12   : > { %p10134_p5 = pnand %p10118_p2, %p9602_p4 }
  0x14   : > { %p10150_p7 = pneg %p10134_p5 }
  0x17   : > { %s9687_s18 = scalar_lea.hbm %s12718_s2, 80 }
  0x18   : > { %p9688_p6 = scmp.ne.s32.totalorder %s12718_s2, %s9687_s18  ;;  %p9694_p10 = scmp.lt.u32.totalorder %s9687_s18, %s12718_s2 }
  0x1a   : > { %p9690_p8 = pnand %p10150_p7, %p9688_p6 }
  0x1c   : > { %p9691_p9 = pneg %p9690_p8 }
  0x1e   : > { %p9696_p11 = pnand %p9694_p10, %p9691_p9 }
  0x20   : > { %9699 = shalt.err (!%p9696_p11)
}
  0x21   : > { %s9700_s14 = scalar_lea.vmem %s10122_s23, 80  ;;  %s9707_s16 = scalar_lea.vmem %s10122_s23, 96 }
  0x22   : > { %p9701_p12 = scmp.ne.s32.totalorder %s10122_s23, %s9700_s14  ;;  %p9708_p1 = scmp.lt.s32.totalorder %s10122_s23, %s10122_s23 }
  0x23   : > { %p9709_p4 = scmp.lt.s32.totalorder %s9707_s16, %s9700_s14 }
  0x24   : > { %p9703_p13 = pnand %p9701_p12, %p10150_p7 }
  0x25   : > { %p9710_p6 = por %p9709_p4, %p9708_p1 }
  0x26   : > { %p9704_p0 = pneg %p9703_p13 }
  0x28   : > { %p9711_p8 = pnand %p9710_p6, %p9704_p0 }
  0x2a   : > { %9714 = shalt.err (!%p9711_p8)
}
  0x2b   : > { %9608 = dma.hbm_to_vmem [thread:$0]  (!%p10134_p5), %s12718_s2, 80, %s10122_s23, [#allocation5]  }
  0x2c   : > { %s9715_s27 = scalar_lea.hbm %s12601_s4, 51200 }
  0x2d   : > { %p9716_p9 = scmp.ne.s32.totalorder %s12601_s4, %s9715_s27  ;;  %p9722_p12 = scmp.lt.u32.totalorder %s9715_s27, %s12601_s4 }
  0x2f   : > { %p9718_p10 = pnand %p9716_p9, %p10150_p7 }
  0x31   : > { %p9719_p11 = pneg %p9718_p10 }
  0x33   : > { %p9724_p13 = pnand %p9722_p12, %p9719_p11 }
  0x35   : > { %9727 = shalt.err (!%p9724_p13)
}
  0x36   : > { %s9728_s23 = scalar_lea.vmem %s10130_s28, 51200  ;;  %p9736_p6 = scmp.lt.s32.totalorder %s10130_s28, %s10130_s28 }
  0x37   : > { %p9729_p0 = scmp.ne.s32.totalorder %s10130_s28, %s9728_s23  ;;  %p9737_p8 = scmp.lt.s32.totalorder %s9728_s23, %s9728_s23 }
  0x39   : > { %p9731_p1 = pnand %p9729_p0, %p10150_p7  ;;  %p9738_p9 = por %p9737_p8, %p9736_p6 }
  0x3b   : > { %p9732_p4 = pneg %p9731_p1 }
  0x3d   : > { %p9739_p10 = pnand %p9738_p9, %p9732_p4 }
  0x3f   : > { %9742 = shalt.err (!%p9739_p10)
}
  0x40   : > { %s12614_s24 = smov 640   ;;  %s12615_s17 = smov 40  }
  0x41   : > { %9614 = dma.hbm_to_vmem [thread:$0]  (!%p10134_p5), %s12601_s4, 51200, %s10130_s28, [#allocation8], %s12614_s24, %s12614_s24, %s12615_s17  }
  0x42   : > { %s9743_s30 = scalar_lea.hbm %s12603_s6, 80 }
  0x43   : > { %p9744_p11 = scmp.ne.s32.totalorder %s12603_s6, %s9743_s30  ;;  %p9750_p0 = scmp.lt.u32.totalorder %s9743_s30, %s12603_s6 }
  0x45   : > { %p9746_p12 = pnand %p9744_p11, %p10150_p7 }
  0x47   : > { %p9747_p13 = pneg %p9746_p12 }
  0x49   : > { %p9752_p1 = pnand %p9750_p0, %p9747_p13 }
  0x4b   : > { %9755 = shalt.err (!%p9752_p1)
}
  0x4c   : > { %s9756_s28 = scalar_lea.vmem %s10138_s13, 80  ;;  %s9763_s18 = scalar_lea.vmem %s10138_s13, 96 }
  0x4d   : > { %p9757_p4 = scmp.ne.s32.totalorder %s10138_s13, %s9756_s28  ;;  %p9764_p9 = scmp.lt.s32.totalorder %s10138_s13, %s10138_s13 }
  0x4e   : > { %p9765_p10 = scmp.lt.s32.totalorder %s9763_s18, %s9756_s28 }
  0x4f   : > { %p9759_p6 = pnand %p9757_p4, %p10150_p7 }
  0x50   : > { %p9766_p11 = por %p9765_p10, %p9764_p9 }
  0x51   : > { %p9760_p8 = pneg %p9759_p6 }
  0x53   : > { %p9767_p12 = pnand %p9766_p11, %p9760_p8 }
  0x55   : > { %9770 = shalt.err (!%p9767_p12)
}
  0x56   : > { %9620 = dma.hbm_to_vmem [thread:$0]  (!%p10134_p5), %s12603_s6, 80, %s10138_s13, [#allocation11]  }
  0x57   : > { %s9771_s30 = scalar_lea.hbm %s12605_s8, 80 }
  0x58   : > { %p9772_p13 = scmp.ne.s32.totalorder %s12605_s8, %s9771_s30  ;;  %p9778_p4 = scmp.lt.u32.totalorder %s9771_s30, %s12605_s8 }
  0x5a   : > { %p9774_p0 = pnand %p9772_p13, %p10150_p7 }
  0x5c   : > { %p9775_p1 = pneg %p9774_p0 }
  0x5e   : > { %p9780_p6 = pnand %p9778_p4, %p9775_p1 }
  0x60   : > { %9783 = shalt.err (!%p9780_p6)
}
  0x61   : > { %s9784_s18 = scalar_lea.vmem %s411_s15, 80  ;;  %s9791_s13 = scalar_lea.vmem %s411_s15, 96 }
  0x62   : > { %p9785_p8 = scmp.ne.s32.totalorder %s411_s15, %s9784_s18  ;;  %p9792_p11 = scmp.lt.s32.totalorder %s411_s15, %s411_s15 }
  0x63   : > { %p9793_p12 = scmp.lt.s32.totalorder %s9791_s13, %s9784_s18 }
  0x64   : > { %p9787_p9 = pnand %p9785_p8, %p10150_p7 }
  0x65   : > { %p9794_p2 = por %p9793_p12, %p9792_p11 }
  0x66   : > { %p9788_p10 = pneg %p9787_p9 }
  0x68   : > { %p9795_p3 = pnand %p9794_p2, %p9788_p10 }
  0x6a   : > { %9798 = shalt.err (!%p9795_p3)
}
  0x6b   : > { %9626 = dma.hbm_to_vmem [thread:$0]  (!%p10134_p5), %s12605_s8, 80, %s411_s15, [#allocation14]  }
  0x6c   : > { %s10033_s20 = smov [#allocation16]   ;;  %s9799_s16 = scalar_lea.hbm %s12607_s10, 102400 }
  0x6d   : > { %s431_s27 = sshll.u32 %s10033_s20, 4  ;;  %p9800_p13 = scmp.ne.s32.totalorder %s12607_s10, %s9799_s16  ;;  %s432_s27 = int_to_ptr.vmem [resolvable:$true] %s431_s27 }
  0x6e   : > { %p9806_p0 = scmp.lt.u32.totalorder %s9799_s16, %s12607_s10 }
  0x6f   : > { %p9802_p2 = pnand %p9800_p13, %p10150_p7 }
  0x71   : > { %p9803_p3 = pneg %p9802_p2 }
  0x73   : > { %p9808_p1 = pnand %p9806_p0, %p9803_p3 }
  0x75   : > { %9811 = shalt.err (!%p9808_p1)
}
  0x76   : > { %s9812_s15 = scalar_lea.vmem %s432_s27, 102400  ;;  %p9820_p9 = scmp.lt.s32.totalorder %s432_s27, %s432_s27 }
  0x77   : > { %p9813_p4 = scmp.ne.s32.totalorder %s432_s27, %s9812_s15  ;;  %p9821_p10 = scmp.lt.s32.totalorder %s9812_s15, %s9812_s15 }
  0x79   : > { %p9815_p6 = pnand %p9813_p4, %p10150_p7  ;;  %p9822_p11 = por %p9821_p10, %p9820_p9 }
  0x7b   : > { %p9816_p8 = pneg %p9815_p6 }
  0x7d   : > { %p9823_p12 = pnand %p9822_p11, %p9816_p8 }
  0x7f   : > { %9826 = shalt.err (!%p9823_p12)
}
  0x80   : > { %s10034_s2 = smov 1280   ;;  %s10035_s19 = smov 80  }
  0x81   : > { %9632 = dma.hbm_to_vmem [thread:$0]  (!%p10134_p5), %s12607_s10, 102400, %s432_s27, [#allocation17], %s10034_s2, %s10034_s2, %s10035_s19  }
  0x82   : > { %s10036_s14 = smov [#allocation2]   ;;  %s10037_s23 = smov [#allocation6]  }
  0x83   : > { %s329_s16 = sshll.u32 %s10036_s14, 4  ;;  %s351_s28 = sshll.u32 %s10037_s23, 4  ;;  %s330_s16 = int_to_ptr.vmem [resolvable:$true] %s329_s16  ;;  %s10259_s28 = int_to_ptr.vmem [resolvable:$true] %s351_s28 }
  0x84   : > { %s9827_s15 = scalar_lea.hbm %s12598_s1, 320 }
  0x85   : > { %p9828_p13 = scmp.ne.s32.totalorder %s12598_s1, %s9827_s15  ;;  %p9834_p0 = scmp.lt.u32.totalorder %s9827_s15, %s12598_s1 }
  0x87   : > { %p9830_p2 = pnand %p9828_p13, %p10150_p7 }
  0x89   : > { %p9831_p3 = pneg %p9830_p2 }
  0x8b   : > { %p9836_p1 = pnand %p9834_p0, %p9831_p3 }
  0x8d   : > { %9839 = shalt.err (!%p9836_p1)
}
  0x8e   : > { %s9840_s2 = scalar_lea.vmem %s330_s16, 320  ;;  %p9848_p9 = scmp.lt.s32.totalorder %s330_s16, %s330_s16 }
  0x8f   : > { %p9841_p4 = scmp.ne.s32.totalorder %s330_s16, %s9840_s2  ;;  %p9849_p10 = scmp.lt.s32.totalorder %s9840_s2, %s9840_s2 }
  0x91   : > { %p9843_p6 = pnand %p9841_p4, %p10150_p7  ;;  %p9850_p11 = por %p9849_p10, %p9848_p9 }
  0x93   : > { %p9844_p8 = pneg %p9843_p6 }
  0x95   : > { %p9851_p12 = pnand %p9850_p11, %p9844_p8 }
  0x97   : > { %9854 = shalt.err (!%p9851_p12)
}
  0x98   : > { %9605 = dma.hbm_to_vmem [thread:$0]  (!%p10134_p5), %s12598_s1, 320, %s330_s16, [#allocation3]  }
  0x99   : > { %s9855_s14 = scalar_lea.hbm %s12600_s3, 80 }
  0x9a   : > { %p9856_p13 = scmp.ne.s32.totalorder %s12600_s3, %s9855_s14  ;;  %p9862_p0 = scmp.lt.u32.totalorder %s9855_s14, %s12600_s3 }
  0x9c   : > { %p9858_p2 = pnand %p9856_p13, %p10150_p7 }
  0x9e   : > { %p9859_p3 = pneg %p9858_p2 }
  0xa0   : > { %p9864_p1 = pnand %p9862_p0, %p9859_p3 }
  0xa2   : > { %9867 = shalt.err (!%p9864_p1)
}
  0xa3   : > { %s9868_s16 = scalar_lea.vmem %s10259_s28, 80  ;;  %s9875_s20 = scalar_lea.vmem %s10259_s28, 96 }
  0xa4   : > { %p9869_p4 = scmp.ne.s32.totalorder %s10259_s28, %s9868_s16  ;;  %p9876_p9 = scmp.lt.s32.totalorder %s10259_s28, %s10259_s28 }
  0xa5   : > { %p9877_p10 = scmp.lt.s32.totalorder %s9875_s20, %s9868_s16 }
  0xa6   : > { %p9871_p6 = pnand %p9869_p4, %p10150_p7 }
  0xa7   : > { %p9878_p11 = por %p9877_p10, %p9876_p9 }
  0xa8   : > { %p9872_p8 = pneg %p9871_p6 }
  0xaa   : > { %p9879_p12 = pnand %p9878_p11, %p9872_p8 }
  0xac   : > { %9882 = shalt.err (!%p9879_p12)
}
  0xad   : > { %9611 = dma.hbm_to_vmem [thread:$0]  (!%p10134_p5), %s12600_s3, 80, %s10259_s28, [#allocation5]  }
  0xae   : > { %s10038_s24 = smov [#allocation9]   ;;  %s10039_s19 = smov [#allocation12]  }
  0xaf   : > { %s375_s17 = sshll.u32 %s10038_s24, 4  ;;  %s396_s30 = sshll.u32 %s10039_s19, 4  ;;  %s376_s17 = int_to_ptr.vmem [resolvable:$true] %s375_s17  ;;  %s10303_s30 = int_to_ptr.vmem [resolvable:$true] %s396_s30 }
  0xb0   : > { %s9883_s18 = scalar_lea.hbm %s12602_s5, 80 }
  0xb1   : > { %p9884_p13 = scmp.ne.s32.totalorder %s12602_s5, %s9883_s18  ;;  %p9890_p0 = scmp.lt.u32.totalorder %s9883_s18, %s12602_s5 }
  0xb3   : > { %p9886_p2 = pnand %p9884_p13, %p10150_p7 }
  0xb5   : > { %p9887_p3 = pneg %p9886_p2 }
  0xb7   : > { %p9892_p1 = pnand %p9890_p0, %p9887_p3 }
  0xb9   : > { %9895 = shalt.err (!%p9892_p1)
}
  0xba   : > { %s9896_s20 = scalar_lea.vmem %s376_s17, 80  ;;  %s9903_s27 = scalar_lea.vmem %s376_s17, 96 }
  0xbb   : > { %p9897_p4 = scmp.ne.s32.totalorder %s376_s17, %s9896_s20  ;;  %p9904_p9 = scmp.lt.s32.totalorder %s376_s17, %s376_s17 }
  0xbc   : > { %p9905_p10 = scmp.lt.s32.totalorder %s9903_s27, %s9896_s20 }
  0xbd   : > { %p9899_p6 = pnand %p9897_p4, %p10150_p7 }
  0xbe   : > { %p9906_p11 = por %p9905_p10, %p9904_p9 }
  0xbf   : > { %p9900_p8 = pneg %p9899_p6 }
  0xc1   : > { %p9907_p12 = pnand %p9906_p11, %p9900_p8 }
  0xc3   : > { %9910 = shalt.err (!%p9907_p12)
}
  0xc4   : > { %9617 = dma.hbm_to_vmem [thread:$0]  (!%p10134_p5), %s12602_s5, 80, %s376_s17, [#allocation8]  }
  0xc5   : > { %s9911_s23 = scalar_lea.hbm %s12604_s7, 51200 }
  0xc6   : > { %p9912_p13 = scmp.ne.s32.totalorder %s12604_s7, %s9911_s23  ;;  %p9918_p0 = scmp.lt.u32.totalorder %s9911_s23, %s12604_s7 }
  0xc8   : > { %p9914_p2 = pnand %p9912_p13, %p10150_p7 }
  0xca   : > { %p9915_p3 = pneg %p9914_p2 }
  0xcc   : > { %p9920_p1 = pnand %p9918_p0, %p9915_p3 }
  0xce   : > { %9923 = shalt.err (!%p9920_p1)
}
  0xcf   : > { %s9924_s17 = scalar_lea.vmem %s10303_s30, 51200  ;;  %p9932_p9 = scmp.lt.s32.totalorder %s10303_s30, %s10303_s30 }
  0xd0   : > { %p9925_p4 = scmp.ne.s32.totalorder %s10303_s30, %s9924_s17  ;;  %p9933_p10 = scmp.lt.s32.totalorder %s9924_s17, %s9924_s17 }
  0xd2   : > { %p9927_p6 = pnand %p9925_p4, %p10150_p7  ;;  %p9934_p11 = por %p9933_p10, %p9932_p9 }
  0xd4   : > { %p9928_p8 = pneg %p9927_p6 }
  0xd6   : > { %p9935_p12 = pnand %p9934_p11, %p9928_p8 }
  0xd8   : > { %9938 = shalt.err (!%p9935_p12)
}
  0xd9   : > { %s12720_s28 = smov 40   ;;  %s12721_s20 = smov 640  }
  0xda   : > { %9623 = dma.hbm_to_vmem [thread:$0]  (!%p10134_p5), %s12604_s7, 51200, %s10303_s30, [#allocation11], %s12721_s20, %s12721_s20, %s12720_s28  }
  0xdb   : > { %s10040_s24 = smov [#allocation15]   ;;  %s10041_s14 = smov [#allocation18]  }
  0xdc   : > { %s421_s19 = sshll.u32 %s10040_s24, 4  ;;  %s445_s23 = sshll.u32 %s10041_s14, 4  ;;  %s422_s19 = int_to_ptr.vmem [resolvable:$true] %s421_s19  ;;  %s10349_s23 = int_to_ptr.vmem [resolvable:$true] %s445_s23 }
  0xdd   : > { %s9939_s15 = scalar_lea.hbm %s12606_s9, 80 }
  0xde   : > { %p9940_p13 = scmp.ne.s32.totalorder %s12606_s9, %s9939_s15  ;;  %p9946_p0 = scmp.lt.u32.totalorder %s9939_s15, %s12606_s9 }
  0xe0   : > { %p9942_p2 = pnand %p9940_p13, %p10150_p7 }
  0xe2   : > { %p9943_p3 = pneg %p9942_p2 }
  0xe4   : > { %p9948_p1 = pnand %p9946_p0, %p9943_p3 }
  0xe6   : > { %9951 = shalt.err (!%p9948_p1)
}
  0xe7   : > { %s9952_s28 = scalar_lea.vmem %s422_s19, 80  ;;  %s9959_s20 = scalar_lea.vmem %s422_s19, 96 }
  0xe8   : > { %p9953_p4 = scmp.ne.s32.totalorder %s422_s19, %s9952_s28  ;;  %p9960_p9 = scmp.lt.s32.totalorder %s422_s19, %s422_s19 }
  0xe9   : > { %p9961_p10 = scmp.lt.s32.totalorder %s9959_s20, %s9952_s28 }
  0xea   : > { %p9955_p6 = pnand %p9953_p4, %p10150_p7 }
  0xeb   : > { %p9962_p11 = por %p9961_p10, %p9960_p9 }
  0xec   : > { %p9956_p8 = pneg %p9955_p6 }
  0xee   : > { %p9963_p12 = pnand %p9962_p11, %p9956_p8 }
  0xf0   : > { %9966 = shalt.err (!%p9963_p12)
}
  0xf1   : > { %9629 = dma.hbm_to_vmem [thread:$0]  (!%p10134_p5), %s12606_s9, 80, %s422_s19, [#allocation14]  }
  0xf2   : > { %s9967_s13 = scalar_lea.hbm %s12608_s11, 160 }
  0xf3   : > { %p9968_p13 = scmp.ne.s32.totalorder %s12608_s11, %s9967_s13  ;;  %p9974_p0 = scmp.lt.u32.totalorder %s9967_s13, %s12608_s11 }
  0xf5   : > { %p9970_p2 = pnand %p9968_p13, %p10150_p7 }
  0xf7   : > { %p9971_p3 = pneg %p9970_p2 }
  0xf9   : > { %p9976_p1 = pnand %p9974_p0, %p9971_p3 }
  0xfb   : > { %9979 = shalt.err (!%p9976_p1)
}
  0xfc   : > { %s9980_s19 = scalar_lea.vmem %s10349_s23, 160  ;;  %p9988_p9 = scmp.lt.s32.totalorder %s10349_s23, %s10349_s23 }
  0xfd   : > { %p9981_p4 = scmp.ne.s32.totalorder %s10349_s23, %s9980_s19  ;;  %p9989_p10 = scmp.lt.s32.totalorder %s9980_s19, %s9980_s19 }
  0xff   : > { %p9983_p6 = pnand %p9981_p4, %p10150_p7  ;;  %p9990_p11 = por %p9989_p10, %p9988_p9 }
 0x101   : > { %p9984_p8 = pneg %p9983_p6 }
 0x103   : > { %p9991_p12 = pnand %p9990_p11, %p9984_p8 }
 0x105   : > { %9994 = shalt.err (!%p9991_p12)
}
 0x106   : > { %9635 = dma.hbm_to_vmem [thread:$0]  (!%p10134_p5), %s12608_s11, 160, %s10349_s23, [#allocation17]  }
 0x107   : > { %p12722_p13 = scmp.ne.s32.totalorder %s12716_s26, 0 }
 0x109   : > { %467 = sbr.rel (%p12722_p13) target bundleno = 1817 (0x719), region = 68 }
 0x110   : > { %p12723_p2 = scmp.ne.s32.totalorder %s12715_s25, 0 }
 0x112   : > { %10000 = dma.done.wait (%p12723_p2), [#allocation3], 320  }
 0x113   : > { %10002 = vsyncadd (%p12723_p2), [#allocation3], 4294966976 }
 0x114   : > { %10004 = dma.done.wait (%p12723_p2), [#allocation5], 160  }
 0x115   : > { %10006 = vsyncadd (%p12723_p2), [#allocation5], 4294967136 }
 0x116   : > { %10008 = dma.done.wait (%p12723_p2), [#allocation8], 51280  }
 0x117   : > { %10010 = vsyncadd (%p12723_p2), [#allocation8], 4294916016 }
 0x118   : > { %10012 = dma.done.wait (%p12723_p2), [#allocation11], 51280  }
 0x119   : > { %10014 = vsyncadd (%p12723_p2), [#allocation11], 4294916016 }
 0x11a   : > { %10016 = dma.done.wait (%p12723_p2), [#allocation14], 160  }
 0x11b   : > { %10018 = vsyncadd (%p12723_p2), [#allocation14], 4294967136 }
 0x11c   : > { %10020 = dma.done.wait (%p12723_p2), [#allocation17], 102560  }
 0x11d   : > { %10022 = vsyncadd (%p12723_p2), [#allocation17], 4294864736  ;;  %s12724_s26 = sadd.s32 4294967295, %s10025_s21   ;;  %v12616_v0 = vmov 0.0   ;;  %v571_v1 = vld [vmem:[#allocation2] sm:$0xff]  ;;  %vm631_vm0 = vcmask 1043456  }
 0x11e   : > { %s7075_s29 = sshll.u32 %s12724_s26, 3  ;;  %706 = vmatprep.mubr.f32.mxu0 %v12616_v0  ;;  %819 = vmatprep.mubr.f32.mxu1 %v12616_v0  ;;  %v572_v2 = vld [vmem:[#allocation2 + $0x8] sm:$0xff]  ;;  %v604_v3 = vcombine.high %v571_v1, %v571_v1  ;;  %vm606_vm1 = vcmask 31744   ;;  %v573_v6 = vld [vmem:[#allocation2 + $0x10] sm:$0xf]  ;;  %v1280_v11 = vld [vmem:[#allocation7 + $0x500] sm:$0xff] }
 0x11f   : > { %p551_p5 = scmp.lt.s32.totalorder %s7075_s29, 15  ;;  %v605_v4 = vcombine.high %v572_v2, %v572_v2  ;;  %v1121_v7 = vld [vmem:[#allocation7 + $0x8] sm:$0xff]  ;;  %v1126_v8 = vld [vmem:[#allocation7 + $0x30] sm:$0xff]  ;;  %v1291_v17 = vld [vmem:[#allocation7 + $0x558] sm:$0xff] }
 0x120   : > { %7079 = vmatprep.subr.msk.mxu0 %vm631_vm0, %v604_v3  ;;  %v1281_v9 = vld [vmem:[#allocation7 + $0x508] sm:$0xff]  ;;  %v1286_v10 = vld [vmem:[#allocation7 + $0x530] sm:$0xff]  ;;  %v7493_v15 = vpack.c.bf16 %v1126_v8, %v1121_v7  ;;  %v1296_v18 = vld [vmem:[#allocation7 + $0x580] sm:$0xff] }
 0x121   : > { %s12896_s29 = smov (!%p551_p5, %s7075_s29), 15  ;;  %7089 = vmatprep.subr.msk.mxu1 %vm631_vm0, %v605_v4  ;;  %7080 = vmatpush1.msk.msra.mxu0 %vm631_vm0, %v571_v1  ;;  %v7557_v13 = vpack.c.bf16 %v1286_v10, %v1281_v9  ;;  %v1285_v14 = vld [vmem:[#allocation7 + $0x528] sm:$0xff]  ;;  %v1290_v19 = vld [vmem:[#allocation7 + $0x550] sm:$0xff]  ;;  %v1295_v20 = vld [vmem:[#allocation7 + $0x578] sm:$0xff]  ;;  %v7561_v21 = vpack.c.bf16 %v1296_v18, %v1291_v17 }
 0x122   : > { %s7076_s22 = sshll.u32 %s12896_s29, 3  ;;  %7090 = vmatpush1.msk.msra.mxu1 %vm631_vm0, %v572_v2  ;;  %7391 = vmatprep.subr.msk.mxu0 %vm631_vm0, %v573_v6  ;;  %v7559_v16 = vpack.c.bf16 %v1285_v14, %v1280_v11  ;;  %v1301_v23 = vld [vmem:[#allocation7 + $0x5a8] sm:$0xff]  ;;  %v1306_v24 = vld [vmem:[#allocation7 + $0x5d0] sm:$0xff]  ;;  %v7563_v25 = vpack.c.bf16 %v1295_v20, %v1290_v19  ;;  %v1300_v27 = vld [vmem:[#allocation7 + $0x5a0] sm:$0xff]  ;;  %s9557_s25 = smul.u32 80, %s12896_s29 }
 0x123   : > { %s10428_s2 = scalar_lea.vmem %s12597_s0, %s7076_s22  ;;  %7558 = vmatprep.subr.bf16.mxu1 %v7557_v13  ;;  %v7565_v26 = vpack.c.bf16 %v1306_v24, %v1301_v23  ;;  %v1305_v28 = vld [vmem:[#allocation7 + $0x5c8] sm:$0xff]  ;;  %v1311_v29 = vld [vmem:[#allocation7 + $0x5f8] sm:$0xff]  ;;  %v1316_v30 = vld [vmem:[#allocation7 + $0x620] sm:$0xff] }
 0x124   : > { %v10431_v5 = vld [vmem:[%s10428_s2] sm:$0xff]  ;;  %v10444_v12 = vld [vmem:[%s10428_s2 + $0x8] sm:$0xff]  ;;  %v10455_v22 = vld [vmem:[%s10428_s2 + $0x10] sm:$0xff]  ;;  %v7567_v32 = vpack.c.bf16 %v1305_v28, %v1300_v27  ;;  %v7569_v33 = vpack.c.bf16 %v1316_v30, %v1311_v29  ;;  %s12383_s18 = scalar_lea.vmem %s12609_s12, %s9557_s25 }
 0x125   : > { %7081 = vmatmul.mubr.msk.f32.vlgmr.msra.gmra.mrb[0].mxu0 %vm606_vm1, %v10431_v5  ;;  %7091 = vmatmul.mubr.msk.f32.vlgmr.msra.gmra.mrb[0].mxu1 %vm606_vm1, %v10431_v5  ;;  %v10464_v31 = vld [vmem:[%s10428_s2 + $0x18] sm:$0xff]  ;;  %v1310_v34 = vld [vmem:[#allocation7 + $0x5f0] sm:$0xff]  ;;  %v1321_v36 = vld [vmem:[#allocation7 + $0x648] sm:$0xff] }
 0x126   : > { %712 = vmatprep.mubr.f32.mxu0 %v12616_v0  ;;  %825 = vmatprep.mubr.f32.mxu1 %v12616_v0  ;;  %v1315_v35 = vld [vmem:[#allocation7 + $0x618] sm:$0xff]  ;;  %v1326_v37 = vld [vmem:[#allocation7 + $0x670] sm:$0xff]  ;;  %v10473_v38 = vld [vmem:[%s10428_s2 + $0x20] sm:$0xff] }
 0x127   : > { %7392 = vmatpush3.msk.msra.mxu0 %vm631_vm0, %v573_v6  ;;  %7560 = vmatpush1.bf16.msra.mxu1 %v7559_v16  ;;  %v7571_v39 = vpack.c.bf16 %v1315_v35, %v1310_v34  ;;  %v7573_v40 = vpack.c.bf16 %v1326_v37, %v1321_v36  ;;  %v1320_v41 = vld [vmem:[#allocation7 + $0x640] sm:$0xff]  ;;  %v1325_v42 = vld [vmem:[#allocation7 + $0x668] sm:$0xff]  ;;  %v1331_v43 = vld [vmem:[#allocation7 + $0x698] sm:$0xff] }
 0x128   : > { %7494 = vmatprep.subr.bf16.mxu0 %v7493_v15  ;;  %7562 = vmatprep.subr.bf16.mxu1 %v7561_v21  ;;  %v1336_v44 = vld [vmem:[#allocation7 + $0x6c0] sm:$0xff]  ;;  %v10482_v45 = vld [vmem:[%s10428_s2 + $0x28] sm:$0xff]  ;;  %v7575_v46 = vpack.c.bf16 %v1325_v42, %v1320_v41  ;;  %v1330_v48 = vld [vmem:[#allocation7 + $0x690] sm:$0xff] }
 0x129   : > { %7082 = vmatmul.mubr.msk.f32.gmra.mrb[2].mxu0 %vm606_vm1, %v10444_v12  ;;  %7092 = vmatmul.mubr.msk.f32.gmra.mrb[2].mxu1 %vm606_vm1, %v10444_v12  ;;  %v7577_v47 = vpack.c.bf16 %v1336_v44, %v1331_v43  ;;  %v1335_v49 = vld [vmem:[#allocation7 + $0x6b8] sm:$0xff]  ;;  %v1341_v50 = vld [vmem:[#allocation7 + $0x6e8] sm:$0xff]  ;;  %v1346_v51 = vld [vmem:[#allocation7 + $0x710] sm:$0xff] }
 0x12a   : > { %718 = vmatprep.mubr.f32.mxu0 %v12616_v0  ;;  %831 = vmatprep.mubr.f32.mxu1 %v12616_v0  ;;  %v10491_v52 = vld [vmem:[%s10428_s2 + $0x30] sm:$0xff]  ;;  %v7579_v53 = vpack.c.bf16 %v1335_v49, %v1330_v48  ;;  %v7581_v54 = vpack.c.bf16 %v1346_v51, %v1341_v50  ;;  %v1340_v55 = vld [vmem:[#allocation7 + $0x6e0] sm:$0xff]  ;;  %v1345_v56 = vld [vmem:[#allocation7 + $0x708] sm:$0xff] }
 0x12b   : > { %7564 = vmatpush1.bf16.msra.mxu1 %v7563_v25  ;;  %v1351_v57 = vld [vmem:[#allocation7 + $0x738] sm:$0xff]  ;;  %v1356_v58 = vld [vmem:[#allocation7 + $0x760] sm:$0xff]  ;;  %v1125_v61 = vld [vmem:[#allocation7 + $0x28] sm:$0xff]  ;;  %v7583_v63 = vpack.c.bf16 %v1345_v56, %v1340_v55 }
 0x12c   : > { %7566 = vmatprep.subr.bf16.mxu1 %v7565_v26  ;;  %v10500_v59 = vld [vmem:[%s10428_s2 + $0x38] sm:$0xff]  ;;  %v1120_v60 = vld [vmem:[#allocation7] sm:$0xff]  ;;  %v7585_v2 = vpack.c.bf16 %v1356_v58, %v1351_v57  ;;  %v1350_v3 = vld [vmem:[#allocation7 + $0x730] sm:$0xff] }
 0x12d   : > { %7083 = vmatmul.mubr.msk.f32.gmra.mrb[4].mxu0 %vm606_vm1, %v10455_v22  ;;  %7093 = vmatmul.mubr.msk.f32.gmra.mrb[4].mxu1 %vm606_vm1, %v10455_v22  ;;  %v1131_v62 = vld [vmem:[#allocation7 + $0x58] sm:$0xff]  ;;  %v1136_v1 = vld [vmem:[#allocation7 + $0x80] sm:$0xff]  ;;  %v1361_v6 = vld [vmem:[#allocation7 + $0x788] sm:$0xff]  ;;  %v7495_v8 = vpack.c.bf16 %v1125_v61, %v1120_v60 }
 0x12e   : > { %724 = vmatprep.mubr.f32.mxu0 %v12616_v0  ;;  %837 = vmatprep.mubr.f32.mxu1 %v12616_v0  ;;  %v1355_v4 = vld [vmem:[#allocation7 + $0x758] sm:$0xff]  ;;  %v1366_v7 = vld [vmem:[#allocation7 + $0x7b0] sm:$0xff]  ;;  %v7497_v9 = vpack.c.bf16 %v1136_v1, %v1131_v62  ;;  %v1141_v13 = vld [vmem:[#allocation7 + $0xa8] sm:$0xff] }
 0x12f   : > { %7568 = vmatpush1.bf16.msra.mxu1 %v7567_v32  ;;  %v1130_v10 = vld [vmem:[#allocation7 + $0x50] sm:$0xff]  ;;  %v1135_v11 = vld [vmem:[#allocation7 + $0x78] sm:$0xff]  ;;  %v7587_v14 = vpack.c.bf16 %v1355_v4, %v1350_v3  ;;  %v7589_v16 = vpack.c.bf16 %v1366_v7, %v1361_v6  ;;  %v1360_v17 = vld [vmem:[#allocation7 + $0x780] sm:$0xff] }
 0x130   : > { %7570 = vmatprep.subr.bf16.mxu1 %v7569_v33  ;;  %v1146_v15 = vld [vmem:[#allocation7 + $0xd0] sm:$0xff]  ;;  %v1365_v18 = vld [vmem:[#allocation7 + $0x7a8] sm:$0xff]  ;;  %v1371_v19 = vld [vmem:[#allocation7 + $0x7d8] sm:$0xff] }
 0x131   : > { %7084 = vmatmul.mubr.msk.f32.gmra.mrb[6].mxu0 %vm606_vm1, %v10464_v31  ;;  %7094 = vmatmul.mubr.msk.f32.gmra.mrb[6].mxu1 %vm606_vm1, %v10464_v31  ;;  %v1376_v20 = vld [vmem:[#allocation7 + $0x800] sm:$0xff]  ;;  %v7501_v21 = vpack.c.bf16 %v1146_v15, %v1141_v13  ;;  %v1145_v24 = vld [vmem:[#allocation7 + $0xc8] sm:$0xff]  ;;  %v1151_v25 = vld [vmem:[#allocation7 + $0xf8] sm:$0xff]  ;;  %v7591_v26 = vpack.c.bf16 %v1365_v18, %v1360_v17 }
 0x132   : > { %730 = vmatprep.mubr.f32.mxu0 %v12616_v0  ;;  %843 = vmatprep.mubr.f32.mxu1 %v12616_v0  ;;  %v1140_v23 = vld [vmem:[#allocation7 + $0xa0] sm:$0xff]  ;;  %v7593_v28 = vpack.c.bf16 %v1376_v20, %v1371_v19  ;;  %v1370_v29 = vld [vmem:[#allocation7 + $0x7d0] sm:$0xff]  ;;  %v1375_v30 = vld [vmem:[#allocation7 + $0x7f8] sm:$0xff] }
 0x133   : > { %7572 = vmatpush1.bf16.msra.mxu1 %v7571_v39  ;;  %v1156_v27 = vld [vmem:[#allocation7 + $0x120] sm:$0xff]  ;;  %v1386_v32 = vld [vmem:[#allocation7 + $0x850] sm:$0xff]  ;;  %v1155_v35 = vld [vmem:[#allocation7 + $0x118] sm:$0xff]  ;;  %v7595_v37 = vpack.c.bf16 %v1375_v30, %v1370_v29 }
 0x134   : > { %7574 = vmatprep.subr.bf16.mxu1 %v7573_v40  ;;  %v7505_v33 = vpack.c.bf16 %v1156_v27, %v1151_v25  ;;  %v1150_v34 = vld [vmem:[#allocation7 + $0xf0] sm:$0xff]  ;;  %v1161_v36 = vld [vmem:[#allocation7 + $0x148] sm:$0xff]  ;;  %v1380_v41 = vld [vmem:[#allocation7 + $0x820] sm:$0xff] }
 0x135   : > { %7085 = vmatmul.mubr.msk.f32.gmra.mrb[8].mxu0 %vm606_vm1, %v10473_v38  ;;  %7095 = vmatmul.mubr.msk.f32.gmra.mrb[8].mxu1 %vm606_vm1, %v10473_v38  ;;  %v1166_v39 = vld [vmem:[#allocation7 + $0x170] sm:$0xff]  ;;  %v1385_v42 = vld [vmem:[#allocation7 + $0x848] sm:$0xff]  ;;  %v1396_v43 = vld [vmem:[#allocation7 + $0x8a0] sm:$0xff] }
 0x136   : > { %736 = vmatprep.mubr.f32.mxu0 %v12616_v0  ;;  %849 = vmatprep.mubr.f32.mxu1 %v12616_v0  ;;  %v7509_v44 = vpack.c.bf16 %v1166_v39, %v1161_v36  ;;  %v1171_v48 = vld [vmem:[#allocation7 + $0x198] sm:$0xff]  ;;  %v7599_v49 = vpack.c.bf16 %v1385_v42, %v1380_v41  ;;  %v1176_v50 = vld [vmem:[#allocation7 + $0x1c0] sm:$0xff]  ;;  %v1406_v55 = vld [vmem:[#allocation7 + $0x8f0] sm:$0xff] }
 0x137   : > { %7576 = vmatpush1.bf16.msra.mxu1 %v7575_v46  ;;  %v1160_v46 = vld [vmem:[#allocation7 + $0x140] sm:$0xff]  ;;  %v7513_v56 = vpack.c.bf16 %v1176_v50, %v1171_v48  ;;  %v1170_v57 = vld [vmem:[#allocation7 + $0x190] sm:$0xff]  ;;  %v1175_v58 = vld [vmem:[#allocation7 + $0x1b8] sm:$0xff] }
 0x138   : > { %7578 = vmatprep.subr.bf16.mxu1 %v7577_v47  ;;  %v1165_v47 = vld [vmem:[#allocation7 + $0x168] sm:$0xff]  ;;  %v1186_v62 = vld [vmem:[#allocation7 + $0x210] sm:$0xff]  ;;  %v1400_v1 = vld [vmem:[#allocation7 + $0x8c0] sm:$0xff] }
 0x139   : > { %7086 = vmatmul.mubr.msk.f32.gmra.mrb[10].mxu0 %vm606_vm1, %v10482_v45  ;;  %7096 = vmatmul.mubr.msk.f32.gmra.mrb[10].mxu1 %vm606_vm1, %v10482_v45  ;;  %v1181_v60 = vld [vmem:[#allocation7 + $0x1e8] sm:$0xff]  ;;  %v1411_v3 = vld [vmem:[#allocation7 + $0x918] sm:$0xff]  ;;  %v1416_v4 = vld [vmem:[#allocation7 + $0x940] sm:$0xff] }
 0x13a   : > { %742 = vmatprep.mubr.f32.mxu0 %v12616_v0  ;;  %855 = vmatprep.mubr.f32.mxu1 %v12616_v0  ;;  %v7517_v6 = vpack.c.bf16 %v1186_v62, %v1181_v60  ;;  %v1180_v7 = vld [vmem:[#allocation7 + $0x1e0] sm:$0xff]  ;;  %v7609_v13 = vpack.c.bf16 %v1416_v4, %v1411_v3  ;;  %v1415_v15 = vld [vmem:[#allocation7 + $0x938] sm:$0xff]  ;;  %v1190_v18 = vld [vmem:[#allocation7 + $0x230] sm:$0xff] }
 0x13b   : > { %7580 = vmatpush1.bf16.msra.mxu1 %v7579_v53  ;;  %v1390_v53 = vld [vmem:[#allocation7 + $0x870] sm:$0xff]  ;;  %v1195_v19 = vld [vmem:[#allocation7 + $0x258] sm:$0xff]  ;;  %v1200_v25 = vld [vmem:[#allocation7 + $0x280] sm:$0xff] }
 0x13c   : > { %7582 = vmatprep.subr.bf16.mxu1 %v7581_v54  ;;  %v1395_v54 = vld [vmem:[#allocation7 + $0x898] sm:$0xff]  ;;  %v1220_v36 = vld [vmem:[#allocation7 + $0x320] sm:$0xff]  ;;  %v1426_v60 = vld [vmem:[#allocation7 + $0x990] sm:$0xff] }
 0x13d   : > { %7087 = vmatmul.mubr.msk.f32.gmra.mrb[12].mxu0 %vm606_vm1, %v10491_v52  ;;  %7097 = vmatmul.mubr.msk.f32.gmra.mrb[12].mxu1 %vm606_vm1, %v10491_v52  ;;  %v7603_v61 = vpack.c.bf16 %v1395_v54, %v1390_v53  ;;  %v1211_v27 = vld [vmem:[#allocation7 + $0x2d8] sm:$0xff]  ;;  %v1240_v48 = vld [vmem:[#allocation7 + $0x3c0] sm:$0xff]  ;;  %v1425_v62 = vld [vmem:[#allocation7 + $0x988] sm:$0xff] }
 0x13e   : > { %748 = vmatprep.mubr.f32.mxu0 %v12616_v0  ;;  %861 = vmatprep.mubr.f32.mxu1 %v12616_v0  ;;  %v1231_v39 = vld [vmem:[#allocation7 + $0x378] sm:$0xff] }
 0x13f   : > { %7584 = vmatpush1.bf16.msra.mxu1 %v7583_v63  ;;  %v1251_v50 = vld [vmem:[#allocation7 + $0x418] sm:$0xff] }
 0x140   : > { %7586 = vmatprep.subr.bf16.mxu1 %v7585_v2  ;;  %v1405_v2 = vld [vmem:[#allocation7 + $0x8e8] sm:$0xff]  ;;  %v10668_v0 = vld [vmem:[#allocation7 + $0xbb8] sm:$0xff] }
 0x141   : > { %7088 = vmatmul.mubr.msk.f32.gmra.mrb[14].mxu0 %vm606_vm1, %v10500_v59  ;;  %7098 = vmatmul.mubr.msk.f32.gmra.mrb[14].mxu1 %vm606_vm1, %v10500_v59 }
 0x142   : > { %7393 = vmatprep.mubr.msk.f32.mxu0 %vm606_vm1, %v10431_v5  ;;  %v7499_v5 = vpack.c.bf16 %v1135_v11, %v1130_v10  ;;  %v7607_v10 = vpack.c.bf16 %v1405_v2, %v1400_v1  ;;  %v1196_v11 = vld [vmem:[#allocation7 + $0x260] sm:$0xff]  ;;  %v1265_v2 = vld [vmem:[#allocation7 + $0x488] sm:$0xff] }
 0x143   : > { %7588 = vmatpush1.bf16.msra.mxu1 %v7587_v14  ;;  %v1410_v14 = vld [vmem:[#allocation7 + $0x910] sm:$0xff]  ;;  %v1260_v1 = vld [vmem:[#allocation7 + $0x460] sm:$0xff] }
 0x144   : > { %7590 = vmatprep.subr.bf16.mxu1 %v7589_v16  ;;  %v7611_v20 = vpack.c.bf16 %v1415_v15, %v1410_v14  ;;  %v1270_v14 = vld [vmem:[#allocation7 + $0x4b0] sm:$0xff]  ;;  %v1275_v15 = vld [vmem:[#allocation7 + $0x4d8] sm:$0xff] }
 0x145   : > { %7394 = vmatmul.mubr.msk.f32.vlgmr.msra.gmra.mrb[16].mxu0 %vm606_vm1, %v10444_v12  ;;  %v1381_v12 = vld [vmem:[#allocation7 + $0x828] sm:$0xff] }
 0x146   : > { %7396 = vmatprep.mubr.msk.f32.mxu0 %vm606_vm1, %v10455_v22  ;;  %7496 = vmatpush1.bf16.msra.mxu0 %v7495_v8  ;;  %v7503_v22 = vpack.c.bf16 %v1145_v24, %v1140_v23  ;;  %v7597_v40 = vpack.c.bf16 %v1386_v32, %v1381_v12  ;;  %v1185_v8 = vld [vmem:[#allocation7 + $0x208] sm:$0xff]  ;;  %v7523_v23 = vpack.c.bf16 %v1195_v19, %v1190_v18  ;;  %v1210_v12 = vld [vmem:[#allocation7 + $0x2d0] sm:$0xff]  ;;  %v1215_v32 = vld [vmem:[#allocation7 + $0x2f8] sm:$0xff] }
 0x147   : > { %7498 = vmatprep.subr.bf16.mxu0 %v7497_v9  ;;  %7592 = vmatpush1.bf16.msra.mxu1 %v7591_v26  ;;  %v1191_v9 = vld [vmem:[#allocation7 + $0x238] sm:$0xff]  ;;  %v7519_v16 = vpack.c.bf16 %v1185_v8, %v1180_v7  ;;  %v1205_v26 = vld [vmem:[#allocation7 + $0x2a8] sm:$0xff]  ;;  %v7551_v8 = vpack.c.bf16 %v1265_v2, %v1260_v1  ;;  %v1128_v19 = vld [vmem:[#allocation7 + $0x40] sm:$0xff] }
 0x148   : > { %7594 = vmatprep.subr.bf16.mxu1 %v7593_v28  ;;  %v7521_v17 = vpack.c.bf16 %v1196_v11, %v1191_v9  ;;  %v1216_v28 = vld [vmem:[#allocation7 + $0x300] sm:$0xff]  ;;  %v7527_v29 = vpack.c.bf16 %v1205_v26, %v1200_v25  ;;  %v1431_v7 = vld [vmem:[#allocation7 + $0x9b8] sm:$0xff]  ;;  %v576_v25 = vlaneseq }
 0x149   : > { %7397 = vmatmul.mubr.msk.f32.gmra.mrb[18].mxu0 %vm606_vm1, %v10464_v31  ;;  %v1391_v31 = vld [vmem:[#allocation7 + $0x878] sm:$0xff]  ;;  %v7529_v30 = vpack.c.bf16 %v1216_v28, %v1211_v27  ;;  %v1436_v9 = vld [vmem:[#allocation7 + $0x9e0] sm:$0xff] }
 0x14a   : > { %7399 = vmatprep.mubr.msk.f32.mxu0 %vm606_vm1, %v10473_v38  ;;  %7500 = vmatpush1.bf16.msra.mxu0 %v7499_v5  ;;  %v7507_v38 = vpack.c.bf16 %v1155_v35, %v1150_v34  ;;  %v7601_v51 = vpack.c.bf16 %v1396_v43, %v1391_v31  ;;  %v1201_v5 = vld [vmem:[#allocation7 + $0x288] sm:$0xff]  ;;  %v7531_v34 = vpack.c.bf16 %v1215_v32, %v1210_v12  ;;  %v1230_v31 = vld [vmem:[#allocation7 + $0x370] sm:$0xff]  ;;  %v1235_v43 = vld [vmem:[#allocation7 + $0x398] sm:$0xff]  ;;  %v10522_v26 = vshrl.u32 %v576_v25, 7 }
 0x14b   : > { %7502 = vmatprep.subr.bf16.mxu0 %v7501_v21  ;;  %7596 = vmatpush1.bf16.msra.mxu1 %v7595_v37  ;;  %v1206_v21 = vld [vmem:[#allocation7 + $0x2b0] sm:$0xff]  ;;  %v1225_v37 = vld [vmem:[#allocation7 + $0x348] sm:$0xff]  ;;  %v1435_v11 = vld [vmem:[#allocation7 + $0x9d8] sm:$0xff] }
 0x14c   : > { %7598 = vmatprep.subr.bf16.mxu1 %v7597_v40  ;;  %v7525_v24 = vpack.c.bf16 %v1206_v21, %v1201_v5  ;;  %v1236_v40 = vld [vmem:[#allocation7 + $0x3a0] sm:$0xff]  ;;  %v7535_v41 = vpack.c.bf16 %v1225_v37, %v1220_v36  ;;  %v1123_v18 = vld [vmem:[#allocation7 + $0x18] sm:$0xff]  ;;  %v1446_v5 = vld [vmem:[#allocation7 + $0xa30] sm:$0xff]  ;;  %v7555_v21 = vpack.c.bf16 %v1275_v15, %v1270_v14  ;;  %12725 = vst [vmem:[#allocation25_spill] sm:$0xff] %v10522_v26  ;;  %v10527_v28 = vsub.s32 0, %v10522_v26 }
 0x14d   : > { %7400 = vmatmul.mubr.msk.f32.gmra.mrb[20].mxu0 %vm606_vm1, %v10482_v45  ;;  %v1401_v45 = vld [vmem:[#allocation7 + $0x8c8] sm:$0xff]  ;;  %v7537_v42 = vpack.c.bf16 %v1236_v40, %v1231_v39  ;;  %v10524_v27 = vld [vmem:[#allocation4] sm:$0x1f]  ;;  %v10535_v12 = vsub.s32 2, %v10522_v26  ;;  %v10538_v32 = vsub.s32 3, %v10522_v26  ;;  %v10554_v40 = vld [vmem:[#allocation7 + $0xa80] sm:$0xff] }
 0x14e   : > { %7402 = vmatprep.mubr.msk.f32.mxu0 %vm606_vm1, %v10491_v52  ;;  %7504 = vmatpush1.bf16.msra.mxu0 %v7503_v22  ;;  %v7511_v52 = vpack.c.bf16 %v1165_v47, %v1160_v46  ;;  %v7605_v63 = vpack.c.bf16 %v1406_v55, %v1401_v45  ;;  %v1221_v22 = vld [vmem:[#allocation7 + $0x328] sm:$0xff]  ;;  %v7539_v46 = vpack.c.bf16 %v1235_v43, %v1230_v31  ;;  %v1250_v45 = vld [vmem:[#allocation7 + $0x410] sm:$0xff]  ;;  %v1255_v55 = vld [vmem:[#allocation7 + $0x438] sm:$0xff] }
 0x14f   : > { %7506 = vmatprep.subr.bf16.mxu0 %v7505_v33  ;;  %7600 = vmatpush1.bf16.msra.mxu1 %v7599_v49  ;;  %v1226_v33 = vld [vmem:[#allocation7 + $0x350] sm:$0xff]  ;;  %v1245_v49 = vld [vmem:[#allocation7 + $0x3e8] sm:$0xff]  ;;  %12726 = vst [vmem:[#allocation26_spill] sm:$0xff] %v10527_v28  ;;  %12728 = vst [vmem:[#allocation28_spill] sm:$0xff] %v10535_v12 }
 0x150   : > { %7602 = vmatprep.subr.bf16.mxu1 %v7601_v51  ;;  %v7533_v35 = vpack.c.bf16 %v1226_v33, %v1221_v22  ;;  %v1256_v51 = vld [vmem:[#allocation7 + $0x440] sm:$0xff]  ;;  %v7543_v53 = vpack.c.bf16 %v1245_v49, %v1240_v48  ;;  %12729 = vst [vmem:[#allocation29_spill] sm:$0xff] %v10538_v32  ;;  %v10540_v22 = vld [vmem:[#allocation7 + $0x10] sm:$0xff]  ;;  %v10542_v33 = vld [vmem:[#allocation7 + $0x38] sm:$0xff] }
 0x151   : > { %7403 = vmatmul.mubr.msk.f32.gmra.mrb[22].mxu0 %vm606_vm1, %v10500_v59  ;;  %v7515_v59 = vpack.c.bf16 %v1175_v58, %v1170_v57  ;;  %v7545_v54 = vpack.c.bf16 %v1256_v51, %v1251_v50  ;;  %v1421_v57 = vld [vmem:[#allocation7 + $0x968] sm:$0xff]  ;;  %v7547_v58 = vpack.c.bf16 %v1255_v55, %v1250_v45  ;;  %v10550_v37 = vld [vmem:[#allocation7 + $0x90] sm:$0xff]  ;;  %v10552_v39 = vld [vmem:[#allocation7 + $0xa58] sm:$0xff]  ;;  %v10578_v50 = vrot.slane %v10524_v27, %v10527_v28 }
 0x152   : > { %7508 = vmatpush1.bf16.msra.mxu0 %v7507_v38  ;;  %v1241_v38 = vld [vmem:[#allocation7 + $0x3c8] sm:$0xff]  ;;  %v7613_v3 = vpack.c.bf16 %v1426_v60, %v1421_v57  ;;  %v10560_v31 = vld [vmem:[#allocation7 + $0xa50] sm:$0xff]  ;;  %v10562_v43 = vld [vmem:[#allocation7 + $0xa78] sm:$0xff]  ;;  %v10598_v57 = vrot.slane %v10524_v27, %v10535_v12  ;;  %v10606_v60 = vrot.slane %v10524_v27, %v10538_v32 }
 0x153   : > { %7510 = vmatprep.subr.bf16.mxu0 %v7509_v44  ;;  %7604 = vmatpush1.bf16.msra.mxu1 %v7603_v61  ;;  %v1246_v44 = vld [vmem:[#allocation7 + $0x3f0] sm:$0xff]  ;;  %v1420_v61 = vld [vmem:[#allocation7 + $0x960] sm:$0xff]  ;;  %v10548_v36 = vld [vmem:[#allocation7 + $0x68] sm:$0xff] }
 0x154   : > { %7606 = vmatprep.subr.bf16.mxu1 %v7605_v63  ;;  %v7541_v47 = vpack.c.bf16 %v1246_v44, %v1241_v38  ;;  %v7615_v4 = vpack.c.bf16 %v1425_v62, %v1420_v61  ;;  %v10564_v38 = vld [vmem:[#allocation7 + $0xb8] sm:$0xff]  ;;  %v10566_v44 = vld [vmem:[#allocation7 + $0xe0] sm:$0xff]  ;;  %v10572_v48 = vld [vmem:[#allocation7 + $0xb0] sm:$0xff] }
 0x155   : > { %12730 = vst [vmem:[#allocation30_spill] sm:$0xff] %v10564_v38  ;;  %12731 = vst [vmem:[#allocation31_spill] sm:$0xff] %v10572_v48  ;;  %v10574_v49 = vld [vmem:[#allocation7 + $0xd8] sm:$0xff]  ;;  %v10580_v51 = vld [vmem:[#allocation7 + $0xaa0] sm:$0xff] }
 0x156   : > { %7512 = vmatpush1.bf16.msra.mxu0 %v7511_v52  ;;  %v1261_v52 = vld [vmem:[#allocation7 + $0x468] sm:$0xff]  ;;  %12732 = vst [vmem:[#allocation32_spill] sm:$0xff] %v10574_v49  ;;  %v10586_v45 = vld [vmem:[#allocation7 + $0x130] sm:$0xff]  ;;  %v10588_v55 = vld [vmem:[#allocation7 + $0xaf8] sm:$0xff] }
 0x157   : > { %7514 = vmatprep.subr.bf16.mxu0 %v7513_v56  ;;  %7608 = vmatpush1.bf16.msra.mxu1 %v7607_v10  ;;  %v1266_v56 = vld [vmem:[#allocation7 + $0x490] sm:$0xff]  ;;  %12734 = vst [vmem:[#allocation34_spill] sm:$0xff] %v10588_v55  ;;  %v10608_v61 = vld [vmem:[#allocation7 + $0x100] sm:$0xff]  ;;  %v10610_v62 = vld [vmem:[#allocation7 + $0x128] sm:$0xff] }
 0x158   : > { %7610 = vmatprep.subr.bf16.mxu1 %v7609_v13  ;;  %v7549_v63 = vpack.c.bf16 %v1266_v56, %v1261_v52  ;;  %v1430_v10 = vld [vmem:[#allocation7 + $0x9b0] sm:$0xff]  ;;  %v10590_v52 = vld [vmem:[#allocation7 + $0xb20] sm:$0xff]  ;;  %v10614_v1 = vld [vmem:[#allocation7 + $0xb18] sm:$0xff] }
 0x159   : > { %12735 = vst [vmem:[#allocation35_spill] sm:$0xff] %v10590_v52  ;;  %v10616_v2 = vld [vmem:[#allocation7 + $0x158] sm:$0xff]  ;;  %v10644_v14 = vld [vmem:[#allocation7 + $0xb68] sm:$0xff]  ;;  %v10666_v25 = vld [vmem:[#allocation7 + $0xb90] sm:$0xff] }
 0x15a   : > { %7516 = vmatpush1.bf16.msra.mxu0 %v7515_v59  ;;  %v1271_v59 = vld [vmem:[#allocation7 + $0x4b8] sm:$0xff]  ;;  %12736 = vst [vmem:[#allocation36_spill] sm:$0xff] %v10616_v2  ;;  %v10646_v15 = vld [vmem:[#allocation7 + $0x1a8] sm:$0xff]  ;;  %v10692_v38 = vld [vmem:[#allocation7 + $0x1f0] sm:$0xff] }
 0x15b   : > { %7518 = vmatprep.subr.bf16.mxu0 %v7517_v6  ;;  %7612 = vmatpush1.bf16.msra.mxu1 %v7611_v20  ;;  %v1276_v6 = vld [vmem:[#allocation7 + $0x4e0] sm:$0xff]  ;;  %v1441_v20 = vld [vmem:[#allocation7 + $0xa08] sm:$0xff]  ;;  %12739 = vst [vmem:[#allocation39_spill] sm:$0xff] %v10646_v15  ;;  %12747 = vst [vmem:[#allocation47_spill] sm:$0xff] %v10692_v38 }
 0x15c   : > { %7614 = vmatprep.subr.bf16.mxu1 %v7613_v3  ;;  %v7553_v13 = vpack.c.bf16 %v1276_v6, %v1271_v59  ;;  %v10618_v3 = vld [vmem:[#allocation7 + $0x180] sm:$0xff]  ;;  %v10622_v59 = vld [vmem:[#allocation7 + $0xb70] sm:$0xff]  ;;  %v10709_v55 = vld [vmem:[#allocation7 + $0xc08] sm:$0xff] }
 0x15d   : > { %12738 = vst [vmem:[#allocation38_spill] sm:$0xff] %v10622_v59  ;;  %v10699_v48 = vld [vmem:[#allocation7 + $0xbe0] sm:$0xff]  ;;  %v10711_v52 = vld [vmem:[#allocation7 + $0x248] sm:$0xff]  ;;  %v10723_v2 = vld [vmem:[#allocation7 + $0xc38] sm:$0xff] }
 0x15e   : > { %7520 = vmatpush1.bf16.msra.mxu0 %v7519_v16  ;;  %v7617_v16 = vpack.c.bf16 %v1436_v9, %v1431_v7  ;;  %v10670_v9 = vld [vmem:[#allocation7 + $0x1f8] sm:$0xff]  ;;  %12749 = vst [vmem:[#allocation49_spill] sm:$0xff] %v10711_v52  ;;  %12751 = vst [vmem:[#allocation51_spill] sm:$0xff] %v10723_v2  ;;  %v10737_v15 = vld [vmem:[#allocation7 + $0x268] sm:$0xff] }
 0x15f   : > { %7522 = vmatprep.subr.bf16.mxu0 %v7521_v17  ;;  %7616 = vmatpush1.bf16.msra.mxu1 %v7615_v4  ;;  %v7619_v17 = vpack.c.bf16 %v1435_v11, %v1430_v10  ;;  %v10620_v4 = vld [vmem:[#allocation7 + $0xb48] sm:$0xff]  ;;  %v10638_v10 = vld [vmem:[#allocation7 + $0x150] sm:$0xff]  ;;  %v10640_v11 = vld [vmem:[#allocation7 + $0x178] sm:$0xff]  ;;  %12743 = vst [vmem:[#allocation43_spill] sm:$0xff] %v10670_v9 }
 0x160   : > { %7618 = vmatprep.subr.bf16.mxu1 %v7617_v16  ;;  %12737 = vst [vmem:[#allocation37_spill] sm:$0xff] %v10620_v4  ;;  %v10648_v16 = vld [vmem:[#allocation7 + $0x1d0] sm:$0xff]  ;;  %v10727_v4 = vld [vmem:[#allocation7 + $0x240] sm:$0xff]  ;;  %12754 = vst [vmem:[#allocation54_spill] sm:$0xff] %v10737_v15 }
 0x161   : > { %12740 = vst [vmem:[#allocation40_spill] sm:$0xff] %v10648_v16  ;;  %12753 = vst [vmem:[#allocation53_spill] sm:$0xff] %v10727_v4 }
 0x162   : > { %7524 = vmatpush1.bf16.msra.mxu0 %v7523_v23  ;;  %v7621_v23 = vpack.c.bf16 %v1446_v5, %v1441_v20  ;;  %v10694_v5 = vld [vmem:[#allocation7 + $0x218] sm:$0xff]  ;;  %v10725_v20 = vld [vmem:[#allocation7 + $0xc60] sm:$0xff] }
 0x163   : > { %7526 = vmatprep.subr.bf16.mxu0 %v7525_v24  ;;  %7620 = vmatpush1.bf16.msra.mxu1 %v7619_v17  ;;  %v7653_v24 = vpack.c.bf16 %v1128_v19, %v1123_v18  ;;  %v10650_v17 = vld [vmem:[#allocation7 + $0xb98] sm:$0xff]  ;;  %v10652_v18 = vld [vmem:[#allocation7 + $0xbc0] sm:$0xff]  ;;  %12752 = vst [vmem:[#allocation52_spill] sm:$0xff] %v10725_v20  ;;  %v10739_v19 = vld [vmem:[#allocation7 + $0xc30] sm:$0xff] }
 0x164   : > { %7622 = vmatprep.subr.bf16.mxu1 %v7621_v23  ;;  %12741 = vst [vmem:[#allocation41_spill] sm:$0xff] %v10650_v17  ;;  %12742 = vst [vmem:[#allocation42_spill] sm:$0xff] %v10652_v18  ;;  %v10662_v23 = vld [vmem:[#allocation7 + $0x1a0] sm:$0xff]  ;;  %v10741_v17 = vld [vmem:[#allocation7 + $0xc58] sm:$0xff] }
 0x165   : > { %12755 = vst [vmem:[#allocation55_spill] sm:$0xff] %v10739_v19  ;;  %12756 = vst [vmem:[#allocation56_spill] sm:$0xff] %v10741_v17 }
 0x166   : > { %7528 = vmatpush1.bf16.msra.mxu0 %v7527_v29  ;;  %v10530_v29 = vsub.s32 1, %v10522_v26 }
 0x167   : > { %7530 = vmatprep.subr.bf16.mxu0 %v7529_v30  ;;  %v10532_v30 = vld [vmem:[#allocation6] sm:$0x1f] }
 0x168   : > { %12727 = vst [vmem:[#allocation27_spill] sm:$0xff] %v10530_v29  ;;  %v10594_v56 = vrot.slane %v10532_v30, %v10527_v28  ;;  %v10626_v6 = vrot.slane %v10532_v30, %v10535_v12  ;;  %v10630_v7 = vrot.slane %v10532_v30, %v10530_v29  ;;  %v10682_v12 = vld [vmem:[#allocation7 + $0xbe8] sm:$0xff] }
 0x169   : > { %12745 = vst [vmem:[#allocation45_spill] sm:$0xff] %v10682_v12 }
 0x16a   : > { %7532 = vmatpush1.bf16.msra.mxu0 %v7531_v34  ;;  %v10544_v34 = vld [vmem:[#allocation7 + $0xa00] sm:$0xff] }
 0x16b   : > { %7534 = vmatprep.subr.bf16.mxu0 %v7533_v35  ;;  %v10546_v35 = vld [vmem:[#allocation7 + $0xa28] sm:$0xff] }
 0x16e   : > { %7536 = vmatpush1.bf16.msra.mxu0 %v7535_v41  ;;  %v10556_v41 = vld [vmem:[#allocation7 + $0x60] sm:$0xff] }
 0x16f   : > { %7538 = vmatprep.subr.bf16.mxu0 %v7537_v42  ;;  %v10558_v42 = vld [vmem:[#allocation7 + $0x88] sm:$0xff] }
 0x172   : > { %7540 = vmatpush1.bf16.msra.mxu0 %v7539_v46  ;;  %v10568_v46 = vld [vmem:[#allocation7 + $0xaa8] sm:$0xff] }
 0x173   : > { %7542 = vmatprep.subr.bf16.mxu0 %v7541_v47  ;;  %v10570_v47 = vld [vmem:[#allocation7 + $0xad0] sm:$0xff] }
 0x176   : > { %7544 = vmatpush1.bf16.msra.mxu0 %v7543_v53  ;;  %v10582_v53 = vld [vmem:[#allocation7 + $0xac8] sm:$0xff] }
 0x177   : > { %7546 = vmatprep.subr.bf16.mxu0 %v7545_v54  ;;  %v10584_v54 = vld [vmem:[#allocation7 + $0x108] sm:$0xff] }
 0x178   : > { %12733 = vst [vmem:[#allocation33_spill] sm:$0xff] %v10584_v54 }
 0x17a   : > { %7548 = vmatpush1.bf16.msra.mxu0 %v7547_v58  ;;  %v10602_v58 = vrot.slane %v10524_v27, %v10530_v29  ;;  %v10684_v29 = vld [vmem:[#allocation7 + $0xc10] sm:$0xff] }
 0x17b   : > { %7550 = vmatprep.subr.bf16.mxu0 %v7549_v63  ;;  %v10612_v63 = vld [vmem:[#allocation7 + $0xaf0] sm:$0xff]  ;;  %12746 = vst [vmem:[#allocation46_spill] sm:$0xff] %v10684_v29 }
 0x17e   : > { %7552 = vmatpush1.bf16.msra.mxu0 %v7551_v8  ;;  %v10634_v8 = vrot.slane %v10532_v30, %v10538_v32  ;;  %v10680_v32 = vld [vmem:[#allocation7 + $0x220] sm:$0xff] }
 0x17f   : > { %7554 = vmatprep.subr.bf16.mxu0 %v7553_v13  ;;  %v10642_v13 = vld [vmem:[#allocation7 + $0xb40] sm:$0xff]  ;;  %12744 = vst [vmem:[#allocation44_spill] sm:$0xff] %v10680_v32 }
 0x182   : > { %7556 = vmatpush1.bf16.msra.mxu0 %v7555_v21  ;;  %v10697_v21 = vsub.s32 4, %v10522_v26  ;;  %v10713_v26 = vld [vmem:[#allocation7 + $0x270] sm:$0xff] }
 0x183   : > { %7654 = vmatprep.subr.bf16.mxu0 %v7653_v24  ;;  %v10664_v24 = vld [vmem:[#allocation7 + $0x1c8] sm:$0xff]  ;;  %12750 = vst [vmem:[#allocation50_spill] sm:$0xff] %v10713_v26 }
 0x184   : > { %12748 = vst [vmem:[#allocation48_spill] sm:$0xff] %v10697_v21  ;;  %v10747_v54 = vrot.slane %v10524_v27, %v10697_v21  ;;  %v10751_v49 = vrot.slane %v10532_v30, %v10697_v21 }
 0x186   : > { %12757 = vst [vmem:[#allocation57_spill] sm:$0xff] %v10751_v49 }
 0x1f8   : > { %v708_v18 = vpop.f32.mrb[0].mxu0  ;;  %v821_v16 = vpop.f32.mrb[0].mxu1 }
 0x1f9   : > { %v709_v12 = vadd.f32 %v708_v18, %v10578_v50  ;;  %v822_v29 = vadd.f32 %v821_v16, %v10598_v57  ;;  %v710_v9 = vpop.f32.mrb[1].mxu0  ;;  %v823_v32 = vpop.f32.mrb[1].mxu1 }
 0x1fa   : > { %v711_v38 = vadd.f32 %v710_v9, %v10602_v58  ;;  %v824_v30 = vadd.f32 %v823_v32, %v10606_v60 }
 0x1fb   : > { %vm973_vm2 = vcmp.ge.f32.partialorder %v709_v12, 0.0  ;;  %v1040_v16 = vmul.f32 %v10594_v56, %v709_v12  ;;  %vm975_vm3 = vcmp.ge.f32.partialorder %v822_v29, 0.0  ;;  %v1042_v28 = vmul.f32 %v10626_v6, %v822_v29 }
 0x1fc   : > { %v1041_v59 = vmul.f32 %v10630_v7, %v711_v38  ;;  %v1043_v27 = vmul.f32 %v10634_v8, %v824_v30  ;;  %v714_v2 = vpop.f32.mrb[2].mxu0  ;;  %v827_v9 = vpop.f32.mrb[2].mxu1  ;;  %vm974_vm4 = vcmp.ge.f32.partialorder %v711_v38, 0.0  ;;  %vm976_vm5 = vcmp.ge.f32.partialorder %v824_v30, 0.0 }
 0x1fd   : > { %v10771_v32 = vsel %vm973_vm2, %v709_v12, %v1040_v16  ;;  %v10773_v21 = vsel %vm975_vm3, %v822_v29, %v1042_v28  ;;  %v715_v18 = vadd.f32 %v714_v2, %v10578_v50  ;;  %v828_v19 = vadd.f32 %v827_v9, %v10598_v57  ;;  %v716_v17 = vpop.f32.mrb[3].mxu0  ;;  %v829_v4 = vpop.f32.mrb[3].mxu1 }
 0x1fe   : > { %12758 = vst [vmem:[#allocation58_spill] sm:$0xff] %v10773_v21  ;;  %v717_v15 = vadd.f32 %v716_v17, %v10602_v58  ;;  %v830_v20 = vadd.f32 %v829_v4, %v10606_v60  ;;  %v10779_v52 = vsel %vm974_vm4, %v711_v38, %v1041_v59  ;;  %v10781_v26 = vsel %vm976_vm5, %v824_v30, %v1043_v27 }
 0x1ff   : > { %12759 = vst [vmem:[#allocation59_spill] sm:$0xff] %v10781_v26  ;;  %v1045_v49 = vmul.f32 %v10594_v56, %v715_v18  ;;  %v1047_v12 = vmul.f32 %v10626_v6, %v828_v19  ;;  %1611 = vmatprep.mubr.f32.mxu0 %v10779_v52  ;;  %1724 = vmatprep.mubr.f32.mxu1 %v10781_v26  ;;  %vm978_vm6 = vcmp.ge.f32.partialorder %v715_v18, 0.0  ;;  %vm980_vm7 = vcmp.ge.f32.partialorder %v828_v19, 0.0 }
 0x200   : > { %v1046_v28 = vmul.f32 %v10630_v7, %v717_v15  ;;  %v1048_v29 = vmul.f32 %v10634_v8, %v830_v20  ;;  %v720_v2 = vpop.f32.mrb[4].mxu0  ;;  %v833_v4 = vpop.f32.mrb[4].mxu1  ;;  %1612 = vmatmul.mubr.f32.vlgmr.msra.gmra.mrb[24].mxu0 %v10771_v32  ;;  %1725 = vmatmul.mubr.f32.vlgmr.msra.gmra.mrb[16].mxu1 %v10773_v21  ;;  %vm979_vm8 = vcmp.ge.f32.partialorder %v717_v15, 0.0  ;;  %vm981_vm9 = vcmp.ge.f32.partialorder %v830_v20, 0.0 }
 0x201   : > { %v721_v38 = vadd.f32 %v720_v2, %v10578_v50  ;;  %v834_v59 = vadd.f32 %v833_v4, %v10598_v57  ;;  %v12760_v17 = vpack.c.bf16 %v10542_v33, %v10540_v22  ;;  %v722_v27 = vpop.f32.mrb[5].mxu0  ;;  %v835_v30 = vpop.f32.mrb[5].mxu1  ;;  %v12761_v16 = vpack.c.bf16 %v10546_v35, %v10544_v34 }
 0x202   : > { %v10800_v9 = vsel %vm978_vm6, %v715_v18, %v1045_v49  ;;  %v723_v21 = vadd.f32 %v722_v27, %v10602_v58  ;;  %v836_v26 = vadd.f32 %v835_v30, %v10606_v60  ;;  %v10804_v2 = vsel %vm979_vm8, %v717_v15, %v1046_v28 }
 0x203   : > { %7656 = vmatpush1.bf16.msra.mxu0 %v12760_v17  ;;  %7624 = vmatpush1.bf16.msra.mxu1 %v12761_v16  ;;  %v10806_v4 = vsel %vm981_vm9, %v830_v20, %v1048_v29  ;;  %v12762_v22 = vpack.c.bf16 %v10550_v37, %v10548_v36  ;;  %v1050_v33 = vmul.f32 %v10594_v56, %v721_v38  ;;  %vm983_vm10 = vcmp.ge.f32.partialorder %v721_v38, 0.0 }
 0x204   : > { %v1052_v34 = vmul.f32 %v10626_v6, %v834_v59  ;;  %1617 = vmatprep.mubr.f32.mxu0 %v10804_v2  ;;  %1730 = vmatprep.mubr.f32.mxu1 %v10806_v4  ;;  %v10816_v35 = vsel %vm980_vm7, %v828_v19, %v1047_v12  ;;  %v1051_v49 = vmul.f32 %v10630_v7, %v723_v21  ;;  %v726_v20 = vpop.f32.mrb[6].mxu0  ;;  %v839_v18 = vpop.f32.mrb[6].mxu1  ;;  %vm984_vm11 = vcmp.ge.f32.partialorder %v723_v21, 0.0 }
 0x205   : > { %7658 = vmatprep.subr.bf16.mxu0 %v12762_v22  ;;  %v1053_v15 = vmul.f32 %v10634_v8, %v836_v26  ;;  %1618 = vmatmul.mubr.f32.gmra.mrb[26].mxu0 %v10800_v9  ;;  %vm986_vm12 = vcmp.ge.f32.partialorder %v836_v26, 0.0  ;;  %v727_v36 = vadd.f32 %v726_v20, %v10578_v50  ;;  %v840_v37 = vadd.f32 %v839_v18, %v10598_v57  ;;  %v728_v28 = vpop.f32.mrb[7].mxu0  ;;  %v841_v29 = vpop.f32.mrb[7].mxu1  ;;  %v12769_v18 = vld [vmem:[#allocation32_spill] sm:$0xff] }
 0x206   : > { %1731 = vmatmul.mubr.f32.gmra.mrb[18].mxu1 %v10816_v35  ;;  %v12763_v19 = vpack.c.bf16 %v10554_v40, %v10552_v39  ;;  %v12764_v12 = vpack.c.bf16 %v10558_v42, %v10556_v41  ;;  %v10830_v17 = vsel %vm983_vm10, %v721_v38, %v1050_v33  ;;  %vm985_vm13 = vcmp.ge.f32.partialorder %v834_v59, 0.0 }
 0x207   : > { %v729_v27 = vadd.f32 %v728_v28, %v10602_v58  ;;  %v842_v30 = vadd.f32 %v841_v29, %v10606_v60  ;;  %v12765_v16 = vpack.c.bf16 %v10562_v43, %v10560_v31  ;;  %v10837_v22 = vsel %vm984_vm11, %v723_v21, %v1051_v49  ;;  %v12766_v43 = vld [vmem:[#allocation30_spill] sm:$0xff] }
 0x208   : > { %7626 = vmatprep.subr.bf16.mxu1 %v12763_v19  ;;  %7660 = vmatpush1.bf16.msra.mxu0 %v12764_v12  ;;  %v10839_v39 = vsel %vm986_vm12, %v836_v26, %v1053_v15  ;;  %v1055_v40 = vmul.f32 %v10594_v56, %v727_v36  ;;  %v1057_v41 = vmul.f32 %v10626_v6, %v840_v37  ;;  %vm988_vm14 = vcmp.ge.f32.partialorder %v727_v36, 0.0  ;;  %v732_v26 = vpop.f32.mrb[8].mxu0  ;;  %v845_v33 = vpop.f32.mrb[8].mxu1  ;;  %v12770_v19 = vld [vmem:[#allocation31_spill] sm:$0xff] }
 0x209   : > { %7628 = vmatpush1.bf16.msra.mxu1 %v12765_v16  ;;  %1623 = vmatprep.mubr.f32.mxu0 %v10837_v22  ;;  %v10845_v42 = vsel %vm985_vm13, %v834_v59, %v1052_v34  ;;  %v1056_v38 = vmul.f32 %v10630_v7, %v729_v27  ;;  %v1058_v31 = vmul.f32 %v10634_v8, %v842_v30  ;;  %vm989_vm15 = vcmp.ge.f32.partialorder %v729_v27, 0.0  ;;  %v734_v15 = vpop.f32.mrb[9].mxu0  ;;  %v847_v20 = vpop.f32.mrb[9].mxu1 }
 0x20a   : > { %1736 = vmatprep.mubr.f32.mxu1 %v10839_v39  ;;  %v12767_v21 = vpack.c.bf16 %v10566_v44, %v12766_v43  ;;  %1624 = vmatmul.mubr.f32.gmra.mrb[28].mxu0 %v10830_v17  ;;  %vm991_vm0 = vcmp.ge.f32.partialorder %v842_v30, 0.0  ;;  %v733_v49 = vadd.f32 %v732_v26, %v10578_v50  ;;  %v846_v59 = vadd.f32 %v845_v33, %v10598_v57  ;;  %v12776_v33 = vld [vmem:[#allocation34_spill] sm:$0xff] }
 0x20b   : > { %1737 = vmatmul.mubr.f32.gmra.mrb[20].mxu1 %v10845_v42  ;;  %v12768_v34 = vpack.c.bf16 %v10570_v47, %v10568_v46  ;;  %v10859_v44 = vsel %vm988_vm14, %v727_v36, %v1055_v40  ;;  %vm990_vm1 = vcmp.ge.f32.partialorder %v840_v37, 0.0  ;;  %v12771_v12 = vpack.c.bf16 %v12769_v18, %v12770_v19  ;;  %v12773_v40 = vld [vmem:[#allocation33_spill] sm:$0xff] }
 0x20c   : > { %7662 = vmatprep.subr.bf16.mxu0 %v12767_v21  ;;  %v735_v28 = vadd.f32 %v734_v15, %v10602_v58  ;;  %v848_v29 = vadd.f32 %v847_v20, %v10606_v60  ;;  %v12772_v16 = vpack.c.bf16 %v10582_v53, %v10580_v51  ;;  %v10869_v43 = vsel %vm989_vm15, %v729_v27, %v1056_v38  ;;  %v738_v53 = vpop.f32.mrb[10].mxu0  ;;  %v851_v27 = vpop.f32.mrb[10].mxu1 }
 0x20d   : > { %7630 = vmatprep.subr.bf16.mxu1 %v12768_v34  ;;  %7664 = vmatpush1.bf16.msra.mxu0 %v12771_v12  ;;  %v1060_v46 = vmul.f32 %v10594_v56, %v733_v49  ;;  %v1062_v47 = vmul.f32 %v10626_v6, %v846_v59  ;;  %v10875_v36 = vsel %vm991_vm0, %v842_v30, %v1058_v31  ;;  %vm993_vm2 = vcmp.ge.f32.partialorder %v733_v49, 0.0  ;;  %v12775_v31 = vld [vmem:[#allocation35_spill] sm:$0xff]  ;;  %v740_v15 = vpop.f32.mrb[11].mxu0  ;;  %v853_v20 = vpop.f32.mrb[11].mxu1 }
 0x20e   : > { %7632 = vmatpush1.bf16.msra.mxu1 %v12772_v16  ;;  %1629 = vmatprep.mubr.f32.mxu0 %v10869_v43  ;;  %v12774_v21 = vpack.c.bf16 %v10586_v45, %v12773_v40  ;;  %v1061_v26 = vmul.f32 %v10630_v7, %v735_v28  ;;  %v1063_v51 = vmul.f32 %v10634_v8, %v848_v29  ;;  %vm994_vm3 = vcmp.ge.f32.partialorder %v735_v28, 0.0 }
 0x20f   : > { %1742 = vmatprep.mubr.f32.mxu1 %v10875_v36  ;;  %1630 = vmatmul.mubr.f32.gmra.mrb[30].mxu0 %v10859_v44  ;;  %v10885_v38 = vsel %vm990_vm1, %v840_v37, %v1057_v41  ;;  %v739_v30 = vadd.f32 %v738_v53, %v10578_v50  ;;  %v852_v45 = vadd.f32 %v851_v27, %v10598_v57  ;;  %vm996_vm4 = vcmp.ge.f32.partialorder %v848_v29, 0.0  ;;  %v12783_v53 = vld [vmem:[#allocation37_spill] sm:$0xff] }
 0x210   : > { %7666 = vmatprep.subr.bf16.mxu0 %v12774_v21  ;;  %1743 = vmatmul.mubr.f32.gmra.mrb[22].mxu1 %v10885_v38  ;;  %v12777_v34 = vpack.c.bf16 %v12775_v31, %v12776_v33  ;;  %v10894_v18 = vsel %vm993_vm2, %v733_v49, %v1060_v46  ;;  %v12778_v37 = vpack.c.bf16 %v10610_v62, %v10608_v61  ;;  %vm995_vm5 = vcmp.ge.f32.partialorder %v846_v59, 0.0  ;;  %v12780_v61 = vld [vmem:[#allocation36_spill] sm:$0xff] }
 0x211   : > { %v741_v41 = vadd.f32 %v740_v15, %v10602_v58  ;;  %v854_v19 = vadd.f32 %v853_v20, %v10606_v60  ;;  %v12779_v12 = vpack.c.bf16 %v10614_v1, %v10612_v63  ;;  %v10904_v16 = vsel %vm994_vm3, %v735_v28, %v1061_v26  ;;  %v744_v1 = vpop.f32.mrb[12].mxu0  ;;  %v857_v28 = vpop.f32.mrb[12].mxu1 }
 0x212   : > { %7634 = vmatprep.subr.bf16.mxu1 %v12777_v34  ;;  %7668 = vmatpush1.bf16.msra.mxu0 %v12778_v37  ;;  %v1065_v40 = vmul.f32 %v10594_v56, %v739_v30  ;;  %v1067_v49 = vmul.f32 %v10626_v6, %v852_v45  ;;  %v10909_v46 = vsel %vm996_vm4, %v848_v29, %v1063_v51  ;;  %vm998_vm6 = vcmp.ge.f32.partialorder %v739_v30, 0.0  ;;  %v746_v31 = vpop.f32.mrb[13].mxu0  ;;  %v859_v33 = vpop.f32.mrb[13].mxu1 }
 0x213   : > { %7636 = vmatpush1.bf16.msra.mxu1 %v12779_v12  ;;  %1635 = vmatprep.mubr.f32.mxu0 %v10904_v16  ;;  %v12781_v62 = vpack.c.bf16 %v10618_v3, %v12780_v61  ;;  %v1066_v21 = vmul.f32 %v10630_v7, %v741_v41  ;;  %v1068_v63 = vmul.f32 %v10634_v8, %v854_v19  ;;  %vm999_vm7 = vcmp.ge.f32.partialorder %v741_v41, 0.0  ;;  %v12782_v3 = vld [vmem:[#allocation38_spill] sm:$0xff] }
 0x214   : > { %1748 = vmatprep.mubr.f32.mxu1 %v10909_v46  ;;  %1636 = vmatmul.mubr.f32.gmra.mrb[32].mxu0 %v10894_v18  ;;  %v10918_v26 = vsel %vm995_vm5, %v846_v59, %v1062_v47  ;;  %v745_v29 = vadd.f32 %v744_v1, %v10578_v50  ;;  %v858_v51 = vadd.f32 %v857_v28, %v10598_v57  ;;  %vm1001_vm8 = vcmp.ge.f32.partialorder %v854_v19, 0.0  ;;  %v12790_v1 = vld [vmem:[#allocation42_spill] sm:$0xff]  ;;  %v12791_v28 = vld [vmem:[#allocation41_spill] sm:$0xff] }
 0x215   : > { %7670 = vmatprep.subr.bf16.mxu0 %v12781_v62  ;;  %1749 = vmatmul.mubr.f32.gmra.mrb[24].mxu1 %v10918_v26  ;;  %v12784_v27 = vpack.c.bf16 %v12782_v3, %v12783_v53  ;;  %v10927_v34 = vsel %vm998_vm6, %v739_v30, %v1065_v40  ;;  %v12785_v59 = vpack.c.bf16 %v10640_v11, %v10638_v10  ;;  %vm1000_vm9 = vcmp.ge.f32.partialorder %v852_v45, 0.0  ;;  %v12787_v10 = vld [vmem:[#allocation40_spill] sm:$0xff]  ;;  %v12788_v11 = vld [vmem:[#allocation39_spill] sm:$0xff] }
 0x216   : > { %v747_v47 = vadd.f32 %v746_v31, %v10602_v58  ;;  %v860_v15 = vadd.f32 %v859_v33, %v10606_v60  ;;  %v12786_v20 = vpack.c.bf16 %v10644_v14, %v10642_v13  ;;  %v10937_v37 = vsel %vm999_vm7, %v741_v41, %v1066_v21  ;;  %v750_v14 = vpop.f32.mrb[14].mxu0  ;;  %v863_v41 = vpop.f32.mrb[14].mxu1 }
 0x217   : > { %7638 = vmatprep.subr.bf16.mxu1 %v12784_v27  ;;  %7672 = vmatpush1.bf16.msra.mxu0 %v12785_v59  ;;  %v1070_v12 = vmul.f32 %v10594_v56, %v745_v29  ;;  %v1072_v30 = vmul.f32 %v10626_v6, %v858_v51  ;;  %v10942_v40 = vsel %vm1001_vm8, %v854_v19, %v1068_v63  ;;  %vm1003_vm10 = vcmp.ge.f32.partialorder %v745_v29, 0.0  ;;  %v752_v53 = vpop.f32.mrb[15].mxu0  ;;  %v865_v27 = vpop.f32.mrb[15].mxu1 }
 0x218   : > { %7640 = vmatpush1.bf16.msra.mxu1 %v12786_v20  ;;  %1641 = vmatprep.mubr.f32.mxu0 %v10937_v37  ;;  %v12789_v61 = vpack.c.bf16 %v12787_v10, %v12788_v11  ;;  %v1071_v62 = vmul.f32 %v10630_v7, %v747_v47  ;;  %v1073_v13 = vmul.f32 %v10634_v8, %v860_v15  ;;  %vm1004_vm11 = vcmp.ge.f32.partialorder %v747_v47, 0.0 }
 0x219   : > { %1754 = vmatprep.mubr.f32.mxu1 %v10942_v40  ;;  %1642 = vmatmul.mubr.f32.gmra.mrb[34].mxu0 %v10927_v34  ;;  %v10951_v21 = vsel %vm1000_vm9, %v852_v45, %v1067_v49  ;;  %v751_v19 = vadd.f32 %v750_v14, %v10578_v50  ;;  %v864_v63 = vadd.f32 %v863_v41, %v10598_v57  ;;  %vm1006_vm12 = vcmp.ge.f32.partialorder %v860_v15, 0.0 }
 0x21a   : > { %7674 = vmatprep.subr.bf16.mxu0 %v12789_v61  ;;  %1755 = vmatmul.mubr.f32.gmra.mrb[26].mxu1 %v10951_v21  ;;  %v12792_v3 = vpack.c.bf16 %v12790_v1, %v12791_v28  ;;  %v10960_v31 = vsel %vm1003_vm10, %v745_v29, %v1070_v12  ;;  %v12793_v45 = vpack.c.bf16 %v10664_v24, %v10662_v23  ;;  %vm1005_vm13 = vcmp.ge.f32.partialorder %v858_v51, 0.0  ;;  %v12795_v23 = vld [vmem:[#allocation44_spill] sm:$0xff]  ;;  %v12796_v24 = vld [vmem:[#allocation43_spill] sm:$0xff]  ;;  %v12799_v12 = vld [vmem:[#allocation45_spill] sm:$0xff] }
 0x21b   : > { %v753_v50 = vadd.f32 %v752_v53, %v10602_v58  ;;  %v866_v57 = vadd.f32 %v865_v27, %v10606_v60  ;;  %v12794_v49 = vpack.c.bf16 %v10668_v0, %v10666_v25  ;;  %v10970_v33 = vsel %vm1004_vm11, %v747_v47, %v1071_v62  ;;  %v1203_v25 = vld [vmem:[#allocation7 + $0x298] sm:$0xff]  ;;  %v1208_v47 = vld [vmem:[#allocation7 + $0x2c0] sm:$0xff]  ;;  %v1209_v61 = vld [vmem:[#allocation7 + $0x2c8] sm:$0xff] }
 0x21c   : > { %7642 = vmatprep.subr.bf16.mxu1 %v12792_v3  ;;  %7676 = vmatpush1.bf16.msra.mxu0 %v12793_v45  ;;  %v1075_v59 = vmul.f32 %v10594_v56, %v751_v19  ;;  %v1077_v29 = vmul.f32 %v10626_v6, %v864_v63  ;;  %v10975_v20 = vsel %vm1006_vm12, %v860_v15, %v1073_v13  ;;  %vm1008_vm14 = vcmp.ge.f32.partialorder %v751_v19, 0.0  ;;  %v7395_v6 = vpop.f32.mrb[16].mxu0  ;;  %v12798_v15 = vld [vmem:[#allocation46_spill] sm:$0xff]  ;;  %v12801_v62 = vld [vmem:[#allocation47_spill] sm:$0xff]  ;;  %v1124_v3 = vld [vmem:[#allocation7 + $0x20] sm:$0xff] }
 0x21d   : > { %7644 = vmatpush1.bf16.msra.mxu1 %v12794_v49  ;;  %1647 = vmatprep.mubr.f32.mxu0 %v10970_v33  ;;  %v12797_v58 = vpack.c.bf16 %v12795_v23, %v12796_v24  ;;  %v1076_v60 = vmul.f32 %v10630_v7, %v753_v50  ;;  %v1078_v0 = vmul.f32 %v10634_v8, %v866_v57  ;;  %vm1009_vm15 = vcmp.ge.f32.partialorder %v753_v50, 0.0  ;;  %v934_v8 = vpop.f32.mrb[17].mxu0  ;;  %v1129_v53 = vld [vmem:[#allocation7 + $0x48] sm:$0xff]  ;;  %v1218_v24 = vld [vmem:[#allocation7 + $0x310] sm:$0xff] }
 0x21e   : > { %1760 = vmatprep.mubr.f32.mxu1 %v10975_v20  ;;  %1648 = vmatmul.mubr.f32.gmra.mrb[36].mxu0 %v10960_v31  ;;  %v10984_v56 = vsel %vm1005_vm13, %v858_v51, %v1072_v30  ;;  %v12800_v10 = vpack.c.bf16 %v12798_v15, %v12799_v12  ;;  %v10991_v7 = vadd.f32 %v7395_v6, %v10747_v54  ;;  %vm1011_vm0 = vcmp.ge.f32.partialorder %v866_v57, 0.0  ;;  %v1202_v51 = vld [vmem:[#allocation7 + $0x290] sm:$0xff]  ;;  %v1204_v30 = vld [vmem:[#allocation7 + $0x2a0] sm:$0xff]  ;;  %v1213_v23 = vld [vmem:[#allocation7 + $0x2e8] sm:$0xff] }
 0x21f   : > { %7678 = vmatprep.subr.bf16.mxu0 %v12797_v58  ;;  %1761 = vmatmul.mubr.f32.gmra.mrb[28].mxu1 %v10984_v56  ;;  %v10993_v11 = vsel %vm1008_vm14, %v751_v19, %v1075_v59  ;;  %vm1010_vm1 = vcmp.ge.f32.partialorder %v864_v63, 0.0  ;;  %v12802_v13 = vpack.c.bf16 %v10694_v5, %v12801_v62  ;;  %v12803_v14 = vpack.c.bf16 %v10709_v55, %v10699_v48  ;;  %v1207_v19 = vld [vmem:[#allocation7 + $0x2b8] sm:$0xff]  ;;  %v12805_v27 = vld [vmem:[#allocation57_spill] sm:$0xff]  ;;  %v12806_v55 = vld [vmem:[#allocation50_spill] sm:$0xff]  ;;  %v7398_v59 = vpop.f32.mrb[18].mxu0 }
 0x220   : > { %7646 = vmatprep.subr.bf16.mxu1 %v12800_v10  ;;  %v935_v41 = vadd.f32 %v934_v8, %v10747_v54  ;;  %v11003_v1 = vsel %vm1009_vm15, %v753_v50, %v1076_v60  ;;  %v11005_v28 = vsel %vm1011_vm0, %v866_v57, %v1078_v0  ;;  %v11009_v5 = vsel %vm1010_vm1, %v864_v63, %v1077_v29  ;;  %v12807_v45 = vld [vmem:[#allocation49_spill] sm:$0xff]  ;;  %v12809_v58 = vld [vmem:[#allocation52_spill] sm:$0xff]  ;;  %v12810_v60 = vld [vmem:[#allocation51_spill] sm:$0xff]  ;;  %v944_v6 = vpop.f32.mrb[19].mxu0 }
 0x221   : > { %7680 = vmatpush1.bf16.msra.mxu0 %v12802_v13  ;;  %7648 = vmatpush1.bf16.msra.mxu1 %v12803_v14  ;;  %12804 = vst [vmem:[#allocation30_spill] sm:$0xff] %v11009_v5  ;;  %v12808_v49 = vpack.c.bf16 %v12806_v55, %v12807_v45  ;;  %v7685_v50 = vpack.c.bf16 %v1208_v47, %v1203_v25  ;;  %v1212_v15 = vld [vmem:[#allocation7 + $0x2e0] sm:$0xff]  ;;  %v1214_v12 = vld [vmem:[#allocation7 + $0x2f0] sm:$0xff]  ;;  %v1219_v10 = vld [vmem:[#allocation7 + $0x318] sm:$0xff]  ;;  %v12818_v55 = vmov 0.0   ;;  %vm982_vm3 = vcmp.ge.f32.partialorder %v10991_v7, 0.0 }
 0x222   : > { %1653 = vmatprep.mubr.f32.mxu0 %v11003_v1  ;;  %1766 = vmatprep.mubr.f32.mxu1 %v11005_v28  ;;  %vm977_vm2 = vcmp.ge.f32.partialorder %v935_v41, 0.0  ;;  %v1044_v48 = vmul.f32 %v12805_v27, %v935_v41  ;;  %v7813_v57 = vpack.c.bf16 %v1209_v61, %v1204_v30  ;;  %v12811_v63 = vpack.c.bf16 %v12809_v58, %v12810_v60  ;;  %v12812_v47 = vld [vmem:[#allocation54_spill] sm:$0xff]  ;;  %v12813_v30 = vld [vmem:[#allocation53_spill] sm:$0xff]  ;;  %v12815_v62 = vld [vmem:[#allocation56_spill] sm:$0xff]  ;;  %v7401_v58 = vpop.f32.mrb[20].mxu0 }
 0x223   : > { %7682 = vmatprep.subr.bf16.mxu0 %v12808_v49  ;;  %1654 = vmatmul.mubr.f32.gmra.mrb[38].mxu0 %v10993_v11  ;;  %v7687_v29 = vpack.c.bf16 %v1207_v19, %v1202_v51  ;;  %v7815_v0 = vpack.c.bf16 %v1129_v53, %v1124_v3  ;;  %v1049_v8 = vmul.f32 %v12805_v27, %v10991_v7  ;;  %v12816_v13 = vld [vmem:[#allocation55_spill] sm:$0xff]  ;;  %v1217_v19 = vld [vmem:[#allocation7 + $0x308] sm:$0xff]  ;;  %v1228_v49 = vld [vmem:[#allocation7 + $0x360] sm:$0xff] }
 0x224   : > { %1767 = vmatmul.mubr.f32.gmra.mrb[30].mxu1 %v11009_v5  ;;  %7650 = vmatprep.subr.bf16.mxu1 %v12811_v63  ;;  %v11023_v25 = vsel %vm977_vm2, %v935_v41, %v1044_v48  ;;  %v12814_v61 = vpack.c.bf16 %v12812_v47, %v12813_v30  ;;  %v12817_v14 = vpack.c.bf16 %v12815_v62, %v12816_v13  ;;  %v1134_v3 = vld [vmem:[#allocation7 + $0x70] sm:$0xff]  ;;  %v1139_v53 = vld [vmem:[#allocation7 + $0x98] sm:$0xff]  ;;  %v1224_v47 = vld [vmem:[#allocation7 + $0x340] sm:$0xff] }
 0x225   : > { %v945_v51 = vadd.f32 %v944_v6, %v10747_v54  ;;  %1950 = vmatprep.mubr.f32.mxu0 %v10779_v52  ;;  %1837 = vmatprep.mubr.f32.mxu1 %v12818_v55  ;;  %v7689_v45 = vpack.c.bf16 %v1218_v24, %v1213_v23  ;;  %v7817_v41 = vpack.c.bf16 %v1219_v10, %v1214_v12  ;;  %v1223_v48 = vld [vmem:[#allocation7 + $0x338] sm:$0xff]  ;;  %v1222_v6 = vld [vmem:[#allocation7 + $0x330] sm:$0xff]  ;;  %v1229_v30 = vld [vmem:[#allocation7 + $0x368] sm:$0xff] }
 0x226   : > { %7684 = vmatpush1.bf16.msra.mxu0 %v12814_v61  ;;  %7652 = vmatpush1.bf16.msra.mxu1 %v12817_v14  ;;  %v7691_v60 = vpack.c.bf16 %v1217_v19, %v1212_v15  ;;  %v7819_v63 = vpack.c.bf16 %v1139_v53, %v1134_v3  ;;  %v954_v61 = vpop.f32.mrb[21].mxu0  ;;  %v950_v62 = vadd.f32 %v7398_v59, %v10747_v54  ;;  %v1144_v24 = vld [vmem:[#allocation7 + $0xc0] sm:$0xff]  ;;  %v1149_v12 = vld [vmem:[#allocation7 + $0xe8] sm:$0xff]  ;;  %v1238_v59 = vld [vmem:[#allocation7 + $0x3b0] sm:$0xff] }
 0x227   : > { %7686 = vmatprep.subr.bf16.mxu0 %v7685_v50  ;;  %7814 = vmatprep.subr.bf16.mxu1 %v7813_v57  ;;  %v1054_v23 = vmul.f32 %v12805_v27, %v945_v51  ;;  %v11041_v50 = vsel %vm982_vm3, %v10991_v7, %v1049_v8  ;;  %v1227_v57 = vld [vmem:[#allocation7 + $0x358] sm:$0xff]  ;;  %v7693_v15 = vpack.c.bf16 %v1228_v49, %v1223_v48  ;;  %vm987_vm4 = vcmp.ge.f32.partialorder %v945_v51, 0.0  ;;  %v1233_v10 = vld [vmem:[#allocation7 + $0x388] sm:$0xff]  ;;  %v1232_v7 = vld [vmem:[#allocation7 + $0x380] sm:$0xff] }
 0x228   : > { %v7695_v13 = vpack.c.bf16 %v1227_v57, %v1222_v6  ;;  %v7823_v14 = vpack.c.bf16 %v1149_v12, %v1144_v24  ;;  %v1234_v8 = vld [vmem:[#allocation7 + $0x390] sm:$0xff]  ;;  %v1239_v19 = vld [vmem:[#allocation7 + $0x3b8] sm:$0xff]  ;;  %v1059_v53 = vmul.f32 %v12805_v27, %v950_v62  ;;  %v1237_v48 = vld [vmem:[#allocation7 + $0x3a8] sm:$0xff]  ;;  %v7697_v6 = vpack.c.bf16 %v1238_v59, %v1233_v10 }
 0x229   : > { %1838 = vmatmul.mubr.f32.vlgmr.msra.gmra.mrb[16].mxu1 %v11023_v25  ;;  %v1154_v49 = vld [vmem:[#allocation7 + $0x110] sm:$0xff]  ;;  %vm992_vm5 = vcmp.ge.f32.partialorder %v950_v62, 0.0  ;;  %v1243_v57 = vld [vmem:[#allocation7 + $0x3d8] sm:$0xff]  ;;  %v1248_v24 = vld [vmem:[#allocation7 + $0x400] sm:$0xff] }
 0x22a   : > { %7688 = vmatpush1.bf16.msra.mxu0 %v7687_v29  ;;  %7816 = vmatpush3.bf16.msra.mxu1 %v7815_v0  ;;  %v7821_v29 = vpack.c.bf16 %v1229_v30, %v1224_v47  ;;  %v11044_v0 = vpop.f32.mrb[22].mxu0  ;;  %v1159_v47 = vld [vmem:[#allocation7 + $0x138] sm:$0xff]  ;;  %v7825_v30 = vpack.c.bf16 %v1239_v19, %v1234_v8  ;;  %v1249_v12 = vld [vmem:[#allocation7 + $0x408] sm:$0xff]  ;;  %v7701_v8 = vpack.c.bf16 %v1248_v24, %v1243_v57 }
 0x22b   : > { %1843 = vmatprep.mubr.f32.mxu1 %v12818_v55  ;;  %7690 = vmatprep.subr.bf16.mxu0 %v7689_v45  ;;  %v964_v3 = vpop.f32.mrb[23].mxu0  ;;  %v11049_v45 = vsel %vm987_vm4, %v945_v51, %v1054_v23  ;;  %v1242_v51 = vld [vmem:[#allocation7 + $0x3d0] sm:$0xff]  ;;  %v1244_v23 = vld [vmem:[#allocation7 + $0x3e0] sm:$0xff]  ;;  %v1247_v10 = vld [vmem:[#allocation7 + $0x3f8] sm:$0xff] }
 0x22c   : > { %7818 = vmatprep.subr.bf16.mxu1 %v7817_v41  ;;  %v955_v41 = vadd.f32 %v954_v61, %v10747_v54  ;;  %v960_v61 = vadd.f32 %v7401_v58, %v10747_v54  ;;  %v1169_v59 = vld [vmem:[#allocation7 + $0x188] sm:$0xff]  ;;  %v7703_v58 = vpack.c.bf16 %v1247_v10, %v1242_v51  ;;  %v1179_v24 = vld [vmem:[#allocation7 + $0x1d8] sm:$0xff]  ;;  %v1268_v10 = vld [vmem:[#allocation7 + $0x4a0] sm:$0xff] }
 0x22d   : > { %1844 = vmatmul.mubr.f32.gmra.mrb[18].mxu1 %v11041_v50  ;;  %v1253_v19 = vld [vmem:[#allocation7 + $0x428] sm:$0xff] }
 0x22e   : > { %7692 = vmatpush1.bf16.msra.mxu0 %v7691_v60  ;;  %7820 = vmatpush3.bf16.msra.mxu1 %v7819_v63  ;;  %v7699_v60 = vpack.c.bf16 %v1237_v48, %v1232_v7  ;;  %v7827_v63 = vpack.c.bf16 %v1159_v47, %v1154_v49  ;;  %v1064_v5 = vmul.f32 %v12805_v27, %v955_v41  ;;  %vm997_vm6 = vcmp.ge.f32.partialorder %v955_v41, 0.0  ;;  %v1258_v48 = vld [vmem:[#allocation7 + $0x450] sm:$0xff]  ;;  %v1257_v57 = vld [vmem:[#allocation7 + $0x448] sm:$0xff] }
 0x22f   : > { %1849 = vmatprep.mubr.f32.mxu1 %v12818_v55  ;;  %7694 = vmatprep.subr.bf16.mxu0 %v7693_v15  ;;  %v11056_v15 = vsel %vm992_vm5, %v950_v62, %v1059_v53  ;;  %v7829_v7 = vpack.c.bf16 %v1249_v12, %v1244_v23  ;;  %v1254_v49 = vld [vmem:[#allocation7 + $0x430] sm:$0xff]  ;;  %v1259_v62 = vld [vmem:[#allocation7 + $0x458] sm:$0xff]  ;;  %v1069_v53 = vmul.f32 %v12805_v27, %v960_v61  ;;  %vm1002_vm7 = vcmp.ge.f32.partialorder %v960_v61, 0.0 }
 0x230   : > { %7822 = vmatprep.subr.bf16.mxu1 %v7821_v29  ;;  %v1164_v29 = vld [vmem:[#allocation7 + $0x160] sm:$0xff]  ;;  %v11061_v47 = vsel %vm997_vm6, %v955_v41, %v1064_v5  ;;  %v7705_v23 = vpack.c.bf16 %v1258_v48, %v1253_v19  ;;  %v7833_v51 = vpack.c.bf16 %v1259_v62, %v1254_v49  ;;  %v1263_v12 = vld [vmem:[#allocation7 + $0x478] sm:$0xff]  ;;  %v1269_v41 = vld [vmem:[#allocation7 + $0x4a8] sm:$0xff] }
 0x231   : > { %1850 = vmatmul.mubr.f32.gmra.mrb[20].mxu1 %v11049_v45  ;;  %v1264_v5 = vld [vmem:[#allocation7 + $0x480] sm:$0xff]  ;;  %v7709_v19 = vpack.c.bf16 %v1268_v10, %v1263_v12  ;;  %v1278_v62 = vld [vmem:[#allocation7 + $0x4f0] sm:$0xff]  ;;  %v1199_v12 = vld [vmem:[#allocation7 + $0x278] sm:$0xff] }
 0x232   : > { %7696 = vmatpush1.bf16.msra.mxu0 %v7695_v13  ;;  %7824 = vmatpush3.bf16.msra.mxu1 %v7823_v14  ;;  %v7831_v13 = vpack.c.bf16 %v1169_v59, %v1164_v29  ;;  %v1252_v14 = vld [vmem:[#allocation7 + $0x420] sm:$0xff]  ;;  %v11069_v59 = vsel %vm1002_vm7, %v960_v61, %v1069_v53  ;;  %v7837_v49 = vpack.c.bf16 %v1269_v41, %v1264_v5  ;;  %v1283_v5 = vld [vmem:[#allocation7 + $0x518] sm:$0xff] }
 0x233   : > { %1855 = vmatprep.mubr.f32.mxu1 %v12818_v55  ;;  %7698 = vmatprep.subr.bf16.mxu0 %v7697_v6  ;;  %v965_v6 = vadd.f32 %v964_v3, %v10747_v54  ;;  %v970_v3 = vadd.f32 %v11044_v0, %v10747_v54  ;;  %v1184_v48 = vld [vmem:[#allocation7 + $0x200] sm:$0xff]  ;;  %v1274_v0 = vld [vmem:[#allocation7 + $0x4d0] sm:$0xff] }
 0x234   : > { %7826 = vmatprep.subr.bf16.mxu1 %v7825_v30  ;;  %v1174_v30 = vld [vmem:[#allocation7 + $0x1b0] sm:$0xff]  ;;  %v1288_v41 = vld [vmem:[#allocation7 + $0x540] sm:$0xff] }
 0x235   : > { %1856 = vmatmul.mubr.f32.gmra.mrb[22].mxu1 %v11056_v15  ;;  %v1074_v29 = vmul.f32 %v12805_v27, %v965_v6  ;;  %vm1007_vm8 = vcmp.ge.f32.partialorder %v965_v6, 0.0  ;;  %v1079_v61 = vmul.f32 %v12805_v27, %v970_v3  ;;  %vm1012_vm9 = vcmp.ge.f32.partialorder %v970_v3, 0.0  ;;  %v1444_v27 = vld [vmem:[#allocation7 + $0xa20] sm:$0xff] }
 0x236   : > { %7700 = vmatpush1.bf16.msra.mxu0 %v7699_v60  ;;  %7828 = vmatpush3.bf16.msra.mxu1 %v7827_v63  ;;  %v7707_v60 = vpack.c.bf16 %v1257_v57, %v1252_v14  ;;  %v7835_v63 = vpack.c.bf16 %v1179_v24, %v1174_v30  ;;  %v1189_v14 = vld [vmem:[#allocation7 + $0x228] sm:$0xff]  ;;  %v1272_v30 = vld [vmem:[#allocation7 + $0x4c0] sm:$0xff] }
 0x237   : > { %1861 = vmatprep.mubr.f32.mxu1 %v12818_v55  ;;  %7702 = vmatprep.subr.bf16.mxu0 %v7701_v8  ;;  %v1262_v8 = vld [vmem:[#allocation7 + $0x470] sm:$0xff]  ;;  %v11074_v53 = vsel %vm1007_vm8, %v965_v6, %v1074_v29  ;;  %v7839_v57 = vpack.c.bf16 %v1189_v14, %v1184_v48  ;;  %v11078_v6 = vsel %vm1012_vm9, %v970_v3, %v1079_v61  ;;  %v1293_v14 = vld [vmem:[#allocation7 + $0x568] sm:$0xff] }
 0x238   : > { %7830 = vmatprep.subr.bf16.mxu1 %v7829_v7  ;;  %v1267_v7 = vld [vmem:[#allocation7 + $0x498] sm:$0xff] }
 0x239   : > { %1862 = vmatmul.mubr.f32.gmra.mrb[24].mxu1 %v11061_v47  ;;  %v7711_v54 = vpack.c.bf16 %v1267_v7, %v1262_v8  ;;  %v7717_v8 = vpack.c.bf16 %v1288_v41, %v1283_v5  ;;  %v1282_v7 = vld [vmem:[#allocation7 + $0x510] sm:$0xff]  ;;  %v1313_v41 = vld [vmem:[#allocation7 + $0x608] sm:$0xff] }
 0x23a   : > { %7704 = vmatpush1.bf16.msra.mxu0 %v7703_v58  ;;  %7832 = vmatpush3.bf16.msra.mxu1 %v7831_v13  ;;  %v1273_v58 = vld [vmem:[#allocation7 + $0x4c8] sm:$0xff]  ;;  %v1279_v13 = vld [vmem:[#allocation7 + $0x4f8] sm:$0xff] }
 0x23b   : > { %1867 = vmatprep.mubr.f32.mxu1 %v12818_v55  ;;  %7706 = vmatprep.subr.bf16.mxu0 %v7705_v23  ;;  %v7713_v24 = vpack.c.bf16 %v1278_v62, %v1273_v58  ;;  %v1277_v23 = vld [vmem:[#allocation7 + $0x4e8] sm:$0xff]  ;;  %v7841_v10 = vpack.c.bf16 %v1279_v13, %v1274_v0  ;;  %v1454_v58 = vld [vmem:[#allocation7 + $0xa70] sm:$0xff]  ;;  %v1459_v62 = vld [vmem:[#allocation7 + $0xa98] sm:$0xff] }
 0x23c   : > { %7834 = vmatprep.subr.bf16.mxu1 %v7833_v51  ;;  %v1194_v51 = vld [vmem:[#allocation7 + $0x250] sm:$0xff]  ;;  %v1297_v0 = vld [vmem:[#allocation7 + $0x588] sm:$0xff]  ;;  %v7881_v61 = vpack.c.bf16 %v1459_v62, %v1454_v58  ;;  %v1327_v58 = vld [vmem:[#allocation7 + $0x678] sm:$0xff] }
 0x23d   : > { %1868 = vmatmul.mubr.f32.gmra.mrb[26].mxu1 %v11069_v59  ;;  %v7843_v29 = vpack.c.bf16 %v1199_v12, %v1194_v51  ;;  %v1307_v12 = vld [vmem:[#allocation7 + $0x5d8] sm:$0xff] }
 0x23e   : > { %7708 = vmatpush1.bf16.msra.mxu0 %v7707_v60  ;;  %7836 = vmatpush3.bf16.msra.mxu1 %v7835_v63  ;;  %v1449_v60 = vld [vmem:[#allocation7 + $0xa48] sm:$0xff]  ;;  %v7715_v63 = vpack.c.bf16 %v1277_v23, %v1272_v30  ;;  %v1308_v30 = vld [vmem:[#allocation7 + $0x5e0] sm:$0xff] }
 0x23f   : > { %1873 = vmatprep.mubr.f32.mxu1 %v12818_v55  ;;  %7710 = vmatprep.subr.bf16.mxu0 %v7709_v19  ;;  %v1287_v19 = vld [vmem:[#allocation7 + $0x538] sm:$0xff]  ;;  %v7877_v48 = vpack.c.bf16 %v1449_v60, %v1444_v27  ;;  %v1469_v23 = vld [vmem:[#allocation7 + $0xae8] sm:$0xff]  ;;  %v1474_v27 = vld [vmem:[#allocation7 + $0xb10] sm:$0xff] }
 0x240   : > { %7838 = vmatprep.subr.bf16.mxu1 %v7837_v49  ;;  %v1298_v49 = vld [vmem:[#allocation7 + $0x590] sm:$0xff]  ;;  %v7719_v3 = vpack.c.bf16 %v1287_v19, %v1282_v7  ;;  %v1479_v60 = vld [vmem:[#allocation7 + $0xb38] sm:$0xff] }
 0x241   : > { %1874 = vmatmul.mubr.f32.gmra.mrb[28].mxu1 %v11074_v53  ;;  %v7721_v13 = vpack.c.bf16 %v1298_v49, %v1293_v14  ;;  %v7889_v7 = vpack.c.bf16 %v1479_v60, %v1474_v27  ;;  %v1323_v19 = vld [vmem:[#allocation7 + $0x658] sm:$0xff]  ;;  %v1489_v14 = vld [vmem:[#allocation7 + $0xb88] sm:$0xff]  ;;  %v1514_v27 = vld [vmem:[#allocation7 + $0xc50] sm:$0xff] }
 0x242   : > { %7712 = vmatpush1.bf16.msra.mxu0 %v7711_v54  ;;  %7840 = vmatpush3.bf16.msra.mxu1 %v7839_v57  ;;  %v1292_v54 = vld [vmem:[#allocation7 + $0x560] sm:$0xff]  ;;  %v1303_v57 = vld [vmem:[#allocation7 + $0x5b8] sm:$0xff] }
 0x243   : > { %1879 = vmatprep.mubr.f32.mxu1 %v12818_v55  ;;  %7714 = vmatprep.subr.bf16.mxu0 %v7713_v24  ;;  %v1464_v24 = vld [vmem:[#allocation7 + $0xac0] sm:$0xff]  ;;  %v7723_v51 = vpack.c.bf16 %v1297_v0, %v1292_v54  ;;  %v1333_v54 = vld [vmem:[#allocation7 + $0x6a8] sm:$0xff]  ;;  %v1494_v0 = vld [vmem:[#allocation7 + $0xbb0] sm:$0xff] }
 0x244   : > { %7842 = vmatprep.subr.bf16.mxu1 %v7841_v10  ;;  %v7725_v10 = vpack.c.bf16 %v1308_v30, %v1303_v57  ;;  %v7885_v5 = vpack.c.bf16 %v1469_v23, %v1464_v24  ;;  %v1337_v57 = vld [vmem:[#allocation7 + $0x6c8] sm:$0xff]  ;;  %v1343_v23 = vld [vmem:[#allocation7 + $0x6f8] sm:$0xff] }
 0x245   : > { %1880 = vmatmul.mubr.f32.gmra.mrb[30].mxu1 %v11078_v6  ;;  %v1519_v60 = vld [vmem:[#allocation7 + $0xc78] sm:$0xff] }
 0x246   : > { %7716 = vmatpush1.bf16.msra.mxu0 %v7715_v63  ;;  %7844 = vmatpush3.bf16.msra.mxu1 %v7843_v29  ;;  %v1317_v29 = vld [vmem:[#allocation7 + $0x628] sm:$0xff] }
 0x247   : > { %2289 = vmatprep.mubr.f32.mxu1 %v10779_v52  ;;  %7718 = vmatprep.subr.bf16.mxu0 %v7717_v8  ;;  %v1302_v52 = vld [vmem:[#allocation7 + $0x5b0] sm:$0xff] }
 0x248   : > { %7878 = vmatprep.subr.bf16.mxu1 %v7877_v48  ;;  %v7727_v63 = vpack.c.bf16 %v1307_v12, %v1302_v52  ;;  %v1509_v52 = vld [vmem:[#allocation7 + $0xc28] sm:$0xff] }
 0x249   : > { %1951 = vmatmul.mubr.f32.vlgmr.msra.gmra.mrb[40].mxu0 %v10771_v32  ;;  %2290 = vmatmul.mubr.f32.vlgmr.msra.gmra.mrb[32].mxu1 %v10771_v32  ;;  %v1318_v32 = vld [vmem:[#allocation7 + $0x630] sm:$0xff] }
 0x24a   : > { %1956 = vmatprep.mubr.f32.mxu0 %v10804_v2  ;;  %7720 = vmatpush1.bf16.msra.mxu0 %v7719_v3  ;;  %v7729_v8 = vpack.c.bf16 %v1318_v32, %v1313_v41  ;;  %v1353_v32 = vld [vmem:[#allocation7 + $0x748] sm:$0xff] }
 0x24b   : > { %2294 = vmatprep.mubr.f32.mxu1 %v10804_v2  ;;  %7880 = vmatpush3.bf16.msra.mxu1 %v7877_v48  ;;  %v1312_v2 = vld [vmem:[#allocation7 + $0x600] sm:$0xff] }
 0x24c   : > { %7722 = vmatprep.subr.bf16.mxu0 %v7721_v13  ;;  %7882 = vmatprep.subr.bf16.mxu1 %v7881_v61  ;;  %v1484_v48 = vld [vmem:[#allocation7 + $0xb60] sm:$0xff]  ;;  %v7731_v49 = vpack.c.bf16 %v1317_v29, %v1312_v2  ;;  %v1499_v13 = vld [vmem:[#allocation7 + $0xbd8] sm:$0xff]  ;;  %v1357_v2 = vld [vmem:[#allocation7 + $0x768] sm:$0xff] }
 0x24d   : > { %1957 = vmatmul.mubr.f32.gmra.mrb[42].mxu0 %v10800_v9  ;;  %2295 = vmatmul.mubr.f32.gmra.mrb[34].mxu1 %v10800_v9  ;;  %v1328_v9 = vld [vmem:[#allocation7 + $0x680] sm:$0xff]  ;;  %v7893_v3 = vpack.c.bf16 %v1489_v14, %v1484_v48  ;;  %v7897_v24 = vpack.c.bf16 %v1499_v13, %v1494_v0  ;;  %v1362_v14 = vld [vmem:[#allocation7 + $0x790] sm:$0xff] }
 0x24e   : > { %1962 = vmatprep.mubr.f32.mxu0 %v10837_v22  ;;  %7724 = vmatpush1.bf16.msra.mxu0 %v7723_v51  ;;  %v7733_v62 = vpack.c.bf16 %v1328_v9, %v1323_v19  ;;  %v1504_v51 = vld [vmem:[#allocation7 + $0xc00] sm:$0xff]  ;;  %v2695_v9 = vld [vmem:[#allocation12 + $0x40] sm:$0xff] }
 0x24f   : > { %2299 = vmatprep.mubr.f32.mxu1 %v10837_v22  ;;  %7884 = vmatpush3.bf16.msra.mxu1 %v7881_v61  ;;  %v1322_v22 = vld [vmem:[#allocation7 + $0x650] sm:$0xff]  ;;  %v7901_v41 = vpack.c.bf16 %v1509_v52, %v1504_v51  ;;  %v1368_v19 = vld [vmem:[#allocation7 + $0x7c0] sm:$0xff] }
 0x250   : > { %7726 = vmatprep.subr.bf16.mxu0 %v7725_v10  ;;  %7886 = vmatprep.subr.bf16.mxu1 %v7885_v5  ;;  %v7735_v61 = vpack.c.bf16 %v1327_v58, %v1322_v22  ;;  %v1347_v10 = vld [vmem:[#allocation7 + $0x718] sm:$0xff]  ;;  %v1373_v22 = vld [vmem:[#allocation7 + $0x7e8] sm:$0xff]  ;;  %v1378_v58 = vld [vmem:[#allocation7 + $0x810] sm:$0xff] }
 0x251   : > { %1963 = vmatmul.mubr.f32.gmra.mrb[44].mxu0 %v10830_v17  ;;  %2300 = vmatmul.mubr.f32.gmra.mrb[36].mxu1 %v10830_v17  ;;  %v1338_v17 = vld [vmem:[#allocation7 + $0x6d0] sm:$0xff]  ;;  %v2705_v0 = vld [vmem:[#allocation12 + $0x90] sm:$0xff]  ;;  %v7753_v13 = vpack.c.bf16 %v1378_v58, %v1373_v22  ;;  %v2710_v52 = vld [vmem:[#allocation12 + $0xb8] sm:$0xff] }
 0x252   : > { %1968 = vmatprep.mubr.f32.mxu0 %v10869_v43  ;;  %7728 = vmatpush1.bf16.msra.mxu0 %v7727_v63  ;;  %v7737_v30 = vpack.c.bf16 %v1338_v17, %v1333_v54  ;;  %v12819_v54 = vld [vmem:[#allocation59_spill] sm:$0xff]  ;;  %v2730_v58 = vld [vmem:[#allocation12 + $0x158] sm:$0xff] }
 0x253   : > { %2304 = vmatprep.mubr.f32.mxu1 %v10869_v43  ;;  %7888 = vmatpush3.bf16.msra.mxu1 %v7885_v5  ;;  %v1332_v43 = vld [vmem:[#allocation7 + $0x6a0] sm:$0xff] }
 0x254   : > { %7730 = vmatprep.subr.bf16.mxu0 %v7729_v8  ;;  %7890 = vmatprep.subr.bf16.mxu1 %v7889_v7  ;;  %v7739_v12 = vpack.c.bf16 %v1337_v57, %v1332_v43  ;;  %v7905_v8 = vpack.c.bf16 %v1519_v60, %v1514_v27  ;;  %v1377_v43 = vld [vmem:[#allocation7 + $0x808] sm:$0xff]  ;;  %v1383_v57 = vld [vmem:[#allocation7 + $0x838] sm:$0xff] }
 0x255   : > { %1969 = vmatmul.mubr.f32.gmra.mrb[46].mxu0 %v10859_v44  ;;  %2305 = vmatmul.mubr.f32.gmra.mrb[38].mxu1 %v10859_v44  ;;  %v1348_v44 = vld [vmem:[#allocation7 + $0x720] sm:$0xff] }
 0x256   : > { %1974 = vmatprep.mubr.f32.mxu0 %v10904_v16  ;;  %7732 = vmatpush1.bf16.msra.mxu0 %v7731_v49  ;;  %v7741_v5 = vpack.c.bf16 %v1348_v44, %v1343_v23  ;;  %v1367_v49 = vld [vmem:[#allocation7 + $0x7b8] sm:$0xff]  ;;  %v2699_v23 = vld [vmem:[#allocation12 + $0x60] sm:$0xff] }
 0x257   : > { %2309 = vmatprep.mubr.f32.mxu1 %v10904_v16  ;;  %7892 = vmatpush3.bf16.msra.mxu1 %v7889_v7  ;;  %v1342_v16 = vld [vmem:[#allocation7 + $0x6f0] sm:$0xff]  ;;  %v1363_v7 = vld [vmem:[#allocation7 + $0x798] sm:$0xff]  ;;  %v7751_v17 = vpack.c.bf16 %v1367_v49, %v1362_v14 }
 0x258   : > { %7734 = vmatprep.subr.bf16.mxu0 %v7733_v62  ;;  %7894 = vmatprep.subr.bf16.mxu1 %v7893_v3  ;;  %v7743_v63 = vpack.c.bf16 %v1347_v10, %v1342_v16  ;;  %v2704_v44 = vld [vmem:[#allocation12 + $0x88] sm:$0xff]  ;;  %v2709_v60 = vld [vmem:[#allocation12 + $0xb0] sm:$0xff]  ;;  %v2719_v14 = vld [vmem:[#allocation12 + $0x100] sm:$0xff] }
 0x259   : > { %1975 = vmatmul.mubr.f32.gmra.mrb[48].mxu0 %v10894_v18  ;;  %2310 = vmatmul.mubr.f32.gmra.mrb[40].mxu1 %v10894_v18  ;;  %v1358_v18 = vld [vmem:[#allocation7 + $0x770] sm:$0xff] }
 0x25a   : > { %1980 = vmatprep.mubr.f32.mxu0 %v10937_v37  ;;  %7736 = vmatpush1.bf16.msra.mxu0 %v7735_v61  ;;  %v7745_v29 = vpack.c.bf16 %v1358_v18, %v1353_v32  ;;  %v1372_v61 = vld [vmem:[#allocation7 + $0x7e0] sm:$0xff]  ;;  %v1382_v10 = vld [vmem:[#allocation7 + $0x830] sm:$0xff]  ;;  %v8075_v18 = vpack.c.bf16 %v2704_v44, %v2699_v23 }
 0x25b   : > { %2314 = vmatprep.mubr.f32.mxu1 %v10937_v37  ;;  %7896 = vmatpush3.bf16.msra.mxu1 %v7893_v3  ;;  %v1352_v37 = vld [vmem:[#allocation7 + $0x740] sm:$0xff]  ;;  %v7755_v51 = vpack.c.bf16 %v1377_v43, %v1372_v61  ;;  %v1398_v32 = vld [vmem:[#allocation7 + $0x8b0] sm:$0xff] }
 0x25c   : > { %7738 = vmatprep.subr.bf16.mxu0 %v7737_v30  ;;  %7898 = vmatprep.subr.bf16.mxu1 %v7897_v24  ;;  %v7747_v48 = vpack.c.bf16 %v1357_v2, %v1352_v37  ;;  %v2694_v3 = vld [vmem:[#allocation12 + $0x38] sm:$0xff]  ;;  %v2720_v2 = vld [vmem:[#allocation12 + $0x108] sm:$0xff]  ;;  %v2729_v43 = vld [vmem:[#allocation12 + $0x150] sm:$0xff] }
 0x25d   : > { %1981 = vmatmul.mubr.f32.gmra.mrb[50].mxu0 %v10927_v34  ;;  %2315 = vmatmul.mubr.f32.gmra.mrb[42].mxu1 %v10927_v34  ;;  %v2690_v34 = vld [vmem:[#allocation12 + $0x18] sm:$0xff]  ;;  %v2724_v49 = vld [vmem:[#allocation12 + $0x128] sm:$0xff] }
 0x25e   : > { %1986 = vmatprep.mubr.f32.mxu0 %v10970_v33  ;;  %7740 = vmatpush1.bf16.msra.mxu0 %v7739_v12  ;;  %v8069_v62 = vpack.c.bf16 %v2695_v9, %v2690_v34  ;;  %v1388_v30 = vld [vmem:[#allocation7 + $0x860] sm:$0xff]  ;;  %v2715_v12 = vld [vmem:[#allocation12 + $0xe0] sm:$0xff]  ;;  %v1403_v34 = vld [vmem:[#allocation7 + $0x8d8] sm:$0xff] }
 0x25f   : > { %2319 = vmatprep.mubr.f32.mxu1 %v10970_v33  ;;  %7900 = vmatpush3.bf16.msra.mxu1 %v7897_v24  ;;  %v7749_v33 = vpack.c.bf16 %v1368_v19, %v1363_v7  ;;  %v7757_v16 = vpack.c.bf16 %v1388_v30, %v1383_v57  ;;  %v8077_v27 = vpack.c.bf16 %v2715_v12, %v2710_v52  ;;  %v1392_v7 = vld [vmem:[#allocation7 + $0x880] sm:$0xff]  ;;  %v1397_v19 = vld [vmem:[#allocation7 + $0x8a8] sm:$0xff]  ;;  %v1423_v52 = vld [vmem:[#allocation7 + $0x978] sm:$0xff] }
 0x260   : > { %7742 = vmatprep.subr.bf16.mxu0 %v7741_v5  ;;  %7902 = vmatprep.subr.bf16.mxu1 %v7901_v41  ;;  %v1387_v5 = vld [vmem:[#allocation7 + $0x858] sm:$0xff]  ;;  %v1408_v9 = vld [vmem:[#allocation7 + $0x900] sm:$0xff]  ;;  %v7763_v22 = vpack.c.bf16 %v1397_v19, %v1392_v7 }
 0x261   : > { %1987 = vmatmul.mubr.f32.gmra.mrb[52].mxu0 %v10960_v31  ;;  %2320 = vmatmul.mubr.f32.gmra.mrb[44].mxu1 %v10960_v31  ;;  %v2689_v31 = vld [vmem:[#allocation12 + $0x10] sm:$0xff]  ;;  %v7759_v37 = vpack.c.bf16 %v1387_v5, %v1382_v10  ;;  %v2734_v57 = vld [vmem:[#allocation12 + $0x178] sm:$0xff]  ;;  %v2739_v5 = vld [vmem:[#allocation12 + $0x1a0] sm:$0xff] }
 0x262   : > { %1992 = vmatprep.mubr.f32.mxu0 %v11003_v1  ;;  %7744 = vmatpush1.bf16.msra.mxu0 %v7743_v63  ;;  %v8071_v24 = vpack.c.bf16 %v2694_v3, %v2689_v31  ;;  %v2714_v63 = vld [vmem:[#allocation12 + $0xd8] sm:$0xff]  ;;  %v7765_v31 = vpack.c.bf16 %v1408_v9, %v1403_v34  ;;  %v1402_v3 = vld [vmem:[#allocation7 + $0x8d0] sm:$0xff]  ;;  %v2749_v19 = vld [vmem:[#allocation12 + $0x1f0] sm:$0xff] }
 0x263   : > { %2324 = vmatprep.mubr.f32.mxu1 %v11003_v1  ;;  %7904 = vmatpush3.bf16.msra.mxu1 %v7901_v41  ;;  %v2700_v1 = vld [vmem:[#allocation12 + $0x68] sm:$0xff]  ;;  %v1393_v41 = vld [vmem:[#allocation7 + $0x888] sm:$0xff]  ;;  %v1412_v44 = vld [vmem:[#allocation7 + $0x920] sm:$0xff] }
 0x264   : > { %7746 = vmatprep.subr.bf16.mxu0 %v7745_v29  ;;  %7906 = vmatprep.subr.bf16.mxu1 %v7905_v8  ;;  %v2725_v29 = vld [vmem:[#allocation12 + $0x130] sm:$0xff]  ;;  %v2754_v34 = vld [vmem:[#allocation12 + $0x218] sm:$0xff] }
 0x265   : > { %1993 = vmatmul.mubr.f32.gmra.mrb[54].mxu0 %v10993_v11  ;;  %2325 = vmatmul.mubr.f32.gmra.mrb[46].mxu1 %v10993_v11  ;;  %v8073_v11 = vpack.c.bf16 %v2705_v0, %v2700_v1  ;;  %v1413_v1 = vld [vmem:[#allocation7 + $0x928] sm:$0xff]  ;;  %v1418_v0 = vld [vmem:[#allocation7 + $0x950] sm:$0xff]  ;;  %v1428_v12 = vld [vmem:[#allocation7 + $0x9a0] sm:$0xff] }
 0x266   : > { %7748 = vmatpush1.bf16.msra.mxu0 %v7747_v48  ;;  %2063 = vmatprep.mubr.f32.mxu0 %v12819_v54  ;;  %v8079_v48 = vpack.c.bf16 %v2714_v63, %v2709_v60  ;;  %v7769_v23 = vpack.c.bf16 %v1418_v0, %v1413_v1  ;;  %v7773_v60 = vpack.c.bf16 %v1428_v12, %v1423_v52  ;;  %v1422_v63 = vld [vmem:[#allocation7 + $0x970] sm:$0xff]  ;;  %v2774_v52 = vld [vmem:[#allocation12 + $0x2b8] sm:$0xff] }
 0x267   : > { %7908 = vmatpush3.bf16.msra.mxu1 %v7905_v8  ;;  %7750 = vmatprep.subr.bf16.mxu0 %v7749_v33  ;;  %v7761_v8 = vpack.c.bf16 %v1398_v32, %v1393_v41  ;;  %v8081_v33 = vpack.c.bf16 %v2725_v29, %v2720_v2  ;;  %v2744_v41 = vld [vmem:[#allocation12 + $0x1c8] sm:$0xff]  ;;  %v1433_v2 = vld [vmem:[#allocation7 + $0x9c8] sm:$0xff] }
 0x268   : > { %7437 = vmatprep.mubr.f32.mxu1 %v11023_v25  ;;  %8070 = vmatprep.subr.bf16.mxu1 %v8069_v62  ;;  %v2735_v62 = vld [vmem:[#allocation12 + $0x180] sm:$0xff]  ;;  %v2764_v1 = vld [vmem:[#allocation12 + $0x268] sm:$0xff] }
 0x269   : > { %v8085_v61 = vpack.c.bf16 %v2735_v62, %v2730_v58  ;;  %v1438_v29 = vld [vmem:[#allocation7 + $0x9f0] sm:$0xff]  ;;  %v1443_v58 = vld [vmem:[#allocation7 + $0xa18] sm:$0xff]  ;;  %v1448_v62 = vld [vmem:[#allocation7 + $0xa40] sm:$0xff] }
 0x26a   : > { %7752 = vmatpush1.bf16.msra.mxu0 %v7751_v17  ;;  %7438 = vmatmul.mubr.f32.vlgmr.msra.gmra.mrb[48].mxu1 %v11041_v50  ;;  %v1407_v17 = vld [vmem:[#allocation7 + $0x8f8] sm:$0xff] }
 0x26b   : > { %7754 = vmatprep.subr.bf16.mxu0 %v7753_v13  ;;  %7440 = vmatprep.mubr.f32.mxu1 %v11049_v45  ;;  %v8083_v13 = vpack.c.bf16 %v2724_v49, %v2719_v14  ;;  %v7767_v30 = vpack.c.bf16 %v1407_v17, %v1402_v3  ;;  %v7777_v14 = vpack.c.bf16 %v1438_v29, %v1433_v2  ;;  %v1432_v49 = vld [vmem:[#allocation7 + $0x9c0] sm:$0xff]  ;;  %v2759_v17 = vld [vmem:[#allocation12 + $0x240] sm:$0xff]  ;;  %v2784_v29 = vld [vmem:[#allocation12 + $0x308] sm:$0xff] }
 0x26c   : > { %8072 = vmatpush1.bf16.msra.mxu1 %v8071_v24  ;;  %v2740_v24 = vld [vmem:[#allocation12 + $0x1a8] sm:$0xff]  ;;  %v2779_v2 = vld [vmem:[#allocation12 + $0x2e0] sm:$0xff] }
 0x26d   : > { %8074 = vmatprep.subr.bf16.mxu1 %v8073_v11  ;;  %v2745_v11 = vld [vmem:[#allocation12 + $0x1d0] sm:$0xff] }
 0x26e   : > { %7756 = vmatpush1.bf16.msra.mxu0 %v7755_v51  ;;  %7441 = vmatmul.mubr.f32.gmra.mrb[50].mxu1 %v11056_v15  ;;  %v1417_v51 = vld [vmem:[#allocation7 + $0x948] sm:$0xff]  ;;  %v8089_v10 = vpack.c.bf16 %v2745_v11, %v2740_v24  ;;  %v1458_v11 = vld [vmem:[#allocation7 + $0xa90] sm:$0xff] }
 0x26f   : > { %7758 = vmatprep.subr.bf16.mxu0 %v7757_v16  ;;  %7443 = vmatprep.mubr.f32.mxu1 %v11061_v47  ;;  %v8087_v16 = vpack.c.bf16 %v2734_v57, %v2729_v43  ;;  %v7771_v32 = vpack.c.bf16 %v1417_v51, %v1412_v44  ;;  %v7781_v43 = vpack.c.bf16 %v1448_v62, %v1443_v58  ;;  %v1442_v57 = vld [vmem:[#allocation7 + $0xa10] sm:$0xff]  ;;  %v1453_v24 = vld [vmem:[#allocation7 + $0xa68] sm:$0xff]  ;;  %v2769_v51 = vld [vmem:[#allocation12 + $0x290] sm:$0xff] }
 0x270   : > { %8076 = vmatpush1.bf16.msra.mxu1 %v8075_v18  ;;  %v2750_v18 = vld [vmem:[#allocation12 + $0x1f8] sm:$0xff]  ;;  %v2789_v58 = vld [vmem:[#allocation12 + $0x330] sm:$0xff] }
 0x271   : > { %8078 = vmatprep.subr.bf16.mxu1 %v8077_v27  ;;  %v2755_v27 = vld [vmem:[#allocation12 + $0x220] sm:$0xff]  ;;  %v2794_v62 = vld [vmem:[#allocation12 + $0x358] sm:$0xff] }
 0x272   : > { %7760 = vmatpush1.bf16.msra.mxu0 %v7759_v37  ;;  %7444 = vmatmul.mubr.f32.gmra.mrb[52].mxu1 %v11069_v59  ;;  %v1427_v37 = vld [vmem:[#allocation7 + $0x998] sm:$0xff]  ;;  %v8093_v7 = vpack.c.bf16 %v2755_v27, %v2750_v18  ;;  %v1468_v27 = vld [vmem:[#allocation7 + $0xae0] sm:$0xff] }
 0x273   : > { %7762 = vmatprep.subr.bf16.mxu0 %v7761_v8  ;;  %7446 = vmatprep.mubr.f32.mxu1 %v11074_v53  ;;  %v8091_v8 = vpack.c.bf16 %v2744_v41, %v2739_v5  ;;  %v7775_v9 = vpack.c.bf16 %v1427_v37, %v1422_v63  ;;  %v7785_v5 = vpack.c.bf16 %v1458_v11, %v1453_v24  ;;  %v1452_v41 = vld [vmem:[#allocation7 + $0xa60] sm:$0xff]  ;;  %v1463_v18 = vld [vmem:[#allocation7 + $0xab8] sm:$0xff]  ;;  %v12820_v63 = vld [vmem:[#allocation58_spill] sm:$0xff] }
 0x274   : > { %8080 = vmatpush1.bf16.msra.mxu1 %v8079_v48  ;;  %v2760_v48 = vld [vmem:[#allocation12 + $0x248] sm:$0xff]  ;;  %v2799_v24 = vld [vmem:[#allocation12 + $0x380] sm:$0xff] }
 0x275   : > { %8082 = vmatprep.subr.bf16.mxu1 %v8081_v33  ;;  %v2765_v33 = vld [vmem:[#allocation12 + $0x270] sm:$0xff]  ;;  %v2804_v11 = vld [vmem:[#allocation12 + $0x3a8] sm:$0xff] }
 0x276   : > { %7764 = vmatpush1.bf16.msra.mxu0 %v7763_v22  ;;  %7447 = vmatmul.mubr.f32.gmra.mrb[54].mxu1 %v11078_v6  ;;  %v1437_v22 = vld [vmem:[#allocation7 + $0x9e8] sm:$0xff]  ;;  %v8097_v3 = vpack.c.bf16 %v2765_v33, %v2760_v48  ;;  %v1467_v48 = vld [vmem:[#allocation7 + $0xad8] sm:$0xff] }
 0x277   : > { %7766 = vmatprep.subr.bf16.mxu0 %v7765_v31  ;;  %v8095_v31 = vpack.c.bf16 %v2754_v34, %v2749_v19  ;;  %v7779_v0 = vpack.c.bf16 %v1437_v22, %v1432_v49  ;;  %v2795_v19 = vld [vmem:[#allocation12 + $0x360] sm:$0xff]  ;;  %v7789_v34 = vpack.c.bf16 %v1468_v27, %v1463_v18  ;;  %v8107_v49 = vpack.c.bf16 %v2784_v29, %v2779_v2  ;;  %v2809_v18 = vld [vmem:[#allocation12 + $0x3d0] sm:$0xff]  ;;  %v2814_v27 = vld [vmem:[#allocation12 + $0x3f8] sm:$0xff] }
 0x278   : > { %8084 = vmatpush1.bf16.msra.mxu1 %v8083_v13  ;;  %v2770_v13 = vld [vmem:[#allocation12 + $0x298] sm:$0xff]  ;;  %v2825_v2 = vld [vmem:[#allocation12 + $0x450] sm:$0xff] }
 0x279   : > { %8086 = vmatprep.subr.bf16.mxu1 %v8085_v61  ;;  %v2775_v61 = vld [vmem:[#allocation12 + $0x2c0] sm:$0xff] }
 0x27a   : > { %7768 = vmatpush1.bf16.msra.mxu0 %v7767_v30  ;;  %v1447_v30 = vld [vmem:[#allocation7 + $0xa38] sm:$0xff]  ;;  %v8101_v44 = vpack.c.bf16 %v2775_v61, %v2770_v13  ;;  %v1473_v33 = vld [vmem:[#allocation7 + $0xb08] sm:$0xff] }
 0x27b   : > { %7770 = vmatprep.subr.bf16.mxu0 %v7769_v23  ;;  %v8099_v23 = vpack.c.bf16 %v2764_v1, %v2759_v17  ;;  %v7783_v12 = vpack.c.bf16 %v1447_v30, %v1442_v57  ;;  %v2805_v17 = vld [vmem:[#allocation12 + $0x3b0] sm:$0xff]  ;;  %v1477_v13 = vld [vmem:[#allocation7 + $0xb28] sm:$0xff]  ;;  %v8111_v57 = vpack.c.bf16 %v2794_v62, %v2789_v58 }
 0x27c   : > { %8088 = vmatpush1.bf16.msra.mxu1 %v8087_v16  ;;  %v2780_v16 = vld [vmem:[#allocation12 + $0x2e8] sm:$0xff]  ;;  %v2835_v58 = vld [vmem:[#allocation12 + $0x4a0] sm:$0xff] }
 0x27d   : > { %8090 = vmatprep.subr.bf16.mxu1 %v8089_v10  ;;  %v2785_v10 = vld [vmem:[#allocation12 + $0x310] sm:$0xff] }
 0x27e   : > { %7772 = vmatpush1.bf16.msra.mxu0 %v7771_v32  ;;  %v1457_v32 = vld [vmem:[#allocation7 + $0xa88] sm:$0xff]  ;;  %v8105_v37 = vpack.c.bf16 %v2785_v10, %v2780_v16  ;;  %v1483_v61 = vld [vmem:[#allocation7 + $0xb58] sm:$0xff] }
 0x27f   : > { %7774 = vmatprep.subr.bf16.mxu0 %v7773_v60  ;;  %v8103_v60 = vpack.c.bf16 %v2774_v52, %v2769_v51  ;;  %v2815_v51 = vld [vmem:[#allocation12 + $0x400] sm:$0xff]  ;;  %v1487_v16 = vld [vmem:[#allocation7 + $0xb78] sm:$0xff] }
 0x280   : > { %8092 = vmatpush1.bf16.msra.mxu1 %v8091_v8  ;;  %v7787_v8 = vpack.c.bf16 %v1457_v32, %v1452_v41  ;;  %v1493_v10 = vld [vmem:[#allocation7 + $0xba8] sm:$0xff]  ;;  %v8115_v41 = vpack.c.bf16 %v2804_v11, %v2799_v24  ;;  %v2845_v24 = vld [vmem:[#allocation12 + $0x4f0] sm:$0xff] }
 0x281   : > { %8094 = vmatprep.subr.bf16.mxu1 %v8093_v7  ;;  %v2790_v7 = vld [vmem:[#allocation12 + $0x338] sm:$0xff] }
 0x282   : > { %7776 = vmatpush1.bf16.msra.mxu0 %v7775_v9  ;;  %v1462_v9 = vld [vmem:[#allocation7 + $0xab0] sm:$0xff]  ;;  %v8109_v22 = vpack.c.bf16 %v2795_v19, %v2790_v7  ;;  %v1497_v7 = vld [vmem:[#allocation7 + $0xbc8] sm:$0xff]  ;;  %v1503_v19 = vld [vmem:[#allocation7 + $0xbf8] sm:$0xff] }
 0x283   : > { %7778 = vmatprep.subr.bf16.mxu0 %v7777_v14  ;;  %v1478_v14 = vld [vmem:[#allocation7 + $0xb30] sm:$0xff] }
 0x284   : > { %8096 = vmatpush1.bf16.msra.mxu1 %v8095_v31  ;;  %v7791_v31 = vpack.c.bf16 %v1467_v48, %v1462_v9  ;;  %v7793_v1 = vpack.c.bf16 %v1478_v14, %v1473_v33  ;;  %v8119_v9 = vpack.c.bf16 %v2814_v27, %v2809_v18  ;;  %v2819_v33 = vld [vmem:[#allocation12 + $0x420] sm:$0xff]  ;;  %v2824_v14 = vld [vmem:[#allocation12 + $0x448] sm:$0xff]  ;;  %v1284_v18 = vld [vmem:[#allocation7 + $0x520] sm:$0xff] }
 0x285   : > { %8098 = vmatprep.subr.bf16.mxu1 %v8097_v3  ;;  %v2800_v3 = vld [vmem:[#allocation12 + $0x388] sm:$0xff]  ;;  %v1289_v27 = vld [vmem:[#allocation7 + $0x548] sm:$0xff] }
 0x286   : > { %7780 = vmatpush1.bf16.msra.mxu0 %v7779_v0  ;;  %v1472_v0 = vld [vmem:[#allocation7 + $0xb00] sm:$0xff]  ;;  %v8113_v30 = vpack.c.bf16 %v2805_v17, %v2800_v3  ;;  %v1507_v3 = vld [vmem:[#allocation7 + $0xc18] sm:$0xff]  ;;  %v1513_v17 = vld [vmem:[#allocation7 + $0xc48] sm:$0xff] }
 0x287   : > { %7782 = vmatprep.subr.bf16.mxu0 %v7781_v43  ;;  %v1488_v43 = vld [vmem:[#allocation7 + $0xb80] sm:$0xff] }
 0x288   : > { %8100 = vmatpush1.bf16.msra.mxu1 %v8099_v23  ;;  %v7795_v23 = vpack.c.bf16 %v1477_v13, %v1472_v0  ;;  %v7797_v52 = vpack.c.bf16 %v1488_v43, %v1483_v61  ;;  %v8123_v0 = vpack.c.bf16 %v2824_v14, %v2819_v33  ;;  %v2829_v61 = vld [vmem:[#allocation12 + $0x470] sm:$0xff]  ;;  %v2834_v43 = vld [vmem:[#allocation12 + $0x498] sm:$0xff] }
 0x289   : > { %2064 = vmatmul.mubr.f32.vlgmr.msra.gmra.mrb[40].mxu0 %v12820_v63  ;;  %8102 = vmatprep.subr.bf16.mxu1 %v8101_v44  ;;  %v2810_v44 = vld [vmem:[#allocation12 + $0x3d8] sm:$0xff] }
 0x28a   : > { %2069 = vmatprep.mubr.f32.mxu0 %v10806_v4  ;;  %7784 = vmatpush1.bf16.msra.mxu0 %v7783_v12  ;;  %v1482_v12 = vld [vmem:[#allocation7 + $0xb50] sm:$0xff]  ;;  %v8117_v32 = vpack.c.bf16 %v2815_v51, %v2810_v44  ;;  %v1517_v44 = vld [vmem:[#allocation7 + $0xc68] sm:$0xff]  ;;  %v1364_v51 = vld [vmem:[#allocation7 + $0x7a0] sm:$0xff] }
 0x28b   : > { %7786 = vmatprep.subr.bf16.mxu0 %v7785_v5  ;;  %v1498_v5 = vld [vmem:[#allocation7 + $0xbd0] sm:$0xff] }
 0x28c   : > { %8104 = vmatpush1.bf16.msra.mxu1 %v8103_v60  ;;  %v7799_v60 = vpack.c.bf16 %v1487_v16, %v1482_v12  ;;  %v7801_v29 = vpack.c.bf16 %v1498_v5, %v1493_v10  ;;  %v8127_v12 = vpack.c.bf16 %v2834_v43, %v2829_v61  ;;  %v2839_v10 = vld [vmem:[#allocation12 + $0x4c0] sm:$0xff]  ;;  %v2844_v5 = vld [vmem:[#allocation12 + $0x4e8] sm:$0xff]  ;;  %v1324_v43 = vld [vmem:[#allocation7 + $0x660] sm:$0xff] }
 0x28d   : > { %2070 = vmatmul.mubr.f32.gmra.mrb[42].mxu0 %v10816_v35  ;;  %8106 = vmatprep.subr.bf16.mxu1 %v8105_v37  ;;  %v2820_v37 = vld [vmem:[#allocation12 + $0x428] sm:$0xff] }
 0x28e   : > { %2075 = vmatprep.mubr.f32.mxu0 %v10839_v39  ;;  %7788 = vmatpush1.bf16.msra.mxu0 %v7787_v8  ;;  %v1492_v8 = vld [vmem:[#allocation7 + $0xba0] sm:$0xff]  ;;  %v8121_v48 = vpack.c.bf16 %v2825_v2, %v2820_v37  ;;  %v1379_v37 = vld [vmem:[#allocation7 + $0x818] sm:$0xff]  ;;  %v8131_v2 = vpack.c.bf16 %v2844_v5, %v2839_v10  ;;  %v1434_v10 = vld [vmem:[#allocation7 + $0x9d0] sm:$0xff] }
 0x28f   : > { %7790 = vmatprep.subr.bf16.mxu0 %v7789_v34  ;;  %v1508_v34 = vld [vmem:[#allocation7 + $0xc20] sm:$0xff]  ;;  %v1439_v5 = vld [vmem:[#allocation7 + $0x9f8] sm:$0xff] }
 0x290   : > { %8108 = vmatpush1.bf16.msra.mxu1 %v8107_v49  ;;  %v7803_v49 = vpack.c.bf16 %v1497_v7, %v1492_v8  ;;  %v7805_v62 = vpack.c.bf16 %v1508_v34, %v1503_v19  ;;  %v7847_v8 = vpack.c.bf16 %v1289_v27, %v1284_v18  ;;  %v1294_v19 = vld [vmem:[#allocation7 + $0x570] sm:$0xff]  ;;  %v1299_v34 = vld [vmem:[#allocation7 + $0x598] sm:$0xff]  ;;  %v7873_v18 = vpack.c.bf16 %v1439_v5, %v1434_v10  ;;  %v2762_v10 = vld [vmem:[#allocation12 + $0x258] sm:$0xff] }
 0x291   : > { %2076 = vmatmul.mubr.f32.gmra.mrb[44].mxu0 %v10845_v42  ;;  %8110 = vmatprep.subr.bf16.mxu1 %v8109_v22  ;;  %v2830_v22 = vld [vmem:[#allocation12 + $0x478] sm:$0xff]  ;;  %v7851_v33 = vpack.c.bf16 %v1299_v34, %v1294_v19  ;;  %v1359_v27 = vld [vmem:[#allocation7 + $0x778] sm:$0xff]  ;;  %v2687_v19 = vld [vmem:[#allocation12] sm:$0xff] }
 0x292   : > { %2081 = vmatprep.mubr.f32.mxu0 %v10875_v36  ;;  %7792 = vmatpush1.bf16.msra.mxu0 %v7791_v31  ;;  %v1502_v31 = vld [vmem:[#allocation7 + $0xbf0] sm:$0xff]  ;;  %v8125_v13 = vpack.c.bf16 %v2835_v58, %v2830_v22  ;;  %v1309_v22 = vld [vmem:[#allocation7 + $0x5e8] sm:$0xff] }
 0x293   : > { %7794 = vmatprep.subr.bf16.mxu0 %v7793_v1  ;;  %v1518_v1 = vld [vmem:[#allocation7 + $0xc70] sm:$0xff] }
 0x294   : > { %8112 = vmatpush1.bf16.msra.mxu1 %v8111_v57  ;;  %v7807_v57 = vpack.c.bf16 %v1507_v3, %v1502_v31  ;;  %v7809_v11 = vpack.c.bf16 %v1518_v1, %v1513_v17  ;;  %v1394_v58 = vld [vmem:[#allocation7 + $0x890] sm:$0xff]  ;;  %v1404_v1 = vld [vmem:[#allocation7 + $0x8e0] sm:$0xff] }
 0x295   : > { %2082 = vmatmul.mubr.f32.gmra.mrb[46].mxu0 %v10885_v38  ;;  %8114 = vmatprep.subr.bf16.mxu1 %v8113_v30  ;;  %v2840_v30 = vld [vmem:[#allocation12 + $0x4c8] sm:$0xff] }
 0x296   : > { %2087 = vmatprep.mubr.f32.mxu0 %v10909_v46  ;;  %7796 = vmatpush1.bf16.msra.mxu0 %v7795_v23  ;;  %v1512_v23 = vld [vmem:[#allocation7 + $0xc40] sm:$0xff]  ;;  %v8129_v16 = vpack.c.bf16 %v2845_v24, %v2840_v30  ;;  %v1314_v17 = vld [vmem:[#allocation7 + $0x610] sm:$0xff]  ;;  %v1419_v30 = vld [vmem:[#allocation7 + $0x958] sm:$0xff] }
 0x297   : > { %7798 = vmatprep.subr.bf16.mxu0 %v7797_v52  ;;  %v1369_v52 = vld [vmem:[#allocation7 + $0x7c8] sm:$0xff]  ;;  %v2692_v34 = vld [vmem:[#allocation12 + $0x28] sm:$0xff] }
 0x298   : > { %8116 = vmatpush1.bf16.msra.mxu1 %v8115_v41  ;;  %v7811_v41 = vpack.c.bf16 %v1517_v44, %v1512_v23  ;;  %v1334_v23 = vld [vmem:[#allocation7 + $0x6b0] sm:$0xff]  ;;  %v1424_v44 = vld [vmem:[#allocation7 + $0x980] sm:$0xff] }
 0x299   : > { %2088 = vmatmul.mubr.f32.gmra.mrb[48].mxu0 %v10918_v26  ;;  %8118 = vmatprep.subr.bf16.mxu1 %v8117_v32  ;;  %v7845_v32 = vpack.c.bf16 %v1369_v52, %v1364_v51  ;;  %v1429_v51 = vld [vmem:[#allocation7 + $0x9a8] sm:$0xff] }
 0x29a   : > { %2093 = vmatprep.mubr.f32.mxu0 %v10942_v40  ;;  %7800 = vmatpush1.bf16.msra.mxu0 %v7799_v60  ;;  %v1374_v60 = vld [vmem:[#allocation7 + $0x7f0] sm:$0xff] }
 0x29b   : > { %7802 = vmatprep.subr.bf16.mxu0 %v7801_v29  ;;  %v12821_v29 = vld [vmem:[#allocation30_spill] sm:$0xff]  ;;  %v7849_v7 = vpack.c.bf16 %v1379_v37, %v1374_v60  ;;  %v2688_v37 = vld [vmem:[#allocation12 + $0x8] sm:$0xff] }
 0x29c   : > { %8120 = vmatpush1.bf16.msra.mxu1 %v8119_v9  ;;  %v1384_v9 = vld [vmem:[#allocation7 + $0x840] sm:$0xff]  ;;  %v2855_v60 = vld [vmem:[#allocation12 + $0x540] sm:$0xff] }
 0x29d   : > { %2094 = vmatmul.mubr.f32.gmra.mrb[50].mxu0 %v10951_v21  ;;  %8122 = vmatprep.subr.bf16.mxu1 %v8121_v48  ;;  %v1389_v48 = vld [vmem:[#allocation7 + $0x868] sm:$0xff] }
 0x29e   : > { %2099 = vmatprep.mubr.f32.mxu0 %v10975_v20  ;;  %7804 = vmatpush1.bf16.msra.mxu0 %v7803_v49  ;;  %v7853_v14 = vpack.c.bf16 %v1389_v48, %v1384_v9  ;;  %v1304_v49 = vld [vmem:[#allocation7 + $0x5c0] sm:$0xff]  ;;  %v2703_v48 = vld [vmem:[#allocation12 + $0x80] sm:$0xff] }
 0x29f   : > { %7806 = vmatprep.subr.bf16.mxu0 %v7805_v62  ;;  %v1399_v62 = vld [vmem:[#allocation7 + $0x8b8] sm:$0xff]  ;;  %v7855_v31 = vpack.c.bf16 %v1309_v22, %v1304_v49  ;;  %v2698_v9 = vld [vmem:[#allocation12 + $0x58] sm:$0xff] }
 0x2a0   : > { %8124 = vmatpush1.bf16.msra.mxu1 %v8123_v0  ;;  %v7857_v3 = vpack.c.bf16 %v1399_v62, %v1394_v58  ;;  %v1409_v0 = vld [vmem:[#allocation7 + $0x908] sm:$0xff]  ;;  %v2708_v22 = vld [vmem:[#allocation12 + $0xa8] sm:$0xff]  ;;  %v2713_v58 = vld [vmem:[#allocation12 + $0xd0] sm:$0xff] }
 0x2a1   : > { %2100 = vmatmul.mubr.f32.gmra.mrb[52].mxu0 %v10984_v56  ;;  %8126 = vmatprep.subr.bf16.mxu1 %v8125_v13  ;;  %v7861_v61 = vpack.c.bf16 %v1409_v0, %v1404_v1  ;;  %v2702_v49 = vld [vmem:[#allocation12 + $0x78] sm:$0xff]  ;;  %v2717_v0 = vld [vmem:[#allocation12 + $0xf0] sm:$0xff] }
 0x2a2   : > { %2105 = vmatprep.mubr.f32.mxu0 %v11005_v28  ;;  %7808 = vmatpush1.bf16.msra.mxu0 %v7807_v57  ;;  %v1414_v57 = vld [vmem:[#allocation7 + $0x930] sm:$0xff] }
 0x2a3   : > { %7810 = vmatprep.subr.bf16.mxu0 %v7809_v11  ;;  %v7865_v11 = vpack.c.bf16 %v1419_v30, %v1414_v57  ;;  %v2738_v57 = vld [vmem:[#allocation12 + $0x198] sm:$0xff] }
 0x2a4   : > { %8128 = vmatpush1.bf16.msra.mxu1 %v8127_v12  ;;  %v7869_v12 = vpack.c.bf16 %v1429_v51, %v1424_v44  ;;  %v2747_v51 = vld [vmem:[#allocation12 + $0x1e0] sm:$0xff] }
 0x2a5   : > { %2106 = vmatmul.mubr.f32.gmra.mrb[54].mxu0 %v12821_v29  ;;  %8130 = vmatprep.subr.bf16.mxu1 %v8129_v16  ;;  %v1344_v16 = vld [vmem:[#allocation7 + $0x700] sm:$0xff] }
 0x2a6   : > { %7812 = vmatpush1.bf16.msra.mxu0 %v7811_v41  ;;  %2176 = vmatprep.mubr.f32.mxu0 %v12818_v55 }
 0x2a7   : > { %7846 = vmatprep.subr.bf16.mxu0 %v7845_v32  ;;  %v2850_v32 = vld [vmem:[#allocation12 + $0x518] sm:$0xff] }
 0x2a8   : > { %8132 = vmatpush1.bf16.msra.mxu1 %v8131_v2  ;;  %v2693_v2 = vld [vmem:[#allocation12 + $0x30] sm:$0xff] }
 0x2a9   : > { %2177 = vmatmul.mubr.f32.vlgmr.msra.gmra.mrb[40].mxu0 %v11023_v25  ;;  %v1319_v25 = vld [vmem:[#allocation7 + $0x638] sm:$0xff] }
 0x2aa   : > { %7848 = vmatpush3.bf16.msra.mxu0 %v7847_v8  ;;  %2182 = vmatprep.mubr.f32.mxu0 %v12818_v55  ;;  %v7859_v13 = vpack.c.bf16 %v1319_v25, %v1314_v17  ;;  %v8133_v8 = vpack.c.bf16 %v2855_v60, %v2850_v32  ;;  %v2718_v17 = vld [vmem:[#allocation12 + $0xf8] sm:$0xff]  ;;  %v2723_v25 = vld [vmem:[#allocation12 + $0x120] sm:$0xff]  ;;  %v2773_v32 = vld [vmem:[#allocation12 + $0x2b0] sm:$0xff] }
 0x2ab   : > { %7850 = vmatprep.subr.bf16.mxu0 %v7849_v7  ;;  %v7921_v1 = vpack.c.bf16 %v2723_v25, %v2718_v17  ;;  %v2802_v17 = vld [vmem:[#allocation12 + $0x398] sm:$0xff] }
 0x2ac   : > { %8134 = vmatprep.subr.bf16.mxu1 %v8133_v8 }
 0x2ad   : > { %2183 = vmatmul.mubr.f32.gmra.mrb[42].mxu0 %v11041_v50  ;;  %v1329_v50 = vld [vmem:[#allocation7 + $0x688] sm:$0xff] }
 0x2ae   : > { %7852 = vmatpush3.bf16.msra.mxu0 %v7851_v33  ;;  %2188 = vmatprep.mubr.f32.mxu0 %v12818_v55  ;;  %v7863_v24 = vpack.c.bf16 %v1329_v50, %v1324_v43  ;;  %v7911_v33 = vpack.c.bf16 %v2692_v34, %v2687_v19  ;;  %v2727_v50 = vld [vmem:[#allocation12 + $0x140] sm:$0xff]  ;;  %v2788_v34 = vld [vmem:[#allocation12 + $0x328] sm:$0xff] }
 0x2af   : > { %7854 = vmatprep.subr.bf16.mxu0 %v7853_v14  ;;  %v7913_v14 = vpack.c.bf16 %v2703_v48, %v2698_v9  ;;  %v2793_v9 = vld [vmem:[#allocation12 + $0x350] sm:$0xff] }
 0x2b1   : > { %2189 = vmatmul.mubr.f32.gmra.mrb[44].mxu0 %v11049_v45  ;;  %v1339_v45 = vld [vmem:[#allocation7 + $0x6d8] sm:$0xff] }
 0x2b2   : > { %7856 = vmatpush3.bf16.msra.mxu0 %v7855_v31  ;;  %2194 = vmatprep.mubr.f32.mxu0 %v12818_v55  ;;  %v7867_v52 = vpack.c.bf16 %v1339_v45, %v1334_v23  ;;  %v7917_v31 = vpack.c.bf16 %v2713_v58, %v2708_v22  ;;  %v2748_v23 = vld [vmem:[#allocation12 + $0x1e8] sm:$0xff]  ;;  %v2803_v58 = vld [vmem:[#allocation12 + $0x3a0] sm:$0xff] }
 0x2b3   : > { %7858 = vmatprep.subr.bf16.mxu0 %v7857_v3  ;;  %v2707_v3 = vld [vmem:[#allocation12 + $0xa0] sm:$0xff] }
 0x2b5   : > { %2195 = vmatmul.mubr.f32.gmra.mrb[46].mxu0 %v11056_v15  ;;  %v1349_v15 = vld [vmem:[#allocation7 + $0x728] sm:$0xff] }
 0x2b6   : > { %7860 = vmatpush3.bf16.msra.mxu0 %v7859_v13  ;;  %2200 = vmatprep.mubr.f32.mxu0 %v12818_v55  ;;  %v7871_v41 = vpack.c.bf16 %v1349_v15, %v1344_v16  ;;  %v2728_v13 = vld [vmem:[#allocation12 + $0x148] sm:$0xff]  ;;  %v2763_v16 = vld [vmem:[#allocation12 + $0x260] sm:$0xff]  ;;  %v2757_v15 = vld [vmem:[#allocation12 + $0x230] sm:$0xff] }
 0x2b7   : > { %7862 = vmatprep.subr.bf16.mxu0 %v7861_v61 }
 0x2b9   : > { %2201 = vmatmul.mubr.f32.gmra.mrb[48].mxu0 %v11061_v47  ;;  %v1354_v47 = vld [vmem:[#allocation7 + $0x750] sm:$0xff] }
 0x2ba   : > { %7864 = vmatpush3.bf16.msra.mxu0 %v7863_v24  ;;  %2206 = vmatprep.mubr.f32.mxu0 %v12818_v55  ;;  %v7875_v7 = vpack.c.bf16 %v1359_v27, %v1354_v47  ;;  %v2767_v47 = vld [vmem:[#allocation12 + $0x280] sm:$0xff]  ;;  %v2772_v27 = vld [vmem:[#allocation12 + $0x2a8] sm:$0xff] }
 0x2bb   : > { %7866 = vmatprep.subr.bf16.mxu0 %v7865_v11  ;;  %v2737_v11 = vld [vmem:[#allocation12 + $0x190] sm:$0xff] }
 0x2bd   : > { %2207 = vmatmul.mubr.f32.gmra.mrb[50].mxu0 %v11069_v59  ;;  %v7909_v59 = vpack.c.bf16 %v2693_v2, %v2688_v37  ;;  %v2778_v37 = vld [vmem:[#allocation12 + $0x2d8] sm:$0xff]  ;;  %v2783_v2 = vld [vmem:[#allocation12 + $0x300] sm:$0xff] }
 0x2be   : > { %7868 = vmatpush3.bf16.msra.mxu0 %v7867_v52  ;;  %2212 = vmatprep.mubr.f32.mxu0 %v12818_v55 }
 0x2bf   : > { %7870 = vmatprep.subr.bf16.mxu0 %v7869_v12  ;;  %v2758_v12 = vld [vmem:[#allocation12 + $0x238] sm:$0xff] }
 0x2c1   : > { %2213 = vmatmul.mubr.f32.gmra.mrb[52].mxu0 %v11074_v53  ;;  %v2697_v53 = vld [vmem:[#allocation12 + $0x50] sm:$0xff] }
 0x2c2   : > { %7872 = vmatpush3.bf16.msra.mxu0 %v7871_v41  ;;  %2218 = vmatprep.mubr.f32.mxu0 %v12818_v55  ;;  %v7915_v62 = vpack.c.bf16 %v2702_v49, %v2697_v53  ;;  %v2768_v41 = vld [vmem:[#allocation12 + $0x288] sm:$0xff]  ;;  %v2787_v53 = vld [vmem:[#allocation12 + $0x320] sm:$0xff] }
 0x2c3   : > { %7874 = vmatprep.subr.bf16.mxu0 %v7873_v18  ;;  %v2792_v49 = vld [vmem:[#allocation12 + $0x348] sm:$0xff] }
 0x2c5   : > { %2219 = vmatmul.mubr.f32.gmra.mrb[54].mxu0 %v11078_v6  ;;  %v2712_v6 = vld [vmem:[#allocation12 + $0xc8] sm:$0xff] }
 0x2c6   : > { %7876 = vmatpush3.bf16.msra.mxu0 %v7875_v7  ;;  %2394 = vmatprep.mubr.f32.mxu0 %v12819_v54  ;;  %v7919_v54 = vpack.c.bf16 %v2712_v6, %v2707_v3  ;;  %v7943_v7 = vpack.c.bf16 %v2772_v27, %v2767_v47  ;;  %v2797_v6 = vld [vmem:[#allocation12 + $0x370] sm:$0xff] }
 0x2c7   : > { %7910 = vmatprep.subr.bf16.mxu0 %v7909_v59  ;;  %v2777_v59 = vld [vmem:[#allocation12 + $0x2d0] sm:$0xff] }
 0x2c9   : > { %2395 = vmatmul.mubr.f32.vlgmr.msra.gmra.mrb[56].mxu0 %v12820_v63  ;;  %v2722_v63 = vld [vmem:[#allocation12 + $0x118] sm:$0xff] }
 0x2ca   : > { %2399 = vmatprep.mubr.f32.mxu0 %v10806_v4  ;;  %7912 = vmatpush1.bf16.msra.mxu0 %v7911_v33  ;;  %v2733_v4 = vld [vmem:[#allocation12 + $0x170] sm:$0xff]  ;;  %v7923_v61 = vpack.c.bf16 %v2722_v63, %v2717_v0  ;;  %v7955_v63 = vpack.c.bf16 %v2802_v17, %v2797_v6  ;;  %v2860_v6 = vld [vmem:[#allocation12 + $0x568] sm:$0xff] }
 0x2cb   : > { %7914 = vmatprep.subr.bf16.mxu0 %v7913_v14  ;;  %v7925_v43 = vpack.c.bf16 %v2733_v4, %v2728_v13  ;;  %v7949_v14 = vpack.c.bf16 %v2793_v9, %v2788_v34  ;;  %v2807_v4 = vld [vmem:[#allocation12 + $0x3c0] sm:$0xff]  ;;  %v11239_v34 = vld [vmem:[#allocation12 + $0x528] sm:$0xff]  ;;  %v2849_v9 = vld [vmem:[#allocation12 + $0x510] sm:$0xff] }
 0x2cc   : > { %v2865_v17 = vld [vmem:[#allocation12 + $0x590] sm:$0xff] }
 0x2cd   : > { %2400 = vmatmul.mubr.f32.gmra.mrb[58].mxu0 %v10816_v35  ;;  %v2732_v35 = vld [vmem:[#allocation12 + $0x168] sm:$0xff] }
 0x2ce   : > { %2404 = vmatprep.mubr.f32.mxu0 %v10839_v39  ;;  %7916 = vmatpush1.bf16.msra.mxu0 %v7915_v62  ;;  %v2743_v39 = vld [vmem:[#allocation12 + $0x1c0] sm:$0xff]  ;;  %v7927_v30 = vpack.c.bf16 %v2732_v35, %v2727_v50  ;;  %v11195_v50 = vld [vmem:[#allocation9] sm:$0x1f] }
 0x2cf   : > { %7918 = vmatprep.subr.bf16.mxu0 %v7917_v31  ;;  %v7929_v24 = vpack.c.bf16 %v2743_v39, %v2738_v57  ;;  %v7951_v31 = vpack.c.bf16 %v2792_v49, %v2787_v53  ;;  %v2818_v35 = vld [vmem:[#allocation12 + $0x418] sm:$0xff]  ;;  %v2823_v57 = vld [vmem:[#allocation12 + $0x440] sm:$0xff] }
 0x2d0   : > { %v2854_v53 = vld [vmem:[#allocation12 + $0x538] sm:$0xff] }
 0x2d1   : > { %2405 = vmatmul.mubr.f32.gmra.mrb[60].mxu0 %v10845_v42  ;;  %v2742_v42 = vld [vmem:[#allocation12 + $0x1b8] sm:$0xff] }
 0x2d2   : > { %2409 = vmatprep.mubr.f32.mxu0 %v10875_v36  ;;  %7920 = vmatpush1.bf16.msra.mxu0 %v7919_v54  ;;  %v2753_v36 = vld [vmem:[#allocation12 + $0x210] sm:$0xff]  ;;  %v7931_v45 = vpack.c.bf16 %v2742_v42, %v2737_v11  ;;  %v2808_v54 = vld [vmem:[#allocation12 + $0x3c8] sm:$0xff]  ;;  %v7961_v42 = vpack.c.bf16 %v2823_v57, %v2818_v35  ;;  %v11241_v49 = vld [vmem:[#allocation12 + $0x558] sm:$0xff] }
 0x2d3   : > { %7922 = vmatprep.subr.bf16.mxu0 %v7921_v1  ;;  %v11164_v44 = vpop.f32.mrb[24].mxu0  ;;  %v2813_v1 = vld [vmem:[#allocation12 + $0x3f0] sm:$0xff]  ;;  %v11260_v35 = vld [vmem:[#allocation12 + $0x560] sm:$0xff]  ;;  %v11262_v57 = vld [vmem:[#allocation12 + $0x588] sm:$0xff] }
 0x2d4   : > { %v11166_v52 = vpop.f32.mrb[25].mxu0  ;;  %v7957_v13 = vpack.c.bf16 %v2813_v1, %v2808_v54  ;;  %v11249_v54 = vld [vmem:[#allocation12 + $0x550] sm:$0xff] }
 0x2d5   : > { %2410 = vmatmul.mubr.f32.gmra.mrb[62].mxu0 %v10885_v38  ;;  %v7933_v38 = vpack.c.bf16 %v2753_v36, %v2748_v23  ;;  %v2817_v23 = vld [vmem:[#allocation12 + $0x410] sm:$0xff]  ;;  %v2822_v36 = vld [vmem:[#allocation12 + $0x438] sm:$0xff] }
 0x2d6   : > { %2414 = vmatprep.mubr.f32.mxu0 %v10909_v46  ;;  %7924 = vmatpush1.bf16.msra.mxu0 %v7923_v61  ;;  %v2752_v46 = vld [vmem:[#allocation12 + $0x208] sm:$0xff] }
 0x2d7   : > { %7926 = vmatprep.subr.bf16.mxu0 %v7925_v43  ;;  %v2812_v61 = vld [vmem:[#allocation12 + $0x3e8] sm:$0xff] }
 0x2d8   : > { %v11170_v5 = vpop.f32.mrb[26].mxu0 }
 0x2d9   : > { %2415 = vmatmul.mubr.f32.gmra.mrb[64].mxu0 %v10918_v26  ;;  %v7935_v26 = vpack.c.bf16 %v2752_v46, %v2747_v51  ;;  %v11172_v18 = vpop.f32.mrb[27].mxu0  ;;  %v11209_v46 = vld [vmem:[#allocation10] sm:$0x1f] }
 0x2da   : > { %2419 = vmatprep.mubr.f32.mxu0 %v10942_v40  ;;  %7928 = vmatpush1.bf16.msra.mxu0 %v7927_v30  ;;  %v7937_v40 = vpack.c.bf16 %v2763_v16, %v2758_v12  ;;  %v7959_v30 = vpack.c.bf16 %v2812_v61, %v2807_v4  ;;  %v2828_v12 = vld [vmem:[#allocation12 + $0x468] sm:$0xff]  ;;  %v2833_v16 = vld [vmem:[#allocation12 + $0x490] sm:$0xff]  ;;  %v11258_v61 = vld [vmem:[#allocation12 + $0x578] sm:$0xff] }
 0x2db   : > { %7930 = vmatprep.subr.bf16.mxu0 %v7929_v24  ;;  %v12822_v24 = vld [vmem:[#allocation26_spill] sm:$0xff]  ;;  %v7965_v27 = vpack.c.bf16 %v2833_v16, %v2828_v12  ;;  %v8135_v12 = vpack.c.bf16 %v2854_v53, %v2849_v9  ;;  %v11295_v9 = vld [vmem:[#allocation12 + $0x5b0] sm:$0xff] }
 0x2dc   : > { %v11201_v11 = vrot.slane %v11195_v50, %v12822_v24  ;;  %v11223_v47 = vrot.slane %v11209_v46, %v12822_v24  ;;  %v3033_v24 = vld [vmem:[#allocation12 + $0xad0] sm:$0xff] }
 0x2dd   : > { %2420 = vmatmul.mubr.f32.gmra.mrb[66].mxu0 %v10951_v21  ;;  %v7939_v21 = vpack.c.bf16 %v2762_v10, %v2757_v15  ;;  %v11176_v60 = vpop.f32.mrb[28].mxu0  ;;  %v2832_v15 = vld [vmem:[#allocation12 + $0x488] sm:$0xff]  ;;  %v7963_v10 = vpack.c.bf16 %v2822_v36, %v2817_v23 }
 0x2de   : > { %2424 = vmatprep.mubr.f32.mxu0 %v10975_v20  ;;  %7932 = vmatpush1.bf16.msra.mxu0 %v7931_v45  ;;  %v7941_v20 = vpack.c.bf16 %v2773_v32, %v2768_v41  ;;  %v11178_v8 = vpop.f32.mrb[29].mxu0  ;;  %v11213_v41 = vld [vmem:[#allocation12 + $0x4b8] sm:$0xff]  ;;  %v11215_v32 = vld [vmem:[#allocation12 + $0x4e0] sm:$0xff]  ;;  %v1620_v1 = vadd.f32 %v11170_v5, %v11201_v11 }
 0x2df   : > { %7934 = vmatprep.subr.bf16.mxu0 %v7933_v38  ;;  %v12823_v38 = vld [vmem:[#allocation27_spill] sm:$0xff] }
 0x2e0   : > { %v11207_v51 = vrot.slane %v11195_v50, %v12823_v38 }
 0x2e1   : > { %2425 = vmatmul.mubr.f32.gmra.mrb[68].mxu0 %v10984_v56  ;;  %v7945_v56 = vpack.c.bf16 %v2783_v2, %v2778_v37  ;;  %v11225_v37 = vld [vmem:[#allocation12 + $0x4d8] sm:$0xff]  ;;  %v11227_v2 = vld [vmem:[#allocation12 + $0x508] sm:$0xff] }
 0x2e2   : > { %2429 = vmatprep.mubr.f32.mxu0 %v11005_v28  ;;  %7936 = vmatpush1.bf16.msra.mxu0 %v7935_v26  ;;  %v2782_v28 = vld [vmem:[#allocation12 + $0x2f8] sm:$0xff]  ;;  %v11181_v19 = vpop.f32.mrb[30].mxu0  ;;  %v1628_v53 = vadd.f32 %v11178_v8, %v11207_v51 }
 0x2e3   : > { %7938 = vmatprep.subr.bf16.mxu0 %v7937_v40  ;;  %v11183_v48 = vpop.f32.mrb[31].mxu0  ;;  %v7947_v33 = vpack.c.bf16 %v2782_v28, %v2777_v59  ;;  %v2827_v40 = vld [vmem:[#allocation12 + $0x460] sm:$0xff]  ;;  %v11235_v28 = vrot.slane %v11209_v46, %v12823_v38  ;;  %v3028_v38 = vld [vmem:[#allocation12 + $0xaa8] sm:$0xff] }
 0x2e5   : > { %2430 = vmatmul.mubr.f32.gmra.mrb[70].mxu0 %v12821_v29  ;;  %v2798_v29 = vld [vmem:[#allocation12 + $0x378] sm:$0xff] }
 0x2e6   : > { %7940 = vmatpush1.bf16.msra.mxu0 %v7939_v21  ;;  %v7953_v3 = vpack.c.bf16 %v2803_v58, %v2798_v29  ;;  %v11217_v21 = vld [vmem:[#allocation12 + $0x4b0] sm:$0xff]  ;;  %v11243_v29 = vld [vmem:[#allocation12 + $0x580] sm:$0xff] }
 0x2e7   : > { %7942 = vmatprep.subr.bf16.mxu0 %v7941_v20  ;;  %v11185_v22 = vpop.f32.mrb[32].mxu0  ;;  %v1614_v20 = vadd.f32 %v11164_v44, %v11201_v11  ;;  %v11237_v44 = vld [vmem:[#allocation12 + $0x500] sm:$0xff]  ;;  %v7977_v16 = vpack.c.bf16 %v11243_v29, %v11241_v49 }
 0x2e8   : > { %v11187_v62 = vpop.f32.mrb[33].mxu0  ;;  %v7975_v4 = vpack.c.bf16 %v11239_v34, %v11237_v44  ;;  %v11363_v44 = vld [vmem:[#allocation12 + $0x658] sm:$0xff]  ;;  %v11365_v34 = vld [vmem:[#allocation12 + $0x680] sm:$0xff] }
 0x2ea   : > { %7944 = vmatpush1.bf16.msra.mxu0 %v7943_v7  ;;  %v11229_v7 = vld [vmem:[#allocation12 + $0x530] sm:$0xff] }
 0x2eb   : > { %7946 = vmatprep.subr.bf16.mxu0 %v7945_v56  ;;  %v1616_v56 = vadd.f32 %v11166_v52, %v11207_v51  ;;  %v7967_v52 = vpack.c.bf16 %v2832_v15, %v2827_v40  ;;  %v8137_v40 = vpack.c.bf16 %v2865_v17, %v2860_v6  ;;  %v11269_v15 = vld [vmem:[#allocation12 + $0x5a8] sm:$0xff] }
 0x2ec   : > { %v11189_v25 = vpop.f32.mrb[34].mxu0 }
 0x2ed   : > { %v11191_v0 = vpop.f32.mrb[35].mxu0 }
 0x2ee   : > { %7948 = vmatpush1.bf16.msra.mxu0 %v7947_v33 }
 0x2ef   : > { %7950 = vmatprep.subr.bf16.mxu0 %v7949_v14 }
 0x2f1   : > { %v11193_v43 = vpop.f32.mrb[36].mxu0 }
 0x2f2   : > { %7952 = vmatpush1.bf16.msra.mxu0 %v7951_v31  ;;  %v11197_v39 = vpop.f32.mrb[37].mxu0  ;;  %v7969_v31 = vpack.c.bf16 %v11215_v32, %v11213_v41  ;;  %v11273_v41 = vld [vmem:[#allocation12 + $0x5b8] sm:$0xff] }
 0x2f3   : > { %7954 = vmatprep.subr.bf16.mxu0 %v7953_v3  ;;  %v7971_v3 = vpack.c.bf16 %v11225_v37, %v11217_v21  ;;  %v7979_v21 = vpack.c.bf16 %v11258_v61, %v11249_v54  ;;  %v11283_v37 = vld [vmem:[#allocation12 + $0x5a0] sm:$0xff]  ;;  %v11396_v54 = vld [vmem:[#allocation12 + $0x6a8] sm:$0xff]  ;;  %v11398_v61 = vld [vmem:[#allocation12 + $0x6d0] sm:$0xff] }
 0x2f6   : > { %7956 = vmatpush1.bf16.msra.mxu0 %v7955_v63  ;;  %v11203_v45 = vpop.f32.mrb[38].mxu0 }
 0x2f7   : > { %7958 = vmatprep.subr.bf16.mxu0 %v7957_v13  ;;  %v11211_v26 = vpop.f32.mrb[39].mxu0  ;;  %v7973_v13 = vpack.c.bf16 %v11229_v7, %v11227_v2  ;;  %v11285_v2 = vld [vmem:[#allocation12 + $0x5c8] sm:$0xff] }
 0x2f8   : > { %v7983_v8 = vpack.c.bf16 %v11285_v2, %v11283_v37  ;;  %v11429_v37 = vld [vmem:[#allocation12 + $0x6f8] sm:$0xff]  ;;  %v11431_v2 = vld [vmem:[#allocation12 + $0x720] sm:$0xff] }
 0x2fa   : > { %7960 = vmatpush1.bf16.msra.mxu0 %v7959_v30  ;;  %v1622_v30 = vadd.f32 %v11172_v18, %v11207_v51 }
 0x2fb   : > { %7962 = vmatprep.subr.bf16.mxu0 %v7961_v42 }
 0x2fc   : > { %v1839_v59 = vpop.f32.mrb[16].mxu1 }
 0x2fd   : > { %v9126_v33 = vadd.f32 %v1839_v59, %v1614_v20  ;;  %v1841_v14 = vpop.f32.mrb[17].mxu1  ;;  %v8139_v20 = vpack.c.bf16 %v11262_v57, %v11260_v35  ;;  %v11315_v57 = vld [vmem:[#allocation12 + $0x620] sm:$0xff] }
 0x2fe   : > { %v9128_v58 = vadd.f32 %v1841_v14, %v1616_v56  ;;  %7964 = vmatpush1.bf16.msra.mxu0 %v7963_v10  ;;  %v11271_v10 = vld [vmem:[#allocation12 + $0x5d0] sm:$0xff]  ;;  %v1626_v56 = vadd.f32 %v11176_v60, %v11201_v11  ;;  %v11297_v14 = vld [vmem:[#allocation12 + $0x5d8] sm:$0xff] }
 0x2ff   : > { %v2607_v63 = vmul.f32 %v9126_v33, %v11223_v47  ;;  %7966 = vmatprep.subr.bf16.mxu0 %v7965_v27  ;;  %vm2540_vm10 = vcmp.ge.f32.partialorder %v9126_v33, 0.0  ;;  %v11281_v27 = vld [vmem:[#allocation12 + $0x5e0] sm:$0xff]  ;;  %v7981_v6 = vpack.c.bf16 %v11271_v10, %v11269_v15  ;;  %v8143_v35 = vpack.c.bf16 %v11297_v14, %v11295_v9 }
 0x300   : > { %v2608_v5 = vmul.f32 %v9128_v58, %v11235_v28  ;;  %v1845_v42 = vpop.f32.mrb[18].mxu1  ;;  %vm2541_vm11 = vcmp.ge.f32.partialorder %v9128_v58, 0.0  ;;  %v8141_v17 = vpack.c.bf16 %v11281_v27, %v11273_v41  ;;  %v1634_v41 = vadd.f32 %v11183_v48, %v11207_v51 }
 0x301   : > { %v9130_v23 = vadd.f32 %v1845_v42, %v1620_v1  ;;  %v1847_v36 = vpop.f32.mrb[19].mxu1  ;;  %v11288_v7 = vsel %vm2540_vm10, %v9126_v33, %v2607_v63  ;;  %v11309_v1 = vld [vmem:[#allocation12 + $0x5f8] sm:$0xff]  ;;  %v1632_v42 = vadd.f32 %v11181_v19, %v11201_v11 }
 0x302   : > { %v9132_v32 = vadd.f32 %v1847_v36, %v1622_v30  ;;  %7968 = vmatpush1.bf16.msra.mxu0 %v7967_v52  ;;  %v11275_v18 = vsel %vm2541_vm11, %v9128_v58, %v2608_v5  ;;  %v11317_v30 = vld [vmem:[#allocation12 + $0x608] sm:$0xff]  ;;  %v11319_v5 = vld [vmem:[#allocation12 + $0x630] sm:$0xff] }
 0x303   : > { %v2612_v59 = vmul.f32 %v9130_v23, %v11223_v47  ;;  %3178 = vmatprep.mubr.f32.mxu0 %v11275_v18  ;;  %3517 = vmatprep.mubr.f32.mxu1 %v11275_v18  ;;  %vm2545_vm13 = vcmp.ge.f32.partialorder %v9130_v23, 0.0 }
 0x304   : > { %v2613_v58 = vmul.f32 %v9132_v32, %v11235_v28  ;;  %v1851_v33 = vpop.f32.mrb[20].mxu1  ;;  %7970 = vmatprep.subr.bf16.mxu0 %v7969_v31  ;;  %3518 = vmatmul.mubr.f32.vlgmr.msra.gmra.mrb[56].mxu1 %v11288_v7  ;;  %vm2546_vm12 = vcmp.ge.f32.partialorder %v9132_v32, 0.0 }
 0x305   : > { %v9134_v60 = vadd.f32 %v1851_v33, %v1626_v56  ;;  %v1853_v52 = vpop.f32.mrb[21].mxu1  ;;  %8136 = vmatpush1.bf16.msra.mxu1 %v8135_v12  ;;  %v11328_v12 = vld [vmem:[#allocation12 + $0x5f0] sm:$0xff]  ;;  %v8145_v56 = vpack.c.bf16 %v11319_v5, %v11317_v30  ;;  %v1638_v33 = vadd.f32 %v11185_v22, %v11201_v11  ;;  %v11374_v5 = vld [vmem:[#allocation12 + $0x640] sm:$0xff] }
 0x306   : > { %v9136_v63 = vadd.f32 %v1853_v52, %v1628_v53  ;;  %7972 = vmatpush1.bf16.msra.mxu0 %v7971_v3  ;;  %v11311_v31 = vsel %vm2546_vm12, %v9132_v32, %v2613_v58  ;;  %8138 = vmatprep.subr.bf16.mxu1 %v8137_v40  ;;  %v11326_v3 = vsel %vm2545_vm13, %v9130_v23, %v2612_v59  ;;  %v11330_v40 = vld [vmem:[#allocation12 + $0x618] sm:$0xff]  ;;  %v2879_v59 = vld [vmem:[#allocation12 + $0x600] sm:$0xff]  ;;  %v11349_v53 = vld [vmem:[#allocation12 + $0x648] sm:$0xff] }
 0x307   : > { %v2617_v36 = vmul.f32 %v9134_v60, %v11223_v47  ;;  %3523 = vmatprep.mubr.f32.mxu1 %v11311_v31  ;;  %7974 = vmatprep.subr.bf16.mxu0 %v7973_v13  ;;  %vm2550_vm15 = vcmp.ge.f32.partialorder %v9134_v60, 0.0  ;;  %v7985_v13 = vpack.c.bf16 %v11315_v57, %v11309_v1  ;;  %v7987_v14 = vpack.c.bf16 %v11330_v40, %v11328_v12  ;;  %v11351_v58 = vld [vmem:[#allocation12 + $0x670] sm:$0xff]  ;;  %v2902_v40 = vld [vmem:[#allocation12 + $0x6b8] sm:$0xff] }
 0x308   : > { %v2618_v32 = vmul.f32 %v9136_v63, %v11235_v28  ;;  %v1857_v27 = vpop.f32.mrb[22].mxu1  ;;  %3524 = vmatmul.mubr.f32.gmra.mrb[58].mxu1 %v11326_v3  ;;  %vm2551_vm14 = vcmp.ge.f32.partialorder %v9136_v63, 0.0  ;;  %v2897_v12 = vld [vmem:[#allocation12 + $0x690] sm:$0xff] }
 0x309   : > { %v9138_v19 = vadd.f32 %v1857_v27, %v1632_v42  ;;  %3179 = vmatmul.mubr.f32.vlgmr.msra.gmra.mrb[72].mxu0 %v11288_v7  ;;  %v1859_v23 = vpop.f32.mrb[23].mxu1  ;;  %8140 = vmatpush1.bf16.msra.mxu1 %v8139_v20  ;;  %v2884_v20 = vld [vmem:[#allocation12 + $0x628] sm:$0xff] }
 0x30a   : > { %v9140_v48 = vadd.f32 %v1859_v23, %v1634_v41  ;;  %3184 = vmatprep.mubr.f32.mxu0 %v11311_v31  ;;  %v11342_v9 = vsel %vm2551_vm14, %v9136_v63, %v2618_v32  ;;  %7976 = vmatpush1.bf16.msra.mxu0 %v7975_v4  ;;  %v11358_v63 = vsel %vm2550_vm15, %v9134_v60, %v2617_v36  ;;  %v11384_v36 = vld [vmem:[#allocation12 + $0x668] sm:$0xff]  ;;  %v2894_v41 = vld [vmem:[#allocation12 + $0x678] sm:$0xff] }
 0x30b   : > { %v2622_v52 = vmul.f32 %v9138_v19, %v11223_v47  ;;  %3529 = vmatprep.mubr.f32.mxu1 %v11342_v9  ;;  %7978 = vmatprep.subr.bf16.mxu0 %v7977_v16  ;;  %v1640_v4 = vadd.f32 %v11187_v62, %v11207_v51  ;;  %vm2555_vm1 = vcmp.ge.f32.partialorder %v9138_v19, 0.0  ;;  %v8147_v29 = vpack.c.bf16 %v2884_v20, %v2879_v59 }
 0x30c   : > { %v2623_v22 = vmul.f32 %v9140_v48, %v11235_v28  ;;  %v1863_v30 = vpop.f32.mrb[24].mxu1  ;;  %3530 = vmatmul.mubr.f32.gmra.mrb[60].mxu1 %v11358_v63  ;;  %vm2556_vm0 = vcmp.ge.f32.partialorder %v9140_v48, 0.0  ;;  %8142 = vmatprep.subr.bf16.mxu1 %v8141_v17  ;;  %v7989_v16 = vpack.c.bf16 %v11351_v58, %v11349_v53  ;;  %v8149_v17 = vpack.c.bf16 %v11365_v34, %v11363_v44  ;;  %v2904_v44 = vld [vmem:[#allocation12 + $0x6c8] sm:$0xff] }
 0x30d   : > { %v9142_v60 = vadd.f32 %v1863_v30, %v1638_v33  ;;  %3185 = vmatmul.mubr.f32.gmra.mrb[74].mxu0 %v11326_v3  ;;  %v1865_v49 = vpop.f32.mrb[25].mxu1  ;;  %8144 = vmatpush1.bf16.msra.mxu1 %v8143_v35  ;;  %v2889_v35 = vld [vmem:[#allocation12 + $0x650] sm:$0xff]  ;;  %v1644_v32 = vadd.f32 %v11189_v25, %v11201_v11  ;;  %v11391_v23 = vsel %vm2555_vm1, %v9138_v19, %v2622_v52  ;;  %v2899_v52 = vld [vmem:[#allocation12 + $0x6a0] sm:$0xff] }
 0x30e   : > { %v9144_v62 = vadd.f32 %v1865_v49, %v1640_v4  ;;  %3190 = vmatprep.mubr.f32.mxu0 %v11342_v9  ;;  %v11377_v42 = vsel %vm2556_vm0, %v9140_v48, %v2623_v22  ;;  %7980 = vmatpush1.bf16.msra.mxu0 %v7979_v21  ;;  %12825 = vst [vmem:[#allocation31_spill] sm:$0xff] %v11391_v23  ;;  %v11407_v48 = vld [vmem:[#allocation12 + $0x698] sm:$0xff] }
 0x30f   : > { %12824 = vst [vmem:[#allocation32_spill] sm:$0xff] %v11377_v42  ;;  %v2627_v27 = vmul.f32 %v9142_v60, %v11223_v47  ;;  %3535 = vmatprep.mubr.f32.mxu1 %v11377_v42  ;;  %7982 = vmatprep.subr.bf16.mxu0 %v7981_v6  ;;  %v1646_v21 = vadd.f32 %v11191_v0, %v11207_v51  ;;  %vm2560_vm3 = vcmp.ge.f32.partialorder %v9142_v60, 0.0 }
 0x310   : > { %v2628_v25 = vmul.f32 %v9144_v62, %v11235_v28  ;;  %v1869_v59 = vpop.f32.mrb[26].mxu1  ;;  %3536 = vmatmul.mubr.f32.gmra.mrb[62].mxu1 %v11391_v23  ;;  %vm2561_vm2 = vcmp.ge.f32.partialorder %v9144_v62, 0.0  ;;  %8146 = vmatprep.subr.bf16.mxu1 %v8145_v56  ;;  %v7991_v10 = vpack.c.bf16 %v11384_v36, %v11374_v5  ;;  %v8151_v6 = vpack.c.bf16 %v2894_v41, %v2889_v35  ;;  %v11415_v56 = vld [vmem:[#allocation12 + $0x6c0] sm:$0xff]  ;;  %v2930_v36 = vld [vmem:[#allocation12 + $0x798] sm:$0xff] }
 0x311   : > { %v9146_v19 = vadd.f32 %v1869_v59, %v1644_v32  ;;  %3191 = vmatmul.mubr.f32.gmra.mrb[76].mxu0 %v11358_v63  ;;  %v1871_v15 = vpop.f32.mrb[27].mxu1  ;;  %8148 = vmatpush1.bf16.msra.mxu1 %v8147_v29  ;;  %v8153_v33 = vpack.c.bf16 %v11398_v61, %v11396_v54  ;;  %v1650_v34 = vadd.f32 %v11193_v43, %v11201_v11  ;;  %v2919_v59 = vld [vmem:[#allocation12 + $0x740] sm:$0xff] }
 0x312   : > { %v9148_v0 = vadd.f32 %v1871_v15, %v1646_v21  ;;  %3196 = vmatprep.mubr.f32.mxu0 %v11377_v42  ;;  %v11410_v20 = vsel %vm2561_vm2, %v9144_v62, %v2628_v25  ;;  %7984 = vmatpush1.bf16.msra.mxu0 %v7983_v8  ;;  %v11424_v22 = vsel %vm2560_vm3, %v9142_v60, %v2627_v27  ;;  %v2909_v62 = vld [vmem:[#allocation12 + $0x6f0] sm:$0xff]  ;;  %v2923_v5 = vld [vmem:[#allocation12 + $0x760] sm:$0xff] }
 0x313   : > { %12826 = vst [vmem:[#allocation33_spill] sm:$0xff] %v11410_v20  ;;  %v2632_v4 = vmul.f32 %v9146_v19, %v11223_v47  ;;  %3541 = vmatprep.mubr.f32.mxu1 %v11410_v20  ;;  %12827 = vst [vmem:[#allocation35_spill] sm:$0xff] %v11424_v22  ;;  %7986 = vmatprep.subr.bf16.mxu0 %v7985_v13  ;;  %v1652_v8 = vadd.f32 %v11197_v39, %v11207_v51  ;;  %vm2565_vm5 = vcmp.ge.f32.partialorder %v9146_v19, 0.0  ;;  %v2925_v21 = vld [vmem:[#allocation12 + $0x770] sm:$0xff] }
 0x314   : > { %v2633_v43 = vmul.f32 %v9148_v0, %v11235_v28  ;;  %v1875_v30 = vpop.f32.mrb[28].mxu1  ;;  %3542 = vmatmul.mubr.f32.gmra.mrb[64].mxu1 %v11424_v22  ;;  %vm2566_vm4 = vcmp.ge.f32.partialorder %v9148_v0, 0.0  ;;  %8150 = vmatprep.subr.bf16.mxu1 %v8149_v17  ;;  %v7993_v57 = vpack.c.bf16 %v11415_v56, %v11407_v48  ;;  %v8155_v13 = vpack.c.bf16 %v2904_v44, %v2899_v52  ;;  %v2914_v17 = vld [vmem:[#allocation12 + $0x718] sm:$0xff]  ;;  %v2912_v56 = vld [vmem:[#allocation12 + $0x708] sm:$0xff] }
 0x315   : > { %v9150_v60 = vadd.f32 %v1875_v30, %v1650_v34  ;;  %3197 = vmatmul.mubr.f32.gmra.mrb[78].mxu0 %v11391_v23  ;;  %v1877_v1 = vpop.f32.mrb[29].mxu1  ;;  %8152 = vmatpush1.bf16.msra.mxu1 %v8151_v6  ;;  %v8157_v29 = vpack.c.bf16 %v11431_v2, %v11429_v37  ;;  %v1656_v35 = vadd.f32 %v11203_v45, %v11201_v11  ;;  %v2908_v11 = vld [vmem:[#allocation12 + $0x6e8] sm:$0xff]  ;;  %v2913_v45 = vld [vmem:[#allocation12 + $0x710] sm:$0xff]  ;;  %v2934_v30 = vld [vmem:[#allocation12 + $0x7b8] sm:$0xff] }
 0x316   : > { %v9152_v49 = vadd.f32 %v1877_v1, %v1652_v8  ;;  %3202 = vmatprep.mubr.f32.mxu0 %v11410_v20  ;;  %v11441_v39 = vsel %vm2566_vm4, %v9148_v0, %v2633_v43  ;;  %7988 = vmatpush1.bf16.msra.mxu0 %v7987_v14  ;;  %v11453_v32 = vsel %vm2565_vm5, %v9146_v19, %v2632_v4  ;;  %v2924_v19 = vld [vmem:[#allocation12 + $0x768] sm:$0xff]  ;;  %v2907_v0 = vld [vmem:[#allocation12 + $0x6e0] sm:$0xff]  ;;  %v2917_v8 = vld [vmem:[#allocation12 + $0x730] sm:$0xff] }
 0x317   : > { %12828 = vst [vmem:[#allocation34_spill] sm:$0xff] %v11441_v39  ;;  %v2637_v41 = vmul.f32 %v9150_v60, %v11223_v47  ;;  %3547 = vmatprep.mubr.f32.mxu1 %v11441_v39  ;;  %12829 = vst [vmem:[#allocation36_spill] sm:$0xff] %v11453_v32  ;;  %7990 = vmatprep.subr.bf16.mxu0 %v7989_v16  ;;  %v1658_v14 = vadd.f32 %v11211_v26, %v11207_v51  ;;  %vm2570_vm7 = vcmp.ge.f32.partialorder %v9150_v60, 0.0  ;;  %v2920_v16 = vld [vmem:[#allocation12 + $0x748] sm:$0xff]  ;;  %v2929_v43 = vld [vmem:[#allocation12 + $0x790] sm:$0xff] }
 0x318   : > { %v2638_v27 = vmul.f32 %v9152_v49, %v11235_v28  ;;  %v1881_v54 = vpop.f32.mrb[30].mxu1  ;;  %3548 = vmatmul.mubr.f32.gmra.mrb[66].mxu1 %v11453_v32  ;;  %vm2571_vm6 = vcmp.ge.f32.partialorder %v9152_v49, 0.0  ;;  %8154 = vmatprep.subr.bf16.mxu1 %v8153_v33  ;;  %v8159_v58 = vpack.c.bf16 %v2914_v17, %v2909_v62  ;;  %v7995_v26 = vpack.c.bf16 %v2902_v40, %v2897_v12  ;;  %v2918_v33 = vld [vmem:[#allocation12 + $0x738] sm:$0xff]  ;;  %v2928_v17 = vld [vmem:[#allocation12 + $0x788] sm:$0xff] }
 0x319   : > { %v9154_v61 = vadd.f32 %v1881_v54, %v1656_v35  ;;  %3203 = vmatmul.mubr.f32.gmra.mrb[80].mxu0 %v11424_v22  ;;  %v1883_v53 = vpop.f32.mrb[31].mxu1  ;;  %8156 = vmatpush1.bf16.msra.mxu1 %v8155_v13  ;;  %v11472_v6 = vsel %vm2570_vm7, %v9150_v60, %v2637_v41  ;;  %v7997_v48 = vpack.c.bf16 %v2913_v45, %v2908_v11  ;;  %v2933_v35 = vld [vmem:[#allocation12 + $0x7b0] sm:$0xff]  ;;  %v2939_v11 = vld [vmem:[#allocation12 + $0x7e0] sm:$0xff]  ;;  %v2944_v45 = vld [vmem:[#allocation12 + $0x808] sm:$0xff] }
 0x31a   : > { %v9156_v25 = vadd.f32 %v1883_v53, %v1658_v14  ;;  %3208 = vmatprep.mubr.f32.mxu0 %v11441_v39  ;;  %v11464_v51 = vsel %vm2571_vm6, %v9152_v49, %v2638_v27  ;;  %7992 = vmatpush1.bf16.msra.mxu0 %v7991_v10  ;;  %12831 = vst [vmem:[#allocation37_spill] sm:$0xff] %v11472_v6  ;;  %v2935_v10 = vld [vmem:[#allocation12 + $0x7c0] sm:$0xff]  ;;  %v2940_v49 = vld [vmem:[#allocation12 + $0x7e8] sm:$0xff]  ;;  %v3054_v20 = vld [vmem:[#allocation12 + $0xb78] sm:$0xff] }
 0x31b   : > { %12830 = vst [vmem:[#allocation38_spill] sm:$0xff] %v11464_v51  ;;  %v2642_v15 = vmul.f32 %v9154_v61, %v11223_v47  ;;  %3553 = vmatprep.mubr.f32.mxu1 %v11464_v51  ;;  %7994 = vmatprep.subr.bf16.mxu0 %v7993_v57  ;;  %vm2575_vm9 = vcmp.ge.f32.partialorder %v9154_v61, 0.0  ;;  %v8161_v47 = vpack.c.bf16 %v2925_v21, %v2920_v16  ;;  %v2922_v57 = vld [vmem:[#allocation12 + $0x758] sm:$0xff]  ;;  %v2927_v27 = vld [vmem:[#allocation12 + $0x780] sm:$0xff]  ;;  %v2932_v53 = vld [vmem:[#allocation12 + $0x7a8] sm:$0xff] }
 0x31c   : > { %v2643_v52 = vmul.f32 %v9156_v25, %v11235_v28  ;;  %v7151_v44 = vpop.f32.mrb[32].mxu1  ;;  %3554 = vmatmul.mubr.f32.gmra.mrb[68].mxu1 %v11472_v6  ;;  %vm2576_vm8 = vcmp.ge.f32.partialorder %v9156_v25, 0.0  ;;  %8158 = vmatprep.subr.bf16.mxu1 %v8157_v29  ;;  %v8163_v4 = vpack.c.bf16 %v2924_v19, %v2919_v59  ;;  %v7999_v2 = vpack.c.bf16 %v2912_v56, %v2907_v0  ;;  %v2945_v29 = vld [vmem:[#allocation12 + $0x810] sm:$0xff]  ;;  %v2955_v16 = vld [vmem:[#allocation12 + $0x860] sm:$0xff]  ;;  %v3044_v39 = vld [vmem:[#allocation12 + $0xb28] sm:$0xff] }
 0x31d   : > { %3209 = vmatmul.mubr.f32.gmra.mrb[82].mxu0 %v11453_v32  ;;  %v7152_v34 = vpop.f32.mrb[33].mxu1  ;;  %8160 = vmatpush1.bf16.msra.mxu1 %v8159_v58  ;;  %v11484_v60 = vsel %vm2575_vm9, %v9154_v61, %v2642_v15  ;;  %v8001_v1 = vpack.c.bf16 %v2923_v5, %v2918_v33  ;;  %v8165_v13 = vpack.c.bf16 %v2935_v10, %v2930_v36  ;;  %v2950_v58 = vld [vmem:[#allocation12 + $0x838] sm:$0xff]  ;;  %v2937_v0 = vld [vmem:[#allocation12 + $0x7d0] sm:$0xff]  ;;  %v3048_v22 = vld [vmem:[#allocation12 + $0xb48] sm:$0xff] }
 0x31e   : > { %v11477_v37 = vadd.f32 %v7152_v34, %v7151_v44  ;;  %3214 = vmatprep.mubr.f32.mxu0 %v11464_v51  ;;  %v11480_v28 = vsel %vm2576_vm8, %v9156_v25, %v2643_v52  ;;  %7996 = vmatpush1.bf16.msra.mxu0 %v7995_v26  ;;  %12833 = vst [vmem:[#allocation39_spill] sm:$0xff] %v11484_v60  ;;  %v2938_v25 = vld [vmem:[#allocation12 + $0x7d8] sm:$0xff]  ;;  %v2943_v26 = vld [vmem:[#allocation12 + $0x800] sm:$0xff]  ;;  %v2949_v33 = vld [vmem:[#allocation12 + $0x830] sm:$0xff] }
 0x31f   : > { %12832 = vst [vmem:[#allocation40_spill] sm:$0xff] %v11480_v28  ;;  %3559 = vmatprep.mubr.f32.mxu1 %v11480_v28  ;;  %7998 = vmatprep.subr.bf16.mxu0 %v7997_v48  ;;  %v8167_v12 = vpack.c.bf16 %v2934_v30, %v2929_v43  ;;  %v8003_v14 = vpack.c.bf16 %v2922_v57, %v2917_v8  ;;  %v2954_v52 = vld [vmem:[#allocation12 + $0x858] sm:$0xff]  ;;  %v2965_v36 = vld [vmem:[#allocation12 + $0x8b0] sm:$0xff]  ;;  %v2948_v34 = vld [vmem:[#allocation12 + $0x828] sm:$0xff] }
 0x320   : > { %v7154_v62 = vpop.f32.mrb[34].mxu1  ;;  %3560 = vmatmul.mubr.f32.gmra.mrb[70].mxu1 %v11484_v60  ;;  %8162 = vmatprep.subr.bf16.mxu1 %v8161_v47  ;;  %v8169_v54 = vpack.c.bf16 %v2945_v29, %v2940_v49  ;;  %v8005_v61 = vpack.c.bf16 %v2933_v35, %v2928_v17  ;;  %v8171_v19 = vpack.c.bf16 %v2944_v45, %v2939_v11  ;;  %v2942_v5 = vld [vmem:[#allocation12 + $0x7f8] sm:$0xff]  ;;  %v2960_v47 = vld [vmem:[#allocation12 + $0x888] sm:$0xff]  ;;  %v2975_v35 = vld [vmem:[#allocation12 + $0x900] sm:$0xff] }
 0x321   : > { %3215 = vmatmul.mubr.f32.gmra.mrb[84].mxu0 %v11472_v6  ;;  %v7155_v41 = vpop.f32.mrb[35].mxu1  ;;  %8164 = vmatpush1.bf16.msra.mxu1 %v8163_v4  ;;  %v8007_v48 = vpack.c.bf16 %v2932_v53, %v2927_v27  ;;  %v8173_v56 = vpack.c.bf16 %v2955_v16, %v2950_v58  ;;  %v8009_v44 = vpack.c.bf16 %v2943_v26, %v2938_v25  ;;  %v2953_v4 = vld [vmem:[#allocation12 + $0x850] sm:$0xff]  ;;  %v2964_v49 = vld [vmem:[#allocation12 + $0x8a8] sm:$0xff]  ;;  %v2970_v17 = vld [vmem:[#allocation12 + $0x8d8] sm:$0xff] }
 0x322   : > { %v11488_v40 = vadd.f32 %v7155_v41, %v7154_v62  ;;  %3220 = vmatprep.mubr.f32.mxu0 %v11480_v28  ;;  %8000 = vmatpush1.bf16.msra.mxu0 %v7999_v2  ;;  %v8175_v8 = vpack.c.bf16 %v2954_v52, %v2949_v33  ;;  %v8011_v30 = vpack.c.bf16 %v2942_v5, %v2937_v0  ;;  %v2952_v62 = vld [vmem:[#allocation12 + $0x848] sm:$0xff]  ;;  %v2969_v58 = vld [vmem:[#allocation12 + $0x8d0] sm:$0xff]  ;;  %v2974_v16 = vld [vmem:[#allocation12 + $0x8f8] sm:$0xff] }
 0x323   : > { %8002 = vmatprep.subr.bf16.mxu0 %v8001_v1  ;;  %8166 = vmatprep.subr.bf16.mxu1 %v8165_v13  ;;  %v2947_v1 = vld [vmem:[#allocation12 + $0x820] sm:$0xff]  ;;  %v8177_v57 = vpack.c.bf16 %v2965_v36, %v2960_v47  ;;  %v8013_v29 = vpack.c.bf16 %v2953_v4, %v2948_v34  ;;  %v8181_v53 = vpack.c.bf16 %v2975_v35, %v2970_v17  ;;  %v2962_v25 = vld [vmem:[#allocation12 + $0x898] sm:$0xff]  ;;  %v2980_v26 = vld [vmem:[#allocation12 + $0x928] sm:$0xff] }
 0x324   : > { %v7157_v21 = vpop.f32.mrb[36].mxu1  ;;  %v2959_v13 = vld [vmem:[#allocation12 + $0x880] sm:$0xff]  ;;  %v8015_v45 = vpack.c.bf16 %v2952_v62, %v2947_v1  ;;  %v2973_v0 = vld [vmem:[#allocation12 + $0x8f0] sm:$0xff]  ;;  %v8183_v33 = vpack.c.bf16 %v2974_v16, %v2969_v58  ;;  %v2972_v4 = vld [vmem:[#allocation12 + $0x8e8] sm:$0xff] }
 0x325   : > { %3221 = vmatmul.mubr.f32.gmra.mrb[86].mxu0 %v11484_v60  ;;  %v7158_v59 = vpop.f32.mrb[37].mxu1  ;;  %8168 = vmatpush1.bf16.msra.mxu1 %v8167_v12  ;;  %v2958_v12 = vld [vmem:[#allocation12 + $0x878] sm:$0xff]  ;;  %v2967_v5 = vld [vmem:[#allocation12 + $0x8c0] sm:$0xff]  ;;  %v2977_v17 = vld [vmem:[#allocation12 + $0x910] sm:$0xff] }
 0x326   : > { %v11492_v15 = vadd.f32 %v7158_v59, %v7157_v21  ;;  %8004 = vmatpush1.bf16.msra.mxu0 %v8003_v14  ;;  %8170 = vmatprep.subr.bf16.mxu1 %v8169_v54  ;;  %v2963_v14 = vld [vmem:[#allocation12 + $0x8a0] sm:$0xff]  ;;  %v8179_v54 = vpack.c.bf16 %v2964_v49, %v2959_v13  ;;  %v2985_v59 = vld [vmem:[#allocation12 + $0x950] sm:$0xff]  ;;  %v2978_v1 = vld [vmem:[#allocation12 + $0x918] sm:$0xff]  ;;  %v8023_v62 = vpack.c.bf16 %v2972_v4, %v2967_v5 }
 0x327   : > { %8006 = vmatprep.subr.bf16.mxu0 %v8005_v61  ;;  %v2957_v61 = vld [vmem:[#allocation12 + $0x870] sm:$0xff]  ;;  %v8017_v21 = vpack.c.bf16 %v2963_v14, %v2958_v12  ;;  %v8185_v47 = vpack.c.bf16 %v2985_v59, %v2980_v26  ;;  %v2979_v36 = vld [vmem:[#allocation12 + $0x920] sm:$0xff]  ;;  %v2994_v12 = vld [vmem:[#allocation12 + $0x998] sm:$0xff] }
 0x328   : > { %v7160_v10 = vpop.f32.mrb[38].mxu1  ;;  %v2993_v58 = vld [vmem:[#allocation12 + $0x990] sm:$0xff]  ;;  %v2987_v59 = vld [vmem:[#allocation12 + $0x960] sm:$0xff]  ;;  %v3034_v51 = vld [vmem:[#allocation12 + $0xad8] sm:$0xff] }
 0x329   : > { %v7161_v2 = vpop.f32.mrb[39].mxu1  ;;  %8172 = vmatpush1.bf16.msra.mxu1 %v8171_v19  ;;  %v3015_v5 = vld [vmem:[#allocation12 + $0xa40] sm:$0xff]  ;;  %v3038_v32 = vld [vmem:[#allocation12 + $0xaf8] sm:$0xff] }
 0x32a   : > { %v11494_v43 = vadd.f32 %v7161_v2, %v7160_v10  ;;  %8008 = vmatpush1.bf16.msra.mxu0 %v8007_v48  ;;  %8174 = vmatprep.subr.bf16.mxu1 %v8173_v56  ;;  %v2968_v48 = vld [vmem:[#allocation12 + $0x8c8] sm:$0xff]  ;;  %v2990_v2 = vld [vmem:[#allocation12 + $0x978] sm:$0xff] }
 0x32b   : > { %8010 = vmatprep.subr.bf16.mxu0 %v8009_v44  ;;  %v8019_v44 = vpack.c.bf16 %v2962_v25, %v2957_v61  ;;  %v2984_v10 = vld [vmem:[#allocation12 + $0x948] sm:$0xff]  ;;  %v8021_v34 = vpack.c.bf16 %v2973_v0, %v2968_v48  ;;  %v2999_v48 = vld [vmem:[#allocation12 + $0x9c0] sm:$0xff]  ;;  %v3058_v23 = vld [vmem:[#allocation12 + $0xb98] sm:$0xff] }
 0x32c   : > { %v7163_v41 = vpop.f32.mrb[40].mxu1  ;;  %v8187_v49 = vpack.c.bf16 %v2984_v10, %v2979_v36  ;;  %v3004_v0 = vld [vmem:[#allocation12 + $0x9e8] sm:$0xff]  ;;  %v3003_v36 = vld [vmem:[#allocation12 + $0x9e0] sm:$0xff] }
 0x32d   : > { %v7164_v27 = vpop.f32.mrb[41].mxu1  ;;  %8176 = vmatpush1.bf16.msra.mxu1 %v8175_v8  ;;  %v2995_v8 = vld [vmem:[#allocation12 + $0x9a0] sm:$0xff] }
 0x32e   : > { %v11496_v11 = vadd.f32 %v7164_v27, %v7163_v41  ;;  %8012 = vmatpush1.bf16.msra.mxu0 %v8011_v30  ;;  %8178 = vmatprep.subr.bf16.mxu1 %v8177_v57  ;;  %v2983_v57 = vld [vmem:[#allocation12 + $0x940] sm:$0xff]  ;;  %v8189_v35 = vpack.c.bf16 %v2995_v8, %v2990_v2  ;;  %v2989_v41 = vld [vmem:[#allocation12 + $0x970] sm:$0xff]  ;;  %v2982_v27 = vld [vmem:[#allocation12 + $0x938] sm:$0xff] }
 0x32f   : > { %8014 = vmatprep.subr.bf16.mxu0 %v8013_v29  ;;  %v8025_v14 = vpack.c.bf16 %v2983_v57, %v2978_v1  ;;  %v8027_v26 = vpack.c.bf16 %v2982_v27, %v2977_v17  ;;  %v2997_v1 = vld [vmem:[#allocation12 + $0x9b0] sm:$0xff]  ;;  %v3002_v57 = vld [vmem:[#allocation12 + $0x9d8] sm:$0xff] }
 0x330   : > { %v7166_v19 = vpop.f32.mrb[42].mxu1 }
 0x331   : > { %v7167_v56 = vpop.f32.mrb[43].mxu1  ;;  %8180 = vmatpush1.bf16.msra.mxu1 %v8179_v54  ;;  %v3000_v54 = vld [vmem:[#allocation12 + $0x9c8] sm:$0xff] }
 0x332   : > { %v11498_v52 = vadd.f32 %v7167_v56, %v7166_v19  ;;  %8016 = vmatpush1.bf16.msra.mxu0 %v8015_v45  ;;  %8182 = vmatprep.subr.bf16.mxu1 %v8181_v53  ;;  %v3005_v45 = vld [vmem:[#allocation12 + $0x9f0] sm:$0xff]  ;;  %v2988_v53 = vld [vmem:[#allocation12 + $0x968] sm:$0xff] }
 0x333   : > { %8018 = vmatprep.subr.bf16.mxu0 %v8017_v21  ;;  %v8191_v21 = vpack.c.bf16 %v2994_v12, %v2989_v41  ;;  %v8193_v19 = vpack.c.bf16 %v3005_v45, %v3000_v54  ;;  %v8029_v56 = vpack.c.bf16 %v2993_v58, %v2988_v53  ;;  %v12834_v45 = vld [vmem:[#allocation28_spill] sm:$0xff]  ;;  %v12835_v53 = vld [vmem:[#allocation29_spill] sm:$0xff] }
 0x334   : > { %v7169_v30 = vpop.f32.mrb[44].mxu1  ;;  %v11526_v58 = vrot.slane %v11195_v50, %v12835_v53 }
 0x335   : > { %v7170_v13 = vpop.f32.mrb[45].mxu1  ;;  %8184 = vmatpush1.bf16.msra.mxu1 %v8183_v33  ;;  %v2992_v33 = vld [vmem:[#allocation12 + $0x988] sm:$0xff] }
 0x336   : > { %v11500_v29 = vadd.f32 %v7170_v13, %v7169_v30  ;;  %8020 = vmatpush1.bf16.msra.mxu0 %v8019_v44  ;;  %8186 = vmatprep.subr.bf16.mxu1 %v8185_v47  ;;  %v3010_v44 = vld [vmem:[#allocation12 + $0xa18] sm:$0xff]  ;;  %v8031_v2 = vpack.c.bf16 %v2992_v33, %v2987_v59  ;;  %v3008_v13 = vld [vmem:[#allocation12 + $0xa08] sm:$0xff]  ;;  %v3009_v33 = vld [vmem:[#allocation12 + $0xa10] sm:$0xff] }
 0x337   : > { %8022 = vmatprep.subr.bf16.mxu0 %v8021_v34  ;;  %v2998_v47 = vld [vmem:[#allocation12 + $0x9b8] sm:$0xff]  ;;  %v8195_v34 = vpack.c.bf16 %v3004_v0, %v2999_v48  ;;  %v8197_v8 = vpack.c.bf16 %v3015_v5, %v3010_v44  ;;  %v3007_v48 = vld [vmem:[#allocation12 + $0xa00] sm:$0xff]  ;;  %v3012_v0 = vld [vmem:[#allocation12 + $0xa28] sm:$0xff] }
 0x338   : > { %v7172_v61 = vpop.f32.mrb[46].mxu1  ;;  %v8033_v30 = vpack.c.bf16 %v3003_v36, %v2998_v47  ;;  %v3014_v44 = vld [vmem:[#allocation12 + $0xa38] sm:$0xff]  ;;  %v3023_v47 = vld [vmem:[#allocation12 + $0xa80] sm:$0xff]  ;;  %v3020_v36 = vld [vmem:[#allocation12 + $0xa68] sm:$0xff] }
 0x339   : > { %v7173_v16 = vpop.f32.mrb[47].mxu1  ;;  %8188 = vmatpush1.bf16.msra.mxu1 %v8187_v49  ;;  %v3013_v49 = vld [vmem:[#allocation12 + $0xa30] sm:$0xff] }
 0x33a   : > { %v11502_v25 = vadd.f32 %v7173_v16, %v7172_v61  ;;  %8024 = vmatpush1.bf16.msra.mxu0 %v8023_v62  ;;  %8190 = vmatprep.subr.bf16.mxu1 %v8189_v35  ;;  %v8035_v35 = vpack.c.bf16 %v3002_v57, %v2997_v1  ;;  %v8037_v41 = vpack.c.bf16 %v3013_v49, %v3008_v13  ;;  %v3017_v13 = vld [vmem:[#allocation12 + $0xa50] sm:$0xff]  ;;  %v3022_v49 = vld [vmem:[#allocation12 + $0xa78] sm:$0xff] }
 0x33b   : > { %8026 = vmatprep.subr.bf16.mxu0 %v8025_v14  ;;  %v11522_v61 = vrot.slane %v11195_v50, %v12834_v45  ;;  %v11530_v16 = vrot.slane %v11209_v46, %v12834_v45  ;;  %v3018_v50 = vld [vmem:[#allocation12 + $0xa58] sm:$0xff]  ;;  %v8039_v1 = vpack.c.bf16 %v3012_v0, %v3007_v48  ;;  %v8199_v57 = vpack.c.bf16 %v3014_v44, %v3009_v33  ;;  %v3035_v0 = vld [vmem:[#allocation12 + $0xae0] sm:$0xff] }
 0x33c   : > { %v3030_v48 = vld [vmem:[#allocation12 + $0xab8] sm:$0xff]  ;;  %v8043_v44 = vpack.c.bf16 %v3022_v49, %v3017_v13  ;;  %v3043_v13 = vld [vmem:[#allocation12 + $0xb20] sm:$0xff] }
 0x33d   : > { %v11504_v10 = vpop.f32.mrb[48].mxu1  ;;  %8192 = vmatpush1.bf16.msra.mxu1 %v8191_v21  ;;  %v8205_v6 = vpack.c.bf16 %v3035_v0, %v3030_v48  ;;  %v3042_v48 = vld [vmem:[#allocation12 + $0xb18] sm:$0xff]  ;;  %v3039_v0 = vld [vmem:[#allocation12 + $0xb00] sm:$0xff] }
 0x33e   : > { %v11506_v4 = vpop.f32.mrb[49].mxu1  ;;  %8028 = vmatpush1.bf16.msra.mxu0 %v8027_v26  ;;  %8194 = vmatprep.subr.bf16.mxu1 %v8193_v19  ;;  %v11534_v26 = vrot.slane %v11209_v46, %v12835_v53  ;;  %v3024_v53 = vld [vmem:[#allocation12 + $0xa88] sm:$0xff] }
 0x33f   : > { %8030 = vmatprep.subr.bf16.mxu0 %v8029_v56 }
 0x341   : > { %v11508_v62 = vpop.f32.mrb[50].mxu1  ;;  %8196 = vmatpush1.bf16.msra.mxu1 %v8195_v34  ;;  %v3025_v34 = vld [vmem:[#allocation12 + $0xa90] sm:$0xff] }
 0x342   : > { %v11510_v17 = vpop.f32.mrb[51].mxu1  ;;  %8032 = vmatpush1.bf16.msra.mxu0 %v8031_v2  ;;  %8198 = vmatprep.subr.bf16.mxu1 %v8197_v8  ;;  %v8201_v45 = vpack.c.bf16 %v3025_v34, %v3020_v36  ;;  %v3027_v36 = vld [vmem:[#allocation12 + $0xaa0] sm:$0xff]  ;;  %v3032_v34 = vld [vmem:[#allocation12 + $0xac8] sm:$0xff] }
 0x343   : > { %8034 = vmatprep.subr.bf16.mxu0 %v8033_v30 }
 0x345   : > { %v11512_v12 = vpop.f32.mrb[52].mxu1 }
 0x346   : > { %v11514_v14 = vpop.f32.mrb[53].mxu1  ;;  %8036 = vmatpush1.bf16.msra.mxu0 %v8035_v35  ;;  %v3019_v35 = vld [vmem:[#allocation12 + $0xa60] sm:$0xff] }
 0x347   : > { %8038 = vmatprep.subr.bf16.mxu0 %v8037_v41 }
 0x349   : > { %v11516_v27 = vpop.f32.mrb[54].mxu1 }
 0x34a   : > { %v11518_v54 = vpop.f32.mrb[55].mxu1 }
 0x37c   : > { %v2178_v21 = vpop.f32.mrb[40].mxu0 }
 0x37d   : > { %v9157_v59 = vadd.f32 %v2178_v21, %v11522_v61  ;;  %v2180_v19 = vpop.f32.mrb[41].mxu0 }
 0x37e   : > { %v9158_v56 = vadd.f32 %v2180_v19, %v11526_v58  ;;  %v8041_v19 = vpack.c.bf16 %v3023_v47, %v3018_v50  ;;  %v8045_v47 = vpack.c.bf16 %v3033_v24, %v3028_v38  ;;  %v3040_v38 = vld [vmem:[#allocation12 + $0xb08] sm:$0xff] }
 0x37f   : > { %v2609_v5 = vmul.f32 %v9157_v59, %v11530_v16  ;;  %vm2542_vm10 = vcmp.ge.f32.partialorder %v9157_v59, 0.0 }
 0x380   : > { %v2610_v2 = vmul.f32 %v9158_v56, %v11534_v26  ;;  %v2184_v46 = vpop.f32.mrb[42].mxu0  ;;  %vm2543_vm11 = vcmp.ge.f32.partialorder %v9158_v56, 0.0 }
 0x381   : > { %v9159_v8 = vadd.f32 %v2184_v46, %v11522_v61  ;;  %v2186_v30 = vpop.f32.mrb[43].mxu0  ;;  %v11545_v60 = vsel %vm2542_vm10, %v9157_v59, %v2609_v5  ;;  %v8203_v5 = vpack.c.bf16 %v3024_v53, %v3019_v35  ;;  %v3045_v53 = vld [vmem:[#allocation12 + $0xb30] sm:$0xff] }
 0x382   : > { %v9160_v41 = vadd.f32 %v2186_v30, %v11526_v58  ;;  %v11542_v21 = vsel %vm2543_vm11, %v9158_v56, %v2610_v2  ;;  %v3029_v2 = vld [vmem:[#allocation12 + $0xab0] sm:$0xff] }
 0x383   : > { %v2614_v46 = vmul.f32 %v9159_v8, %v11530_v16  ;;  %3291 = vmatprep.mubr.f32.mxu0 %v11542_v21  ;;  %3630 = vmatprep.mubr.f32.mxu1 %v11542_v21  ;;  %vm2547_vm13 = vcmp.ge.f32.partialorder %v9159_v8, 0.0 }
 0x384   : > { %v2615_v33 = vmul.f32 %v9160_v41, %v11534_v26  ;;  %v2190_v56 = vpop.f32.mrb[44].mxu0  ;;  %3292 = vmatmul.mubr.f32.vlgmr.msra.gmra.mrb[72].mxu0 %v11545_v60  ;;  %3631 = vmatmul.mubr.f32.vlgmr.msra.gmra.mrb[56].mxu1 %v11545_v60  ;;  %vm2548_vm12 = vcmp.ge.f32.partialorder %v9160_v41, 0.0 }
 0x385   : > { %v9161_v59 = vadd.f32 %v2190_v56, %v11522_v61  ;;  %v2192_v50 = vpop.f32.mrb[45].mxu0  ;;  %8040 = vmatpush1.bf16.msra.mxu0 %v8039_v1  ;;  %8200 = vmatpush1.bf16.msra.mxu1 %v8199_v57  ;;  %v11561_v24 = vsel %vm2547_vm13, %v9159_v8, %v2614_v46  ;;  %v8049_v8 = vpack.c.bf16 %v3043_v13, %v3038_v32  ;;  %v3037_v46 = vld [vmem:[#allocation12 + $0xaf0] sm:$0xff] }
 0x386   : > { %v9162_v30 = vadd.f32 %v2192_v50, %v11526_v58  ;;  %v11555_v28 = vsel %vm2548_vm12, %v9160_v41, %v2615_v33  ;;  %8042 = vmatprep.subr.bf16.mxu0 %v8041_v19  ;;  %8202 = vmatprep.subr.bf16.mxu1 %v8201_v45  ;;  %v8047_v45 = vpack.c.bf16 %v3032_v34, %v3027_v36  ;;  %v3053_v36 = vld [vmem:[#allocation12 + $0xb70] sm:$0xff] }
 0x387   : > { %v2619_v49 = vmul.f32 %v9161_v59, %v11530_v16  ;;  %3297 = vmatprep.mubr.f32.mxu0 %v11555_v28  ;;  %3636 = vmatprep.mubr.f32.mxu1 %v11555_v28  ;;  %vm2552_vm15 = vcmp.ge.f32.partialorder %v9161_v59, 0.0  ;;  %v8207_v19 = vpack.c.bf16 %v3034_v51, %v3029_v2  ;;  %v8209_v50 = vpack.c.bf16 %v3045_v53, %v3040_v38  ;;  %v3050_v51 = vld [vmem:[#allocation12 + $0xb58] sm:$0xff]  ;;  %v3052_v38 = vld [vmem:[#allocation12 + $0xb68] sm:$0xff]  ;;  %v3049_v53 = vld [vmem:[#allocation12 + $0xb50] sm:$0xff] }
 0x388   : > { %v2620_v1 = vmul.f32 %v9162_v30, %v11534_v26  ;;  %v2196_v57 = vpop.f32.mrb[46].mxu0  ;;  %3298 = vmatmul.mubr.f32.gmra.mrb[74].mxu0 %v11561_v24  ;;  %3637 = vmatmul.mubr.f32.gmra.mrb[58].mxu1 %v11561_v24  ;;  %vm2553_vm14 = vcmp.ge.f32.partialorder %v9162_v30, 0.0  ;;  %v8211_v13 = vpack.c.bf16 %v3044_v39, %v3039_v0  ;;  %v3060_v39 = vld [vmem:[#allocation12 + $0xba8] sm:$0xff] }
 0x389   : > { %v9163_v35 = vadd.f32 %v2196_v57, %v11522_v61  ;;  %v2198_v41 = vpop.f32.mrb[47].mxu0  ;;  %8044 = vmatpush1.bf16.msra.mxu0 %v8043_v44  ;;  %8204 = vmatpush1.bf16.msra.mxu1 %v8203_v5  ;;  %v11574_v32 = vsel %vm2552_vm15, %v9161_v59, %v2619_v49  ;;  %v3055_v44 = vld [vmem:[#allocation12 + $0xb80] sm:$0xff]  ;;  %v8053_v59 = vpack.c.bf16 %v3053_v36, %v3048_v22 }
 0x38a   : > { %v9164_v33 = vadd.f32 %v2198_v41, %v11526_v58  ;;  %v11568_v56 = vsel %vm2553_vm14, %v9162_v30, %v2620_v1  ;;  %8046 = vmatprep.subr.bf16.mxu0 %v8045_v47  ;;  %8206 = vmatprep.subr.bf16.mxu1 %v8205_v6  ;;  %v8051_v6 = vpack.c.bf16 %v3042_v48, %v3037_v46  ;;  %v3047_v49 = vld [vmem:[#allocation12 + $0xb40] sm:$0xff] }
 0x38b   : > { %v2624_v34 = vmul.f32 %v9163_v35, %v11530_v16  ;;  %3303 = vmatprep.mubr.f32.mxu0 %v11568_v56  ;;  %3642 = vmatprep.mubr.f32.mxu1 %v11568_v56  ;;  %vm2557_vm1 = vcmp.ge.f32.partialorder %v9163_v35, 0.0  ;;  %v8213_v41 = vpack.c.bf16 %v3055_v44, %v3050_v51  ;;  %v3063_v46 = vld [vmem:[#allocation12 + $0xbc0] sm:$0xff]  ;;  %v8215_v36 = vpack.c.bf16 %v3054_v20, %v3049_v53  ;;  %v3062_v51 = vld [vmem:[#allocation12 + $0xbb8] sm:$0xff] }
 0x38c   : > { %v2625_v5 = vmul.f32 %v9164_v33, %v11534_v26  ;;  %v2202_v2 = vpop.f32.mrb[48].mxu0  ;;  %3304 = vmatmul.mubr.f32.gmra.mrb[76].mxu0 %v11574_v32  ;;  %3643 = vmatmul.mubr.f32.gmra.mrb[60].mxu1 %v11574_v32  ;;  %vm2558_vm0 = vcmp.ge.f32.partialorder %v9164_v33, 0.0  ;;  %v3059_v44 = vld [vmem:[#allocation12 + $0xba0] sm:$0xff]  ;;  %v3070_v20 = vld [vmem:[#allocation12 + $0xbf8] sm:$0xff] }
 0x38d   : > { %v9165_v47 = vadd.f32 %v2202_v2, %v11522_v61  ;;  %v2204_v30 = vpop.f32.mrb[49].mxu0  ;;  %8048 = vmatpush1.bf16.msra.mxu0 %v8047_v45  ;;  %8208 = vmatpush1.bf16.msra.mxu1 %v8207_v19  ;;  %v11587_v22 = vsel %vm2557_vm1, %v9163_v35, %v2624_v34  ;;  %v3065_v45 = vld [vmem:[#allocation12 + $0xbd0] sm:$0xff]  ;;  %v8057_v35 = vpack.c.bf16 %v3063_v46, %v3058_v23 }
 0x38e   : > { %v9166_v1 = vadd.f32 %v2204_v30, %v11526_v58  ;;  %v11581_v57 = vsel %vm2558_vm0, %v9164_v33, %v2625_v5  ;;  %8050 = vmatprep.subr.bf16.mxu0 %v8049_v8  ;;  %8210 = vmatprep.subr.bf16.mxu1 %v8209_v50  ;;  %12837 = vst [vmem:[#allocation41_spill] sm:$0xff] %v11587_v22  ;;  %v3057_v34 = vld [vmem:[#allocation12 + $0xb90] sm:$0xff] }
 0x38f   : > { %12836 = vst [vmem:[#allocation42_spill] sm:$0xff] %v11581_v57  ;;  %v2629_v48 = vmul.f32 %v9165_v47, %v11530_v16  ;;  %3309 = vmatprep.mubr.f32.mxu0 %v11581_v57  ;;  %3648 = vmatprep.mubr.f32.mxu1 %v11581_v57  ;;  %vm2562_vm3 = vcmp.ge.f32.partialorder %v9165_v47, 0.0  ;;  %v8055_v8 = vpack.c.bf16 %v3052_v38, %v3047_v49  ;;  %v3068_v57 = vld [vmem:[#allocation12 + $0xbe8] sm:$0xff]  ;;  %v3073_v49 = vld [vmem:[#allocation12 + $0xc10] sm:$0xff] }
 0x390   : > { %v2630_v19 = vmul.f32 %v9166_v1, %v11534_v26  ;;  %v2208_v0 = vpop.f32.mrb[50].mxu0  ;;  %3310 = vmatmul.mubr.f32.gmra.mrb[78].mxu0 %v11587_v22  ;;  %3649 = vmatmul.mubr.f32.gmra.mrb[62].mxu1 %v11587_v22  ;;  %vm2563_vm2 = vcmp.ge.f32.partialorder %v9166_v1, 0.0  ;;  %v8217_v30 = vpack.c.bf16 %v3065_v45, %v3060_v39  ;;  %v3064_v22 = vld [vmem:[#allocation12 + $0xbc8] sm:$0xff]  ;;  %v3069_v45 = vld [vmem:[#allocation12 + $0xbf0] sm:$0xff] }
 0x391   : > { %v9167_v33 = vadd.f32 %v2208_v0, %v11522_v61  ;;  %v2210_v50 = vpop.f32.mrb[51].mxu0  ;;  %8052 = vmatpush1.bf16.msra.mxu0 %v8051_v6  ;;  %8212 = vmatpush1.bf16.msra.mxu1 %v8211_v13  ;;  %v11600_v23 = vsel %vm2562_vm3, %v9165_v47, %v2629_v48  ;;  %v3075_v6 = vld [vmem:[#allocation12 + $0xc20] sm:$0xff]  ;;  %v8219_v46 = vpack.c.bf16 %v3064_v22, %v3059_v44  ;;  %v3072_v39 = vld [vmem:[#allocation12 + $0xc08] sm:$0xff] }
 0x392   : > { %v9168_v5 = vadd.f32 %v2210_v50, %v11526_v58  ;;  %v11594_v2 = vsel %vm2563_vm2, %v9166_v1, %v2630_v19  ;;  %8054 = vmatprep.subr.bf16.mxu0 %v8053_v59  ;;  %8214 = vmatprep.subr.bf16.mxu1 %v8213_v41  ;;  %12839 = vst [vmem:[#allocation43_spill] sm:$0xff] %v11600_v23  ;;  %v3067_v48 = vld [vmem:[#allocation12 + $0xbe0] sm:$0xff] }
 0x393   : > { %12838 = vst [vmem:[#allocation44_spill] sm:$0xff] %v11594_v2  ;;  %v2634_v38 = vmul.f32 %v9167_v33, %v11530_v16  ;;  %3315 = vmatprep.mubr.f32.mxu0 %v11594_v2  ;;  %3654 = vmatprep.mubr.f32.mxu1 %v11594_v2  ;;  %vm2567_vm5 = vcmp.ge.f32.partialorder %v9167_v33, 0.0  ;;  %v8059_v59 = vpack.c.bf16 %v3062_v51, %v3057_v34  ;;  %v3078_v2 = vld [vmem:[#allocation12 + $0xc38] sm:$0xff]  ;;  %v3083_v34 = vld [vmem:[#allocation12 + $0xc60] sm:$0xff] }
 0x394   : > { %v2635_v13 = vmul.f32 %v9168_v5, %v11534_v26  ;;  %v2214_v53 = vpop.f32.mrb[52].mxu0  ;;  %3316 = vmatmul.mubr.f32.gmra.mrb[80].mxu0 %v11600_v23  ;;  %3655 = vmatmul.mubr.f32.gmra.mrb[64].mxu1 %v11600_v23  ;;  %vm2568_vm4 = vcmp.ge.f32.partialorder %v9168_v5, 0.0  ;;  %v8061_v47 = vpack.c.bf16 %v3073_v49, %v3068_v57  ;;  %v8221_v50 = vpack.c.bf16 %v3075_v6, %v3070_v20  ;;  %v3074_v23 = vld [vmem:[#allocation12 + $0xc18] sm:$0xff] }
 0x395   : > { %v9169_v1 = vadd.f32 %v2214_v53, %v11522_v61  ;;  %v2216_v41 = vpop.f32.mrb[53].mxu0  ;;  %8056 = vmatpush1.bf16.msra.mxu0 %v8055_v8  ;;  %8216 = vmatpush1.bf16.msra.mxu1 %v8215_v36  ;;  %v9684_v51 = vld [vmem:[#allocation9] sm:$0x1f]  ;;  %v11616_v57 = vsel %vm2567_vm5, %v9167_v33, %v2634_v38  ;;  %v3080_v8 = vld [vmem:[#allocation12 + $0xc48] sm:$0xff]  ;;  %v8223_v20 = vpack.c.bf16 %v3074_v23, %v3069_v45 }
 0x396   : > { %v9170_v19 = vadd.f32 %v2216_v41, %v11526_v58  ;;  %v11607_v0 = vsel %vm2568_vm4, %v9168_v5, %v2635_v13  ;;  %8058 = vmatprep.subr.bf16.mxu0 %v8057_v35  ;;  %8218 = vmatprep.subr.bf16.mxu1 %v8217_v30  ;;  %v12841_v53 = vld [vmem:[#allocation48_spill] sm:$0xff]  ;;  %12842 = vst [vmem:[#allocation45_spill] sm:$0xff] %v11616_v57 }
 0x397   : > { %12840 = vst [vmem:[#allocation46_spill] sm:$0xff] %v11607_v0  ;;  %v11610_v42 = vrot.slane %v9684_v51, %v12841_v53  ;;  %v2639_v22 = vmul.f32 %v9169_v1, %v11530_v16  ;;  %3321 = vmatprep.mubr.f32.mxu0 %v11607_v0  ;;  %3660 = vmatprep.mubr.f32.mxu1 %v11607_v0  ;;  %v3085_v36 = vld [vmem:[#allocation12 + $0xc70] sm:$0xff]  ;;  %vm2572_vm7 = vcmp.ge.f32.partialorder %v9169_v1, 0.0  ;;  %v3082_v51 = vld [vmem:[#allocation12 + $0xc58] sm:$0xff]  ;;  %v3084_v0 = vld [vmem:[#allocation12 + $0xc68] sm:$0xff] }
 0x398   : > { %v2640_v35 = vmul.f32 %v9170_v19, %v11534_v26  ;;  %v2220_v44 = vpop.f32.mrb[54].mxu0  ;;  %3322 = vmatmul.mubr.f32.gmra.mrb[82].mxu0 %v11616_v57  ;;  %3661 = vmatmul.mubr.f32.gmra.mrb[66].mxu1 %v11616_v57  ;;  %vm2573_vm6 = vcmp.ge.f32.partialorder %v9170_v19, 0.0  ;;  %v8063_v5 = vpack.c.bf16 %v3072_v39, %v3067_v48  ;;  %v8065_v33 = vpack.c.bf16 %v3083_v34, %v3078_v2  ;;  %v3077_v38 = vld [vmem:[#allocation12 + $0xc30] sm:$0xff]  ;;  %v3079_v57 = vld [vmem:[#allocation12 + $0xc40] sm:$0xff] }
 0x399   : > { %v9171_v30 = vadd.f32 %v2220_v44, %v11522_v61  ;;  %v2222_v49 = vpop.f32.mrb[55].mxu0  ;;  %8060 = vmatpush1.bf16.msra.mxu0 %v8059_v59  ;;  %8220 = vmatpush1.bf16.msra.mxu1 %v8219_v46  ;;  %v8225_v41 = vpack.c.bf16 %v3085_v36, %v3080_v8  ;;  %v11629_v61 = vsel %vm2572_vm7, %v9169_v1, %v2639_v22  ;;  %v2771_v2 = vld [vmem:[#allocation12 + $0x2a0] sm:$0xff]  ;;  %v2776_v59 = vld [vmem:[#allocation12 + $0x2c8] sm:$0xff]  ;;  %v9685_v36 = vld [vmem:[#allocation10] sm:$0x1f] }
 0x39a   : > { %v9172_v6 = vadd.f32 %v2222_v49, %v11526_v58  ;;  %v11623_v13 = vsel %vm2573_vm6, %v9170_v19, %v2640_v35  ;;  %8062 = vmatprep.subr.bf16.mxu0 %v8061_v47  ;;  %8222 = vmatprep.subr.bf16.mxu1 %v8221_v50  ;;  %v2931_v46 = vld [vmem:[#allocation12 + $0x7a0] sm:$0xff]  ;;  %v8067_v39 = vpack.c.bf16 %v3082_v51, %v3077_v38  ;;  %v2696_v35 = vld [vmem:[#allocation12 + $0x48] sm:$0xff]  ;;  %v2781_v38 = vld [vmem:[#allocation12 + $0x2f0] sm:$0xff] }
 0x39b   : > { %v2644_v48 = vmul.f32 %v9171_v30, %v11530_v16  ;;  %3327 = vmatprep.mubr.f32.mxu0 %v11623_v13  ;;  %3666 = vmatprep.mubr.f32.mxu1 %v11623_v13  ;;  %vm2577_vm9 = vcmp.ge.f32.partialorder %v9171_v30, 0.0  ;;  %v2936_v16 = vld [vmem:[#allocation12 + $0x7c8] sm:$0xff]  ;;  %v8227_v45 = vpack.c.bf16 %v3084_v0, %v3079_v57  ;;  %v2292_v1 = vadd.f32 %v11477_v37, %v11610_v42  ;;  %v2691_v57 = vld [vmem:[#allocation12 + $0x20] sm:$0xff]  ;;  %v2941_v51 = vld [vmem:[#allocation12 + $0x7f0] sm:$0xff] }
 0x39c   : > { %v2645_v58 = vmul.f32 %v9172_v6, %v11534_v26  ;;  %v7207_v23 = vpop.f32.mrb[56].mxu0  ;;  %3328 = vmatmul.mubr.f32.gmra.mrb[84].mxu0 %v11629_v61  ;;  %3667 = vmatmul.mubr.f32.gmra.mrb[68].mxu1 %v11629_v61  ;;  %vm2578_vm8 = vcmp.ge.f32.partialorder %v9172_v6, 0.0  ;;  %v8229_v34 = vpack.c.bf16 %v2776_v59, %v2771_v2  ;;  %v8261_v22 = vpack.c.bf16 %v2936_v16, %v2931_v46  ;;  %v2701_v59 = vld [vmem:[#allocation12 + $0x70] sm:$0xff] }
 0x39d   : > { %v7208_v47 = vpop.f32.mrb[57].mxu0  ;;  %8064 = vmatpush1.bf16.msra.mxu0 %v8063_v5  ;;  %8224 = vmatpush1.bf16.msra.mxu1 %v8223_v20  ;;  %v11641_v50 = vsel %vm2577_vm9, %v9171_v30, %v2644_v48  ;;  %v11644_v0 = vrot.slane %v9685_v36, %v12841_v53  ;;  %v2851_v5 = vld [vmem:[#allocation12 + $0x520] sm:$0xff]  ;;  %v2856_v30 = vld [vmem:[#allocation12 + $0x548] sm:$0xff]  ;;  %v2297_v49 = vadd.f32 %v11488_v40, %v11610_v42  ;;  %v2946_v48 = vld [vmem:[#allocation12 + $0x818] sm:$0xff] }
 0x39e   : > { %v7209_v19 = vadd.f32 %v7208_v47, %v7207_v23  ;;  %v11636_v26 = vsel %vm2578_vm8, %v9172_v6, %v2645_v58  ;;  %8066 = vmatprep.subr.bf16.mxu0 %v8065_v33  ;;  %8226 = vmatprep.subr.bf16.mxu1 %v8225_v41  ;;  %v2786_v6 = vld [vmem:[#allocation12 + $0x318] sm:$0xff]  ;;  %v8231_v41 = vpack.c.bf16 %v2696_v35, %v2691_v57  ;;  %v2796_v36 = vld [vmem:[#allocation12 + $0x368] sm:$0xff] }
 0x39f   : > { %3333 = vmatprep.mubr.f32.mxu0 %v11636_v26  ;;  %3672 = vmatprep.mubr.f32.mxu1 %v11636_v26  ;;  %v8263_v40 = vpack.c.bf16 %v2856_v30, %v2851_v5  ;;  %v2302_v46 = vadd.f32 %v11492_v15, %v11610_v42  ;;  %v8233_v47 = vpack.c.bf16 %v2786_v6, %v2781_v38  ;;  %v2956_v57 = vld [vmem:[#allocation12 + $0x868] sm:$0xff]  ;;  %v2711_v30 = vld [vmem:[#allocation12 + $0xc0] sm:$0xff] }
 0x3a0   : > { %v2397_v8 = vadd.f32 %v7209_v19, %v2292_v1  ;;  %v7210_v37 = vpop.f32.mrb[58].mxu0  ;;  %3334 = vmatmul.mubr.f32.gmra.mrb[86].mxu0 %v11641_v50  ;;  %3673 = vmatmul.mubr.f32.gmra.mrb[70].mxu1 %v11641_v50  ;;  %v2791_v1 = vld [vmem:[#allocation12 + $0x340] sm:$0xff] }
 0x3a1   : > { %v7211_v44 = vpop.f32.mrb[59].mxu0  ;;  %8068 = vmatpush1.bf16.msra.mxu0 %v8067_v39  ;;  %8228 = vmatpush1.bf16.msra.mxu1 %v8227_v45  ;;  %v2861_v39 = vld [vmem:[#allocation12 + $0x570] sm:$0xff]  ;;  %v2866_v45 = vld [vmem:[#allocation12 + $0x598] sm:$0xff]  ;;  %v8237_v38 = vpack.c.bf16 %v2796_v36, %v2791_v1 }
 0x3a2   : > { %v2502_v20 = vadd.f32 %v11506_v4, %v2397_v8  ;;  %v7212_v33 = vadd.f32 %v7211_v44, %v7210_v37  ;;  %3404 = vmatprep.mubr.f32.mxu0 %v12818_v55  ;;  %3743 = vmatprep.mubr.f32.mxu1 %v12818_v55  ;;  %v2706_v4 = vld [vmem:[#allocation12 + $0x98] sm:$0xff]  ;;  %v8265_v8 = vpack.c.bf16 %v2946_v48, %v2941_v51  ;;  %v2951_v37 = vld [vmem:[#allocation12 + $0x840] sm:$0xff]  ;;  %v2876_v48 = vld [vmem:[#allocation12 + $0x5e8] sm:$0xff] }
 0x3a3   : > { %8230 = vmatprep.subr.bf16.mxu0 %v8229_v34  ;;  %8262 = vmatprep.subr.bf16.mxu1 %v8261_v22  ;;  %v8235_v35 = vpack.c.bf16 %v2706_v4, %v2701_v59  ;;  %v8269_v6 = vpack.c.bf16 %v2956_v57, %v2951_v37  ;;  %v2871_v51 = vld [vmem:[#allocation12 + $0x5c0] sm:$0xff]  ;;  %v2966_v59 = vld [vmem:[#allocation12 + $0x8b8] sm:$0xff]  ;;  %v2881_v36 = vld [vmem:[#allocation12 + $0x610] sm:$0xff] }
 0x3a4   : > { %v2611_v2 = vmul.f32 %v11644_v0, %v2502_v20  ;;  %v2402_v58 = vadd.f32 %v7212_v33, %v2297_v49  ;;  %v7213_v23 = vpop.f32.mrb[60].mxu0  ;;  %vm2544_vm10 = vcmp.ge.f32.partialorder %v2502_v20, 0.0  ;;  %v2716_v49 = vld [vmem:[#allocation12 + $0xe8] sm:$0xff]  ;;  %v2726_v1 = vld [vmem:[#allocation12 + $0x138] sm:$0xff]  ;;  %v11680_v57 = vld [vmem:[#allocation12 + $0x3e0] sm:$0xff] }
 0x3a5   : > { %v7214_v16 = vpop.f32.mrb[61].mxu0  ;;  %v8239_v4 = vpack.c.bf16 %v2716_v49, %v2711_v30  ;;  %v2886_v37 = vld [vmem:[#allocation12 + $0x638] sm:$0xff] }
 0x3a6   : > { %v2507_v19 = vadd.f32 %v11504_v10, %v2402_v58  ;;  %v7215_v34 = vadd.f32 %v7214_v16, %v7213_v23  ;;  %v11657_v22 = vsel %vm2544_vm10, %v2502_v20, %v2611_v2  ;;  %v8267_v10 = vpack.c.bf16 %v2866_v45, %v2861_v39  ;;  %v2721_v45 = vld [vmem:[#allocation12 + $0x110] sm:$0xff] }
 0x3a7   : > { %3405 = vmatmul.mubr.f32.vlgmr.msra.gmra.mrb[72].mxu0 %v11657_v22  ;;  %3744 = vmatmul.mubr.f32.vlgmr.msra.gmra.mrb[56].mxu1 %v11657_v22  ;;  %v2307_v20 = vadd.f32 %v11494_v43, %v11610_v42  ;;  %v2806_v43 = vld [vmem:[#allocation12 + $0x3b8] sm:$0xff]  ;;  %v8271_v39 = vpack.c.bf16 %v2876_v48, %v2871_v51  ;;  %v8243_v30 = vpack.c.bf16 %v2726_v1, %v2721_v45  ;;  %v2731_v51 = vld [vmem:[#allocation12 + $0x160] sm:$0xff]  ;;  %v2736_v48 = vld [vmem:[#allocation12 + $0x188] sm:$0xff] }
 0x3a8   : > { %v2407_v15 = vadd.f32 %v7215_v34, %v2302_v46  ;;  %v7216_v44 = vpop.f32.mrb[62].mxu0  ;;  %8232 = vmatpush3.bf16.msra.mxu0 %v8231_v41  ;;  %8264 = vmatpush3.bf16.msra.mxu1 %v8263_v40  ;;  %vm2549_vm11 = vcmp.ge.f32.partialorder %v2507_v19, 0.0  ;;  %v2616_v5 = vmul.f32 %v11644_v0, %v2507_v19  ;;  %v11666_v41 = vld [vmem:[#allocation12 + $0x390] sm:$0xff] }
 0x3a9   : > { %v7217_v33 = vpop.f32.mrb[63].mxu0  ;;  %3410 = vmatprep.mubr.f32.mxu0 %v12818_v55  ;;  %3749 = vmatprep.mubr.f32.mxu1 %v12818_v55  ;;  %v2961_v40 = vld [vmem:[#allocation12 + $0x890] sm:$0xff]  ;;  %v8241_v34 = vpack.c.bf16 %v2806_v43, %v11666_v41  ;;  %v2896_v43 = vld [vmem:[#allocation12 + $0x688] sm:$0xff] }
 0x3aa   : > { %v2512_v2 = vadd.f32 %v11510_v17, %v2407_v15  ;;  %v7218_v58 = vadd.f32 %v7217_v33, %v7216_v44  ;;  %v11670_v23 = vsel %vm2549_vm11, %v2507_v19, %v2616_v5  ;;  %8234 = vmatprep.subr.bf16.mxu0 %v8233_v47  ;;  %8266 = vmatprep.subr.bf16.mxu1 %v8265_v8  ;;  %v2971_v5 = vld [vmem:[#allocation12 + $0x8e0] sm:$0xff] }
 0x3ab   : > { %3411 = vmatmul.mubr.f32.gmra.mrb[74].mxu0 %v11670_v23  ;;  %3750 = vmatmul.mubr.f32.gmra.mrb[58].mxu1 %v11670_v23  ;;  %v2312_v47 = vadd.f32 %v11496_v11, %v11610_v42  ;;  %v8273_v8 = vpack.c.bf16 %v2966_v59, %v2961_v40  ;;  %v2816_v11 = vld [vmem:[#allocation12 + $0x408] sm:$0xff]  ;;  %v8275_v33 = vpack.c.bf16 %v2886_v37, %v2881_v36  ;;  %v2821_v40 = vld [vmem:[#allocation12 + $0x430] sm:$0xff]  ;;  %v2746_v36 = vld [vmem:[#allocation12 + $0x1d8] sm:$0xff] }
 0x3ac   : > { %v2412_v46 = vadd.f32 %v7218_v58, %v2307_v20  ;;  %v7219_v16 = vpop.f32.mrb[64].mxu0  ;;  %8236 = vmatpush3.bf16.msra.mxu0 %v8235_v35  ;;  %8268 = vmatpush3.bf16.msra.mxu1 %v8267_v10  ;;  %vm2554_vm12 = vcmp.ge.f32.partialorder %v2512_v2, 0.0  ;;  %v2621_v17 = vmul.f32 %v11644_v0, %v2512_v2  ;;  %v2976_v10 = vld [vmem:[#allocation12 + $0x908] sm:$0xff]  ;;  %v8245_v41 = vpack.c.bf16 %v2816_v11, %v11680_v57  ;;  %v2891_v58 = vld [vmem:[#allocation12 + $0x660] sm:$0xff] }
 0x3ad   : > { %v7220_v19 = vpop.f32.mrb[65].mxu0  ;;  %3416 = vmatprep.mubr.f32.mxu0 %v12818_v55  ;;  %3755 = vmatprep.mubr.f32.mxu1 %v12818_v55  ;;  %v2831_v11 = vld [vmem:[#allocation12 + $0x480] sm:$0xff] }
 0x3ae   : > { %v2517_v35 = vadd.f32 %v11508_v62, %v2412_v46  ;;  %v7221_v15 = vadd.f32 %v7220_v19, %v7219_v16  ;;  %v11684_v44 = vsel %vm2554_vm12, %v2512_v2, %v2621_v17  ;;  %8238 = vmatprep.subr.bf16.mxu0 %v8237_v38  ;;  %8270 = vmatprep.subr.bf16.mxu1 %v8269_v6  ;;  %v2981_v16 = vld [vmem:[#allocation12 + $0x930] sm:$0xff]  ;;  %v2986_v17 = vld [vmem:[#allocation12 + $0x958] sm:$0xff] }
 0x3af   : > { %3417 = vmatmul.mubr.f32.gmra.mrb[76].mxu0 %v11684_v44  ;;  %3756 = vmatmul.mubr.f32.gmra.mrb[60].mxu1 %v11684_v44  ;;  %v2317_v38 = vadd.f32 %v11498_v52, %v11610_v42  ;;  %v8277_v2 = vpack.c.bf16 %v2976_v10, %v2971_v5  ;;  %v2826_v52 = vld [vmem:[#allocation12 + $0x458] sm:$0xff]  ;;  %v2741_v19 = vld [vmem:[#allocation12 + $0x1b0] sm:$0xff]  ;;  %v8281_v57 = vpack.c.bf16 %v2986_v17, %v2981_v16 }
 0x3b0   : > { %v2417_v49 = vadd.f32 %v7221_v15, %v2312_v47  ;;  %v7222_v20 = vpop.f32.mrb[66].mxu0  ;;  %8240 = vmatpush3.bf16.msra.mxu0 %v8239_v4  ;;  %8272 = vmatpush3.bf16.msra.mxu1 %v8271_v39  ;;  %vm2559_vm13 = vcmp.ge.f32.partialorder %v2517_v35, 0.0  ;;  %v2626_v62 = vmul.f32 %v11644_v0, %v2517_v35  ;;  %v8247_v39 = vpack.c.bf16 %v2736_v48, %v2731_v51  ;;  %v2906_v15 = vld [vmem:[#allocation12 + $0x6d8] sm:$0xff]  ;;  %v2841_v17 = vld [vmem:[#allocation12 + $0x4d0] sm:$0xff] }
 0x3b1   : > { %v7223_v6 = vpop.f32.mrb[67].mxu0  ;;  %3422 = vmatprep.mubr.f32.mxu0 %v12818_v55  ;;  %3761 = vmatprep.mubr.f32.mxu1 %v12818_v55  ;;  %v8279_v47 = vpack.c.bf16 %v2896_v43, %v2891_v58  ;;  %v8249_v37 = vpack.c.bf16 %v2826_v52, %v2821_v40  ;;  %v2911_v40 = vld [vmem:[#allocation12 + $0x700] sm:$0xff] }
 0x3b2   : > { %v2522_v59 = vadd.f32 %v11514_v14, %v2417_v49  ;;  %v7224_v4 = vadd.f32 %v7223_v6, %v7222_v20  ;;  %v11696_v46 = vsel %vm2559_vm13, %v2517_v35, %v2626_v62  ;;  %8242 = vmatprep.subr.bf16.mxu0 %v8241_v34  ;;  %8274 = vmatprep.subr.bf16.mxu1 %v8273_v8  ;;  %v2901_v35 = vld [vmem:[#allocation12 + $0x6b0] sm:$0xff]  ;;  %v2836_v49 = vld [vmem:[#allocation12 + $0x4a8] sm:$0xff] }
 0x3b3   : > { %3423 = vmatmul.mubr.f32.gmra.mrb[78].mxu0 %v11696_v46  ;;  %3762 = vmatmul.mubr.f32.gmra.mrb[62].mxu1 %v11696_v46  ;;  %v2322_v34 = vadd.f32 %v11500_v29, %v11610_v42  ;;  %v2991_v29 = vld [vmem:[#allocation12 + $0x980] sm:$0xff]  ;;  %v2996_v20 = vld [vmem:[#allocation12 + $0x9a8] sm:$0xff]  ;;  %v8251_v62 = vpack.c.bf16 %v2746_v36, %v2741_v19  ;;  %v8283_v48 = vpack.c.bf16 %v2906_v15, %v2901_v35  ;;  %v2761_v19 = vld [vmem:[#allocation12 + $0x250] sm:$0xff] }
 0x3b4   : > { %v2422_v45 = vadd.f32 %v7224_v4, %v2317_v38  ;;  %v7225_v1 = vpop.f32.mrb[68].mxu0  ;;  %8244 = vmatpush3.bf16.msra.mxu0 %v8243_v30  ;;  %8276 = vmatpush3.bf16.msra.mxu1 %v8275_v33  ;;  %vm2564_vm14 = vcmp.ge.f32.partialorder %v2522_v59, 0.0  ;;  %v2631_v14 = vmul.f32 %v11644_v0, %v2522_v59  ;;  %v2751_v38 = vld [vmem:[#allocation12 + $0x200] sm:$0xff]  ;;  %v2756_v6 = vld [vmem:[#allocation12 + $0x228] sm:$0xff]  ;;  %v8253_v58 = vpack.c.bf16 %v2836_v49, %v2831_v11  ;;  %v2766_v36 = vld [vmem:[#allocation12 + $0x278] sm:$0xff] }
 0x3b5   : > { %v7226_v8 = vpop.f32.mrb[69].mxu0  ;;  %3428 = vmatprep.mubr.f32.mxu0 %v12818_v55  ;;  %3767 = vmatprep.mubr.f32.mxu1 %v12818_v55  ;;  %v8285_v43 = vpack.c.bf16 %v2996_v20, %v2991_v29  ;;  %v2926_v35 = vld [vmem:[#allocation12 + $0x778] sm:$0xff]  ;;  %v3011_v15 = vld [vmem:[#allocation12 + $0xa20] sm:$0xff]  ;;  %v3016_v11 = vld [vmem:[#allocation12 + $0xa48] sm:$0xff]  ;;  %v8259_v49 = vpack.c.bf16 %v2766_v36, %v2761_v19 }
 0x3b6   : > { %v2527_v5 = vadd.f32 %v11512_v12, %v2422_v45  ;;  %v7227_v10 = vadd.f32 %v7226_v8, %v7225_v1  ;;  %v11707_v30 = vsel %vm2564_vm14, %v2522_v59, %v2631_v14  ;;  %8246 = vmatprep.subr.bf16.mxu0 %v8245_v41  ;;  %8278 = vmatprep.subr.bf16.mxu1 %v8277_v2  ;;  %v2916_v59 = vld [vmem:[#allocation12 + $0x728] sm:$0xff]  ;;  %v3006_v45 = vld [vmem:[#allocation12 + $0x9f8] sm:$0xff] }
 0x3b7   : > { %3429 = vmatmul.mubr.f32.gmra.mrb[80].mxu0 %v11707_v30  ;;  %3768 = vmatmul.mubr.f32.gmra.mrb[64].mxu1 %v11707_v30  ;;  %v2327_v41 = vadd.f32 %v11502_v25, %v11610_v42  ;;  %v8255_v42 = vpack.c.bf16 %v2756_v6, %v2751_v38  ;;  %v3001_v25 = vld [vmem:[#allocation12 + $0x9d0] sm:$0xff]  ;;  %v8287_v14 = vpack.c.bf16 %v2916_v59, %v2911_v40  ;;  %v4285_v6 = vld [vmem:[#allocation16 + $0xf8] sm:$0xff]  ;;  %v4324_v19 = vld [vmem:[#allocation16 + $0x230] sm:$0xff] }
 0x3b8   : > { %v2427_v33 = vadd.f32 %v7227_v10, %v2322_v34  ;;  %v7228_v51 = vpop.f32.mrb[70].mxu0  ;;  %8248 = vmatpush3.bf16.msra.mxu0 %v8247_v39  ;;  %8280 = vmatpush3.bf16.msra.mxu1 %v8279_v47  ;;  %vm2569_vm15 = vcmp.ge.f32.partialorder %v2527_v5, 0.0  ;;  %v2636_v12 = vmul.f32 %v11644_v0, %v2527_v5  ;;  %v2846_v39 = vld [vmem:[#allocation12 + $0x4f8] sm:$0xff]  ;;  %v4265_v10 = vld [vmem:[#allocation16 + $0x58] sm:$0xff]  ;;  %v4274_v59 = vld [vmem:[#allocation16 + $0xa0] sm:$0xff] }
 0x3b9   : > { %v7229_v2 = vpop.f32.mrb[71].mxu0  ;;  %3434 = vmatprep.mubr.f32.mxu0 %v12818_v55  ;;  %3773 = vmatprep.mubr.f32.mxu1 %v12818_v55  ;;  %v8257_v47 = vpack.c.bf16 %v2846_v39, %v2841_v17  ;;  %v4275_v38 = vld [vmem:[#allocation16 + $0xa8] sm:$0xff]  ;;  %v4345_v36 = vld [vmem:[#allocation16 + $0x2d8] sm:$0xff] }
 0x3ba   : > { %v2532_v4 = vadd.f32 %v11518_v54, %v2427_v33  ;;  %v7230_v52 = vadd.f32 %v7229_v2, %v7228_v51  ;;  %v11717_v16 = vsel %vm2569_vm15, %v2527_v5, %v2636_v12  ;;  %8250 = vmatprep.subr.bf16.mxu0 %v8249_v37  ;;  %8282 = vmatprep.subr.bf16.mxu1 %v8281_v57  ;;  %v2921_v57 = vld [vmem:[#allocation12 + $0x750] sm:$0xff]  ;;  %v3026_v12 = vld [vmem:[#allocation12 + $0xa98] sm:$0xff]  ;;  %v3031_v2 = vld [vmem:[#allocation12 + $0xac0] sm:$0xff] }
 0x3bb   : > { %3435 = vmatmul.mubr.f32.gmra.mrb[82].mxu0 %v11717_v16  ;;  %3774 = vmatmul.mubr.f32.gmra.mrb[66].mxu1 %v11717_v16  ;;  %v8289_v37 = vpack.c.bf16 %v3006_v45, %v3001_v25  ;;  %v4255_v5 = vld [vmem:[#allocation16 + $0x8] sm:$0xff]  ;;  %v8291_v29 = vpack.c.bf16 %v2926_v35, %v2921_v57  ;;  %v8329_v40 = vpack.c.bf16 %v4285_v6, %v4275_v38  ;;  %v4294_v25 = vld [vmem:[#allocation16 + $0x140] sm:$0xff]  ;;  %v4304_v45 = vld [vmem:[#allocation16 + $0x190] sm:$0xff] }
 0x3bc   : > { %v2432_v1 = vadd.f32 %v7230_v52, %v2327_v41  ;;  %8252 = vmatpush3.bf16.msra.mxu0 %v8251_v62  ;;  %8284 = vmatpush3.bf16.msra.mxu1 %v8283_v48  ;;  %vm2574_vm0 = vcmp.ge.f32.partialorder %v2532_v4, 0.0  ;;  %v2641_v54 = vmul.f32 %v11644_v0, %v2532_v4  ;;  %v8293_v62 = vpack.c.bf16 %v3016_v11, %v3011_v15  ;;  %v3021_v33 = vld [vmem:[#allocation12 + $0xa70] sm:$0xff]  ;;  %v4305_v52 = vld [vmem:[#allocation16 + $0x198] sm:$0xff]  ;;  %v3066_v35 = vld [vmem:[#allocation12 + $0xbd8] sm:$0xff] }
 0x3bd   : > { %3440 = vmatprep.mubr.f32.mxu0 %v12818_v55  ;;  %3779 = vmatprep.mubr.f32.mxu1 %v12818_v55  ;;  %v8325_v51 = vpack.c.bf16 %v4265_v10, %v4255_v5  ;;  %v4254_v48 = vld [vmem:[#allocation16] sm:$0xff]  ;;  %v8297_v41 = vpack.c.bf16 %v3026_v12, %v3021_v33  ;;  %v4344_v5 = vld [vmem:[#allocation16 + $0x2d0] sm:$0xff] }
 0x3be   : > { %v2537_v34 = vadd.f32 %v11516_v27, %v2432_v1  ;;  %v11725_v8 = vsel %vm2574_vm0, %v2532_v4, %v2641_v54  ;;  %8254 = vmatprep.subr.bf16.mxu0 %v8253_v58  ;;  %8286 = vmatprep.subr.bf16.mxu1 %v8285_v43  ;;  %v3036_v43 = vld [vmem:[#allocation12 + $0xae8] sm:$0xff]  ;;  %v4284_v4 = vld [vmem:[#allocation16 + $0xf0] sm:$0xff]  ;;  %v3041_v17 = vld [vmem:[#allocation12 + $0xb10] sm:$0xff]  ;;  %v8335_v54 = vpack.c.bf16 %v4304_v45, %v4294_v25 }
 0x3bf   : > { %3441 = vmatmul.mubr.f32.gmra.mrb[84].mxu0 %v11725_v8  ;;  %3780 = vmatmul.mubr.f32.gmra.mrb[68].mxu1 %v11725_v8  ;;  %v8331_v39 = vpack.c.bf16 %v4284_v4, %v4274_v59  ;;  %v3051_v1 = vld [vmem:[#allocation12 + $0xb60] sm:$0xff]  ;;  %v4334_v11 = vld [vmem:[#allocation16 + $0x280] sm:$0xff]  ;;  %v12847_v10 = vld [vmem:[#allocation33_spill] sm:$0xff] }
 0x3c0   : > { %8256 = vmatpush3.bf16.msra.mxu0 %v8255_v42  ;;  %8288 = vmatpush3.bf16.msra.mxu1 %v8287_v14  ;;  %vm2579_vm1 = vcmp.ge.f32.partialorder %v2537_v34, 0.0  ;;  %v2646_v27 = vmul.f32 %v11644_v0, %v2537_v34  ;;  %v4264_v0 = vld [vmem:[#allocation16 + $0x50] sm:$0xff]  ;;  %v12849_v12 = vld [vmem:[#allocation35_spill] sm:$0xff]  ;;  %v3081_v4 = vld [vmem:[#allocation12 + $0xc50] sm:$0xff] }
 0x3c1   : > { %3446 = vmatprep.mubr.f32.mxu0 %v12818_v55  ;;  %3785 = vmatprep.mubr.f32.mxu1 %v12818_v55  ;;  %v8327_v58 = vpack.c.bf16 %v4264_v0, %v4254_v48  ;;  %v3071_v33 = vld [vmem:[#allocation12 + $0xc00] sm:$0xff]  ;;  %v3076_v48 = vld [vmem:[#allocation12 + $0xc28] sm:$0xff]  ;;  %v4395_v45 = vld [vmem:[#allocation16 + $0x468] sm:$0xff] }
 0x3c2   : > { %v11732_v20 = vsel %vm2579_vm1, %v2537_v34, %v2646_v27  ;;  %8258 = vmatprep.subr.bf16.mxu0 %v8257_v47  ;;  %8290 = vmatprep.subr.bf16.mxu1 %v8289_v37  ;;  %v4314_v47 = vld [vmem:[#allocation16 + $0x1e0] sm:$0xff]  ;;  %v4355_v27 = vld [vmem:[#allocation16 + $0x328] sm:$0xff]  ;;  %v4364_v6 = vld [vmem:[#allocation16 + $0x370] sm:$0xff]  ;;  %v8317_v59 = vpack.c.bf16 %v3076_v48, %v3071_v33 }
 0x3c3   : > { %3447 = vmatmul.mubr.f32.gmra.mrb[86].mxu0 %v11732_v20  ;;  %3786 = vmatmul.mubr.f32.gmra.mrb[70].mxu1 %v11732_v20  ;;  %v3061_v37 = vld [vmem:[#allocation12 + $0xbb0] sm:$0xff]  ;;  %v8339_v57 = vpack.c.bf16 %v4324_v19, %v4314_v47  ;;  %v12855_v25 = vld [vmem:[#allocation38_spill] sm:$0xff] }
 0x3c4   : > { %8260 = vmatpush3.bf16.msra.mxu0 %v8259_v49  ;;  %3856 = vmatprep.mubr.f32.mxu0 %v11275_v18  ;;  %v4295_v18 = vld [vmem:[#allocation16 + $0x148] sm:$0xff]  ;;  %v4365_v49 = vld [vmem:[#allocation16 + $0x378] sm:$0xff]  ;;  %v4354_v38 = vld [vmem:[#allocation16 + $0x320] sm:$0xff] }
 0x3c5   : > { %8292 = vmatpush3.bf16.msra.mxu1 %v8291_v29  ;;  %3961 = vmatprep.mubr.f32.mxu1 %v11542_v21  ;;  %v8301_v21 = vpack.c.bf16 %v3036_v43, %v3031_v2  ;;  %v8333_v42 = vpack.c.bf16 %v4305_v52, %v4295_v18  ;;  %v12848_v29 = vld [vmem:[#allocation44_spill] sm:$0xff]  ;;  %v8345_v0 = vpack.c.bf16 %v4365_v49, %v4355_v27  ;;  %v12851_v2 = vld [vmem:[#allocation34_spill] sm:$0xff] }
 0x3c6   : > { %8294 = vmatprep.subr.bf16.mxu0 %v8293_v62  ;;  %8326 = vmatprep.subr.bf16.mxu1 %v8325_v51  ;;  %v8343_v51 = vpack.c.bf16 %v4344_v5, %v4334_v11  ;;  %v4385_v43 = vld [vmem:[#allocation16 + $0x418] sm:$0xff]  ;;  %v8347_v18 = vpack.c.bf16 %v4364_v6, %v4354_v38  ;;  %v12853_v52 = vld [vmem:[#allocation36_spill] sm:$0xff]  ;;  %v4404_v19 = vld [vmem:[#allocation16 + $0x4b0] sm:$0xff] }
 0x3c7   : > { %3857 = vmatmul.mubr.f32.vlgmr.msra.gmra.mrb[88].mxu0 %v11288_v7  ;;  %v3046_v7 = vld [vmem:[#allocation12 + $0xb38] sm:$0xff]  ;;  %v4394_v47 = vld [vmem:[#allocation16 + $0x460] sm:$0xff]  ;;  %v4445_v5 = vld [vmem:[#allocation16 + $0x5f8] sm:$0xff] }
 0x3c8   : > { %3962 = vmatmul.mubr.f32.vlgmr.msra.gmra.mrb[72].mxu1 %v11545_v60  ;;  %3861 = vmatprep.mubr.f32.mxu0 %v11311_v31  ;;  %v4315_v31 = vld [vmem:[#allocation16 + $0x1e8] sm:$0xff]  ;;  %v4325_v60 = vld [vmem:[#allocation16 + $0x238] sm:$0xff]  ;;  %v4424_v11 = vld [vmem:[#allocation16 + $0x550] sm:$0xff] }
 0x3c9   : > { %3966 = vmatprep.mubr.f32.mxu1 %v11555_v28  ;;  %8296 = vmatpush3.bf16.msra.mxu0 %v8293_v62  ;;  %v8305_v28 = vpack.c.bf16 %v3046_v7, %v3041_v17  ;;  %v8337_v14 = vpack.c.bf16 %v4325_v60, %v4315_v31  ;;  %v8313_v62 = vpack.c.bf16 %v3066_v35, %v3061_v37  ;;  %v4384_v7 = vld [vmem:[#allocation16 + $0x410] sm:$0xff]  ;;  %v4405_v31 = vld [vmem:[#allocation16 + $0x4b8] sm:$0xff]  ;;  %v4287_v35 = vld [vmem:[#allocation16 + $0x108] sm:$0xff] }
 0x3ca   : > { %8298 = vmatprep.subr.bf16.mxu0 %v8297_v41  ;;  %8328 = vmatpush1.bf16.msra.mxu1 %v8327_v58  ;;  %v4375_v58 = vld [vmem:[#allocation16 + $0x3c8] sm:$0xff]  ;;  %v4277_v37 = vld [vmem:[#allocation16 + $0xb8] sm:$0xff]  ;;  %v4276_v27 = vld [vmem:[#allocation16 + $0xb0] sm:$0xff] }
 0x3cb   : > { %3862 = vmatmul.mubr.f32.gmra.mrb[90].mxu0 %v11326_v3  ;;  %8330 = vmatprep.subr.bf16.mxu1 %v8329_v40  ;;  %v3056_v3 = vld [vmem:[#allocation12 + $0xb88] sm:$0xff]  ;;  %v12852_v40 = vld [vmem:[#allocation46_spill] sm:$0xff]  ;;  %v8349_v17 = vpack.c.bf16 %v4385_v43, %v4375_v58  ;;  %v4307_v33 = vld [vmem:[#allocation16 + $0x1a8] sm:$0xff] }
 0x3cc   : > { %3967 = vmatmul.mubr.f32.gmra.mrb[74].mxu1 %v11561_v24  ;;  %3866 = vmatprep.mubr.f32.mxu0 %v11342_v9  ;;  %v12843_v9 = vld [vmem:[#allocation32_spill] sm:$0xff]  ;;  %v8309_v34 = vpack.c.bf16 %v3056_v3, %v3051_v1  ;;  %v4444_v48 = vld [vmem:[#allocation16 + $0x5f0] sm:$0xff] }
 0x3cd   : > { %3971 = vmatprep.mubr.f32.mxu1 %v11568_v56  ;;  %8300 = vmatpush3.bf16.msra.mxu0 %v8297_v41  ;;  %v4335_v24 = vld [vmem:[#allocation16 + $0x288] sm:$0xff]  ;;  %v12844_v56 = vld [vmem:[#allocation42_spill] sm:$0xff]  ;;  %v12850_v41 = vld [vmem:[#allocation43_spill] sm:$0xff] }
 0x3ce   : > { %8302 = vmatprep.subr.bf16.mxu0 %v8301_v21  ;;  %8332 = vmatpush1.bf16.msra.mxu1 %v8331_v39  ;;  %v8341_v15 = vpack.c.bf16 %v4345_v36, %v4335_v24  ;;  %v4374_v39 = vld [vmem:[#allocation16 + $0x3c0] sm:$0xff]  ;;  %v4267_v3 = vld [vmem:[#allocation16 + $0x68] sm:$0xff]  ;;  %v4425_v36 = vld [vmem:[#allocation16 + $0x558] sm:$0xff] }
 0x3cf   : > { %3867 = vmatmul.mubr.f32.gmra.mrb[92].mxu0 %v11358_v63  ;;  %8334 = vmatprep.subr.bf16.mxu1 %v8333_v42  ;;  %v12845_v63 = vld [vmem:[#allocation31_spill] sm:$0xff]  ;;  %v12854_v42 = vld [vmem:[#allocation45_spill] sm:$0xff]  ;;  %v8351_v1 = vpack.c.bf16 %v4384_v7, %v4374_v39 }
 0x3d0   : > { %3972 = vmatmul.mubr.f32.gmra.mrb[76].mxu1 %v11574_v32  ;;  %3871 = vmatprep.mubr.f32.mxu0 %v12843_v9  ;;  %v12846_v32 = vld [vmem:[#allocation41_spill] sm:$0xff]  ;;  %v12857_v9 = vld [vmem:[#allocation40_spill] sm:$0xff]  ;;  %v4337_v39 = vld [vmem:[#allocation16 + $0x298] sm:$0xff] }
 0x3d1   : > { %3976 = vmatprep.mubr.f32.mxu1 %v12844_v56  ;;  %8304 = vmatpush3.bf16.msra.mxu0 %v8301_v21  ;;  %v3086_v21 = vld [vmem:[#allocation12 + $0xc78] sm:$0xff]  ;;  %v4286_v49 = vld [vmem:[#allocation16 + $0x100] sm:$0xff] }
 0x3d2   : > { %8306 = vmatprep.subr.bf16.mxu0 %v8305_v28  ;;  %8336 = vmatpush1.bf16.msra.mxu1 %v8335_v54  ;;  %v8321_v60 = vpack.c.bf16 %v3086_v21, %v3081_v4  ;;  %v12856_v54 = vld [vmem:[#allocation37_spill] sm:$0xff] }
 0x3d3   : > { %3872 = vmatmul.mubr.f32.gmra.mrb[94].mxu0 %v12845_v63  ;;  %8338 = vmatprep.subr.bf16.mxu1 %v8337_v14  ;;  %v8353_v14 = vpack.c.bf16 %v4405_v31, %v4395_v45  ;;  %v4415_v24 = vld [vmem:[#allocation16 + $0x508] sm:$0xff]  ;;  %v4256_v56 = vld [vmem:[#allocation16 + $0x10] sm:$0xff]  ;;  %v12858_v63 = vld [vmem:[#allocation39_spill] sm:$0xff] }
 0x3d4   : > { %3977 = vmatmul.mubr.f32.gmra.mrb[78].mxu1 %v12846_v32  ;;  %3876 = vmatprep.mubr.f32.mxu0 %v12847_v10  ;;  %v8489_v10 = vpack.c.bf16 %v4287_v35, %v4277_v37  ;;  %v4296_v6 = vld [vmem:[#allocation16 + $0x150] sm:$0xff]  ;;  %v4327_v43 = vld [vmem:[#allocation16 + $0x248] sm:$0xff]  ;;  %v4474_v45 = vld [vmem:[#allocation16 + $0x6e0] sm:$0xff] }
 0x3d5   : > { %3981 = vmatprep.mubr.f32.mxu1 %v12848_v29  ;;  %8308 = vmatpush3.bf16.msra.mxu0 %v8305_v28  ;;  %v4257_v28 = vld [vmem:[#allocation16 + $0x18] sm:$0xff]  ;;  %v4464_v4 = vld [vmem:[#allocation16 + $0x690] sm:$0xff] }
 0x3d6   : > { %8310 = vmatprep.subr.bf16.mxu0 %v8309_v34  ;;  %8340 = vmatpush1.bf16.msra.mxu1 %v8339_v57  ;;  %v8355_v57 = vpack.c.bf16 %v4404_v19, %v4394_v47  ;;  %v4297_v29 = vld [vmem:[#allocation16 + $0x158] sm:$0xff]  ;;  %v4316_v21 = vld [vmem:[#allocation16 + $0x1f0] sm:$0xff]  ;;  %v4367_v47 = vld [vmem:[#allocation16 + $0x388] sm:$0xff] }
 0x3d7   : > { %3877 = vmatmul.mubr.f32.gmra.mrb[96].mxu0 %v12849_v12  ;;  %8342 = vmatprep.subr.bf16.mxu1 %v8341_v15  ;;  %v8357_v15 = vpack.c.bf16 %v4425_v36, %v4415_v24  ;;  %v4434_v12 = vld [vmem:[#allocation16 + $0x5a0] sm:$0xff]  ;;  %v8493_v38 = vpack.c.bf16 %v4307_v33, %v4297_v29  ;;  %v4484_v31 = vld [vmem:[#allocation16 + $0x730] sm:$0xff]  ;;  %v4525_v36 = vld [vmem:[#allocation16 + $0x878] sm:$0xff] }
 0x3d8   : > { %3982 = vmatmul.mubr.f32.gmra.mrb[80].mxu1 %v12850_v41  ;;  %3881 = vmatprep.mubr.f32.mxu0 %v12851_v2  ;;  %v4306_v41 = vld [vmem:[#allocation16 + $0x1a0] sm:$0xff]  ;;  %v4317_v2 = vld [vmem:[#allocation16 + $0x1f8] sm:$0xff]  ;;  %v8363_v58 = vpack.c.bf16 %v4444_v48, %v4434_v12  ;;  %v4504_v24 = vld [vmem:[#allocation16 + $0x7d0] sm:$0xff] }
 0x3d9   : > { %3986 = vmatprep.mubr.f32.mxu1 %v12852_v40  ;;  %8312 = vmatpush3.bf16.msra.mxu0 %v8309_v34  ;;  %v4266_v34 = vld [vmem:[#allocation16 + $0x60] sm:$0xff]  ;;  %v4377_v37 = vld [vmem:[#allocation16 + $0x3d8] sm:$0xff]  ;;  %v4407_v29 = vld [vmem:[#allocation16 + $0x4c8] sm:$0xff] }
 0x3da   : > { %8314 = vmatprep.subr.bf16.mxu0 %v8313_v62  ;;  %8344 = vmatpush1.bf16.msra.mxu1 %v8343_v51  ;;  %v8487_v32 = vpack.c.bf16 %v4266_v34, %v4256_v56  ;;  %v4356_v56 = vld [vmem:[#allocation16 + $0x330] sm:$0xff]  ;;  %v4366_v34 = vld [vmem:[#allocation16 + $0x380] sm:$0xff]  ;;  %v4555_v12 = vld [vmem:[#allocation16 + $0x968] sm:$0xff] }
 0x3db   : > { %3882 = vmatmul.mubr.f32.gmra.mrb[98].mxu0 %v12853_v52  ;;  %8346 = vmatprep.subr.bf16.mxu1 %v8345_v0  ;;  %v8491_v0 = vpack.c.bf16 %v4286_v49, %v4276_v27  ;;  %v8497_v52 = vpack.c.bf16 %v4327_v43, %v4317_v2  ;;  %v4397_v27 = vld [vmem:[#allocation16 + $0x478] sm:$0xff]  ;;  %v4534_v33 = vld [vmem:[#allocation16 + $0x8c0] sm:$0xff]  ;;  %v4427_v2 = vld [vmem:[#allocation16 + $0x568] sm:$0xff] }
 0x3dc   : > { %3987 = vmatmul.mubr.f32.gmra.mrb[82].mxu1 %v12854_v42  ;;  %3886 = vmatprep.mubr.f32.mxu0 %v12855_v25  ;;  %v4347_v42 = vld [vmem:[#allocation16 + $0x2e8] sm:$0xff]  ;;  %v4565_v48 = vld [vmem:[#allocation16 + $0x9b8] sm:$0xff]  ;;  %v4554_v43 = vld [vmem:[#allocation16 + $0x960] sm:$0xff] }
 0x3dd   : > { %3991 = vmatprep.mubr.f32.mxu1 %v11623_v13  ;;  %8316 = vmatpush3.bf16.msra.mxu0 %v8313_v62  ;;  %v8485_v13 = vpack.c.bf16 %v4267_v3, %v4257_v28  ;;  %v8501_v28 = vpack.c.bf16 %v4347_v42, %v4337_v39  ;;  %v4357_v3 = vld [vmem:[#allocation16 + $0x338] sm:$0xff]  ;;  %v4447_v39 = vld [vmem:[#allocation16 + $0x608] sm:$0xff] }
 0x3de   : > { %8318 = vmatprep.subr.bf16.mxu0 %v8317_v59  ;;  %8348 = vmatpush1.bf16.msra.mxu1 %v8347_v18  ;;  %v4485_v18 = vld [vmem:[#allocation16 + $0x738] sm:$0xff] }
 0x3df   : > { %3887 = vmatmul.mubr.f32.gmra.mrb[100].mxu0 %v12856_v54  ;;  %8350 = vmatprep.subr.bf16.mxu1 %v8349_v17  ;;  %v4326_v17 = vld [vmem:[#allocation16 + $0x240] sm:$0xff] }
 0x3e0   : > { %3992 = vmatmul.mubr.f32.gmra.mrb[84].mxu1 %v11629_v61  ;;  %3891 = vmatprep.mubr.f32.mxu0 %v12857_v9  ;;  %v4414_v61 = vld [vmem:[#allocation16 + $0x500] sm:$0xff] }
 0x3e1   : > { %3996 = vmatprep.mubr.f32.mxu1 %v11636_v26  ;;  %8320 = vmatpush3.bf16.msra.mxu0 %v8317_v59  ;;  %v4435_v26 = vld [vmem:[#allocation16 + $0x5a8] sm:$0xff]  ;;  %v8359_v62 = vpack.c.bf16 %v4424_v11, %v4414_v61  ;;  %v4454_v59 = vld [vmem:[#allocation16 + $0x640] sm:$0xff]  ;;  %v4524_v61 = vld [vmem:[#allocation16 + $0x870] sm:$0xff] }
 0x3e2   : > { %8322 = vmatprep.subr.bf16.mxu0 %v8321_v60  ;;  %8352 = vmatpush1.bf16.msra.mxu1 %v8351_v1  ;;  %v8361_v51 = vpack.c.bf16 %v4445_v5, %v4435_v26  ;;  %v8367_v7 = vpack.c.bf16 %v4464_v4, %v4454_v59  ;;  %v4336_v1 = vld [vmem:[#allocation16 + $0x290] sm:$0xff]  ;;  %v4346_v54 = vld [vmem:[#allocation16 + $0x2e0] sm:$0xff]  ;;  %v4535_v11 = vld [vmem:[#allocation16 + $0x8c8] sm:$0xff] }
 0x3e3   : > { %3892 = vmatmul.mubr.f32.gmra.mrb[102].mxu0 %v12858_v63  ;;  %8354 = vmatprep.subr.bf16.mxu1 %v8353_v14  ;;  %v8371_v14 = vpack.c.bf16 %v4484_v31, %v4474_v45  ;;  %v4494_v9 = vld [vmem:[#allocation16 + $0x780] sm:$0xff]  ;;  %v4387_v63 = vld [vmem:[#allocation16 + $0x428] sm:$0xff]  ;;  %v4545_v26 = vld [vmem:[#allocation16 + $0x918] sm:$0xff] }
 0x3e4   : > { %3997 = vmatmul.mubr.f32.gmra.mrb[86].mxu1 %v11641_v50  ;;  %7481 = vmatprep.mubr.f32.mxu0 %v11657_v22  ;;  %v4455_v50 = vld [vmem:[#allocation16 + $0x648] sm:$0xff]  ;;  %v4465_v22 = vld [vmem:[#allocation16 + $0x698] sm:$0xff]  ;;  %v8509_v5 = vpack.c.bf16 %v4387_v63, %v4377_v37  ;;  %v4436_v45 = vld [vmem:[#allocation16 + $0x5b0] sm:$0xff] }
 0x3e5   : > { %8324 = vmatpush3.bf16.msra.mxu0 %v8321_v60  ;;  %v8365_v40 = vpack.c.bf16 %v4465_v22, %v4455_v50  ;;  %v4505_v60 = vld [vmem:[#allocation16 + $0x7d8] sm:$0xff]  ;;  %v8513_v22 = vpack.c.bf16 %v4407_v29, %v4397_v27  ;;  %v4575_v59 = vld [vmem:[#allocation16 + $0xa08] sm:$0xff]  ;;  %v4446_v31 = vld [vmem:[#allocation16 + $0x600] sm:$0xff] }
 0x3e6   : > { %8486 = vmatprep.subr.bf16.mxu0 %v8485_v13  ;;  %8356 = vmatpush1.bf16.msra.mxu1 %v8355_v57  ;;  %v8505_v13 = vpack.c.bf16 %v4367_v47, %v4357_v3  ;;  %v8375_v57 = vpack.c.bf16 %v4504_v24, %v4494_v9  ;;  %v4585_v4 = vld [vmem:[#allocation16 + $0xa58] sm:$0xff]  ;;  %v4476_v9 = vld [vmem:[#allocation16 + $0x6f0] sm:$0xff]  ;;  %v4486_v24 = vld [vmem:[#allocation16 + $0x740] sm:$0xff] }
 0x3e7   : > { %8358 = vmatprep.subr.bf16.mxu1 %v8357_v15  ;;  %v4514_v15 = vld [vmem:[#allocation16 + $0x820] sm:$0xff]  ;;  %v4477_v3 = vld [vmem:[#allocation16 + $0x6f8] sm:$0xff] }
 0x3e8   : > { %7482 = vmatmul.mubr.f32.vlgmr.msra.gmra.mrb[104].mxu0 %v11670_v23  ;;  %v4475_v23 = vld [vmem:[#allocation16 + $0x6e8] sm:$0xff]  ;;  %v8379_v49 = vpack.c.bf16 %v4524_v61, %v4514_v15  ;;  %v4517_v37 = vld [vmem:[#allocation16 + $0x838] sm:$0xff]  ;;  %v4516_v15 = vld [vmem:[#allocation16 + $0x830] sm:$0xff] }
 0x3e9   : > { %7484 = vmatprep.mubr.f32.mxu0 %v11684_v44  ;;  %8488 = vmatpush1.bf16.msra.mxu0 %v8487_v32  ;;  %v8495_v44 = vpack.c.bf16 %v4306_v41, %v4296_v6  ;;  %v8369_v25 = vpack.c.bf16 %v4485_v18, %v4475_v23  ;;  %v4376_v32 = vld [vmem:[#allocation16 + $0x3d0] sm:$0xff]  ;;  %v4417_v6 = vld [vmem:[#allocation16 + $0x518] sm:$0xff]  ;;  %v4526_v61 = vld [vmem:[#allocation16 + $0x880] sm:$0xff] }
 0x3ea   : > { %8490 = vmatprep.subr.bf16.mxu0 %v8489_v10  ;;  %8360 = vmatpush1.bf16.msra.mxu1 %v8359_v62  ;;  %v4386_v10 = vld [vmem:[#allocation16 + $0x420] sm:$0xff]  ;;  %v8381_v62 = vpack.c.bf16 %v4545_v26, %v4535_v11  ;;  %v8517_v18 = vpack.c.bf16 %v4427_v2, %v4417_v6  ;;  %v4537_v11 = vld [vmem:[#allocation16 + $0x8d8] sm:$0xff]  ;;  %v4547_v26 = vld [vmem:[#allocation16 + $0x928] sm:$0xff] }
 0x3eb   : > { %8362 = vmatprep.subr.bf16.mxu1 %v8361_v51  ;;  %v4544_v51 = vld [vmem:[#allocation16 + $0x910] sm:$0xff]  ;;  %v8511_v50 = vpack.c.bf16 %v4386_v10, %v4376_v32  ;;  %v4546_v10 = vld [vmem:[#allocation16 + $0x920] sm:$0xff]  ;;  %v4557_v27 = vld [vmem:[#allocation16 + $0x978] sm:$0xff] }
 0x3ec   : > { %7485 = vmatmul.mubr.f32.gmra.mrb[106].mxu0 %v11696_v46  ;;  %v4495_v46 = vld [vmem:[#allocation16 + $0x788] sm:$0xff]  ;;  %v8383_v41 = vpack.c.bf16 %v4544_v51, %v4534_v33  ;;  %v4536_v32 = vld [vmem:[#allocation16 + $0x8d0] sm:$0xff]  ;;  %v4566_v51 = vld [vmem:[#allocation16 + $0x9c0] sm:$0xff] }
 0x3ed   : > { %7487 = vmatprep.mubr.f32.mxu0 %v11707_v30  ;;  %8492 = vmatpush1.bf16.msra.mxu0 %v8491_v0  ;;  %v8499_v30 = vpack.c.bf16 %v4326_v17, %v4316_v21  ;;  %v8373_v19 = vpack.c.bf16 %v4505_v60, %v4495_v46  ;;  %v4396_v0 = vld [vmem:[#allocation16 + $0x470] sm:$0xff]  ;;  %v4437_v17 = vld [vmem:[#allocation16 + $0x5b8] sm:$0xff]  ;;  %v4467_v60 = vld [vmem:[#allocation16 + $0x6a8] sm:$0xff]  ;;  %v8543_v29 = vpack.c.bf16 %v4546_v10, %v4536_v32 }
 0x3ee   : > { %8494 = vmatprep.subr.bf16.mxu0 %v8493_v38  ;;  %8364 = vmatpush1.bf16.msra.mxu1 %v8363_v58  ;;  %v4406_v38 = vld [vmem:[#allocation16 + $0x4c0] sm:$0xff]  ;;  %v8385_v58 = vpack.c.bf16 %v4565_v48, %v4555_v12  ;;  %v4457_v46 = vld [vmem:[#allocation16 + $0x658] sm:$0xff]  ;;  %v4556_v33 = vld [vmem:[#allocation16 + $0x970] sm:$0xff] }
 0x3ef   : > { %8366 = vmatprep.subr.bf16.mxu1 %v8365_v40  ;;  %v4564_v40 = vld [vmem:[#allocation16 + $0x9b0] sm:$0xff]  ;;  %v8515_v23 = vpack.c.bf16 %v4406_v38, %v4396_v0  ;;  %v4577_v12 = vld [vmem:[#allocation16 + $0xa18] sm:$0xff]  ;;  %v4587_v48 = vld [vmem:[#allocation16 + $0xa68] sm:$0xff] }
 0x3f0   : > { %7488 = vmatmul.mubr.f32.gmra.mrb[108].mxu0 %v11717_v16  ;;  %v4515_v16 = vld [vmem:[#allocation16 + $0x828] sm:$0xff]  ;;  %v8387_v21 = vpack.c.bf16 %v4564_v40, %v4554_v43  ;;  %v11776_v0 = vld [vmem:[#allocation13] sm:$0x1f]  ;;  %v11778_v38 = vld [vmem:[#allocation15] sm:$0x1f] }
 0x3f1   : > { %7490 = vmatprep.mubr.f32.mxu0 %v11725_v8  ;;  %8496 = vmatpush1.bf16.msra.mxu0 %v8495_v44  ;;  %v8503_v8 = vpack.c.bf16 %v4346_v54, %v4336_v1  ;;  %v8377_v35 = vpack.c.bf16 %v4525_v36, %v4515_v16  ;;  %v4416_v44 = vld [vmem:[#allocation16 + $0x510] sm:$0xff]  ;;  %v4466_v54 = vld [vmem:[#allocation16 + $0x6a0] sm:$0xff]  ;;  %v4497_v16 = vld [vmem:[#allocation16 + $0x798] sm:$0xff] }
 0x3f2   : > { %8498 = vmatprep.subr.bf16.mxu0 %v8497_v52  ;;  %8368 = vmatpush1.bf16.msra.mxu1 %v8367_v7  ;;  %v4426_v52 = vld [vmem:[#allocation16 + $0x560] sm:$0xff]  ;;  %v8389_v7 = vpack.c.bf16 %v4585_v4, %v4575_v59  ;;  %v4456_v1 = vld [vmem:[#allocation16 + $0x650] sm:$0xff]  ;;  %v4507_v36 = vld [vmem:[#allocation16 + $0x7e8] sm:$0xff] }
 0x3f3   : > { %8370 = vmatprep.subr.bf16.mxu1 %v8369_v25  ;;  %v8519_v42 = vpack.c.bf16 %v4426_v52, %v4416_v44  ;;  %v8521_v25 = vpack.c.bf16 %v4447_v39, %v4437_v17  ;;  %v8527_v47 = vpack.c.bf16 %v4466_v54, %v4456_v1  ;;  %v12859_v6 = vld [vmem:[#allocation26_spill] sm:$0xff]  ;;  %v12860_v2 = vld [vmem:[#allocation27_spill] sm:$0xff] }
 0x3f4   : > { %7491 = vmatmul.mubr.f32.gmra.mrb[110].mxu0 %v11732_v20  ;;  %v8507_v20 = vpack.c.bf16 %v4366_v34, %v4356_v56  ;;  %v4496_v56 = vld [vmem:[#allocation16 + $0x790] sm:$0xff]  ;;  %v4506_v34 = vld [vmem:[#allocation16 + $0x7e0] sm:$0xff]  ;;  %v11790_v43 = vrot.slane %v11778_v38, %v12859_v6  ;;  %v11796_v4 = vrot.slane %v11778_v38, %v12860_v2 }
 0x3f5   : > { %8500 = vmatpush1.bf16.msra.mxu0 %v8499_v30  ;;  %v8523_v30 = vpack.c.bf16 %v4446_v31, %v4436_v45  ;;  %v8535_v63 = vpack.c.bf16 %v4506_v34, %v4496_v56  ;;  %v4584_v17 = vld [vmem:[#allocation16 + $0xa50] sm:$0xff] }
 0x3f6   : > { %8502 = vmatprep.subr.bf16.mxu0 %v8501_v28  ;;  %8372 = vmatpush1.bf16.msra.mxu1 %v8371_v14  ;;  %v8525_v28 = vpack.c.bf16 %v4467_v60, %v4457_v46  ;;  %v4487_v14 = vld [vmem:[#allocation16 + $0x748] sm:$0xff]  ;;  %v4605_v60 = vld [vmem:[#allocation16 + $0xaf8] sm:$0xff] }
 0x3f7   : > { %8374 = vmatprep.subr.bf16.mxu1 %v8373_v19  ;;  %v8529_v19 = vpack.c.bf16 %v4487_v14, %v4477_v3  ;;  %v4595_v46 = vld [vmem:[#allocation16 + $0xaa8] sm:$0xff]  ;;  %v4597_v3 = vld [vmem:[#allocation16 + $0xab8] sm:$0xff] }
 0x3f8   : > { %v4607_v14 = vld [vmem:[#allocation16 + $0xb08] sm:$0xff] }
 0x3f9   : > { %8504 = vmatpush1.bf16.msra.mxu0 %v8503_v8  ;;  %v8531_v8 = vpack.c.bf16 %v4486_v24, %v4476_v9 }
 0x3fa   : > { %8506 = vmatprep.subr.bf16.mxu0 %v8505_v13  ;;  %8376 = vmatpush1.bf16.msra.mxu1 %v8375_v57  ;;  %v8533_v13 = vpack.c.bf16 %v4507_v36, %v4497_v16  ;;  %v4527_v57 = vld [vmem:[#allocation16 + $0x888] sm:$0xff]  ;;  %v8393_v16 = vpack.c.bf16 %v4605_v60, %v4595_v46  ;;  %v4594_v36 = vld [vmem:[#allocation16 + $0xaa0] sm:$0xff]  ;;  %v4637_v46 = vld [vmem:[#allocation16 + $0xbf8] sm:$0xff] }
 0x3fb   : > { %8378 = vmatprep.subr.bf16.mxu1 %v8377_v35  ;;  %v8537_v35 = vpack.c.bf16 %v4527_v57, %v4517_v37  ;;  %v8553_v57 = vpack.c.bf16 %v4607_v14, %v4597_v3  ;;  %v4647_v60 = vld [vmem:[#allocation16 + $0xc48] sm:$0xff] }
 0x3fd   : > { %8508 = vmatpush1.bf16.msra.mxu0 %v8507_v20  ;;  %v8539_v20 = vpack.c.bf16 %v4526_v61, %v4516_v15 }
 0x3fe   : > { %8510 = vmatprep.subr.bf16.mxu0 %v8509_v5  ;;  %8380 = vmatpush1.bf16.msra.mxu1 %v8379_v49  ;;  %v8541_v5 = vpack.c.bf16 %v4547_v26, %v4537_v11  ;;  %v4567_v49 = vld [vmem:[#allocation16 + $0x9c8] sm:$0xff] }
 0x3ff   : > { %8382 = vmatprep.subr.bf16.mxu1 %v8381_v62  ;;  %v8545_v62 = vpack.c.bf16 %v4567_v49, %v4557_v27  ;;  %v4615_v26 = vld [vmem:[#allocation16 + $0xb48] sm:$0xff]  ;;  %v4617_v27 = vld [vmem:[#allocation16 + $0xb58] sm:$0xff] }
 0x400   : > { %v4627_v49 = vld [vmem:[#allocation16 + $0xba8] sm:$0xff] }
 0x401   : > { %8512 = vmatpush1.bf16.msra.mxu0 %v8511_v50  ;;  %v8547_v50 = vpack.c.bf16 %v4566_v51, %v4556_v33 }
 0x402   : > { %8514 = vmatprep.subr.bf16.mxu0 %v8513_v22  ;;  %8384 = vmatpush1.bf16.msra.mxu1 %v8383_v41  ;;  %v8549_v22 = vpack.c.bf16 %v4587_v48, %v4577_v12  ;;  %v11782_v41 = vrot.slane %v11776_v0, %v12859_v6  ;;  %v4727_v6 = vld [vmem:[#allocation16 + $0xec8] sm:$0xff] }
 0x403   : > { %8386 = vmatprep.subr.bf16.mxu1 %v8385_v58  ;;  %v11786_v58 = vrot.slane %v11776_v0, %v12860_v2  ;;  %v4717_v2 = vld [vmem:[#allocation16 + $0xe78] sm:$0xff] }
 0x405   : > { %8516 = vmatpush1.bf16.msra.mxu0 %v8515_v23 }
 0x406   : > { %8518 = vmatprep.subr.bf16.mxu0 %v8517_v18  ;;  %8388 = vmatpush1.bf16.msra.mxu1 %v8387_v21  ;;  %v4574_v21 = vld [vmem:[#allocation16 + $0xa00] sm:$0xff] }
 0x407   : > { %8390 = vmatprep.subr.bf16.mxu1 %v8389_v7  ;;  %v4576_v7 = vld [vmem:[#allocation16 + $0xa10] sm:$0xff]  ;;  %v8391_v54 = vpack.c.bf16 %v4584_v17, %v4574_v21 }
 0x409   : > { %8520 = vmatpush1.bf16.msra.mxu0 %v8519_v42  ;;  %v4586_v42 = vld [vmem:[#allocation16 + $0xa60] sm:$0xff] }
 0x40a   : > { %8522 = vmatprep.subr.bf16.mxu0 %v8521_v25  ;;  %v8551_v9 = vpack.c.bf16 %v4586_v42, %v4576_v7  ;;  %v4635_v7 = vld [vmem:[#allocation16 + $0xbe8] sm:$0xff]  ;;  %v4645_v42 = vld [vmem:[#allocation16 + $0xc38] sm:$0xff] }
 0x40d   : > { %8524 = vmatpush1.bf16.msra.mxu0 %v8523_v30 }
 0x40e   : > { %8526 = vmatprep.subr.bf16.mxu0 %v8525_v28 }
 0x411   : > { %8528 = vmatpush1.bf16.msra.mxu0 %v8527_v47 }
 0x412   : > { %8530 = vmatprep.subr.bf16.mxu0 %v8529_v19 }
 0x415   : > { %8532 = vmatpush1.bf16.msra.mxu0 %v8531_v8  ;;  %v4604_v8 = vld [vmem:[#allocation16 + $0xaf0] sm:$0xff] }
 0x416   : > { %8534 = vmatprep.subr.bf16.mxu0 %v8533_v13  ;;  %v8395_v10 = vpack.c.bf16 %v4604_v8, %v4594_v36  ;;  %v4636_v36 = vld [vmem:[#allocation16 + $0xbf0] sm:$0xff]  ;;  %v4646_v8 = vld [vmem:[#allocation16 + $0xc40] sm:$0xff] }
 0x419   : > { %8536 = vmatpush1.bf16.msra.mxu0 %v8535_v63  ;;  %v4596_v63 = vld [vmem:[#allocation16 + $0xab0] sm:$0xff] }
 0x41a   : > { %8538 = vmatprep.subr.bf16.mxu0 %v8537_v35  ;;  %v4606_v35 = vld [vmem:[#allocation16 + $0xb00] sm:$0xff] }
 0x41d   : > { %8540 = vmatpush1.bf16.msra.mxu0 %v8539_v20  ;;  %v4625_v20 = vld [vmem:[#allocation16 + $0xb98] sm:$0xff] }
 0x41e   : > { %8542 = vmatprep.subr.bf16.mxu0 %v8541_v5 }
 0x421   : > { %8544 = vmatpush1.bf16.msra.mxu0 %v8543_v29  ;;  %v8555_v29 = vpack.c.bf16 %v4606_v35, %v4596_v63  ;;  %v8561_v35 = vpack.c.bf16 %v4647_v60, %v4637_v46  ;;  %v4685_v60 = vld [vmem:[#allocation16 + $0xd78] sm:$0xff] }
 0x422   : > { %8546 = vmatprep.subr.bf16.mxu0 %v8545_v62  ;;  %v4614_v62 = vld [vmem:[#allocation16 + $0xb40] sm:$0xff] }
 0x425   : > { %8548 = vmatpush1.bf16.msra.mxu0 %v8547_v50  ;;  %v8397_v50 = vpack.c.bf16 %v4625_v20, %v4615_v26  ;;  %v4665_v26 = vld [vmem:[#allocation16 + $0xcd8] sm:$0xff] }
 0x426   : > { %8550 = vmatprep.subr.bf16.mxu0 %v8549_v22  ;;  %v4624_v22 = vld [vmem:[#allocation16 + $0xb90] sm:$0xff] }
 0x47a   : > { %v3406_v40 = vpop.f32.mrb[72].mxu0  ;;  %v11792_v59 = vpop.f32.mrb[56].mxu1 }
 0x47b   : > { %v9173_v23 = vadd.f32 %v3406_v40, %v11782_v41  ;;  %v3408_v18 = vpop.f32.mrb[73].mxu0  ;;  %v11799_v44 = vpop.f32.mrb[57].mxu1  ;;  %v4616_v40 = vld [vmem:[#allocation16 + $0xb50] sm:$0xff] }
 0x47c   : > { %v9174_v52 = vadd.f32 %v3408_v18, %v11786_v58 }
 0x47d   : > { %v4174_v39 = vmul.f32 %v9173_v23, %v11790_v43  ;;  %vm4107_vm2 = vcmp.ge.f32.partialorder %v9173_v23, 0.0 }
 0x47e   : > { %vm4108_vm3 = vcmp.ge.f32.partialorder %v9174_v52, 0.0  ;;  %v4175_v25 = vmul.f32 %v9174_v52, %v11796_v4  ;;  %v3412_v45 = vpop.f32.mrb[74].mxu0  ;;  %v11804_v31 = vpop.f32.mrb[58].mxu1 }
 0x47f   : > { %v9175_v30 = vadd.f32 %v3412_v45, %v11782_v41  ;;  %v3414_v28 = vpop.f32.mrb[75].mxu0  ;;  %v11807_v1 = vpop.f32.mrb[59].mxu1  ;;  %v11813_v24 = vsel %vm4107_vm2, %v9173_v23, %v4174_v39  ;;  %v4626_v23 = vld [vmem:[#allocation16 + $0xba0] sm:$0xff]  ;;  %v8557_v39 = vpack.c.bf16 %v4627_v49, %v4617_v27  ;;  %v8563_v49 = vpack.c.bf16 %v4646_v8, %v4636_v36 }
 0x480   : > { %v11809_v47 = vsel %vm4108_vm3, %v9174_v52, %v4175_v25  ;;  %v9176_v19 = vadd.f32 %v3414_v28, %v11786_v58  ;;  %v8559_v28 = vpack.c.bf16 %v4626_v23, %v4616_v40  ;;  %v4674_v36 = vld [vmem:[#allocation16 + $0xd20] sm:$0xff] }
 0x481   : > { %5172 = vmatprep.mubr.f32.mxu1 %v11809_v47  ;;  %5511 = vmatprep.mubr.f32.mxu0 %v11809_v47  ;;  %v4179_v13 = vmul.f32 %v9175_v30, %v11790_v43  ;;  %vm4112_vm5 = vcmp.ge.f32.partialorder %v9175_v30, 0.0 }
 0x482   : > { %vm4113_vm4 = vcmp.ge.f32.partialorder %v9176_v19, 0.0  ;;  %v4180_v56 = vmul.f32 %v9176_v19, %v11796_v4  ;;  %v3418_v34 = vpop.f32.mrb[76].mxu0  ;;  %v11819_v37 = vpop.f32.mrb[60].mxu1  ;;  %5173 = vmatmul.mubr.f32.vlgmr.msra.gmra.mrb[88].mxu1 %v11813_v24  ;;  %5512 = vmatmul.mubr.f32.vlgmr.msra.gmra.mrb[112].mxu0 %v11813_v24 }
 0x483   : > { %v9177_v15 = vadd.f32 %v3418_v34, %v11782_v41  ;;  %8392 = vmatpush1.bf16.msra.mxu1 %v8391_v54  ;;  %v3420_v61 = vpop.f32.mrb[77].mxu0  ;;  %v11824_v11 = vpop.f32.mrb[61].mxu1  ;;  %8552 = vmatpush1.bf16.msra.mxu0 %v8551_v9  ;;  %v11832_v33 = vsel %vm4112_vm5, %v9175_v30, %v4179_v13  ;;  %v8399_v30 = vpack.c.bf16 %v4624_v22, %v4614_v62  ;;  %v4634_v54 = vld [vmem:[#allocation16 + $0xbe0] sm:$0xff]  ;;  %v4664_v22 = vld [vmem:[#allocation16 + $0xcd0] sm:$0xff] }
 0x484   : > { %v11827_v5 = vsel %vm4113_vm4, %v9176_v19, %v4180_v56  ;;  %v9178_v32 = vadd.f32 %v3420_v61, %v11786_v58  ;;  %8394 = vmatprep.subr.bf16.mxu1 %v8393_v16  ;;  %8554 = vmatprep.subr.bf16.mxu0 %v8553_v57  ;;  %v8401_v9 = vpack.c.bf16 %v4645_v42, %v4635_v7  ;;  %v4644_v16 = vld [vmem:[#allocation16 + $0xc30] sm:$0xff]  ;;  %v4655_v61 = vld [vmem:[#allocation16 + $0xc88] sm:$0xff]  ;;  %v4666_v42 = vld [vmem:[#allocation16 + $0xce0] sm:$0xff] }
 0x485   : > { %5178 = vmatprep.mubr.f32.mxu1 %v11827_v5  ;;  %5517 = vmatprep.mubr.f32.mxu0 %v11827_v5  ;;  %v4184_v18 = vmul.f32 %v9177_v15, %v11790_v43  ;;  %vm4117_vm7 = vcmp.ge.f32.partialorder %v9177_v15, 0.0  ;;  %v8403_v27 = vpack.c.bf16 %v4644_v16, %v4634_v54  ;;  %v4656_v7 = vld [vmem:[#allocation16 + $0xc90] sm:$0xff]  ;;  %v4677_v54 = vld [vmem:[#allocation16 + $0xd38] sm:$0xff] }
 0x486   : > { %vm4118_vm6 = vcmp.ge.f32.partialorder %v9178_v32, 0.0  ;;  %v4185_v51 = vmul.f32 %v9178_v32, %v11796_v4  ;;  %v3424_v12 = vpop.f32.mrb[78].mxu0  ;;  %v11836_v48 = vpop.f32.mrb[62].mxu1  ;;  %5179 = vmatmul.mubr.f32.gmra.mrb[90].mxu1 %v11832_v33  ;;  %5518 = vmatmul.mubr.f32.gmra.mrb[114].mxu0 %v11832_v33  ;;  %v8567_v16 = vpack.c.bf16 %v4666_v42, %v4656_v7 }
 0x487   : > { %v9179_v52 = vadd.f32 %v3424_v12, %v11782_v41  ;;  %v3426_v21 = vpop.f32.mrb[79].mxu0  ;;  %v11841_v17 = vpop.f32.mrb[63].mxu1  ;;  %8396 = vmatpush1.bf16.msra.mxu1 %v8395_v10  ;;  %8556 = vmatpush1.bf16.msra.mxu0 %v8555_v29  ;;  %v11854_v13 = vsel %vm4117_vm7, %v9177_v15, %v4184_v18  ;;  %v4667_v10 = vld [vmem:[#allocation16 + $0xce8] sm:$0xff]  ;;  %v8405_v12 = vpack.c.bf16 %v4665_v26, %v4655_v61  ;;  %v4684_v26 = vld [vmem:[#allocation16 + $0xd70] sm:$0xff] }
 0x488   : > { %v11844_v25 = vsel %vm4118_vm6, %v9178_v32, %v4185_v51  ;;  %v9180_v45 = vadd.f32 %v3426_v21, %v11786_v58  ;;  %8398 = vmatprep.subr.bf16.mxu1 %v8397_v50  ;;  %12861 = vst [vmem:[#allocation47_spill] sm:$0xff] %v11854_v13  ;;  %8558 = vmatprep.subr.bf16.mxu0 %v8557_v39  ;;  %v4657_v32 = vld [vmem:[#allocation16 + $0xc98] sm:$0xff]  ;;  %v4654_v50 = vld [vmem:[#allocation16 + $0xc80] sm:$0xff] }
 0x489   : > { %5184 = vmatprep.mubr.f32.mxu1 %v11844_v25  ;;  %5523 = vmatprep.mubr.f32.mxu0 %v11844_v25  ;;  %v4189_v56 = vmul.f32 %v9179_v52, %v11790_v43  ;;  %vm4122_vm9 = vcmp.ge.f32.partialorder %v9179_v52, 0.0  ;;  %v8565_v39 = vpack.c.bf16 %v4667_v10, %v4657_v32  ;;  %v4686_v32 = vld [vmem:[#allocation16 + $0xd80] sm:$0xff]  ;;  %v8411_v42 = vpack.c.bf16 %v4684_v26, %v4674_v36  ;;  %v4715_v36 = vld [vmem:[#allocation16 + $0xe68] sm:$0xff] }
 0x48a   : > { %vm4123_vm8 = vcmp.ge.f32.partialorder %v9180_v45, 0.0  ;;  %v4190_v3 = vmul.f32 %v9180_v45, %v11796_v4  ;;  %v3430_v14 = vpop.f32.mrb[80].mxu0  ;;  %v11851_v19 = vpop.f32.mrb[64].mxu1  ;;  %5185 = vmatmul.mubr.f32.gmra.mrb[92].mxu1 %v11854_v13  ;;  %5524 = vmatmul.mubr.f32.gmra.mrb[116].mxu0 %v11854_v13  ;;  %v4895_v13 = vld [vmem:[#allocation16 + $0x1408] sm:$0xff] }
 0x48b   : > { %v9181_v34 = vadd.f32 %v3430_v14, %v11782_v41  ;;  %v3432_v57 = vpop.f32.mrb[81].mxu0  ;;  %v11858_v63 = vpop.f32.mrb[65].mxu1  ;;  %8400 = vmatpush1.bf16.msra.mxu1 %v8399_v30  ;;  %8560 = vmatpush1.bf16.msra.mxu0 %v8559_v28  ;;  %v11871_v40 = vsel %vm4122_vm9, %v9179_v52, %v4189_v56  ;;  %v4675_v52 = vld [vmem:[#allocation16 + $0xd28] sm:$0xff]  ;;  %v8407_v28 = vpack.c.bf16 %v4664_v22, %v4654_v50  ;;  %v4697_v50 = vld [vmem:[#allocation16 + $0xdd8] sm:$0xff] }
 0x48c   : > { %v11861_v20 = vsel %vm4123_vm8, %v9180_v45, %v4190_v3  ;;  %v9182_v15 = vadd.f32 %v3432_v57, %v11786_v58  ;;  %8402 = vmatprep.subr.bf16.mxu1 %v8401_v9  ;;  %12863 = vst [vmem:[#allocation50_spill] sm:$0xff] %v11871_v40  ;;  %8562 = vmatprep.subr.bf16.mxu0 %v8561_v35  ;;  %v4687_v3 = vld [vmem:[#allocation16 + $0xd88] sm:$0xff] }
 0x48d   : > { %12862 = vst [vmem:[#allocation57_spill] sm:$0xff] %v11861_v20  ;;  %5190 = vmatprep.mubr.f32.mxu1 %v11861_v20  ;;  %v4194_v23 = vmul.f32 %v9181_v34, %v11790_v43  ;;  %5529 = vmatprep.mubr.f32.mxu0 %v11861_v20  ;;  %vm4127_vm11 = vcmp.ge.f32.partialorder %v9181_v34, 0.0  ;;  %v8409_v61 = vpack.c.bf16 %v4685_v60, %v4675_v52  ;;  %v4707_v22 = vld [vmem:[#allocation16 + $0xe28] sm:$0xff]  ;;  %v4694_v60 = vld [vmem:[#allocation16 + $0xdc0] sm:$0xff] }
 0x48e   : > { %vm4128_vm10 = vcmp.ge.f32.partialorder %v9182_v15, 0.0  ;;  %v4195_v29 = vmul.f32 %v9182_v15, %v11796_v4  ;;  %v3436_v62 = vpop.f32.mrb[82].mxu0  ;;  %v11868_v51 = vpop.f32.mrb[66].mxu1  ;;  %5191 = vmatmul.mubr.f32.gmra.mrb[94].mxu1 %v11871_v40  ;;  %5530 = vmatmul.mubr.f32.gmra.mrb[118].mxu0 %v11871_v40  ;;  %v4846_v40 = vld [vmem:[#allocation16 + $0x1280] sm:$0xff] }
 0x48f   : > { %v3438_v18 = vpop.f32.mrb[83].mxu0  ;;  %v11875_v21 = vpop.f32.mrb[67].mxu1  ;;  %v9183_v46 = vadd.f32 %v3436_v62, %v11782_v41  ;;  %8404 = vmatpush1.bf16.msra.mxu1 %v8403_v27  ;;  %8564 = vmatpush1.bf16.msra.mxu0 %v8563_v49  ;;  %v11888_v8 = vsel %vm4127_vm11, %v9181_v34, %v4194_v23  ;;  %v8569_v34 = vpack.c.bf16 %v4687_v3, %v4677_v54  ;;  %v4695_v49 = vld [vmem:[#allocation16 + $0xdc8] sm:$0xff]  ;;  %v4866_v20 = vld [vmem:[#allocation16 + $0x1320] sm:$0xff] }
 0x490   : > { %v11878_v45 = vsel %vm4128_vm10, %v9182_v15, %v4195_v29  ;;  %v9184_v30 = vadd.f32 %v3438_v18, %v11786_v58  ;;  %8406 = vmatprep.subr.bf16.mxu1 %v8405_v12  ;;  %12865 = vst [vmem:[#allocation52_spill] sm:$0xff] %v11888_v8  ;;  %8566 = vmatprep.subr.bf16.mxu0 %v8565_v39  ;;  %v4676_v15 = vld [vmem:[#allocation16 + $0xd30] sm:$0xff]  ;;  %v4705_v29 = vld [vmem:[#allocation16 + $0xe18] sm:$0xff] }
 0x491   : > { %12864 = vst [vmem:[#allocation49_spill] sm:$0xff] %v11878_v45  ;;  %5196 = vmatprep.mubr.f32.mxu1 %v11878_v45  ;;  %5535 = vmatprep.mubr.f32.mxu0 %v11878_v45  ;;  %v4199_v10 = vmul.f32 %v9183_v46, %v11790_v43  ;;  %vm4132_vm13 = vcmp.ge.f32.partialorder %v9183_v46, 0.0  ;;  %v12867_v23 = vld [vmem:[#allocation29_spill] sm:$0xff]  ;;  %v8571_v52 = vpack.c.bf16 %v4686_v32, %v4676_v15  ;;  %v4826_v45 = vld [vmem:[#allocation16 + $0x11e0] sm:$0xff] }
 0x492   : > { %v3442_v14 = vpop.f32.mrb[84].mxu0  ;;  %v11885_v9 = vpop.f32.mrb[68].mxu1  ;;  %vm4133_vm12 = vcmp.ge.f32.partialorder %v9184_v30, 0.0  ;;  %v4200_v56 = vmul.f32 %v9184_v30, %v11796_v4  ;;  %5197 = vmatmul.mubr.f32.gmra.mrb[96].mxu1 %v11888_v8  ;;  %5536 = vmatmul.mubr.f32.gmra.mrb[120].mxu0 %v11888_v8  ;;  %v11906_v18 = vrot.slane %v11776_v0, %v12867_v23  ;;  %v4806_v8 = vld [vmem:[#allocation16 + $0x1140] sm:$0xff] }
 0x493   : > { %v3444_v57 = vpop.f32.mrb[85].mxu0  ;;  %v11892_v35 = vpop.f32.mrb[69].mxu1  ;;  %v11896_v27 = vadd.f32 %v3442_v14, %v11782_v41  ;;  %8408 = vmatpush1.bf16.msra.mxu1 %v8407_v28  ;;  %8568 = vmatpush1.bf16.msra.mxu0 %v8567_v16  ;;  %v11913_v28 = vrot.slane %v11778_v38, %v12867_v23  ;;  %v8413_v16 = vpack.c.bf16 %v4705_v29, %v4695_v49  ;;  %v4725_v23 = vld [vmem:[#allocation16 + $0xeb8] sm:$0xff] }
 0x494   : > { %v11900_v62 = vsel %vm4133_vm12, %v9184_v30, %v4200_v56  ;;  %v9186_v12 = vadd.f32 %v3444_v57, %v11786_v58  ;;  %v4704_v30 = vld [vmem:[#allocation16 + $0xe10] sm:$0xff]  ;;  %8410 = vmatprep.subr.bf16.mxu1 %v8409_v61  ;;  %v4706_v57 = vld [vmem:[#allocation16 + $0xe20] sm:$0xff]  ;;  %v11920_v26 = vsel %vm4132_vm13, %v9183_v46, %v4199_v10  ;;  %8570 = vmatprep.subr.bf16.mxu0 %v8569_v34 }
 0x495   : > { %12866 = vst [vmem:[#allocation51_spill] sm:$0xff] %v11900_v62  ;;  %5202 = vmatprep.mubr.f32.mxu1 %v11900_v62  ;;  %5541 = vmatprep.mubr.f32.mxu0 %v11900_v62  ;;  %v4696_v56 = vld [vmem:[#allocation16 + $0xdd0] sm:$0xff]  ;;  %12868 = vst [vmem:[#allocation54_spill] sm:$0xff] %v11920_v26  ;;  %v4204_v15 = vmul.f32 %v11896_v27, %v11790_v43  ;;  %v8573_v61 = vpack.c.bf16 %v4707_v22, %v4697_v50  ;;  %vm4137_vm15 = vcmp.ge.f32.partialorder %v11896_v27, 0.0  ;;  %v11934_v34 = vld [vmem:[#allocation16 + $0xe60] sm:$0xff] }
 0x496   : > { %v3448_v39 = vpop.f32.mrb[86].mxu0  ;;  %v11909_v7 = vpop.f32.mrb[70].mxu1  ;;  %vm4138_vm14 = vcmp.ge.f32.partialorder %v9186_v12, 0.0  ;;  %v4205_v54 = vmul.f32 %v9186_v12, %v11796_v4  ;;  %5203 = vmatmul.mubr.f32.gmra.mrb[98].mxu1 %v11920_v26  ;;  %5542 = vmatmul.mubr.f32.gmra.mrb[122].mxu0 %v11920_v26  ;;  %v8415_v10 = vpack.c.bf16 %v4704_v30, %v4694_v60  ;;  %v8575_v50 = vpack.c.bf16 %v4706_v57, %v4696_v56  ;;  %v4724_v22 = vld [vmem:[#allocation16 + $0xeb0] sm:$0xff]  ;;  %v4737_v26 = vld [vmem:[#allocation16 + $0xf18] sm:$0xff]  ;;  %v4747_v62 = vld [vmem:[#allocation16 + $0xf68] sm:$0xff] }
 0x497   : > { %v3450_v3 = vpop.f32.mrb[87].mxu0  ;;  %v11917_v14 = vpop.f32.mrb[71].mxu1  ;;  %v11925_v32 = vadd.f32 %v3448_v39, %v11782_v41  ;;  %v11938_v41 = vadd.f32 %v11799_v44, %v11906_v18  ;;  %8412 = vmatpush1.bf16.msra.mxu1 %v8411_v42  ;;  %8572 = vmatpush1.bf16.msra.mxu0 %v8571_v52  ;;  %v4716_v39 = vld [vmem:[#allocation16 + $0xe70] sm:$0xff]  ;;  %v8417_v30 = vpack.c.bf16 %v4725_v23, %v4715_v36  ;;  %v11946_v52 = vld [vmem:[#allocation16 + $0xf08] sm:$0xff] }
 0x498   : > { %v11929_v49 = vsel %vm4138_vm14, %v9186_v12, %v4205_v54  ;;  %v9188_v46 = vadd.f32 %v3450_v3, %v11786_v58  ;;  %v11942_v12 = vrot.slane %v11776_v0, %v12841_v53  ;;  %v4726_v54 = vld [vmem:[#allocation16 + $0xec0] sm:$0xff]  ;;  %8414 = vmatprep.subr.bf16.mxu1 %v8413_v16  ;;  %v8577_v42 = vpack.c.bf16 %v4727_v6, %v4717_v2  ;;  %v4745_v16 = vld [vmem:[#allocation16 + $0xf58] sm:$0xff] }
 0x499   : > { %12869 = vst [vmem:[#allocation53_spill] sm:$0xff] %v11929_v49  ;;  %5208 = vmatprep.mubr.f32.mxu1 %v11929_v49  ;;  %v11951_v3 = vsel %vm4137_vm15, %v11896_v27, %v4204_v15  ;;  %v4209_v56 = vmul.f32 %v11925_v32, %v11790_v43  ;;  %5547 = vmatprep.mubr.f32.mxu0 %v11929_v49  ;;  %vm4142_vm1 = vcmp.ge.f32.partialorder %v11925_v32, 0.0  ;;  %vm4110_vm2 = vcmp.ge.f32.partialorder %v11938_v41, 0.0  ;;  %v4786_v49 = vld [vmem:[#allocation16 + $0x10a0] sm:$0xff] }
 0x49a   : > { %v7287_v29 = vpop.f32.mrb[88].mxu0  ;;  %vm4143_vm0 = vcmp.ge.f32.partialorder %v9188_v46, 0.0  ;;  %v4210_v58 = vmul.f32 %v9188_v46, %v11796_v4  ;;  %12870 = vst [vmem:[#allocation56_spill] sm:$0xff] %v11951_v3  ;;  %8574 = vmatprep.subr.bf16.mxu0 %v8573_v61  ;;  %5209 = vmatmul.mubr.f32.gmra.mrb[100].mxu1 %v11951_v3  ;;  %v8419_v2 = vpack.c.bf16 %v4724_v22, %v11934_v34  ;;  %v4734_v61 = vld [vmem:[#allocation16 + $0xf00] sm:$0xff] }
 0x49b   : > { %v7343_v60 = vpop.f32.mrb[72].mxu1  ;;  %v7288_v44 = vpop.f32.mrb[89].mxu0  ;;  %5548 = vmatmul.mubr.f32.gmra.mrb[124].mxu0 %v11951_v3  ;;  %v8579_v43 = vpack.c.bf16 %v4726_v54, %v4716_v39  ;;  %v4177_v27 = vmul.f32 %v11938_v41, %v11913_v28  ;;  %8416 = vmatpush1.bf16.msra.mxu1 %v8415_v10  ;;  %v8421_v34 = vpack.c.bf16 %v4745_v16, %v11946_v52  ;;  %v4736_v39 = vld [vmem:[#allocation16 + $0xf10] sm:$0xff]  ;;  %v4746_v54 = vld [vmem:[#allocation16 + $0xf60] sm:$0xff]  ;;  %v4755_v10 = vld [vmem:[#allocation16 + $0xfa8] sm:$0xff] }
 0x49c   : > { %v7289_v4 = vadd.f32 %v7288_v44, %v7287_v29  ;;  %v7344_v57 = vpop.f32.mrb[73].mxu1  ;;  %v11958_v6 = vsel %vm4143_vm0, %v9188_v46, %v4210_v58  ;;  %8576 = vmatpush1.bf16.msra.mxu0 %v8575_v50  ;;  %v4744_v29 = vld [vmem:[#allocation16 + $0xf50] sm:$0xff]  ;;  %8418 = vmatprep.subr.bf16.mxu1 %v8417_v30  ;;  %v8581_v22 = vpack.c.bf16 %v4747_v62, %v4737_v26  ;;  %v4757_v30 = vld [vmem:[#allocation16 + $0xfb8] sm:$0xff]  ;;  %v4754_v16 = vld [vmem:[#allocation16 + $0xfa0] sm:$0xff] }
 0x49d   : > { %12871 = vst [vmem:[#allocation55_spill] sm:$0xff] %v11958_v6  ;;  %v7345_v36 = vadd.f32 %v7344_v57, %v7343_v60  ;;  %5214 = vmatprep.mubr.f32.mxu1 %v11958_v6  ;;  %v11972_v50 = vsel %vm4142_vm1, %v11925_v32, %v4209_v56  ;;  %5553 = vmatprep.mubr.f32.mxu0 %v11958_v6  ;;  %v4767_v57 = vld [vmem:[#allocation16 + $0x1008] sm:$0xff]  ;;  %v4776_v6 = vld [vmem:[#allocation16 + $0x1050] sm:$0xff] }
 0x49e   : > { %v3859_v23 = vadd.f32 %v7289_v4, %v11942_v12  ;;  %v7290_v15 = vpop.f32.mrb[90].mxu0  ;;  %12872 = vst [vmem:[#allocation59_spill] sm:$0xff] %v11972_v50  ;;  %8578 = vmatprep.subr.bf16.mxu0 %v8577_v42  ;;  %v4765_v4 = vld [vmem:[#allocation16 + $0xff8] sm:$0xff]  ;;  %5215 = vmatmul.mubr.f32.gmra.mrb[102].mxu1 %v11972_v50  ;;  %v8423_v26 = vpack.c.bf16 %v4744_v29, %v4734_v61 }
 0x49f   : > { %v7346_v46 = vpop.f32.mrb[74].mxu1  ;;  %v7291_v58 = vpop.f32.mrb[91].mxu0  ;;  %5554 = vmatmul.mubr.f32.gmra.mrb[126].mxu0 %v11972_v50  ;;  %v11982_v32 = vsel %vm4110_vm2, %v11938_v41, %v4177_v27  ;;  %8420 = vmatpush1.bf16.msra.mxu1 %v8419_v2  ;;  %v8583_v56 = vpack.c.bf16 %v4746_v54, %v4736_v39  ;;  %v8425_v61 = vpack.c.bf16 %v4765_v4, %v4755_v10  ;;  %v4775_v41 = vld [vmem:[#allocation16 + $0x1048] sm:$0xff]  ;;  %v4785_v27 = vld [vmem:[#allocation16 + $0x1098] sm:$0xff] }
 0x4a0   : > { %v7292_v60 = vadd.f32 %v7291_v58, %v7290_v15  ;;  %v7347_v44 = vpop.f32.mrb[75].mxu1  ;;  %v11975_v3 = vadd.f32 %v7345_v36, %v3859_v23  ;;  %12873 = vst [vmem:[#allocation58_spill] sm:$0xff] %v11982_v32  ;;  %8580 = vmatpush1.bf16.msra.mxu0 %v8579_v43  ;;  %v4764_v23 = vld [vmem:[#allocation16 + $0xff0] sm:$0xff]  ;;  %5285 = vmatprep.mubr.f32.mxu1 %v11982_v32  ;;  %v4766_v58 = vld [vmem:[#allocation16 + $0x1000] sm:$0xff]  ;;  %v4787_v39 = vld [vmem:[#allocation16 + $0x10a8] sm:$0xff] }
 0x4a1   : > { %v7348_v62 = vadd.f32 %v7347_v44, %v7346_v46  ;;  %5624 = vmatprep.mubr.f32.mxu0 %v11982_v32  ;;  %v8585_v29 = vpack.c.bf16 %v4767_v57, %v4757_v30  ;;  %v4756_v46 = vld [vmem:[#allocation16 + $0xfb0] sm:$0xff]  ;;  %8422 = vmatprep.subr.bf16.mxu1 %v8421_v34  ;;  %v8427_v10 = vpack.c.bf16 %v4764_v23, %v4754_v16  ;;  %v4774_v30 = vld [vmem:[#allocation16 + $0x1040] sm:$0xff] }
 0x4a2   : > { %v3864_v42 = vadd.f32 %v7292_v60, %v11942_v12  ;;  %v7293_v52 = vpop.f32.mrb[92].mxu0  ;;  %8582 = vmatprep.subr.bf16.mxu0 %v8581_v22  ;;  %v4777_v60 = vld [vmem:[#allocation16 + $0x1058] sm:$0xff]  ;;  %v8587_v4 = vpack.c.bf16 %v4766_v58, %v4756_v46  ;;  %v4784_v57 = vld [vmem:[#allocation16 + $0x1090] sm:$0xff]  ;;  %v8591_v46 = vpack.c.bf16 %v4786_v49, %v4776_v6  ;;  %v4794_v58 = vld [vmem:[#allocation16 + $0x10e0] sm:$0xff] }
 0x4a3   : > { %v7349_v36 = vpop.f32.mrb[76].mxu1  ;;  %v7294_v15 = vpop.f32.mrb[93].mxu0  ;;  %8424 = vmatpush1.bf16.msra.mxu1 %v8423_v26  ;;  %v4805_v26 = vld [vmem:[#allocation16 + $0x1138] sm:$0xff] }
 0x4a4   : > { %v7295_v2 = vadd.f32 %v7294_v15, %v7293_v52  ;;  %v7350_v43 = vpop.f32.mrb[77].mxu1  ;;  %v11987_v54 = vadd.f32 %v7348_v62, %v3864_v42  ;;  %8584 = vmatpush1.bf16.msra.mxu0 %v8583_v56  ;;  %8426 = vmatprep.subr.bf16.mxu1 %v8425_v61  ;;  %v8429_v52 = vpack.c.bf16 %v4785_v27, %v4775_v41  ;;  %v4795_v62 = vld [vmem:[#allocation16 + $0x10e8] sm:$0xff]  ;;  %v4797_v56 = vld [vmem:[#allocation16 + $0x10f8] sm:$0xff]  ;;  %v4804_v41 = vld [vmem:[#allocation16 + $0x1130] sm:$0xff] }
 0x4a5   : > { %v7351_v44 = vadd.f32 %v7350_v43, %v7349_v36  ;;  %8586 = vmatprep.subr.bf16.mxu0 %v8585_v29  ;;  %v8589_v15 = vpack.c.bf16 %v4787_v39, %v4777_v60  ;;  %v4807_v43 = vld [vmem:[#allocation16 + $0x1148] sm:$0xff]  ;;  %v8431_v29 = vpack.c.bf16 %v4784_v57, %v4774_v30  ;;  %v8433_v60 = vpack.c.bf16 %v4805_v26, %v4795_v62  ;;  %v4824_v62 = vld [vmem:[#allocation16 + $0x11d0] sm:$0xff] }
 0x4a6   : > { %v3869_v32 = vadd.f32 %v7295_v2, %v11942_v12  ;;  %v7296_v50 = vpop.f32.mrb[94].mxu0  ;;  %v8593_v39 = vpack.c.bf16 %v4807_v43, %v4797_v56  ;;  %v8435_v57 = vpack.c.bf16 %v4804_v41, %v4794_v58 }
 0x4a7   : > { %v7352_v34 = vpop.f32.mrb[78].mxu1  ;;  %v7297_v22 = vpop.f32.mrb[95].mxu0  ;;  %8428 = vmatpush1.bf16.msra.mxu1 %v8427_v10  ;;  %v4825_v10 = vld [vmem:[#allocation16 + $0x11d8] sm:$0xff] }
 0x4a8   : > { %v7298_v42 = vadd.f32 %v7297_v22, %v7296_v50  ;;  %v7353_v36 = vpop.f32.mrb[79].mxu1  ;;  %v11990_v2 = vadd.f32 %v7351_v44, %v3869_v32  ;;  %8588 = vmatpush1.bf16.msra.mxu0 %v8587_v4  ;;  %8430 = vmatprep.subr.bf16.mxu1 %v8429_v52  ;;  %v4796_v22 = vld [vmem:[#allocation16 + $0x10f0] sm:$0xff]  ;;  %v4815_v32 = vld [vmem:[#allocation16 + $0x1188] sm:$0xff]  ;;  %v4817_v4 = vld [vmem:[#allocation16 + $0x1198] sm:$0xff] }
 0x4a9   : > { %v7354_v16 = vadd.f32 %v7353_v36, %v7352_v34  ;;  %8590 = vmatprep.subr.bf16.mxu0 %v8589_v15  ;;  %v4827_v36 = vld [vmem:[#allocation16 + $0x11e8] sm:$0xff]  ;;  %v8595_v52 = vpack.c.bf16 %v4806_v8, %v4796_v22  ;;  %v4814_v15 = vld [vmem:[#allocation16 + $0x1180] sm:$0xff]  ;;  %v8437_v43 = vpack.c.bf16 %v4825_v10, %v4815_v32  ;;  %v4844_v32 = vld [vmem:[#allocation16 + $0x1270] sm:$0xff] }
 0x4aa   : > { %v3874_v23 = vadd.f32 %v7298_v42, %v11942_v12  ;;  %v7299_v61 = vpop.f32.mrb[96].mxu0  ;;  %v4834_v22 = vld [vmem:[#allocation16 + $0x1220] sm:$0xff] }
 0x4ab   : > { %v7355_v27 = vpop.f32.mrb[80].mxu1  ;;  %v7300_v50 = vpop.f32.mrb[97].mxu0  ;;  %8432 = vmatpush1.bf16.msra.mxu1 %v8431_v29  ;;  %v4845_v29 = vld [vmem:[#allocation16 + $0x1278] sm:$0xff] }
 0x4ac   : > { %v7301_v44 = vadd.f32 %v7300_v50, %v7299_v61  ;;  %v7356_v34 = vpop.f32.mrb[81].mxu1  ;;  %v11993_v42 = vadd.f32 %v7354_v16, %v3874_v23  ;;  %8592 = vmatpush1.bf16.msra.mxu0 %v8591_v46  ;;  %8434 = vmatprep.subr.bf16.mxu1 %v8433_v60  ;;  %v8597_v61 = vpack.c.bf16 %v4827_v36, %v4817_v4  ;;  %v4816_v50 = vld [vmem:[#allocation16 + $0x1190] sm:$0xff]  ;;  %v4835_v16 = vld [vmem:[#allocation16 + $0x1228] sm:$0xff]  ;;  %v4837_v46 = vld [vmem:[#allocation16 + $0x1238] sm:$0xff] }
 0x4ad   : > { %v7357_v30 = vadd.f32 %v7356_v34, %v7355_v27  ;;  %8594 = vmatprep.subr.bf16.mxu0 %v8593_v39  ;;  %v4847_v34 = vld [vmem:[#allocation16 + $0x1288] sm:$0xff]  ;;  %v8439_v60 = vpack.c.bf16 %v4824_v62, %v4814_v15  ;;  %v8599_v39 = vpack.c.bf16 %v4826_v45, %v4816_v50  ;;  %v8441_v36 = vpack.c.bf16 %v4845_v29, %v4835_v16  ;;  %v4854_v50 = vld [vmem:[#allocation16 + $0x12c0] sm:$0xff]  ;;  %v4864_v16 = vld [vmem:[#allocation16 + $0x1310] sm:$0xff] }
 0x4ae   : > { %v3879_v49 = vadd.f32 %v7301_v44, %v11942_v12  ;;  %v7302_v6 = vpop.f32.mrb[98].mxu0 }
 0x4af   : > { %v7358_v26 = vpop.f32.mrb[82].mxu1  ;;  %v7303_v56 = vpop.f32.mrb[99].mxu0  ;;  %8436 = vmatpush1.bf16.msra.mxu1 %v8435_v57  ;;  %v4865_v57 = vld [vmem:[#allocation16 + $0x1318] sm:$0xff] }
 0x4b0   : > { %v7304_v23 = vadd.f32 %v7303_v56, %v7302_v6  ;;  %v7359_v27 = vpop.f32.mrb[83].mxu1  ;;  %v11996_v44 = vadd.f32 %v7357_v30, %v3879_v49  ;;  %8596 = vmatpush1.bf16.msra.mxu0 %v8595_v52  ;;  %8438 = vmatprep.subr.bf16.mxu1 %v8437_v43  ;;  %v8601_v6 = vpack.c.bf16 %v4847_v34, %v4837_v46  ;;  %v4836_v56 = vld [vmem:[#allocation16 + $0x1230] sm:$0xff]  ;;  %v4855_v30 = vld [vmem:[#allocation16 + $0x12c8] sm:$0xff]  ;;  %v4857_v52 = vld [vmem:[#allocation16 + $0x12d8] sm:$0xff] }
 0x4b1   : > { %v7360_v58 = vadd.f32 %v7359_v27, %v7358_v26  ;;  %8598 = vmatprep.subr.bf16.mxu0 %v8597_v61  ;;  %v4867_v27 = vld [vmem:[#allocation16 + $0x1328] sm:$0xff]  ;;  %v8443_v43 = vpack.c.bf16 %v4844_v32, %v4834_v22  ;;  %v8603_v61 = vpack.c.bf16 %v4846_v40, %v4836_v56  ;;  %v8445_v34 = vpack.c.bf16 %v4865_v57, %v4855_v30  ;;  %v4877_v22 = vld [vmem:[#allocation16 + $0x1378] sm:$0xff]  ;;  %v4884_v57 = vld [vmem:[#allocation16 + $0x13b0] sm:$0xff] }
 0x4b2   : > { %v3884_v8 = vadd.f32 %v7304_v23, %v11942_v12  ;;  %v7305_v41 = vpop.f32.mrb[100].mxu0  ;;  %v4887_v40 = vld [vmem:[#allocation16 + $0x13c8] sm:$0xff]  ;;  %v8447_v56 = vpack.c.bf16 %v4864_v16, %v4854_v50 }
 0x4b3   : > { %v7361_v10 = vpop.f32.mrb[84].mxu1  ;;  %v7306_v4 = vpop.f32.mrb[101].mxu0  ;;  %8440 = vmatpush1.bf16.msra.mxu1 %v8439_v60  ;;  %v4907_v50 = vld [vmem:[#allocation16 + $0x1468] sm:$0xff] }
 0x4b4   : > { %v7307_v49 = vadd.f32 %v7306_v4, %v7305_v41  ;;  %v7362_v26 = vpop.f32.mrb[85].mxu1  ;;  %v11999_v23 = vadd.f32 %v7360_v58, %v3884_v8  ;;  %8600 = vmatpush1.bf16.msra.mxu0 %v8599_v39  ;;  %8442 = vmatprep.subr.bf16.mxu1 %v8441_v36  ;;  %v8605_v41 = vpack.c.bf16 %v4867_v27, %v4857_v52  ;;  %v4856_v4 = vld [vmem:[#allocation16 + $0x12d0] sm:$0xff]  ;;  %v4875_v58 = vld [vmem:[#allocation16 + $0x1368] sm:$0xff] }
 0x4b5   : > { %v7363_v15 = vadd.f32 %v7362_v26, %v7361_v10  ;;  %8602 = vmatprep.subr.bf16.mxu0 %v8601_v6  ;;  %v12874_v8 = vld [vmem:[#allocation28_spill] sm:$0xff]  ;;  %v8607_v30 = vpack.c.bf16 %v4866_v20, %v4856_v4  ;;  %v8609_v27 = vpack.c.bf16 %v4887_v40, %v4877_v22  ;;  %v4904_v4 = vld [vmem:[#allocation16 + $0x1450] sm:$0xff]  ;;  %v4925_v40 = vld [vmem:[#allocation16 + $0x14f8] sm:$0xff] }
 0x4b6   : > { %v3889_v45 = vadd.f32 %v7307_v49, %v11942_v12  ;;  %v7308_v62 = vpop.f32.mrb[102].mxu0  ;;  %v12004_v60 = vrot.slane %v11776_v0, %v12874_v8  ;;  %v4885_v49 = vld [vmem:[#allocation16 + $0x13b8] sm:$0xff]  ;;  %v4874_v26 = vld [vmem:[#allocation16 + $0x1360] sm:$0xff] }
 0x4b7   : > { %v7364_v29 = vpop.f32.mrb[86].mxu1  ;;  %v7309_v46 = vpop.f32.mrb[103].mxu0  ;;  %8444 = vmatpush1.bf16.msra.mxu1 %v8443_v43  ;;  %v8449_v52 = vpack.c.bf16 %v4885_v49, %v4875_v58  ;;  %v4905_v43 = vld [vmem:[#allocation16 + $0x1458] sm:$0xff]  ;;  %v4906_v22 = vld [vmem:[#allocation16 + $0x1460] sm:$0xff] }
 0x4b8   : > { %v7310_v39 = vadd.f32 %v7309_v46, %v7308_v62  ;;  %v7365_v10 = vpop.f32.mrb[87].mxu1  ;;  %v12006_v32 = vadd.f32 %v7363_v15, %v3889_v45  ;;  %8604 = vmatpush1.bf16.msra.mxu0 %v8603_v61  ;;  %8446 = vmatprep.subr.bf16.mxu1 %v8445_v34  ;;  %v4876_v62 = vld [vmem:[#allocation16 + $0x1370] sm:$0xff]  ;;  %v4886_v46 = vld [vmem:[#allocation16 + $0x13c0] sm:$0xff]  ;;  %v9189_v15 = vadd.f32 %v11792_v59, %v12004_v60  ;;  %v4897_v61 = vld [vmem:[#allocation16 + $0x1418] sm:$0xff] }
 0x4b9   : > { %v7366_v36 = vadd.f32 %v7365_v10, %v7364_v29  ;;  %8606 = vmatprep.subr.bf16.mxu0 %v8605_v41  ;;  %v12013_v45 = vrot.slane %v11778_v38, %v12874_v8  ;;  %v9192_v29 = vadd.f32 %v11807_v1, %v11906_v18  ;;  %v8451_v59 = vpack.c.bf16 %v4884_v57, %v4874_v26  ;;  %v4894_v41 = vld [vmem:[#allocation16 + $0x1400] sm:$0xff]  ;;  %v4915_v1 = vld [vmem:[#allocation16 + $0x14a8] sm:$0xff] }
 0x4ba   : > { %v3894_v6 = vadd.f32 %v7310_v39, %v11942_v12  ;;  %v8611_v38 = vpack.c.bf16 %v4886_v46, %v4876_v62  ;;  %v9191_v58 = vadd.f32 %v11804_v31, %v12004_v60  ;;  %v8453_v10 = vpack.c.bf16 %v4905_v43, %v4895_v13  ;;  %v4927_v26 = vld [vmem:[#allocation16 + $0x1508] sm:$0xff]  ;;  %v4916_v62 = vld [vmem:[#allocation16 + $0x14b0] sm:$0xff]  ;;  %v4926_v43 = vld [vmem:[#allocation16 + $0x1500] sm:$0xff] }
 0x4bb   : > { %v7483_v0 = vpop.f32.mrb[104].mxu0  ;;  %8448 = vmatpush1.bf16.msra.mxu1 %v8447_v56  ;;  %v8613_v49 = vpack.c.bf16 %v4907_v50, %v4897_v61  ;;  %vm4109_vm3 = vcmp.ge.f32.partialorder %v9189_v15, 0.0  ;;  %v4182_v31 = vmul.f32 %v9192_v29, %v11913_v28  ;;  %vm4115_vm4 = vcmp.ge.f32.partialorder %v9192_v29, 0.0  ;;  %v12042_v61 = vld [vmem:[#allocation16 + $0x1548] sm:$0xff]  ;;  %v4945_v50 = vld [vmem:[#allocation16 + $0x1598] sm:$0xff] }
 0x4bc   : > { %v12016_v12 = vadd.f32 %v7483_v0, %v11987_v54  ;;  %v4068_v20 = vpop.f32.mrb[105].mxu0  ;;  %v12018_v16 = vadd.f32 %v7366_v36, %v3894_v6  ;;  %8608 = vmatpush1.bf16.msra.mxu0 %v8607_v30  ;;  %v4896_v54 = vld [vmem:[#allocation16 + $0x1410] sm:$0xff]  ;;  %8450 = vmatprep.subr.bf16.mxu1 %v8449_v52  ;;  %v9194_v36 = vadd.f32 %v11824_v11, %v11906_v18  ;;  %v4917_v30 = vld [vmem:[#allocation16 + $0x14b8] sm:$0xff]  ;;  %vm4114_vm5 = vcmp.ge.f32.partialorder %v9191_v58, 0.0 }
 0x4bd   : > { %v12023_v34 = vadd.f32 %v4068_v20, %v11975_v3  ;;  %8610 = vmatprep.subr.bf16.mxu0 %v8609_v27  ;;  %v4176_v3 = vmul.f32 %v9189_v15, %v12013_v45  ;;  %v8455_v57 = vpack.c.bf16 %v4904_v4, %v4894_v41  ;;  %v8615_v0 = vpack.c.bf16 %v4906_v22, %v4896_v54  ;;  %v4914_v27 = vld [vmem:[#allocation16 + $0x14a0] sm:$0xff]  ;;  %v4924_v11 = vld [vmem:[#allocation16 + $0x14f0] sm:$0xff]  ;;  %v4947_v54 = vld [vmem:[#allocation16 + $0x15a8] sm:$0xff] }
 0x4be   : > { %v8457_v52 = vpack.c.bf16 %v4925_v40, %v4915_v1  ;;  %v12040_v46 = vadd.f32 %v11819_v37, %v12004_v60  ;;  %v4937_v37 = vld [vmem:[#allocation16 + $0x1558] sm:$0xff]  ;;  %vm4120_vm6 = vcmp.ge.f32.partialorder %v9194_v36, 0.0  ;;  %v8461_v22 = vpack.c.bf16 %v4945_v50, %v12042_v61  ;;  %v4944_v1 = vld [vmem:[#allocation16 + $0x1590] sm:$0xff]  ;;  %v4966_v50 = vld [vmem:[#allocation16 + $0x1640] sm:$0xff] }
 0x4bf   : > { %v7486_v39 = vpop.f32.mrb[106].mxu0  ;;  %8452 = vmatpush1.bf16.msra.mxu1 %v8451_v59  ;;  %v12045_v59 = vsel %vm4109_vm3, %v9189_v15, %v4176_v3  ;;  %v8621_v3 = vpack.c.bf16 %v4947_v54, %v4937_v37  ;;  %v4956_v61 = vld [vmem:[#allocation16 + $0x15f0] sm:$0xff]  ;;  %v9197_v37 = vadd.f32 %v11851_v19, %v12004_v60  ;;  %v4985_v54 = vld [vmem:[#allocation16 + $0x16d8] sm:$0xff]  ;;  %vm4111_vm2 = vcmp.ge.f32.partialorder %v12023_v34, 0.0 }
 0x4c0   : > { %v12031_v6 = vadd.f32 %v7486_v39, %v11993_v42  ;;  %v4078_v56 = vpop.f32.mrb[107].mxu0  ;;  %8612 = vmatpush1.bf16.msra.mxu0 %v8611_v38  ;;  %v4181_v42 = vmul.f32 %v9191_v58, %v12013_v45  ;;  %8454 = vmatprep.subr.bf16.mxu1 %v8453_v10  ;;  %v4187_v38 = vmul.f32 %v9194_v36, %v11913_v28  ;;  %vm4119_vm7 = vcmp.ge.f32.partialorder %v12040_v46, 0.0 }
 0x4c1   : > { %v12035_v13 = vadd.f32 %v4078_v56, %v11990_v2  ;;  %8614 = vmatprep.subr.bf16.mxu0 %v8613_v49  ;;  %v8617_v2 = vpack.c.bf16 %v4927_v26, %v4917_v30  ;;  %v12052_v39 = vsel %vm4115_vm4, %v9192_v29, %v4182_v31  ;;  %v9196_v10 = vadd.f32 %v11841_v17, %v11906_v18  ;;  %v4934_v29 = vld [vmem:[#allocation16 + $0x1540] sm:$0xff]  ;;  %v4936_v56 = vld [vmem:[#allocation16 + $0x1550] sm:$0xff]  ;;  %v4955_v26 = vld [vmem:[#allocation16 + $0x15e8] sm:$0xff] }
 0x4c2   : > { %5286 = vmatmul.mubr.f32.vlgmr.msra.gmra.mrb[88].mxu1 %v12045_v59  ;;  %v8619_v49 = vpack.c.bf16 %v4926_v43, %v4916_v62  ;;  %v12064_v40 = vsel %vm4114_vm5, %v9191_v58, %v4181_v42  ;;  %v4186_v17 = vmul.f32 %v12040_v46, %v12013_v45  ;;  %v4946_v30 = vld [vmem:[#allocation16 + $0x15a0] sm:$0xff]  ;;  %v12070_v31 = vsel %vm4120_vm6, %v9194_v36, %v4187_v38  ;;  %v4957_v62 = vld [vmem:[#allocation16 + $0x15f8] sm:$0xff]  ;;  %v4975_v38 = vld [vmem:[#allocation16 + $0x1688] sm:$0xff] }
 0x4c3   : > { %v7489_v20 = vpop.f32.mrb[108].mxu0  ;;  %5625 = vmatmul.mubr.f32.vlgmr.msra.gmra.mrb[112].mxu0 %v12045_v59  ;;  %5291 = vmatprep.mubr.f32.mxu1 %v12052_v39  ;;  %v4192_v42 = vmul.f32 %v9196_v10, %v11913_v28  ;;  %v9198_v36 = vadd.f32 %v11858_v63, %v11906_v18  ;;  %vm4125_vm8 = vcmp.ge.f32.partialorder %v9196_v10, 0.0  ;;  %vm4129_vm11 = vcmp.ge.f32.partialorder %v9197_v37, 0.0 }
 0x4c4   : > { %v12049_v41 = vadd.f32 %v7489_v20, %v11999_v23  ;;  %v4088_v4 = vpop.f32.mrb[109].mxu0  ;;  %8456 = vmatpush1.bf16.msra.mxu1 %v8455_v57  ;;  %v8459_v23 = vpack.c.bf16 %v4924_v11, %v4914_v27  ;;  %5630 = vmatprep.mubr.f32.mxu0 %v12052_v39  ;;  %v9195_v57 = vadd.f32 %v11836_v48, %v12004_v60  ;;  %v4965_v11 = vld [vmem:[#allocation16 + $0x1638] sm:$0xff]  ;;  %v4964_v20 = vld [vmem:[#allocation16 + $0x1630] sm:$0xff]  ;;  %vm4116_vm3 = vcmp.ge.f32.partialorder %v12016_v12, 0.0 }
 0x4c5   : > { %v12059_v15 = vadd.f32 %v4088_v4, %v11996_v44  ;;  %8616 = vmatpush1.bf16.msra.mxu0 %v8615_v0  ;;  %8458 = vmatprep.subr.bf16.mxu1 %v8457_v52  ;;  %v4967_v0 = vld [vmem:[#allocation16 + $0x1648] sm:$0xff]  ;;  %v4954_v52 = vld [vmem:[#allocation16 + $0x15e0] sm:$0xff]  ;;  %v8465_v43 = vpack.c.bf16 %v4965_v11, %v4955_v26  ;;  %vm4130_vm10 = vcmp.ge.f32.partialorder %v9198_v36, 0.0  ;;  %v9199_v11 = vadd.f32 %v11868_v51, %v12004_v60 }
 0x4c6   : > { %8618 = vmatprep.subr.bf16.mxu0 %v8617_v2  ;;  %5292 = vmatmul.mubr.f32.gmra.mrb[90].mxu1 %v12064_v40  ;;  %v8623_v2 = vpack.c.bf16 %v4946_v30, %v4936_v56  ;;  %v8625_v63 = vpack.c.bf16 %v4967_v0, %v4957_v62  ;;  %v4191_v4 = vmul.f32 %v9195_v57, %v12013_v45  ;;  %vm4124_vm9 = vcmp.ge.f32.partialorder %v9195_v57, 0.0  ;;  %v4976_v56 = vld [vmem:[#allocation16 + $0x1690] sm:$0xff]  ;;  %v4986_v30 = vld [vmem:[#allocation16 + $0x16e0] sm:$0xff]  ;;  %v5005_v62 = vld [vmem:[#allocation16 + $0x1778] sm:$0xff] }
 0x4c7   : > { %v7492_v44 = vpop.f32.mrb[110].mxu0  ;;  %5631 = vmatmul.mubr.f32.gmra.mrb[114].mxu0 %v12064_v40  ;;  %5297 = vmatprep.mubr.f32.mxu1 %v12070_v31  ;;  %v8467_v19 = vpack.c.bf16 %v4964_v20, %v4954_v52  ;;  %v4997_v0 = vld [vmem:[#allocation16 + $0x1738] sm:$0xff]  ;;  %v4994_v20 = vld [vmem:[#allocation16 + $0x1720] sm:$0xff]  ;;  %vm4134_vm13 = vcmp.ge.f32.partialorder %v9199_v11, 0.0  ;;  %vm4121_vm4 = vcmp.ge.f32.partialorder %v12035_v13, 0.0  ;;  %vm4126_vm5 = vcmp.ge.f32.partialorder %v12031_v6, 0.0 }
 0x4c8   : > { %v12075_v58 = vadd.f32 %v7492_v44, %v12018_v16  ;;  %v4098_v27 = vpop.f32.mrb[111].mxu0  ;;  %8460 = vmatpush1.bf16.msra.mxu1 %v8459_v23  ;;  %v8463_v16 = vpack.c.bf16 %v4944_v1, %v4934_v29  ;;  %5636 = vmatprep.mubr.f32.mxu0 %v12070_v31  ;;  %v4977_v23 = vld [vmem:[#allocation16 + $0x1698] sm:$0xff]  ;;  %v12097_v29 = vsel %vm4125_vm8, %v9196_v10, %v4192_v42  ;;  %v5007_v42 = vld [vmem:[#allocation16 + $0x1788] sm:$0xff]  ;;  %vm4131_vm6 = vcmp.ge.f32.partialorder %v12059_v15, 0.0 }
 0x4c9   : > { %v12084_v48 = vadd.f32 %v4098_v27, %v12006_v32  ;;  %8620 = vmatpush1.bf16.msra.mxu0 %v8619_v49  ;;  %v12091_v32 = vsel %vm4119_vm7, %v12040_v46, %v4186_v17  ;;  %8462 = vmatprep.subr.bf16.mxu1 %v8461_v22  ;;  %v4987_v49 = vld [vmem:[#allocation16 + $0x16e8] sm:$0xff]  ;;  %v4197_v1 = vmul.f32 %v9198_v36, %v11913_v28  ;;  %v4974_v22 = vld [vmem:[#allocation16 + $0x1680] sm:$0xff]  ;;  %v4984_v17 = vld [vmem:[#allocation16 + $0x16d0] sm:$0xff]  ;;  %vm4136_vm7 = vcmp.ge.f32.partialorder %v12049_v41, 0.0 }
 0x4ca   : > { %8622 = vmatprep.subr.bf16.mxu0 %v8621_v3  ;;  %v9200_v46 = vadd.f32 %v11875_v21, %v11906_v18  ;;  %5298 = vmatmul.mubr.f32.gmra.mrb[92].mxu1 %v12091_v32  ;;  %v8627_v10 = vpack.c.bf16 %v4966_v50, %v4956_v61  ;;  %v8469_v44 = vpack.c.bf16 %v4985_v54, %v4975_v38  ;;  %v4995_v21 = vld [vmem:[#allocation16 + $0x1728] sm:$0xff]  ;;  %v4996_v61 = vld [vmem:[#allocation16 + $0x1730] sm:$0xff]  ;;  %v5006_v50 = vld [vmem:[#allocation16 + $0x1780] sm:$0xff] }
 0x4cb   : > { %5637 = vmatmul.mubr.f32.gmra.mrb[116].mxu0 %v12091_v32  ;;  %5303 = vmatprep.mubr.f32.mxu1 %v12097_v29  ;;  %v8629_v3 = vpack.c.bf16 %v4987_v49, %v4977_v23  ;;  %v12107_v26 = vsel %vm4124_vm9, %v9195_v57, %v4191_v4  ;;  %v4196_v27 = vmul.f32 %v9197_v37, %v12013_v45  ;;  %v5025_v23 = vld [vmem:[#allocation16 + $0x1818] sm:$0xff]  ;;  %vm4141_vm8 = vcmp.ge.f32.partialorder %v12084_v48, 0.0 }
 0x4cc   : > { %8464 = vmatpush1.bf16.msra.mxu1 %v8463_v16  ;;  %5642 = vmatprep.mubr.f32.mxu0 %v12097_v29  ;;  %v12113_v16 = vsel %vm4130_vm10, %v9198_v36, %v4197_v1  ;;  %v4202_v52 = vmul.f32 %v9200_v46, %v11913_v28  ;;  %v9202_v57 = vadd.f32 %v11892_v35, %v11906_v18  ;;  %vm4135_vm12 = vcmp.ge.f32.partialorder %v9200_v46, 0.0  ;;  %v5015_v35 = vld [vmem:[#allocation16 + $0x17c8] sm:$0xff]  ;;  %v5017_v49 = vld [vmem:[#allocation16 + $0x17d8] sm:$0xff] }
 0x4cd   : > { %8624 = vmatpush1.bf16.msra.mxu0 %v8623_v2  ;;  %8466 = vmatprep.subr.bf16.mxu1 %v8465_v43  ;;  %v8471_v51 = vpack.c.bf16 %v4984_v17, %v4974_v22  ;;  %v5004_v2 = vld [vmem:[#allocation16 + $0x1770] sm:$0xff]  ;;  %v8631_v36 = vpack.c.bf16 %v4986_v30, %v4976_v56  ;;  %v8473_v43 = vpack.c.bf16 %v5005_v62, %v4995_v21  ;;  %v5027_v1 = vld [vmem:[#allocation16 + $0x1828] sm:$0xff]  ;;  %v5026_v21 = vld [vmem:[#allocation16 + $0x1820] sm:$0xff]  ;;  %vm4146_vm9 = vcmp.ge.f32.partialorder %v12075_v58, 0.0 }
 0x4ce   : > { %8626 = vmatprep.subr.bf16.mxu0 %v8625_v63  ;;  %5304 = vmatmul.mubr.f32.gmra.mrb[94].mxu1 %v12107_v26  ;;  %v8633_v63 = vpack.c.bf16 %v5007_v42, %v4997_v0  ;;  %v12123_v38 = vsel %vm4129_vm11, %v9197_v37, %v4196_v27  ;;  %v4201_v4 = vmul.f32 %v9199_v11, %v12013_v45  ;;  %vm4140_vm14 = vcmp.ge.f32.partialorder %v9202_v57, 0.0  ;;  %v5016_v56 = vld [vmem:[#allocation16 + $0x17d0] sm:$0xff]  ;;  %v5035_v27 = vld [vmem:[#allocation16 + $0x1868] sm:$0xff]  ;;  %v5045_v62 = vld [vmem:[#allocation16 + $0x18b8] sm:$0xff] }
 0x4cf   : > { %5643 = vmatmul.mubr.f32.gmra.mrb[118].mxu0 %v12107_v26  ;;  %5309 = vmatprep.mubr.f32.mxu1 %v12113_v16  ;;  %v9201_v54 = vadd.f32 %v11885_v9, %v12004_v60  ;;  %v4207_v22 = vmul.f32 %v9202_v57, %v11913_v28  ;;  %v9204_v37 = vadd.f32 %v11917_v14, %v11906_v18 }
 0x4d0   : > { %8468 = vmatpush1.bf16.msra.mxu1 %v8467_v19  ;;  %5648 = vmatprep.mubr.f32.mxu0 %v12113_v16  ;;  %v12129_v19 = vsel %vm4135_vm12, %v9200_v46, %v4202_v52  ;;  %v8475_v9 = vpack.c.bf16 %v5004_v2, %v4994_v20  ;;  %v8635_v17 = vpack.c.bf16 %v5006_v50, %v4996_v61  ;;  %v5047_v52 = vld [vmem:[#allocation16 + $0x18c8] sm:$0xff]  ;;  %v5034_v20 = vld [vmem:[#allocation16 + $0x1860] sm:$0xff]  ;;  %v5044_v2 = vld [vmem:[#allocation16 + $0x18b0] sm:$0xff] }
 0x4d1   : > { %8628 = vmatpush1.bf16.msra.mxu0 %v8627_v10  ;;  %8470 = vmatprep.subr.bf16.mxu1 %v8469_v44  ;;  %v8477_v46 = vpack.c.bf16 %v5025_v23, %v5015_v35  ;;  %v8637_v10 = vpack.c.bf16 %v5027_v1, %v5017_v49  ;;  %v5014_v44 = vld [vmem:[#allocation16 + $0x17c0] sm:$0xff]  ;;  %v12139_v18 = vsel %vm4134_vm13, %v9199_v11, %v4201_v4  ;;  %vm4139_vm15 = vcmp.ge.f32.partialorder %v9201_v54, 0.0  ;;  %v5037_v11 = vld [vmem:[#allocation16 + $0x1878] sm:$0xff]  ;;  %v4259_v35 = vld [vmem:[#allocation16 + $0x28] sm:$0xff] }
 0x4d2   : > { %8630 = vmatprep.subr.bf16.mxu0 %v8629_v3  ;;  %5310 = vmatmul.mubr.f32.gmra.mrb[96].mxu1 %v12123_v38  ;;  %v5024_v3 = vld [vmem:[#allocation16 + $0x1810] sm:$0xff]  ;;  %v4206_v14 = vmul.f32 %v9201_v54, %v12013_v45  ;;  %v9203_v30 = vadd.f32 %v11909_v7, %v12004_v60  ;;  %v12145_v0 = vsel %vm4140_vm14, %v9202_v57, %v4207_v22  ;;  %vm4145_vm0 = vcmp.ge.f32.partialorder %v9204_v37, 0.0  ;;  %v9686_v60 = vld [vmem:[#allocation15] sm:$0x1f]  ;;  %v5046_v50 = vld [vmem:[#allocation16 + $0x18c0] sm:$0xff] }
 0x4d3   : > { %5649 = vmatmul.mubr.f32.gmra.mrb[120].mxu0 %v12123_v38  ;;  %5315 = vmatprep.mubr.f32.mxu1 %v12129_v19  ;;  %v4212_v42 = vmul.f32 %v9204_v37, %v11913_v28  ;;  %v8479_v7 = vpack.c.bf16 %v5024_v3, %v5014_v44  ;;  %v8639_v57 = vpack.c.bf16 %v5026_v21, %v5016_v56  ;;  %v4269_v4 = vld [vmem:[#allocation16 + $0x78] sm:$0xff]  ;;  %v4271_v1 = vld [vmem:[#allocation16 + $0x88] sm:$0xff]  ;;  %v4260_v44 = vld [vmem:[#allocation16 + $0x30] sm:$0xff] }
 0x4d4   : > { %8472 = vmatpush1.bf16.msra.mxu1 %v8471_v51  ;;  %5654 = vmatprep.mubr.f32.mxu0 %v12129_v19  ;;  %v12152_v51 = vrot.slane %v9686_v60, %v12841_v53  ;;  %v8481_v28 = vpack.c.bf16 %v5045_v62, %v5035_v27  ;;  %v8641_v61 = vpack.c.bf16 %v5047_v52, %v5037_v11  ;;  %vm4144_vm1 = vcmp.ge.f32.partialorder %v9203_v30, 0.0  ;;  %v4261_v49 = vld [vmem:[#allocation16 + $0x38] sm:$0xff]  ;;  %v4270_v3 = vld [vmem:[#allocation16 + $0x80] sm:$0xff]  ;;  %v4279_v56 = vld [vmem:[#allocation16 + $0xc8] sm:$0xff] }
 0x4d5   : > { %8632 = vmatpush1.bf16.msra.mxu0 %v8631_v36  ;;  %8474 = vmatprep.subr.bf16.mxu1 %v8473_v43  ;;  %v5036_v36 = vld [vmem:[#allocation16 + $0x1870] sm:$0xff]  ;;  %v12156_v43 = vsel %vm4139_vm15, %v9201_v54, %v4206_v14  ;;  %v12160_v23 = vsel %vm4145_vm0, %v9204_v37, %v4212_v42  ;;  %v8645_v22 = vpack.c.bf16 %v4269_v4, %v4259_v35  ;;  %v4289_v14 = vld [vmem:[#allocation16 + $0x118] sm:$0xff]  ;;  %v4291_v27 = vld [vmem:[#allocation16 + $0x128] sm:$0xff] }
 0x4d6   : > { %8634 = vmatprep.subr.bf16.mxu0 %v8633_v63  ;;  %5316 = vmatmul.mubr.f32.gmra.mrb[98].mxu1 %v12139_v18  ;;  %v4211_v63 = vmul.f32 %v9203_v30, %v12013_v45  ;;  %v8483_v45 = vpack.c.bf16 %v5044_v2, %v5034_v20  ;;  %v8643_v54 = vpack.c.bf16 %v5046_v50, %v5036_v36  ;;  %v4281_v21 = vld [vmem:[#allocation16 + $0xd8] sm:$0xff]  ;;  %v4278_v42 = vld [vmem:[#allocation16 + $0xc0] sm:$0xff]  ;;  %v4288_v11 = vld [vmem:[#allocation16 + $0x110] sm:$0xff] }
 0x4d7   : > { %5655 = vmatmul.mubr.f32.gmra.mrb[122].mxu0 %v12139_v18  ;;  %5321 = vmatprep.mubr.f32.mxu1 %v12145_v0  ;;  %v4178_v37 = vmul.f32 %v12152_v51, %v12023_v34  ;;  %v8807_v62 = vpack.c.bf16 %v4270_v3, %v4260_v44  ;;  %v4183_v52 = vmul.f32 %v12152_v51, %v12016_v12  ;;  %v4299_v2 = vld [vmem:[#allocation16 + $0x168] sm:$0xff]  ;;  %v4309_v36 = vld [vmem:[#allocation16 + $0x1b8] sm:$0xff]  ;;  %v4298_v35 = vld [vmem:[#allocation16 + $0x160] sm:$0xff] }
 0x4d8   : > { %8476 = vmatpush1.bf16.msra.mxu1 %v8475_v9  ;;  %5660 = vmatprep.mubr.f32.mxu0 %v12145_v0  ;;  %v4258_v9 = vld [vmem:[#allocation16 + $0x20] sm:$0xff]  ;;  %v8649_v60 = vpack.c.bf16 %v4289_v14, %v4279_v56  ;;  %v8809_v20 = vpack.c.bf16 %v4291_v27, %v4281_v21  ;;  %v4311_v50 = vld [vmem:[#allocation16 + $0x1c8] sm:$0xff]  ;;  %v4308_v4 = vld [vmem:[#allocation16 + $0x1b0] sm:$0xff] }
 0x4d9   : > { %8636 = vmatpush1.bf16.msra.mxu0 %v8635_v17  ;;  %8478 = vmatprep.subr.bf16.mxu1 %v8477_v46  ;;  %v4268_v17 = vld [vmem:[#allocation16 + $0x70] sm:$0xff]  ;;  %v12166_v46 = vsel %vm4144_vm1, %v9203_v30, %v4211_v63  ;;  %v8651_v63 = vpack.c.bf16 %v4288_v11, %v4278_v42  ;;  %v4331_v44 = vld [vmem:[#allocation16 + $0x268] sm:$0xff]  ;;  %v4318_v56 = vld [vmem:[#allocation16 + $0x200] sm:$0xff] }
 0x4da   : > { %8638 = vmatprep.subr.bf16.mxu0 %v8637_v10  ;;  %5322 = vmatmul.mubr.f32.gmra.mrb[100].mxu1 %v12156_v43  ;;  %v8805_v10 = vpack.c.bf16 %v4271_v1, %v4261_v49  ;;  %v8647_v30 = vpack.c.bf16 %v4268_v17, %v4258_v9  ;;  %v12187_v49 = vsel %vm4116_vm3, %v12016_v12, %v4183_v52  ;;  %v4319_v17 = vld [vmem:[#allocation16 + $0x208] sm:$0xff]  ;;  %v4328_v14 = vld [vmem:[#allocation16 + $0x250] sm:$0xff]  ;;  %v4330_v42 = vld [vmem:[#allocation16 + $0x260] sm:$0xff] }
 0x4db   : > { %5661 = vmatmul.mubr.f32.gmra.mrb[124].mxu0 %v12156_v43  ;;  %5327 = vmatprep.mubr.f32.mxu1 %v12160_v23  ;;  %v4188_v1 = vmul.f32 %v12152_v51, %v12035_v13  ;;  %v8655_v12 = vpack.c.bf16 %v4308_v4, %v4298_v35  ;;  %v4339_v52 = vld [vmem:[#allocation16 + $0x2a8] sm:$0xff]  ;;  %v4350_v35 = vld [vmem:[#allocation16 + $0x300] sm:$0xff]  ;;  %v4761_v53 = vld [vmem:[#allocation16 + $0xfd8] sm:$0xff] }
 0x4dc   : > { %8480 = vmatpush1.bf16.msra.mxu1 %v8479_v7  ;;  %5666 = vmatprep.mubr.f32.mxu0 %v12160_v23  ;;  %v12180_v7 = vsel %vm4111_vm2, %v12023_v34, %v4178_v37  ;;  %v4329_v37 = vld [vmem:[#allocation16 + $0x258] sm:$0xff] }
 0x4dd   : > { %8640 = vmatpush1.bf16.msra.mxu0 %v8639_v57  ;;  %8482 = vmatprep.subr.bf16.mxu1 %v8481_v28  ;;  %v4280_v57 = vld [vmem:[#allocation16 + $0xd0] sm:$0xff]  ;;  %v4290_v28 = vld [vmem:[#allocation16 + $0x120] sm:$0xff]  ;;  %v12201_v21 = vsel %vm4121_vm4, %v12035_v13, %v4188_v1  ;;  %v8657_v27 = vpack.c.bf16 %v4329_v37, %v4319_v17  ;;  %v4341_v13 = vld [vmem:[#allocation16 + $0x2b8] sm:$0xff] }
 0x4de   : > { %8642 = vmatprep.subr.bf16.mxu0 %v8641_v61  ;;  %5328 = vmatmul.mubr.f32.gmra.mrb[102].mxu1 %v12166_v46  ;;  %v4301_v61 = vld [vmem:[#allocation16 + $0x178] sm:$0xff]  ;;  %v8811_v34 = vpack.c.bf16 %v4290_v28, %v4280_v57  ;;  %v8659_v57 = vpack.c.bf16 %v4328_v14, %v4318_v56  ;;  %v4351_v28 = vld [vmem:[#allocation16 + $0x308] sm:$0xff]  ;;  %v4358_v17 = vld [vmem:[#allocation16 + $0x340] sm:$0xff] }
 0x4df   : > { %5667 = vmatmul.mubr.f32.gmra.mrb[126].mxu0 %v12166_v46  ;;  %5398 = vmatprep.mubr.f32.mxu1 %v12818_v55  ;;  %v8813_v9 = vpack.c.bf16 %v4311_v50, %v4301_v61  ;;  %v4198_v61 = vmul.f32 %v12152_v51, %v12059_v15  ;;  %v8821_v4 = vpack.c.bf16 %v4351_v28, %v4341_v13  ;;  %v4359_v1 = vld [vmem:[#allocation16 + $0x348] sm:$0xff]  ;;  %v4368_v37 = vld [vmem:[#allocation16 + $0x390] sm:$0xff]  ;;  %v4370_v56 = vld [vmem:[#allocation16 + $0x3a0] sm:$0xff] }
 0x4e0   : > { %8484 = vmatpush1.bf16.msra.mxu1 %v8483_v45  ;;  %5737 = vmatprep.mubr.f32.mxu0 %v12818_v55  ;;  %v8653_v45 = vpack.c.bf16 %v4309_v36, %v4299_v2  ;;  %v4338_v2 = vld [vmem:[#allocation16 + $0x2a0] sm:$0xff]  ;;  %v4348_v36 = vld [vmem:[#allocation16 + $0x2f0] sm:$0xff]  ;;  %v4208_v13 = vmul.f32 %v12152_v51, %v12084_v48 }
 0x4e1   : > { %8644 = vmatpush1.bf16.msra.mxu0 %v8643_v54  ;;  %8646 = vmatprep.subr.bf16.mxu1 %v8645_v22  ;;  %v4300_v54 = vld [vmem:[#allocation16 + $0x170] sm:$0xff]  ;;  %v4310_v22 = vld [vmem:[#allocation16 + $0x1c0] sm:$0xff] }
 0x4e2   : > { %8806 = vmatprep.subr.bf16.mxu0 %v8805_v10  ;;  %v4321_v10 = vld [vmem:[#allocation16 + $0x218] sm:$0xff]  ;;  %v8815_v3 = vpack.c.bf16 %v4310_v22, %v4300_v54  ;;  %v4371_v22 = vld [vmem:[#allocation16 + $0x3a8] sm:$0xff] }
 0x4e3   : > { %5399 = vmatmul.mubr.f32.vlgmr.msra.gmra.mrb[88].mxu1 %v12180_v7  ;;  %v8817_v11 = vpack.c.bf16 %v4331_v44, %v4321_v10  ;;  %v4361_v54 = vld [vmem:[#allocation16 + $0x358] sm:$0xff]  ;;  %v12225_v10 = vsel %vm4131_vm6, %v12059_v15, %v4198_v61  ;;  %v4399_v61 = vld [vmem:[#allocation16 + $0x488] sm:$0xff] }
 0x4e4   : > { %5738 = vmatmul.mubr.f32.vlgmr.msra.gmra.mrb[112].mxu0 %v12180_v7  ;;  %8648 = vmatpush1.bf16.msra.mxu1 %v8647_v30  ;;  %v4193_v30 = vmul.f32 %v12152_v51, %v12031_v6  ;;  %v8825_v14 = vpack.c.bf16 %v4371_v22, %v4361_v54  ;;  %v4381_v15 = vld [vmem:[#allocation16 + $0x3f8] sm:$0xff]  ;;  %v12249_v54 = vsel %vm4141_vm8, %v12084_v48, %v4208_v13 }
 0x4e5   : > { %8808 = vmatpush1.bf16.msra.mxu0 %v8807_v62  ;;  %5404 = vmatprep.mubr.f32.mxu1 %v12818_v55  ;;  %v4320_v62 = vld [vmem:[#allocation16 + $0x210] sm:$0xff]  ;;  %v4421_v48 = vld [vmem:[#allocation16 + $0x538] sm:$0xff] }
 0x4e6   : > { %5743 = vmatprep.mubr.f32.mxu0 %v12818_v55  ;;  %8650 = vmatprep.subr.bf16.mxu1 %v8649_v60  ;;  %v4349_v60 = vld [vmem:[#allocation16 + $0x2f8] sm:$0xff] }
 0x4e7   : > { %5405 = vmatmul.mubr.f32.gmra.mrb[90].mxu1 %v12187_v49  ;;  %8810 = vmatprep.subr.bf16.mxu0 %v8809_v20  ;;  %v8819_v20 = vpack.c.bf16 %v4330_v42, %v4320_v62  ;;  %v8661_v50 = vpack.c.bf16 %v4349_v60, %v4339_v52  ;;  %v8667_v62 = vpack.c.bf16 %v4368_v37, %v4358_v17  ;;  %v4391_v42 = vld [vmem:[#allocation16 + $0x448] sm:$0xff]  ;;  %v4378_v52 = vld [vmem:[#allocation16 + $0x3e0] sm:$0xff]  ;;  %v4388_v60 = vld [vmem:[#allocation16 + $0x430] sm:$0xff] }
 0x4e8   : > { %5744 = vmatmul.mubr.f32.gmra.mrb[114].mxu0 %v12187_v49  ;;  %8652 = vmatpush1.bf16.msra.mxu1 %v8651_v63  ;;  %v12211_v63 = vsel %vm4126_vm5, %v12031_v6, %v4193_v30  ;;  %v8663_v6 = vpack.c.bf16 %v4348_v36, %v4338_v2  ;;  %v4379_v30 = vld [vmem:[#allocation16 + $0x3e8] sm:$0xff]  ;;  %v4390_v2 = vld [vmem:[#allocation16 + $0x440] sm:$0xff]  ;;  %v8829_v36 = vpack.c.bf16 %v4391_v42, %v4381_v15  ;;  %v4441_v13 = vld [vmem:[#allocation16 + $0x5d8] sm:$0xff] }
 0x4e9   : > { %8812 = vmatpush1.bf16.msra.mxu0 %v8811_v34  ;;  %5410 = vmatprep.mubr.f32.mxu1 %v12818_v55  ;;  %v4340_v34 = vld [vmem:[#allocation16 + $0x2b0] sm:$0xff]  ;;  %v4410_v17 = vld [vmem:[#allocation16 + $0x4e0] sm:$0xff] }
 0x4ea   : > { %5749 = vmatprep.mubr.f32.mxu0 %v12818_v55  ;;  %8654 = vmatprep.subr.bf16.mxu1 %v8653_v45  ;;  %v4369_v45 = vld [vmem:[#allocation16 + $0x398] sm:$0xff]  ;;  %v4430_v42 = vld [vmem:[#allocation16 + $0x580] sm:$0xff] }
 0x4eb   : > { %5411 = vmatmul.mubr.f32.gmra.mrb[92].mxu1 %v12201_v21  ;;  %8814 = vmatprep.subr.bf16.mxu0 %v8813_v9  ;;  %v8823_v9 = vpack.c.bf16 %v4350_v35, %v4340_v34  ;;  %v8665_v44 = vpack.c.bf16 %v4369_v45, %v4359_v1  ;;  %v4401_v34 = vld [vmem:[#allocation16 + $0x498] sm:$0xff]  ;;  %v4411_v35 = vld [vmem:[#allocation16 + $0x4e8] sm:$0xff]  ;;  %v4398_v1 = vld [vmem:[#allocation16 + $0x480] sm:$0xff] }
 0x4ec   : > { %5750 = vmatmul.mubr.f32.gmra.mrb[116].mxu0 %v12201_v21  ;;  %8656 = vmatpush1.bf16.msra.mxu1 %v8655_v12  ;;  %v4203_v12 = vmul.f32 %v12152_v51, %v12049_v41  ;;  %v4408_v45 = vld [vmem:[#allocation16 + $0x4d0] sm:$0xff]  ;;  %v8833_v37 = vpack.c.bf16 %v4411_v35, %v4401_v34  ;;  %v4450_v34 = vld [vmem:[#allocation16 + $0x620] sm:$0xff]  ;;  %v4459_v35 = vld [vmem:[#allocation16 + $0x668] sm:$0xff] }
 0x4ed   : > { %8816 = vmatpush1.bf16.msra.mxu0 %v8815_v3  ;;  %5416 = vmatprep.mubr.f32.mxu1 %v12818_v55  ;;  %v4360_v3 = vld [vmem:[#allocation16 + $0x350] sm:$0xff] }
 0x4ee   : > { %5755 = vmatprep.mubr.f32.mxu0 %v12818_v55  ;;  %8658 = vmatprep.subr.bf16.mxu1 %v8657_v27  ;;  %v4389_v27 = vld [vmem:[#allocation16 + $0x438] sm:$0xff] }
 0x4ef   : > { %5417 = vmatmul.mubr.f32.gmra.mrb[94].mxu1 %v12211_v63  ;;  %8818 = vmatprep.subr.bf16.mxu0 %v8817_v11  ;;  %v8827_v11 = vpack.c.bf16 %v4370_v56, %v4360_v3  ;;  %v8669_v28 = vpack.c.bf16 %v4389_v27, %v4379_v30  ;;  %v4431_v3 = vld [vmem:[#allocation16 + $0x588] sm:$0xff]  ;;  %v4428_v30 = vld [vmem:[#allocation16 + $0x570] sm:$0xff] }
 0x4f0   : > { %5756 = vmatmul.mubr.f32.gmra.mrb[118].mxu0 %v12211_v63  ;;  %8660 = vmatpush1.bf16.msra.mxu1 %v8659_v57  ;;  %v12235_v57 = vsel %vm4136_vm7, %v12049_v41, %v4203_v12  ;;  %v8671_v41 = vpack.c.bf16 %v4388_v60, %v4378_v52  ;;  %v4419_v12 = vld [vmem:[#allocation16 + $0x528] sm:$0xff]  ;;  %v4420_v27 = vld [vmem:[#allocation16 + $0x530] sm:$0xff]  ;;  %v4449_v52 = vld [vmem:[#allocation16 + $0x618] sm:$0xff]  ;;  %v8837_v60 = vpack.c.bf16 %v4431_v3, %v4421_v48 }
 0x4f1   : > { %8820 = vmatpush1.bf16.msra.mxu0 %v8819_v20  ;;  %5422 = vmatprep.mubr.f32.mxu1 %v12818_v55  ;;  %v4380_v20 = vld [vmem:[#allocation16 + $0x3f0] sm:$0xff]  ;;  %v4479_v48 = vld [vmem:[#allocation16 + $0x708] sm:$0xff]  ;;  %v4489_v3 = vld [vmem:[#allocation16 + $0x758] sm:$0xff] }
 0x4f2   : > { %5761 = vmatprep.mubr.f32.mxu0 %v12818_v55  ;;  %8662 = vmatprep.subr.bf16.mxu1 %v8661_v50  ;;  %v4409_v50 = vld [vmem:[#allocation16 + $0x4d8] sm:$0xff] }
 0x4f3   : > { %5423 = vmatmul.mubr.f32.gmra.mrb[96].mxu1 %v12225_v10  ;;  %8822 = vmatprep.subr.bf16.mxu0 %v8821_v4  ;;  %v8831_v4 = vpack.c.bf16 %v4390_v2, %v4380_v20  ;;  %v8673_v22 = vpack.c.bf16 %v4409_v50, %v4399_v61  ;;  %v4448_v61 = vld [vmem:[#allocation16 + $0x610] sm:$0xff] }
 0x4f4   : > { %5762 = vmatmul.mubr.f32.gmra.mrb[120].mxu0 %v12225_v10  ;;  %8664 = vmatpush1.bf16.msra.mxu1 %v8663_v6  ;;  %v4213_v6 = vmul.f32 %v12152_v51, %v12075_v58  ;;  %v8675_v51 = vpack.c.bf16 %v4408_v45, %v4398_v1  ;;  %v4440_v50 = vld [vmem:[#allocation16 + $0x5d0] sm:$0xff]  ;;  %v4461_v1 = vld [vmem:[#allocation16 + $0x678] sm:$0xff]  ;;  %v4471_v45 = vld [vmem:[#allocation16 + $0x6c8] sm:$0xff] }
 0x4f5   : > { %8824 = vmatpush1.bf16.msra.mxu0 %v8823_v9  ;;  %5428 = vmatprep.mubr.f32.mxu1 %v12818_v55  ;;  %v4400_v9 = vld [vmem:[#allocation16 + $0x490] sm:$0xff] }
 0x4f6   : > { %5767 = vmatprep.mubr.f32.mxu0 %v12818_v55  ;;  %8666 = vmatprep.subr.bf16.mxu1 %v8665_v44  ;;  %v4429_v44 = vld [vmem:[#allocation16 + $0x578] sm:$0xff]  ;;  %v8835_v56 = vpack.c.bf16 %v4410_v17, %v4400_v9  ;;  %v4458_v17 = vld [vmem:[#allocation16 + $0x660] sm:$0xff] }
 0x4f7   : > { %5429 = vmatmul.mubr.f32.gmra.mrb[98].mxu1 %v12235_v57  ;;  %8826 = vmatprep.subr.bf16.mxu0 %v8825_v14  ;;  %v4418_v14 = vld [vmem:[#allocation16 + $0x520] sm:$0xff]  ;;  %v8677_v15 = vpack.c.bf16 %v4429_v44, %v4419_v12  ;;  %v4460_v12 = vld [vmem:[#allocation16 + $0x670] sm:$0xff]  ;;  %v8845_v44 = vpack.c.bf16 %v4471_v45, %v4461_v1  ;;  %v4519_v45 = vld [vmem:[#allocation16 + $0x848] sm:$0xff] }
 0x4f8   : > { %5768 = vmatmul.mubr.f32.gmra.mrb[122].mxu0 %v12235_v57  ;;  %8668 = vmatpush1.bf16.msra.mxu1 %v8667_v62  ;;  %v12259_v62 = vsel %vm4146_vm9, %v12075_v58, %v4213_v6  ;;  %v8679_v20 = vpack.c.bf16 %v4428_v30, %v4418_v14  ;;  %v8839_v58 = vpack.c.bf16 %v4430_v42, %v4420_v27  ;;  %v4491_v14 = vld [vmem:[#allocation16 + $0x768] sm:$0xff]  ;;  %v4478_v42 = vld [vmem:[#allocation16 + $0x700] sm:$0xff] }
 0x4f9   : > { %8828 = vmatpush1.bf16.msra.mxu0 %v8827_v11  ;;  %5434 = vmatprep.mubr.f32.mxu1 %v12818_v55  ;;  %v4439_v11 = vld [vmem:[#allocation16 + $0x5c8] sm:$0xff]  ;;  %v4510_v1 = vld [vmem:[#allocation16 + $0x800] sm:$0xff] }
 0x4fa   : > { %5773 = vmatprep.mubr.f32.mxu0 %v12818_v55  ;;  %8670 = vmatprep.subr.bf16.mxu1 %v8669_v28  ;;  %v4451_v28 = vld [vmem:[#allocation16 + $0x628] sm:$0xff]  ;;  %v8681_v2 = vpack.c.bf16 %v4449_v52, %v4439_v11  ;;  %v4488_v11 = vld [vmem:[#allocation16 + $0x750] sm:$0xff] }
 0x4fb   : > { %5435 = vmatmul.mubr.f32.gmra.mrb[100].mxu1 %v12249_v54  ;;  %8830 = vmatprep.subr.bf16.mxu0 %v8829_v36  ;;  %v4438_v36 = vld [vmem:[#allocation16 + $0x5c0] sm:$0xff]  ;;  %v4480_v52 = vld [vmem:[#allocation16 + $0x710] sm:$0xff] }
 0x4fc   : > { %5774 = vmatmul.mubr.f32.gmra.mrb[124].mxu0 %v12249_v54  ;;  %8672 = vmatpush1.bf16.msra.mxu1 %v8671_v41  ;;  %v8841_v41 = vpack.c.bf16 %v4451_v28, %v4441_v13  ;;  %v8683_v6 = vpack.c.bf16 %v4448_v61, %v4438_v36  ;;  %v4490_v13 = vld [vmem:[#allocation16 + $0x760] sm:$0xff]  ;;  %v4499_v28 = vld [vmem:[#allocation16 + $0x7a8] sm:$0xff]  ;;  %v8691_v36 = vpack.c.bf16 %v4488_v11, %v4478_v42 }
 0x4fd   : > { %8832 = vmatpush1.bf16.msra.mxu0 %v8831_v4  ;;  %5440 = vmatprep.mubr.f32.mxu1 %v12818_v55  ;;  %v4469_v4 = vld [vmem:[#allocation16 + $0x6b8] sm:$0xff]  ;;  %v8851_v61 = vpack.c.bf16 %v4490_v13, %v4480_v52  ;;  %v4548_v13 = vld [vmem:[#allocation16 + $0x930] sm:$0xff] }
 0x4fe   : > { %5779 = vmatprep.mubr.f32.mxu0 %v12818_v55  ;;  %8674 = vmatprep.subr.bf16.mxu1 %v8673_v22  ;;  %v8843_v22 = vpack.c.bf16 %v4450_v34, %v4440_v50  ;;  %v8685_v9 = vpack.c.bf16 %v4469_v4, %v4459_v35  ;;  %v4508_v34 = vld [vmem:[#allocation16 + $0x7f0] sm:$0xff] }
 0x4ff   : > { %5441 = vmatmul.mubr.f32.gmra.mrb[102].mxu1 %v12259_v62  ;;  %8834 = vmatprep.subr.bf16.mxu0 %v8833_v37  ;;  %v4468_v37 = vld [vmem:[#allocation16 + $0x6b0] sm:$0xff] }
 0x500   : > { %5780 = vmatmul.mubr.f32.gmra.mrb[126].mxu0 %v12259_v62  ;;  %8676 = vmatpush1.bf16.msra.mxu1 %v8675_v51  ;;  %v4470_v51 = vld [vmem:[#allocation16 + $0x6c0] sm:$0xff]  ;;  %v8687_v30 = vpack.c.bf16 %v4468_v37, %v4458_v17  ;;  %v4500_v35 = vld [vmem:[#allocation16 + $0x7b0] sm:$0xff] }
 0x501   : > { %5850 = vmatprep.mubr.f32.mxu1 %v11809_v47  ;;  %8836 = vmatpush1.bf16.msra.mxu0 %v8835_v56  ;;  %v4481_v56 = vld [vmem:[#allocation16 + $0x718] sm:$0xff]  ;;  %v8847_v27 = vpack.c.bf16 %v4470_v51, %v4460_v12  ;;  %v8855_v37 = vpack.c.bf16 %v4510_v1, %v4500_v35  ;;  %v4528_v51 = vld [vmem:[#allocation16 + $0x890] sm:$0xff] }
 0x502   : > { %6189 = vmatprep.mubr.f32.mxu0 %v11809_v47  ;;  %8678 = vmatprep.subr.bf16.mxu1 %v8677_v15  ;;  %v8689_v15 = vpack.c.bf16 %v4489_v3, %v4479_v48  ;;  %v4520_v48 = vld [vmem:[#allocation16 + $0x850] sm:$0xff] }
 0x503   : > { %8838 = vmatprep.subr.bf16.mxu0 %v8837_v60  ;;  %v8849_v60 = vpack.c.bf16 %v4491_v14, %v4481_v56  ;;  %v4530_v56 = vld [vmem:[#allocation16 + $0x8a0] sm:$0xff]  ;;  %v4539_v14 = vld [vmem:[#allocation16 + $0x8e8] sm:$0xff]  ;;  %v4568_v1 = vld [vmem:[#allocation16 + $0x9d0] sm:$0xff] }
 0x504   : > { %8680 = vmatpush1.bf16.msra.mxu1 %v8679_v20  ;;  %v4509_v20 = vld [vmem:[#allocation16 + $0x7f8] sm:$0xff]  ;;  %v8859_v11 = vpack.c.bf16 %v4530_v56, %v4520_v48  ;;  %v4578_v56 = vld [vmem:[#allocation16 + $0xa20] sm:$0xff] }
 0x505   : > { %8840 = vmatpush1.bf16.msra.mxu0 %v8839_v58  ;;  %8682 = vmatprep.subr.bf16.mxu1 %v8681_v2  ;;  %v4501_v58 = vld [vmem:[#allocation16 + $0x7b8] sm:$0xff]  ;;  %v4511_v2 = vld [vmem:[#allocation16 + $0x808] sm:$0xff]  ;;  %v8693_v50 = vpack.c.bf16 %v4509_v20, %v4499_v28  ;;  %v4540_v28 = vld [vmem:[#allocation16 + $0x8f0] sm:$0xff] }
 0x506   : > { %8842 = vmatprep.subr.bf16.mxu0 %v8841_v41  ;;  %v4498_v41 = vld [vmem:[#allocation16 + $0x7a0] sm:$0xff]  ;;  %v8853_v4 = vpack.c.bf16 %v4511_v2, %v4501_v58  ;;  %v4559_v2 = vld [vmem:[#allocation16 + $0x988] sm:$0xff] }
 0x507   : > { %v8695_v17 = vpack.c.bf16 %v4508_v34, %v4498_v41  ;;  %v4550_v58 = vld [vmem:[#allocation16 + $0x940] sm:$0xff] }
 0x508   : > { %8684 = vmatpush1.bf16.msra.mxu1 %v8683_v6  ;;  %v4529_v6 = vld [vmem:[#allocation16 + $0x898] sm:$0xff]  ;;  %v8863_v34 = vpack.c.bf16 %v4550_v58, %v4540_v28  ;;  %v4608_v58 = vld [vmem:[#allocation16 + $0xb10] sm:$0xff] }
 0x509   : > { %8844 = vmatpush1.bf16.msra.mxu0 %v8843_v22  ;;  %8686 = vmatprep.subr.bf16.mxu1 %v8685_v9  ;;  %v4521_v22 = vld [vmem:[#allocation16 + $0x858] sm:$0xff]  ;;  %v4531_v9 = vld [vmem:[#allocation16 + $0x8a8] sm:$0xff]  ;;  %v8697_v12 = vpack.c.bf16 %v4529_v6, %v4519_v45  ;;  %v4560_v45 = vld [vmem:[#allocation16 + $0x990] sm:$0xff] }
 0x50a   : > { %8846 = vmatprep.subr.bf16.mxu0 %v8845_v44  ;;  %v4518_v44 = vld [vmem:[#allocation16 + $0x840] sm:$0xff]  ;;  %v8857_v3 = vpack.c.bf16 %v4531_v9, %v4521_v22  ;;  %v4579_v9 = vld [vmem:[#allocation16 + $0xa28] sm:$0xff] }
 0x50b   : > { %v8699_v42 = vpack.c.bf16 %v4528_v51, %v4518_v44  ;;  %v4570_v22 = vld [vmem:[#allocation16 + $0x9e0] sm:$0xff] }
 0x50c   : > { %8688 = vmatpush1.bf16.msra.mxu1 %v8687_v30  ;;  %v4549_v30 = vld [vmem:[#allocation16 + $0x938] sm:$0xff]  ;;  %v8867_v51 = vpack.c.bf16 %v4570_v22, %v4560_v45  ;;  %v4628_v22 = vld [vmem:[#allocation16 + $0xbb0] sm:$0xff] }
 0x50d   : > { %8848 = vmatpush1.bf16.msra.mxu0 %v8847_v27  ;;  %8690 = vmatprep.subr.bf16.mxu1 %v8689_v15  ;;  %v4541_v27 = vld [vmem:[#allocation16 + $0x8f8] sm:$0xff]  ;;  %v4551_v15 = vld [vmem:[#allocation16 + $0x948] sm:$0xff]  ;;  %v8701_v52 = vpack.c.bf16 %v4549_v30, %v4539_v14  ;;  %v4588_v14 = vld [vmem:[#allocation16 + $0xa70] sm:$0xff] }
 0x50e   : > { %8850 = vmatprep.subr.bf16.mxu0 %v8849_v60  ;;  %v4538_v60 = vld [vmem:[#allocation16 + $0x8e0] sm:$0xff]  ;;  %v8861_v20 = vpack.c.bf16 %v4551_v15, %v4541_v27  ;;  %v4580_v30 = vld [vmem:[#allocation16 + $0xa30] sm:$0xff]  ;;  %v4599_v15 = vld [vmem:[#allocation16 + $0xac8] sm:$0xff] }
 0x50f   : > { %v8703_v41 = vpack.c.bf16 %v4548_v13, %v4538_v60  ;;  %v4590_v27 = vld [vmem:[#allocation16 + $0xa80] sm:$0xff]  ;;  %v8711_v60 = vpack.c.bf16 %v4588_v14, %v4578_v56 }
 0x510   : > { %8692 = vmatpush1.bf16.msra.mxu1 %v8691_v36  ;;  %v4569_v36 = vld [vmem:[#allocation16 + $0x9d8] sm:$0xff]  ;;  %v8871_v13 = vpack.c.bf16 %v4590_v27, %v4580_v30  ;;  %v4638_v30 = vld [vmem:[#allocation16 + $0xc00] sm:$0xff]  ;;  %v4648_v27 = vld [vmem:[#allocation16 + $0xc50] sm:$0xff] }
 0x511   : > { %8852 = vmatpush1.bf16.msra.mxu0 %v8851_v61  ;;  %8694 = vmatprep.subr.bf16.mxu1 %v8693_v50  ;;  %v4561_v61 = vld [vmem:[#allocation16 + $0x998] sm:$0xff]  ;;  %v4571_v50 = vld [vmem:[#allocation16 + $0x9e8] sm:$0xff]  ;;  %v8705_v35 = vpack.c.bf16 %v4569_v36, %v4559_v2  ;;  %v4600_v2 = vld [vmem:[#allocation16 + $0xad0] sm:$0xff] }
 0x512   : > { %8854 = vmatprep.subr.bf16.mxu0 %v8853_v4  ;;  %v4558_v4 = vld [vmem:[#allocation16 + $0x980] sm:$0xff]  ;;  %v8865_v6 = vpack.c.bf16 %v4571_v50, %v4561_v61  ;;  %v4619_v50 = vld [vmem:[#allocation16 + $0xb68] sm:$0xff] }
 0x513   : > { %v8707_v44 = vpack.c.bf16 %v4568_v1, %v4558_v4  ;;  %v4610_v61 = vld [vmem:[#allocation16 + $0xb20] sm:$0xff] }
 0x514   : > { %8696 = vmatpush1.bf16.msra.mxu1 %v8695_v17  ;;  %v4589_v17 = vld [vmem:[#allocation16 + $0xa78] sm:$0xff]  ;;  %v8875_v1 = vpack.c.bf16 %v4610_v61, %v4600_v2  ;;  %v8723_v2 = vpack.c.bf16 %v4648_v27, %v4638_v30  ;;  %v4690_v30 = vld [vmem:[#allocation16 + $0xda0] sm:$0xff]  ;;  %v4699_v27 = vld [vmem:[#allocation16 + $0xde8] sm:$0xff] }
 0x515   : > { %8856 = vmatpush1.bf16.msra.mxu0 %v8855_v37  ;;  %8698 = vmatprep.subr.bf16.mxu1 %v8697_v12  ;;  %v4581_v37 = vld [vmem:[#allocation16 + $0xa38] sm:$0xff]  ;;  %v4591_v12 = vld [vmem:[#allocation16 + $0xa88] sm:$0xff]  ;;  %v8709_v48 = vpack.c.bf16 %v4589_v17, %v4579_v9  ;;  %v4620_v9 = vld [vmem:[#allocation16 + $0xb70] sm:$0xff] }
 0x516   : > { %8858 = vmatprep.subr.bf16.mxu0 %v8857_v3  ;;  %v8869_v3 = vpack.c.bf16 %v4591_v12, %v4581_v37  ;;  %v4630_v37 = vld [vmem:[#allocation16 + $0xbc0] sm:$0xff]  ;;  %v4639_v12 = vld [vmem:[#allocation16 + $0xc08] sm:$0xff] }
 0x517   : > { %v8879_v56 = vpack.c.bf16 %v4630_v37, %v4620_v9  ;;  %v4681_v9 = vld [vmem:[#allocation16 + $0xd58] sm:$0xff] }
 0x518   : > { %8700 = vmatpush1.bf16.msra.mxu1 %v8699_v42  ;;  %v4609_v42 = vld [vmem:[#allocation16 + $0xb18] sm:$0xff] }
 0x519   : > { %8860 = vmatpush1.bf16.msra.mxu0 %v8859_v11  ;;  %8702 = vmatprep.subr.bf16.mxu1 %v8701_v52  ;;  %v4601_v11 = vld [vmem:[#allocation16 + $0xad8] sm:$0xff]  ;;  %v4611_v52 = vld [vmem:[#allocation16 + $0xb28] sm:$0xff]  ;;  %v8713_v28 = vpack.c.bf16 %v4609_v42, %v4599_v15  ;;  %v4640_v15 = vld [vmem:[#allocation16 + $0xc10] sm:$0xff] }
 0x51a   : > { %8862 = vmatprep.subr.bf16.mxu0 %v8861_v20  ;;  %v4598_v20 = vld [vmem:[#allocation16 + $0xac0] sm:$0xff]  ;;  %v8873_v36 = vpack.c.bf16 %v4611_v52, %v4601_v11 }
 0x51b   : > { %v8715_v4 = vpack.c.bf16 %v4608_v58, %v4598_v20  ;;  %v12875_v42 = vld [vmem:[#allocation47_spill] sm:$0xff]  ;;  %v4671_v58 = vld [vmem:[#allocation16 + $0xd08] sm:$0xff] }
 0x51c   : > { %8704 = vmatpush1.bf16.msra.mxu1 %v8703_v41  ;;  %v4629_v41 = vld [vmem:[#allocation16 + $0xbb8] sm:$0xff]  ;;  %v4650_v52 = vld [vmem:[#allocation16 + $0xc60] sm:$0xff] }
 0x51d   : > { %8864 = vmatpush1.bf16.msra.mxu0 %v8863_v34  ;;  %8706 = vmatprep.subr.bf16.mxu1 %v8705_v35  ;;  %v4621_v34 = vld [vmem:[#allocation16 + $0xb78] sm:$0xff]  ;;  %v4631_v35 = vld [vmem:[#allocation16 + $0xbc8] sm:$0xff]  ;;  %v8717_v45 = vpack.c.bf16 %v4629_v41, %v4619_v50  ;;  %v4658_v50 = vld [vmem:[#allocation16 + $0xca0] sm:$0xff] }
 0x51e   : > { %8866 = vmatprep.subr.bf16.mxu0 %v8865_v6  ;;  %v4618_v6 = vld [vmem:[#allocation16 + $0xb60] sm:$0xff]  ;;  %v8877_v17 = vpack.c.bf16 %v4631_v35, %v4621_v34  ;;  %v4661_v20 = vld [vmem:[#allocation16 + $0xcb8] sm:$0xff]  ;;  %v4668_v41 = vld [vmem:[#allocation16 + $0xcf0] sm:$0xff] }
 0x51f   : > { %v4660_v34 = vld [vmem:[#allocation16 + $0xcb0] sm:$0xff]  ;;  %v8727_v37 = vpack.c.bf16 %v4668_v41, %v4658_v50 }
 0x520   : > { %8708 = vmatpush1.bf16.msra.mxu1 %v8707_v44  ;;  %v4649_v44 = vld [vmem:[#allocation16 + $0xc58] sm:$0xff] }
 0x521   : > { %8868 = vmatpush1.bf16.msra.mxu0 %v8867_v51  ;;  %8710 = vmatprep.subr.bf16.mxu1 %v8709_v48  ;;  %v4641_v51 = vld [vmem:[#allocation16 + $0xc18] sm:$0xff]  ;;  %v4651_v48 = vld [vmem:[#allocation16 + $0xc68] sm:$0xff]  ;;  %v8721_v14 = vpack.c.bf16 %v4649_v44, %v4639_v12 }
 0x522   : > { %8870 = vmatprep.subr.bf16.mxu0 %v8869_v3  ;;  %v8719_v3 = vpack.c.bf16 %v4628_v22, %v4618_v6  ;;  %v8881_v11 = vpack.c.bf16 %v4651_v48, %v4641_v51  ;;  %v12877_v35 = vld [vmem:[#allocation50_spill] sm:$0xff]  ;;  %v12878_v22 = vld [vmem:[#allocation49_spill] sm:$0xff]  ;;  %v4678_v51 = vld [vmem:[#allocation16 + $0xd40] sm:$0xff] }
 0x523   : > { %5851 = vmatmul.mubr.f32.vlgmr.msra.gmra.mrb[104].mxu1 %v11813_v24  ;;  %v4689_v6 = vld [vmem:[#allocation16 + $0xd98] sm:$0xff]  ;;  %v4688_v48 = vld [vmem:[#allocation16 + $0xd90] sm:$0xff] }
 0x524   : > { %6190 = vmatmul.mubr.f32.vlgmr.msra.gmra.mrb[128].mxu0 %v11813_v24  ;;  %5856 = vmatprep.mubr.f32.mxu1 %v11827_v5  ;;  %v12881_v50 = vld [vmem:[#allocation54_spill] sm:$0xff] }
 0x525   : > { %8712 = vmatpush1.bf16.msra.mxu1 %v8711_v60  ;;  %6195 = vmatprep.mubr.f32.mxu0 %v11827_v5  ;;  %v4659_v60 = vld [vmem:[#allocation16 + $0xca8] sm:$0xff] }
 0x526   : > { %8872 = vmatpush1.bf16.msra.mxu0 %v8871_v13  ;;  %8714 = vmatprep.subr.bf16.mxu1 %v8713_v28  ;;  %v4669_v13 = vld [vmem:[#allocation16 + $0xcf8] sm:$0xff]  ;;  %v12876_v28 = vld [vmem:[#allocation57_spill] sm:$0xff] }
 0x527   : > { %5857 = vmatmul.mubr.f32.gmra.mrb[106].mxu1 %v11832_v33  ;;  %8874 = vmatprep.subr.bf16.mxu0 %v8873_v36  ;;  %v8883_v36 = vpack.c.bf16 %v4650_v52, %v4640_v15  ;;  %v8725_v61 = vpack.c.bf16 %v4669_v13, %v4659_v60  ;;  %v4709_v15 = vld [vmem:[#allocation16 + $0xe38] sm:$0xff]  ;;  %v4711_v60 = vld [vmem:[#allocation16 + $0xe48] sm:$0xff]  ;;  %v8731_v13 = vpack.c.bf16 %v4688_v48, %v4678_v51  ;;  %v4728_v51 = vld [vmem:[#allocation16 + $0xed0] sm:$0xff] }
 0x528   : > { %6196 = vmatmul.mubr.f32.gmra.mrb[130].mxu0 %v11832_v33  ;;  %5862 = vmatprep.mubr.f32.mxu1 %v11844_v25  ;;  %v4701_v52 = vld [vmem:[#allocation16 + $0xdf8] sm:$0xff]  ;;  %v4720_v48 = vld [vmem:[#allocation16 + $0xe90] sm:$0xff] }
 0x529   : > { %8716 = vmatpush1.bf16.msra.mxu1 %v8715_v4  ;;  %6201 = vmatprep.mubr.f32.mxu0 %v11844_v25  ;;  %v8885_v4 = vpack.c.bf16 %v4671_v58, %v4661_v20  ;;  %v8733_v58 = vpack.c.bf16 %v4709_v15, %v4699_v27  ;;  %v8893_v41 = vpack.c.bf16 %v4711_v60, %v4701_v52  ;;  %v4739_v27 = vld [vmem:[#allocation16 + $0xf28] sm:$0xff]  ;;  %v4749_v15 = vld [vmem:[#allocation16 + $0xf78] sm:$0xff] }
 0x52a   : > { %8876 = vmatpush1.bf16.msra.mxu0 %v8875_v1  ;;  %8718 = vmatprep.subr.bf16.mxu1 %v8717_v45  ;;  %v4670_v1 = vld [vmem:[#allocation16 + $0xd00] sm:$0xff]  ;;  %v4679_v45 = vld [vmem:[#allocation16 + $0xd48] sm:$0xff]  ;;  %v4741_v60 = vld [vmem:[#allocation16 + $0xf38] sm:$0xff] }
 0x52b   : > { %5863 = vmatmul.mubr.f32.gmra.mrb[108].mxu1 %v12875_v42  ;;  %8878 = vmatprep.subr.bf16.mxu0 %v8877_v17  ;;  %v4691_v17 = vld [vmem:[#allocation16 + $0xda8] sm:$0xff]  ;;  %v8887_v12 = vpack.c.bf16 %v4670_v1, %v4660_v34  ;;  %v8729_v44 = vpack.c.bf16 %v4689_v6, %v4679_v45  ;;  %v4710_v34 = vld [vmem:[#allocation16 + $0xe40] sm:$0xff]  ;;  %v4729_v1 = vld [vmem:[#allocation16 + $0xed8] sm:$0xff] }
 0x52c   : > { %6202 = vmatmul.mubr.f32.gmra.mrb[132].mxu0 %v12875_v42  ;;  %5868 = vmatprep.mubr.f32.mxu1 %v12876_v28  ;;  %v12882_v45 = vld [vmem:[#allocation53_spill] sm:$0xff]  ;;  %v4721_v6 = vld [vmem:[#allocation16 + $0xe98] sm:$0xff] }
 0x52d   : > { %8720 = vmatpush1.bf16.msra.mxu1 %v8719_v3  ;;  %6207 = vmatprep.mubr.f32.mxu0 %v12876_v28  ;;  %v4680_v3 = vld [vmem:[#allocation16 + $0xd50] sm:$0xff]  ;;  %v12884_v52 = vld [vmem:[#allocation55_spill] sm:$0xff] }
 0x52e   : > { %8880 = vmatpush1.bf16.msra.mxu0 %v8879_v56  ;;  %8722 = vmatprep.subr.bf16.mxu1 %v8721_v14  ;;  %v12879_v56 = vld [vmem:[#allocation52_spill] sm:$0xff]  ;;  %v8889_v14 = vpack.c.bf16 %v4691_v17, %v4681_v9  ;;  %v8891_v20 = vpack.c.bf16 %v4690_v30, %v4680_v3 }
 0x52f   : > { %5869 = vmatmul.mubr.f32.gmra.mrb[110].mxu1 %v12877_v35  ;;  %8882 = vmatprep.subr.bf16.mxu0 %v8881_v11  ;;  %v12880_v11 = vld [vmem:[#allocation51_spill] sm:$0xff]  ;;  %v4731_v9 = vld [vmem:[#allocation16 + $0xee8] sm:$0xff] }
 0x530   : > { %6208 = vmatmul.mubr.f32.gmra.mrb[134].mxu0 %v12877_v35  ;;  %5874 = vmatprep.mubr.f32.mxu1 %v12878_v22  ;;  %v12883_v3 = vld [vmem:[#allocation56_spill] sm:$0xff] }
 0x531   : > { %8724 = vmatpush1.bf16.msra.mxu1 %v8723_v2  ;;  %6213 = vmatprep.mubr.f32.mxu0 %v12878_v22  ;;  %v4698_v2 = vld [vmem:[#allocation16 + $0xde0] sm:$0xff] }
 0x532   : > { %8884 = vmatpush1.bf16.msra.mxu0 %v8883_v36  ;;  %8726 = vmatprep.subr.bf16.mxu1 %v8725_v61  ;;  %v4708_v36 = vld [vmem:[#allocation16 + $0xe30] sm:$0xff]  ;;  %v4730_v30 = vld [vmem:[#allocation16 + $0xee0] sm:$0xff] }
 0x533   : > { %5875 = vmatmul.mubr.f32.gmra.mrb[112].mxu1 %v12879_v56  ;;  %8886 = vmatprep.subr.bf16.mxu0 %v8885_v4  ;;  %v4700_v61 = vld [vmem:[#allocation16 + $0xdf0] sm:$0xff]  ;;  %v4719_v4 = vld [vmem:[#allocation16 + $0xe88] sm:$0xff]  ;;  %v8735_v17 = vpack.c.bf16 %v4708_v36, %v4698_v2  ;;  %v8741_v2 = vpack.c.bf16 %v4749_v15, %v4739_v27  ;;  %v4738_v36 = vld [vmem:[#allocation16 + $0xf20] sm:$0xff] }
 0x534   : > { %6214 = vmatmul.mubr.f32.gmra.mrb[136].mxu0 %v12879_v56  ;;  %5880 = vmatprep.mubr.f32.mxu1 %v12880_v11  ;;  %v4770_v15 = vld [vmem:[#allocation16 + $0x1020] sm:$0xff] }
 0x535   : > { %8728 = vmatpush1.bf16.msra.mxu1 %v8727_v37  ;;  %6219 = vmatprep.mubr.f32.mxu0 %v12880_v11  ;;  %v8895_v37 = vpack.c.bf16 %v4710_v34, %v4700_v61  ;;  %v4748_v61 = vld [vmem:[#allocation16 + $0xf70] sm:$0xff]  ;;  %v12885_v34 = vld [vmem:[#allocation59_spill] sm:$0xff] }
 0x536   : > { %8888 = vmatpush1.bf16.msra.mxu0 %v8887_v12  ;;  %8730 = vmatprep.subr.bf16.mxu1 %v8729_v44  ;;  %v8737_v12 = vpack.c.bf16 %v4729_v1, %v4719_v4  ;;  %v4718_v44 = vld [vmem:[#allocation16 + $0xe80] sm:$0xff] }
 0x537   : > { %5881 = vmatmul.mubr.f32.gmra.mrb[114].mxu1 %v12881_v50  ;;  %8890 = vmatprep.subr.bf16.mxu0 %v8889_v14  ;;  %v8897_v14 = vpack.c.bf16 %v4731_v9, %v4721_v6  ;;  %v4750_v1 = vld [vmem:[#allocation16 + $0xf80] sm:$0xff]  ;;  %v4759_v6 = vld [vmem:[#allocation16 + $0xfc8] sm:$0xff]  ;;  %v4769_v9 = vld [vmem:[#allocation16 + $0x1018] sm:$0xff] }
 0x538   : > { %6220 = vmatmul.mubr.f32.gmra.mrb[138].mxu0 %v12881_v50  ;;  %5886 = vmatprep.mubr.f32.mxu1 %v12882_v45 }
 0x539   : > { %8732 = vmatpush1.bf16.msra.mxu1 %v8731_v13  ;;  %6225 = vmatprep.mubr.f32.mxu0 %v12882_v45  ;;  %v4751_v13 = vld [vmem:[#allocation16 + $0xf88] sm:$0xff] }
 0x53a   : > { %8892 = vmatpush1.bf16.msra.mxu0 %v8891_v20  ;;  %8734 = vmatprep.subr.bf16.mxu1 %v8733_v58  ;;  %v8739_v20 = vpack.c.bf16 %v4728_v51, %v4718_v44  ;;  %v8899_v58 = vpack.c.bf16 %v4730_v30, %v4720_v48  ;;  %v8901_v4 = vpack.c.bf16 %v4751_v13, %v4741_v60  ;;  %v4771_v44 = vld [vmem:[#allocation16 + $0x1028] sm:$0xff]  ;;  %v4758_v48 = vld [vmem:[#allocation16 + $0xfc0] sm:$0xff]  ;;  %v4760_v30 = vld [vmem:[#allocation16 + $0xfd0] sm:$0xff] }
 0x53b   : > { %5887 = vmatmul.mubr.f32.gmra.mrb[116].mxu1 %v12883_v3  ;;  %8894 = vmatprep.subr.bf16.mxu0 %v8893_v41  ;;  %v4740_v41 = vld [vmem:[#allocation16 + $0xf30] sm:$0xff]  ;;  %v8745_v51 = vpack.c.bf16 %v4769_v9, %v4759_v6  ;;  %v8905_v27 = vpack.c.bf16 %v4771_v44, %v4761_v53  ;;  %v4779_v60 = vld [vmem:[#allocation16 + $0x1068] sm:$0xff]  ;;  %v4789_v13 = vld [vmem:[#allocation16 + $0x10b8] sm:$0xff] }
 0x53c   : > { %6226 = vmatmul.mubr.f32.gmra.mrb[140].mxu0 %v12883_v3  ;;  %5892 = vmatprep.mubr.f32.mxu1 %v12884_v52  ;;  %v4799_v6 = vld [vmem:[#allocation16 + $0x1108] sm:$0xff]  ;;  %v4801_v53 = vld [vmem:[#allocation16 + $0x1118] sm:$0xff] }
 0x53d   : > { %8736 = vmatpush1.bf16.msra.mxu1 %v8735_v17  ;;  %6231 = vmatprep.mubr.f32.mxu0 %v12884_v52  ;;  %v12886_v17 = vld [vmem:[#allocation58_spill] sm:$0xff]  ;;  %v4791_v52 = vld [vmem:[#allocation16 + $0x10c8] sm:$0xff] }
 0x53e   : > { %8896 = vmatpush1.bf16.msra.mxu0 %v8895_v37  ;;  %8738 = vmatprep.subr.bf16.mxu1 %v8737_v12  ;;  %v8743_v37 = vpack.c.bf16 %v4748_v61, %v4738_v36  ;;  %v8903_v12 = vpack.c.bf16 %v4750_v1, %v4740_v41  ;;  %v8749_v36 = vpack.c.bf16 %v4789_v13, %v4779_v60  ;;  %v4780_v61 = vld [vmem:[#allocation16 + $0x1070] sm:$0xff]  ;;  %v4790_v1 = vld [vmem:[#allocation16 + $0x10c0] sm:$0xff]  ;;  %v4811_v9 = vld [vmem:[#allocation16 + $0x1168] sm:$0xff] }
 0x53f   : > { %5893 = vmatmul.mubr.f32.gmra.mrb[118].mxu1 %v12885_v34  ;;  %8898 = vmatprep.subr.bf16.mxu0 %v8897_v14  ;;  %v4768_v14 = vld [vmem:[#allocation16 + $0x1010] sm:$0xff]  ;;  %v4819_v60 = vld [vmem:[#allocation16 + $0x11a8] sm:$0xff] }
 0x540   : > { %6232 = vmatmul.mubr.f32.gmra.mrb[142].mxu0 %v12885_v34  ;;  %5963 = vmatprep.mubr.f32.mxu1 %v12886_v17  ;;  %v4781_v34 = vld [vmem:[#allocation16 + $0x1078] sm:$0xff]  ;;  %v8747_v3 = vpack.c.bf16 %v4768_v14, %v4758_v48  ;;  %v4800_v14 = vld [vmem:[#allocation16 + $0x1110] sm:$0xff] }
 0x541   : > { %8740 = vmatpush1.bf16.msra.mxu1 %v8739_v20  ;;  %6302 = vmatprep.mubr.f32.mxu0 %v12886_v17  ;;  %v8907_v20 = vpack.c.bf16 %v4770_v15, %v4760_v30  ;;  %v8909_v41 = vpack.c.bf16 %v4791_v52, %v4781_v34  ;;  %v8913_v30 = vpack.c.bf16 %v4811_v9, %v4801_v53  ;;  %v4810_v15 = vld [vmem:[#allocation16 + $0x1160] sm:$0xff]  ;;  %v4821_v52 = vld [vmem:[#allocation16 + $0x11b8] sm:$0xff]  ;;  %v4831_v34 = vld [vmem:[#allocation16 + $0x1208] sm:$0xff] }
 0x542   : > { %8900 = vmatpush1.bf16.msra.mxu0 %v8899_v58  ;;  %8742 = vmatprep.subr.bf16.mxu1 %v8741_v2  ;;  %v4778_v58 = vld [vmem:[#allocation16 + $0x1060] sm:$0xff]  ;;  %v4788_v2 = vld [vmem:[#allocation16 + $0x10b0] sm:$0xff]  ;;  %v4851_v53 = vld [vmem:[#allocation16 + $0x12a8] sm:$0xff] }
 0x543   : > { %8902 = vmatprep.subr.bf16.mxu0 %v8901_v4  ;;  %v4809_v4 = vld [vmem:[#allocation16 + $0x1158] sm:$0xff]  ;;  %v8751_v44 = vpack.c.bf16 %v4788_v2, %v4778_v58  ;;  %v4820_v2 = vld [vmem:[#allocation16 + $0x11b0] sm:$0xff] }
 0x544   : > { %v8753_v48 = vpack.c.bf16 %v4809_v4, %v4799_v6  ;;  %v4839_v6 = vld [vmem:[#allocation16 + $0x1248] sm:$0xff]  ;;  %v4841_v4 = vld [vmem:[#allocation16 + $0x1258] sm:$0xff] }
 0x545   : > { %8744 = vmatpush1.bf16.msra.mxu1 %v8743_v37  ;;  %v8911_v37 = vpack.c.bf16 %v4790_v1, %v4780_v61  ;;  %v8917_v61 = vpack.c.bf16 %v4831_v34, %v4821_v52  ;;  %v4830_v1 = vld [vmem:[#allocation16 + $0x1200] sm:$0xff]  ;;  %v4871_v52 = vld [vmem:[#allocation16 + $0x1348] sm:$0xff] }
 0x546   : > { %8904 = vmatpush1.bf16.msra.mxu0 %v8903_v12  ;;  %8746 = vmatprep.subr.bf16.mxu1 %v8745_v51  ;;  %v4798_v12 = vld [vmem:[#allocation16 + $0x1100] sm:$0xff]  ;;  %v4808_v51 = vld [vmem:[#allocation16 + $0x1150] sm:$0xff] }
 0x547   : > { %8906 = vmatprep.subr.bf16.mxu0 %v8905_v27  ;;  %v4829_v27 = vld [vmem:[#allocation16 + $0x11f8] sm:$0xff]  ;;  %v8755_v13 = vpack.c.bf16 %v4808_v51, %v4798_v12  ;;  %v4840_v51 = vld [vmem:[#allocation16 + $0x1250] sm:$0xff] }
 0x548   : > { %v8757_v58 = vpack.c.bf16 %v4829_v27, %v4819_v60  ;;  %v4859_v60 = vld [vmem:[#allocation16 + $0x12e8] sm:$0xff]  ;;  %v4861_v27 = vld [vmem:[#allocation16 + $0x12f8] sm:$0xff] }
 0x549   : > { %8748 = vmatpush1.bf16.msra.mxu1 %v8747_v3  ;;  %v8915_v3 = vpack.c.bf16 %v4810_v15, %v4800_v14  ;;  %v8921_v14 = vpack.c.bf16 %v4851_v53, %v4841_v4  ;;  %v4850_v15 = vld [vmem:[#allocation16 + $0x12a0] sm:$0xff]  ;;  %v4891_v4 = vld [vmem:[#allocation16 + $0x13e8] sm:$0xff] }
 0x54a   : > { %8908 = vmatpush1.bf16.msra.mxu0 %v8907_v20  ;;  %8750 = vmatprep.subr.bf16.mxu1 %v8749_v36  ;;  %v4818_v20 = vld [vmem:[#allocation16 + $0x11a0] sm:$0xff]  ;;  %v4828_v36 = vld [vmem:[#allocation16 + $0x11f0] sm:$0xff] }
 0x54b   : > { %8910 = vmatprep.subr.bf16.mxu0 %v8909_v41  ;;  %v4849_v41 = vld [vmem:[#allocation16 + $0x1298] sm:$0xff]  ;;  %v8759_v9 = vpack.c.bf16 %v4828_v36, %v4818_v20  ;;  %v4860_v36 = vld [vmem:[#allocation16 + $0x12f0] sm:$0xff] }
 0x54c   : > { %v8761_v12 = vpack.c.bf16 %v4849_v41, %v4839_v6  ;;  %v4879_v6 = vld [vmem:[#allocation16 + $0x1388] sm:$0xff]  ;;  %v4881_v41 = vld [vmem:[#allocation16 + $0x1398] sm:$0xff] }
 0x54d   : > { %8752 = vmatpush1.bf16.msra.mxu1 %v8751_v44  ;;  %v8919_v44 = vpack.c.bf16 %v4830_v1, %v4820_v2  ;;  %v8925_v2 = vpack.c.bf16 %v4871_v52, %v4861_v27  ;;  %v4870_v1 = vld [vmem:[#allocation16 + $0x1340] sm:$0xff]  ;;  %v4911_v27 = vld [vmem:[#allocation16 + $0x1488] sm:$0xff] }
 0x54e   : > { %8912 = vmatpush1.bf16.msra.mxu0 %v8911_v37  ;;  %8754 = vmatprep.subr.bf16.mxu1 %v8753_v48  ;;  %v4838_v37 = vld [vmem:[#allocation16 + $0x1240] sm:$0xff]  ;;  %v4848_v48 = vld [vmem:[#allocation16 + $0x1290] sm:$0xff] }
 0x54f   : > { %8914 = vmatprep.subr.bf16.mxu0 %v8913_v30  ;;  %v4869_v30 = vld [vmem:[#allocation16 + $0x1338] sm:$0xff]  ;;  %v8763_v34 = vpack.c.bf16 %v4848_v48, %v4838_v37  ;;  %v4880_v48 = vld [vmem:[#allocation16 + $0x1390] sm:$0xff] }
 0x550   : > { %v8765_v20 = vpack.c.bf16 %v4869_v30, %v4859_v60  ;;  %v4899_v60 = vld [vmem:[#allocation16 + $0x1428] sm:$0xff]  ;;  %v4901_v30 = vld [vmem:[#allocation16 + $0x1438] sm:$0xff] }
 0x551   : > { %8756 = vmatpush1.bf16.msra.mxu1 %v8755_v13  ;;  %v8923_v13 = vpack.c.bf16 %v4850_v15, %v4840_v51  ;;  %v8929_v51 = vpack.c.bf16 %v4891_v4, %v4881_v41  ;;  %v4890_v15 = vld [vmem:[#allocation16 + $0x13e0] sm:$0xff]  ;;  %v4931_v41 = vld [vmem:[#allocation16 + $0x1528] sm:$0xff] }
 0x552   : > { %8916 = vmatpush1.bf16.msra.mxu0 %v8915_v3  ;;  %8758 = vmatprep.subr.bf16.mxu1 %v8757_v58  ;;  %v4858_v3 = vld [vmem:[#allocation16 + $0x12e0] sm:$0xff]  ;;  %v4868_v58 = vld [vmem:[#allocation16 + $0x1330] sm:$0xff] }
 0x553   : > { %8918 = vmatprep.subr.bf16.mxu0 %v8917_v61  ;;  %v4889_v61 = vld [vmem:[#allocation16 + $0x13d8] sm:$0xff]  ;;  %v8767_v53 = vpack.c.bf16 %v4868_v58, %v4858_v3  ;;  %v4908_v58 = vld [vmem:[#allocation16 + $0x1470] sm:$0xff] }
 0x554   : > { %v8769_v37 = vpack.c.bf16 %v4889_v61, %v4879_v6  ;;  %v4919_v6 = vld [vmem:[#allocation16 + $0x14c8] sm:$0xff]  ;;  %v4921_v61 = vld [vmem:[#allocation16 + $0x14d8] sm:$0xff] }
 0x555   : > { %8760 = vmatpush1.bf16.msra.mxu1 %v8759_v9  ;;  %v8927_v9 = vpack.c.bf16 %v4870_v1, %v4860_v36  ;;  %v4900_v36 = vld [vmem:[#allocation16 + $0x1430] sm:$0xff]  ;;  %v4910_v1 = vld [vmem:[#allocation16 + $0x1480] sm:$0xff] }
 0x556   : > { %8920 = vmatpush1.bf16.msra.mxu0 %v8919_v44  ;;  %8762 = vmatprep.subr.bf16.mxu1 %v8761_v12  ;;  %v4878_v44 = vld [vmem:[#allocation16 + $0x1380] sm:$0xff]  ;;  %v4888_v12 = vld [vmem:[#allocation16 + $0x13d0] sm:$0xff] }
 0x557   : > { %8922 = vmatprep.subr.bf16.mxu0 %v8921_v14  ;;  %v4909_v14 = vld [vmem:[#allocation16 + $0x1478] sm:$0xff]  ;;  %v8771_v52 = vpack.c.bf16 %v4888_v12, %v4878_v44  ;;  %v4928_v44 = vld [vmem:[#allocation16 + $0x1510] sm:$0xff] }
 0x558   : > { %v8773_v3 = vpack.c.bf16 %v4909_v14, %v4899_v60  ;;  %v4920_v12 = vld [vmem:[#allocation16 + $0x14d0] sm:$0xff]  ;;  %v4949_v60 = vld [vmem:[#allocation16 + $0x15b8] sm:$0xff] }
 0x559   : > { %8764 = vmatpush1.bf16.msra.mxu1 %v8763_v34  ;;  %v8931_v34 = vpack.c.bf16 %v4890_v15, %v4880_v48  ;;  %v8937_v48 = vpack.c.bf16 %v4931_v41, %v4921_v61  ;;  %v4939_v15 = vld [vmem:[#allocation16 + $0x1568] sm:$0xff]  ;;  %v4941_v14 = vld [vmem:[#allocation16 + $0x1578] sm:$0xff] }
 0x55a   : > { %8924 = vmatpush1.bf16.msra.mxu0 %v8923_v13  ;;  %8766 = vmatprep.subr.bf16.mxu1 %v8765_v20  ;;  %v8933_v13 = vpack.c.bf16 %v4911_v27, %v4901_v30  ;;  %v4898_v20 = vld [vmem:[#allocation16 + $0x1420] sm:$0xff]  ;;  %v4951_v30 = vld [vmem:[#allocation16 + $0x15c8] sm:$0xff] }
 0x55b   : > { %8926 = vmatprep.subr.bf16.mxu0 %v8925_v2  ;;  %v4929_v2 = vld [vmem:[#allocation16 + $0x1518] sm:$0xff]  ;;  %v8775_v4 = vpack.c.bf16 %v4908_v58, %v4898_v20  ;;  %v4940_v20 = vld [vmem:[#allocation16 + $0x1570] sm:$0xff]  ;;  %v8941_v58 = vpack.c.bf16 %v4951_v30, %v4941_v14  ;;  %v4971_v61 = vld [vmem:[#allocation16 + $0x1668] sm:$0xff] }
 0x55c   : > { %v4991_v14 = vld [vmem:[#allocation16 + $0x1708] sm:$0xff] }
 0x55d   : > { %8768 = vmatpush1.bf16.msra.mxu1 %v8767_v53  ;;  %v8935_v53 = vpack.c.bf16 %v4910_v1, %v4900_v36  ;;  %v4950_v36 = vld [vmem:[#allocation16 + $0x15c0] sm:$0xff]  ;;  %v4959_v1 = vld [vmem:[#allocation16 + $0x1608] sm:$0xff] }
 0x55e   : > { %8928 = vmatpush1.bf16.msra.mxu0 %v8927_v9  ;;  %8770 = vmatprep.subr.bf16.mxu1 %v8769_v37  ;;  %v8777_v9 = vpack.c.bf16 %v4929_v2, %v4919_v6  ;;  %v4918_v37 = vld [vmem:[#allocation16 + $0x14c0] sm:$0xff]  ;;  %v4969_v6 = vld [vmem:[#allocation16 + $0x1658] sm:$0xff] }
 0x55f   : > { %8930 = vmatprep.subr.bf16.mxu0 %v8929_v51  ;;  %v4930_v51 = vld [vmem:[#allocation16 + $0x1520] sm:$0xff]  ;;  %v8779_v27 = vpack.c.bf16 %v4928_v44, %v4918_v37  ;;  %v4961_v2 = vld [vmem:[#allocation16 + $0x1618] sm:$0xff]  ;;  %v4968_v37 = vld [vmem:[#allocation16 + $0x1650] sm:$0xff] }
 0x560   : > { %v4960_v44 = vld [vmem:[#allocation16 + $0x1610] sm:$0xff] }
 0x561   : > { %8772 = vmatpush1.bf16.msra.mxu1 %v8771_v52  ;;  %v8939_v52 = vpack.c.bf16 %v4930_v51, %v4920_v12  ;;  %v8945_v12 = vpack.c.bf16 %v4971_v61, %v4961_v2  ;;  %v4979_v51 = vld [vmem:[#allocation16 + $0x16a8] sm:$0xff] }
 0x562   : > { %8932 = vmatpush1.bf16.msra.mxu0 %v8931_v34  ;;  %8774 = vmatprep.subr.bf16.mxu1 %v8773_v3  ;;  %v8781_v34 = vpack.c.bf16 %v4949_v60, %v4939_v15  ;;  %v4938_v3 = vld [vmem:[#allocation16 + $0x1560] sm:$0xff]  ;;  %v4989_v15 = vld [vmem:[#allocation16 + $0x16f8] sm:$0xff]  ;;  %v5011_v2 = vld [vmem:[#allocation16 + $0x17a8] sm:$0xff] }
 0x563   : > { %8934 = vmatprep.subr.bf16.mxu0 %v8933_v13  ;;  %v4948_v13 = vld [vmem:[#allocation16 + $0x15b0] sm:$0xff]  ;;  %v4981_v60 = vld [vmem:[#allocation16 + $0x16b8] sm:$0xff] }
 0x564   : > { %5964 = vmatmul.mubr.f32.vlgmr.msra.gmra.mrb[104].mxu1 %v12045_v59  ;;  %v8783_v41 = vpack.c.bf16 %v4948_v13, %v4938_v3  ;;  %v4988_v3 = vld [vmem:[#allocation16 + $0x16f0] sm:$0xff] }
 0x565   : > { %6303 = vmatmul.mubr.f32.vlgmr.msra.gmra.mrb[128].mxu0 %v12045_v59  ;;  %5969 = vmatprep.mubr.f32.mxu1 %v12052_v39  ;;  %v4980_v13 = vld [vmem:[#allocation16 + $0x16b0] sm:$0xff] }
 0x566   : > { %8776 = vmatpush1.bf16.msra.mxu1 %v8775_v4  ;;  %6308 = vmatprep.mubr.f32.mxu0 %v12052_v39  ;;  %v8943_v4 = vpack.c.bf16 %v4950_v36, %v4940_v20  ;;  %v8949_v20 = vpack.c.bf16 %v4991_v14, %v4981_v60  ;;  %v4999_v36 = vld [vmem:[#allocation16 + $0x1748] sm:$0xff] }
 0x567   : > { %8936 = vmatpush1.bf16.msra.mxu0 %v8935_v53  ;;  %8778 = vmatprep.subr.bf16.mxu1 %v8777_v9  ;;  %v8785_v53 = vpack.c.bf16 %v4969_v6, %v4959_v1  ;;  %v4958_v9 = vld [vmem:[#allocation16 + $0x1600] sm:$0xff]  ;;  %v5009_v1 = vld [vmem:[#allocation16 + $0x1798] sm:$0xff]  ;;  %v5031_v60 = vld [vmem:[#allocation16 + $0x1848] sm:$0xff] }
 0x568   : > { %5970 = vmatmul.mubr.f32.gmra.mrb[106].mxu1 %v12064_v40  ;;  %8938 = vmatprep.subr.bf16.mxu0 %v8937_v48  ;;  %v4970_v48 = vld [vmem:[#allocation16 + $0x1660] sm:$0xff]  ;;  %v8787_v30 = vpack.c.bf16 %v4968_v37, %v4958_v9  ;;  %v5001_v6 = vld [vmem:[#allocation16 + $0x1758] sm:$0xff]  ;;  %v5008_v9 = vld [vmem:[#allocation16 + $0x1790] sm:$0xff] }
 0x569   : > { %6309 = vmatmul.mubr.f32.gmra.mrb[130].mxu0 %v12064_v40  ;;  %5975 = vmatprep.mubr.f32.mxu1 %v12070_v31  ;;  %v5000_v37 = vld [vmem:[#allocation16 + $0x1750] sm:$0xff] }
 0x56a   : > { %8780 = vmatpush1.bf16.msra.mxu1 %v8779_v27  ;;  %6314 = vmatprep.mubr.f32.mxu0 %v12070_v31  ;;  %v8947_v27 = vpack.c.bf16 %v4970_v48, %v4960_v44  ;;  %v8953_v44 = vpack.c.bf16 %v5011_v2, %v5001_v6  ;;  %v5019_v48 = vld [vmem:[#allocation16 + $0x17e8] sm:$0xff] }
 0x56b   : > { %8940 = vmatpush1.bf16.msra.mxu0 %v8939_v52  ;;  %8782 = vmatprep.subr.bf16.mxu1 %v8781_v34  ;;  %v8789_v52 = vpack.c.bf16 %v4989_v15, %v4979_v51  ;;  %v4978_v34 = vld [vmem:[#allocation16 + $0x16a0] sm:$0xff]  ;;  %v5029_v51 = vld [vmem:[#allocation16 + $0x1838] sm:$0xff]  ;;  %v5051_v6 = vld [vmem:[#allocation16 + $0x18e8] sm:$0xff] }
 0x56c   : > { %5976 = vmatmul.mubr.f32.gmra.mrb[108].mxu1 %v12091_v32  ;;  %8942 = vmatprep.subr.bf16.mxu0 %v8941_v58  ;;  %v4990_v58 = vld [vmem:[#allocation16 + $0x1700] sm:$0xff]  ;;  %v8791_v61 = vpack.c.bf16 %v4988_v3, %v4978_v34  ;;  %v5021_v15 = vld [vmem:[#allocation16 + $0x17f8] sm:$0xff]  ;;  %v5028_v34 = vld [vmem:[#allocation16 + $0x1830] sm:$0xff] }
 0x56d   : > { %6315 = vmatmul.mubr.f32.gmra.mrb[132].mxu0 %v12091_v32  ;;  %5981 = vmatprep.mubr.f32.mxu1 %v12097_v29  ;;  %v5020_v3 = vld [vmem:[#allocation16 + $0x17f0] sm:$0xff] }
 0x56e   : > { %8784 = vmatpush1.bf16.msra.mxu1 %v8783_v41  ;;  %6320 = vmatprep.mubr.f32.mxu0 %v12097_v29  ;;  %v8951_v41 = vpack.c.bf16 %v4990_v58, %v4980_v13  ;;  %v8957_v13 = vpack.c.bf16 %v5031_v60, %v5021_v15  ;;  %v5039_v58 = vld [vmem:[#allocation16 + $0x1888] sm:$0xff] }
 0x56f   : > { %8944 = vmatpush1.bf16.msra.mxu0 %v8943_v4  ;;  %8786 = vmatprep.subr.bf16.mxu1 %v8785_v53  ;;  %v8793_v4 = vpack.c.bf16 %v5009_v1, %v4999_v36  ;;  %v4998_v53 = vld [vmem:[#allocation16 + $0x1740] sm:$0xff]  ;;  %v5049_v36 = vld [vmem:[#allocation16 + $0x18d8] sm:$0xff] }
 0x570   : > { %5982 = vmatmul.mubr.f32.gmra.mrb[110].mxu1 %v12107_v26  ;;  %8946 = vmatprep.subr.bf16.mxu0 %v8945_v12  ;;  %v5010_v12 = vld [vmem:[#allocation16 + $0x17a0] sm:$0xff]  ;;  %v8795_v14 = vpack.c.bf16 %v5008_v9, %v4998_v53  ;;  %v5041_v1 = vld [vmem:[#allocation16 + $0x1898] sm:$0xff]  ;;  %v5048_v53 = vld [vmem:[#allocation16 + $0x18d0] sm:$0xff] }
 0x571   : > { %6321 = vmatmul.mubr.f32.gmra.mrb[134].mxu0 %v12107_v26  ;;  %5987 = vmatprep.mubr.f32.mxu1 %v12113_v16  ;;  %v5040_v9 = vld [vmem:[#allocation16 + $0x1890] sm:$0xff] }
 0x572   : > { %8788 = vmatpush1.bf16.msra.mxu1 %v8787_v30  ;;  %6326 = vmatprep.mubr.f32.mxu0 %v12113_v16  ;;  %v8955_v30 = vpack.c.bf16 %v5010_v12, %v5000_v37  ;;  %v8961_v37 = vpack.c.bf16 %v5051_v6, %v5041_v1  ;;  %v4263_v12 = vld [vmem:[#allocation16 + $0x48] sm:$0xff]  ;;  %v4302_v6 = vld [vmem:[#allocation16 + $0x180] sm:$0xff] }
 0x573   : > { %8948 = vmatpush1.bf16.msra.mxu0 %v8947_v27  ;;  %8790 = vmatprep.subr.bf16.mxu1 %v8789_v52  ;;  %v8797_v27 = vpack.c.bf16 %v5029_v51, %v5019_v48  ;;  %v5018_v52 = vld [vmem:[#allocation16 + $0x17e0] sm:$0xff]  ;;  %v4273_v48 = vld [vmem:[#allocation16 + $0x98] sm:$0xff] }
 0x574   : > { %5988 = vmatmul.mubr.f32.gmra.mrb[112].mxu1 %v12123_v38  ;;  %8950 = vmatprep.subr.bf16.mxu0 %v8949_v20  ;;  %v5030_v20 = vld [vmem:[#allocation16 + $0x1840] sm:$0xff]  ;;  %v8799_v2 = vpack.c.bf16 %v5028_v34, %v5018_v52  ;;  %v8965_v60 = vpack.c.bf16 %v4273_v48, %v4263_v12  ;;  %v4293_v52 = vld [vmem:[#allocation16 + $0x138] sm:$0xff]  ;;  %v4343_v12 = vld [vmem:[#allocation16 + $0x2c8] sm:$0xff] }
 0x575   : > { %6327 = vmatmul.mubr.f32.gmra.mrb[136].mxu0 %v12123_v38  ;;  %5993 = vmatprep.mubr.f32.mxu1 %v12129_v19  ;;  %v4353_v48 = vld [vmem:[#allocation16 + $0x318] sm:$0xff] }
 0x576   : > { %8792 = vmatpush1.bf16.msra.mxu1 %v8791_v61  ;;  %6332 = vmatprep.mubr.f32.mxu0 %v12129_v19  ;;  %v8959_v61 = vpack.c.bf16 %v5030_v20, %v5020_v3  ;;  %v4282_v3 = vld [vmem:[#allocation16 + $0xe0] sm:$0xff] }
 0x577   : > { %8952 = vmatpush1.bf16.msra.mxu0 %v8951_v41  ;;  %8794 = vmatprep.subr.bf16.mxu1 %v8793_v4  ;;  %v8801_v41 = vpack.c.bf16 %v5049_v36, %v5039_v58  ;;  %v5038_v4 = vld [vmem:[#allocation16 + $0x1880] sm:$0xff]  ;;  %v4303_v58 = vld [vmem:[#allocation16 + $0x188] sm:$0xff]  ;;  %v4313_v36 = vld [vmem:[#allocation16 + $0x1d8] sm:$0xff] }
 0x578   : > { %5994 = vmatmul.mubr.f32.gmra.mrb[114].mxu1 %v12139_v18  ;;  %8954 = vmatprep.subr.bf16.mxu0 %v8953_v44  ;;  %v5050_v44 = vld [vmem:[#allocation16 + $0x18e0] sm:$0xff]  ;;  %v8803_v51 = vpack.c.bf16 %v5048_v53, %v5038_v4  ;;  %v4333_v4 = vld [vmem:[#allocation16 + $0x278] sm:$0xff] }
 0x579   : > { %6333 = vmatmul.mubr.f32.gmra.mrb[138].mxu0 %v12139_v18  ;;  %5999 = vmatprep.mubr.f32.mxu1 %v12145_v0  ;;  %v8963_v15 = vpack.c.bf16 %v5050_v44, %v5040_v9  ;;  %v4322_v9 = vld [vmem:[#allocation16 + $0x220] sm:$0xff] }
 0x57a   : > { %8796 = vmatpush1.bf16.msra.mxu1 %v8795_v14  ;;  %6338 = vmatprep.mubr.f32.mxu0 %v12145_v0  ;;  %v4262_v14 = vld [vmem:[#allocation16 + $0x40] sm:$0xff] }
 0x57b   : > { %8956 = vmatpush1.bf16.msra.mxu0 %v8955_v30  ;;  %8798 = vmatprep.subr.bf16.mxu1 %v8797_v27  ;;  %v4272_v30 = vld [vmem:[#allocation16 + $0x90] sm:$0xff]  ;;  %v4283_v27 = vld [vmem:[#allocation16 + $0xe8] sm:$0xff] }
 0x57c   : > { %6000 = vmatmul.mubr.f32.gmra.mrb[116].mxu1 %v12156_v43  ;;  %8958 = vmatprep.subr.bf16.mxu0 %v8957_v13  ;;  %v8967_v34 = vpack.c.bf16 %v4272_v30, %v4262_v14  ;;  %v4292_v13 = vld [vmem:[#allocation16 + $0x130] sm:$0xff]  ;;  %v8969_v20 = vpack.c.bf16 %v4293_v52, %v4283_v27  ;;  %v8981_v14 = vpack.c.bf16 %v4353_v48, %v4343_v12  ;;  %v4363_v30 = vld [vmem:[#allocation16 + $0x368] sm:$0xff]  ;;  %v4373_v27 = vld [vmem:[#allocation16 + $0x3b8] sm:$0xff] }
 0x57d   : > { %6339 = vmatmul.mubr.f32.gmra.mrb[140].mxu0 %v12156_v43  ;;  %6005 = vmatprep.mubr.f32.mxu1 %v12160_v23  ;;  %v8971_v1 = vpack.c.bf16 %v4292_v13, %v4282_v3  ;;  %v4372_v3 = vld [vmem:[#allocation16 + $0x3b0] sm:$0xff]  ;;  %v8985_v13 = vpack.c.bf16 %v4373_v27, %v4363_v30  ;;  %v4433_v12 = vld [vmem:[#allocation16 + $0x598] sm:$0xff] }
 0x57e   : > { %8800 = vmatpush1.bf16.msra.mxu1 %v8799_v2  ;;  %6344 = vmatprep.mubr.f32.mxu0 %v12160_v23  ;;  %v4312_v2 = vld [vmem:[#allocation16 + $0x1d0] sm:$0xff]  ;;  %v4453_v30 = vld [vmem:[#allocation16 + $0x638] sm:$0xff] }
 0x57f   : > { %8960 = vmatpush1.bf16.msra.mxu0 %v8959_v61  ;;  %8802 = vmatprep.subr.bf16.mxu1 %v8801_v41  ;;  %v8973_v61 = vpack.c.bf16 %v4313_v36, %v4303_v58  ;;  %v4323_v41 = vld [vmem:[#allocation16 + $0x228] sm:$0xff]  ;;  %v8975_v53 = vpack.c.bf16 %v4312_v2, %v4302_v6  ;;  %v4393_v58 = vld [vmem:[#allocation16 + $0x458] sm:$0xff]  ;;  %v4392_v6 = vld [vmem:[#allocation16 + $0x450] sm:$0xff] }
 0x580   : > { %6006 = vmatmul.mubr.f32.gmra.mrb[118].mxu1 %v12166_v46  ;;  %8962 = vmatprep.subr.bf16.mxu0 %v8961_v37  ;;  %v4332_v37 = vld [vmem:[#allocation16 + $0x270] sm:$0xff]  ;;  %v8977_v44 = vpack.c.bf16 %v4333_v4, %v4323_v41  ;;  %v4413_v41 = vld [vmem:[#allocation16 + $0x4f8] sm:$0xff] }
 0x581   : > { %6345 = vmatmul.mubr.f32.gmra.mrb[142].mxu0 %v12166_v46  ;;  %6076 = vmatprep.mubr.f32.mxu1 %v12818_v55 }
 0x582   : > { %8804 = vmatpush1.bf16.msra.mxu1 %v8803_v51  ;;  %6415 = vmatprep.mubr.f32.mxu0 %v12818_v55  ;;  %v8979_v51 = vpack.c.bf16 %v4332_v37, %v4322_v9  ;;  %v4412_v9 = vld [vmem:[#allocation16 + $0x4f0] sm:$0xff] }
 0x583   : > { %8964 = vmatpush1.bf16.msra.mxu0 %v8963_v15  ;;  %8966 = vmatprep.subr.bf16.mxu1 %v8965_v60  ;;  %v4342_v15 = vld [vmem:[#allocation16 + $0x2c0] sm:$0xff]  ;;  %v4352_v60 = vld [vmem:[#allocation16 + $0x310] sm:$0xff] }
 0x584   : > { %v8983_v52 = vpack.c.bf16 %v4352_v60, %v4342_v15  ;;  %v4422_v15 = vld [vmem:[#allocation16 + $0x540] sm:$0xff]  ;;  %v4432_v60 = vld [vmem:[#allocation16 + $0x590] sm:$0xff] }
 0x585   : > { %6077 = vmatmul.mubr.f32.vlgmr.msra.gmra.mrb[104].mxu1 %v12180_v7  ;;  %v8999_v27 = vpack.c.bf16 %v4432_v60, %v4422_v15  ;;  %v12361_v15 = vld [vmem:[#allocation18] sm:$0xff]  ;;  %v4523_v60 = vld [vmem:[#allocation16 + $0x868] sm:$0xff] }
 0x586   : > { %6416 = vmatmul.mubr.f32.vlgmr.msra.gmra.mrb[128].mxu0 %v12180_v7  ;;  %8968 = vmatpush1.bf16.msra.mxu1 %v8967_v34  ;;  %v4362_v34 = vld [vmem:[#allocation16 + $0x360] sm:$0xff] }
 0x587   : > { %6082 = vmatprep.mubr.f32.mxu1 %v12818_v55  ;;  %6421 = vmatprep.mubr.f32.mxu0 %v12818_v55  ;;  %v8987_v36 = vpack.c.bf16 %v4372_v3, %v4362_v34  ;;  %v4442_v34 = vld [vmem:[#allocation16 + $0x5e0] sm:$0xff]  ;;  %v4452_v3 = vld [vmem:[#allocation16 + $0x630] sm:$0xff] }
 0x588   : > { %8970 = vmatprep.subr.bf16.mxu1 %v8969_v20  ;;  %v4383_v20 = vld [vmem:[#allocation16 + $0x408] sm:$0xff] }
 0x589   : > { %6083 = vmatmul.mubr.f32.gmra.mrb[106].mxu1 %v12187_v49  ;;  %v8989_v2 = vpack.c.bf16 %v4393_v58, %v4383_v20  ;;  %v4473_v20 = vld [vmem:[#allocation16 + $0x6d8] sm:$0xff]  ;;  %v9003_v58 = vpack.c.bf16 %v4452_v3, %v4442_v34  ;;  %v4522_v3 = vld [vmem:[#allocation16 + $0x860] sm:$0xff] }
 0x58a   : > { %6422 = vmatmul.mubr.f32.gmra.mrb[130].mxu0 %v12187_v49  ;;  %8972 = vmatpush1.bf16.msra.mxu1 %v8971_v1  ;;  %v4382_v1 = vld [vmem:[#allocation16 + $0x400] sm:$0xff] }
 0x58b   : > { %6088 = vmatprep.mubr.f32.mxu1 %v12818_v55  ;;  %6427 = vmatprep.mubr.f32.mxu0 %v12818_v55  ;;  %v8991_v4 = vpack.c.bf16 %v4392_v6, %v4382_v1  ;;  %v4462_v1 = vld [vmem:[#allocation16 + $0x680] sm:$0xff]  ;;  %v4472_v6 = vld [vmem:[#allocation16 + $0x6d0] sm:$0xff] }
 0x58c   : > { %8974 = vmatprep.subr.bf16.mxu1 %v8973_v61  ;;  %v4403_v61 = vld [vmem:[#allocation16 + $0x4a8] sm:$0xff] }
 0x58d   : > { %6089 = vmatmul.mubr.f32.gmra.mrb[108].mxu1 %v12201_v21  ;;  %v8993_v37 = vpack.c.bf16 %v4413_v41, %v4403_v61  ;;  %v4493_v61 = vld [vmem:[#allocation16 + $0x778] sm:$0xff]  ;;  %v9007_v41 = vpack.c.bf16 %v4472_v6, %v4462_v1  ;;  %v4543_v1 = vld [vmem:[#allocation16 + $0x908] sm:$0xff] }
 0x58e   : > { %6428 = vmatmul.mubr.f32.gmra.mrb[132].mxu0 %v12201_v21  ;;  %8976 = vmatpush1.bf16.msra.mxu1 %v8975_v53  ;;  %v4402_v53 = vld [vmem:[#allocation16 + $0x4a0] sm:$0xff]  ;;  %v4553_v6 = vld [vmem:[#allocation16 + $0x958] sm:$0xff] }
 0x58f   : > { %6094 = vmatprep.mubr.f32.mxu1 %v12818_v55  ;;  %6433 = vmatprep.mubr.f32.mxu0 %v12818_v55  ;;  %v8995_v48 = vpack.c.bf16 %v4412_v9, %v4402_v53  ;;  %v4492_v53 = vld [vmem:[#allocation16 + $0x770] sm:$0xff]  ;;  %v4503_v9 = vld [vmem:[#allocation16 + $0x7c8] sm:$0xff] }
 0x590   : > { %8978 = vmatprep.subr.bf16.mxu1 %v8977_v44  ;;  %v4423_v44 = vld [vmem:[#allocation16 + $0x548] sm:$0xff] }
 0x591   : > { %6095 = vmatmul.mubr.f32.gmra.mrb[110].mxu1 %v12211_v63 }
 0x592   : > { %6434 = vmatmul.mubr.f32.gmra.mrb[134].mxu0 %v12211_v63  ;;  %8980 = vmatpush1.bf16.msra.mxu1 %v8979_v51  ;;  %v8997_v51 = vpack.c.bf16 %v4433_v12, %v4423_v44 }
 0x593   : > { %6100 = vmatprep.mubr.f32.mxu1 %v12818_v55  ;;  %6439 = vmatprep.mubr.f32.mxu0 %v12818_v55 }
 0x594   : > { %8982 = vmatprep.subr.bf16.mxu1 %v8981_v14  ;;  %v4443_v14 = vld [vmem:[#allocation16 + $0x5e8] sm:$0xff] }
 0x595   : > { %6101 = vmatmul.mubr.f32.gmra.mrb[112].mxu1 %v12225_v10 }
 0x596   : > { %6440 = vmatmul.mubr.f32.gmra.mrb[136].mxu0 %v12225_v10  ;;  %8984 = vmatpush1.bf16.msra.mxu1 %v8983_v52  ;;  %v9001_v52 = vpack.c.bf16 %v4453_v30, %v4443_v14  ;;  %v4533_v14 = vld [vmem:[#allocation16 + $0x8b8] sm:$0xff] }
 0x597   : > { %6106 = vmatprep.mubr.f32.mxu1 %v12818_v55  ;;  %6445 = vmatprep.mubr.f32.mxu0 %v12818_v55  ;;  %v9017_v34 = vpack.c.bf16 %v4533_v14, %v4523_v60  ;;  %v4563_v60 = vld [vmem:[#allocation16 + $0x9a8] sm:$0xff]  ;;  %v4573_v14 = vld [vmem:[#allocation16 + $0x9f8] sm:$0xff] }
 0x598   : > { %8986 = vmatprep.subr.bf16.mxu1 %v8985_v13  ;;  %v4463_v13 = vld [vmem:[#allocation16 + $0x688] sm:$0xff] }
 0x599   : > { %6107 = vmatmul.mubr.f32.gmra.mrb[114].mxu1 %v12235_v57 }
 0x59a   : > { %6446 = vmatmul.mubr.f32.gmra.mrb[138].mxu0 %v12235_v57  ;;  %8988 = vmatpush1.bf16.msra.mxu1 %v8987_v36  ;;  %v9005_v36 = vpack.c.bf16 %v4473_v20, %v4463_v13  ;;  %v4532_v13 = vld [vmem:[#allocation16 + $0x8b0] sm:$0xff]  ;;  %v12370_v20 = vrot.slane %v12361_v15, %v12874_v8 }
 0x59b   : > { %6112 = vmatprep.mubr.f32.mxu1 %v12818_v55  ;;  %6451 = vmatprep.mubr.f32.mxu0 %v12818_v55  ;;  %v9019_v8 = vpack.c.bf16 %v4532_v13, %v4522_v3 }
 0x59c   : > { %8990 = vmatprep.subr.bf16.mxu1 %v8989_v2  ;;  %v4483_v2 = vld [vmem:[#allocation16 + $0x728] sm:$0xff] }
 0x59d   : > { %6113 = vmatmul.mubr.f32.gmra.mrb[116].mxu1 %v12249_v54 }
 0x59e   : > { %6452 = vmatmul.mubr.f32.gmra.mrb[140].mxu0 %v12249_v54  ;;  %8992 = vmatpush1.bf16.msra.mxu1 %v8991_v4  ;;  %v9009_v4 = vpack.c.bf16 %v4493_v61, %v4483_v2  ;;  %v12889_v2 = vld [vmem:[#allocation29_spill] sm:$0xff] }
 0x59f   : > { %6118 = vmatprep.mubr.f32.mxu1 %v12818_v55  ;;  %6457 = vmatprep.mubr.f32.mxu0 %v12818_v55  ;;  %v12378_v61 = vrot.slane %v12361_v15, %v12889_v2  ;;  %v9025_v2 = vpack.c.bf16 %v4573_v14, %v4563_v60 }
 0x5a0   : > { %8994 = vmatprep.subr.bf16.mxu1 %v8993_v37  ;;  %v4513_v37 = vld [vmem:[#allocation16 + $0x818] sm:$0xff] }
 0x5a1   : > { %6119 = vmatmul.mubr.f32.gmra.mrb[118].mxu1 %v12259_v62  ;;  %v9013_v12 = vpack.c.bf16 %v4513_v37, %v4503_v9  ;;  %v9021_v9 = vpack.c.bf16 %v4553_v6, %v4543_v1  ;;  %v4542_v37 = vld [vmem:[#allocation16 + $0x900] sm:$0xff] }
 0x5a2   : > { %6458 = vmatmul.mubr.f32.gmra.mrb[142].mxu0 %v12259_v62  ;;  %8996 = vmatpush1.bf16.msra.mxu1 %v8995_v48  ;;  %v4502_v48 = vld [vmem:[#allocation16 + $0x7c0] sm:$0xff] }
 0x5a3   : > { %6528 = vmatprep.mubr.f32.mxu1 %v11809_v47  ;;  %8998 = vmatprep.subr.bf16.mxu1 %v8997_v51  ;;  %v4482_v47 = vld [vmem:[#allocation16 + $0x720] sm:$0xff]  ;;  %v4512_v51 = vld [vmem:[#allocation16 + $0x810] sm:$0xff] }
 0x5a4   : > { %v9011_v44 = vpack.c.bf16 %v4492_v53, %v4482_v47  ;;  %v9015_v30 = vpack.c.bf16 %v4512_v51, %v4502_v48 }
 0x5a6   : > { %9000 = vmatpush1.bf16.msra.mxu1 %v8999_v27  ;;  %v12887_v27 = vld [vmem:[#allocation26_spill] sm:$0xff] }
 0x5a7   : > { %9002 = vmatprep.subr.bf16.mxu1 %v9001_v52  ;;  %v12366_v52 = vrot.slane %v12361_v15, %v12887_v27 }
 0x5aa   : > { %9004 = vmatpush1.bf16.msra.mxu1 %v9003_v58  ;;  %v12888_v58 = vld [vmem:[#allocation27_spill] sm:$0xff] }
 0x5ab   : > { %9006 = vmatprep.subr.bf16.mxu1 %v9005_v36  ;;  %v12374_v36 = vrot.slane %v12361_v15, %v12888_v58 }
 0x5ae   : > { %9008 = vmatpush1.bf16.msra.mxu1 %v9007_v41 }
 0x5af   : > { %9010 = vmatprep.subr.bf16.mxu1 %v9009_v4 }
 0x5b2   : > { %9012 = vmatpush1.bf16.msra.mxu1 %v9011_v44  ;;  %v4552_v44 = vld [vmem:[#allocation16 + $0x950] sm:$0xff] }
 0x5b3   : > { %9014 = vmatprep.subr.bf16.mxu1 %v9013_v12 }
 0x5b6   : > { %9016 = vmatpush1.bf16.msra.mxu1 %v9015_v30  ;;  %v5400_v41 = vpop.f32.mrb[88].mxu1 }
 0x5b7   : > { %v9205_v4 = vadd.f32 %v5400_v41, %v12366_v52  ;;  %v5739_v47 = vpop.f32.mrb[112].mxu0  ;;  %v5402_v53 = vpop.f32.mrb[89].mxu1  ;;  %9018 = vmatprep.subr.bf16.mxu1 %v9017_v34  ;;  %v9023_v34 = vpack.c.bf16 %v4552_v44, %v4542_v37  ;;  %v4562_v41 = vld [vmem:[#allocation16 + $0x9a0] sm:$0xff] }
 0x5b8   : > { %v9221_v12 = vadd.f32 %v5739_v47, %v12370_v20  ;;  %v9206_v48 = vadd.f32 %v5402_v53, %v12374_v36  ;;  %v5741_v51 = vpop.f32.mrb[113].mxu0 }
 0x5b9   : > { %6803 = vst [vmem:[%s12383_s18] sm:$0xff] %v9205_v4  ;;  %v9222_v30 = vadd.f32 %v5741_v51, %v12378_v61  ;;  %v4572_v4 = vld [vmem:[#allocation16 + $0x9f0] sm:$0xff] }
 0x5ba   : > { %6805 = vst [vmem:[%s12383_s18 + $0x10] sm:$0xff] %v9221_v12  ;;  %6804 = vst [vmem:[%s12383_s18 + $0x8] sm:$0xff] %v9206_v48  ;;  %9020 = vmatpush1.bf16.msra.mxu1 %v9019_v8  ;;  %v5406_v3 = vpop.f32.mrb[90].mxu1  ;;  %v4583_v12 = vld [vmem:[#allocation16 + $0xa48] sm:$0xff]  ;;  %v4593_v48 = vld [vmem:[#allocation16 + $0xa98] sm:$0xff] }
 0x5bb   : > { %6806 = vst [vmem:[%s12383_s18 + $0x18] sm:$0xff] %v9222_v30  ;;  %v9207_v13 = vadd.f32 %v5406_v3, %v12366_v52  ;;  %v5745_v1 = vpop.f32.mrb[114].mxu0  ;;  %v5408_v6 = vpop.f32.mrb[91].mxu1  ;;  %9022 = vmatprep.subr.bf16.mxu1 %v9021_v9  ;;  %v9027_v9 = vpack.c.bf16 %v4572_v4, %v4562_v41  ;;  %v9029_v30 = vpack.c.bf16 %v4593_v48, %v4583_v12  ;;  %v4582_v3 = vld [vmem:[#allocation16 + $0xa40] sm:$0xff] }
 0x5bc   : > { %v9223_v47 = vadd.f32 %v5745_v1, %v12370_v20  ;;  %v9208_v53 = vadd.f32 %v5408_v6, %v12374_v36  ;;  %v5747_v8 = vpop.f32.mrb[115].mxu0 }
 0x5bd   : > { %6813 = vst [vmem:[%s12383_s18 + $0x50] sm:$0xff] %v9207_v13  ;;  %v9224_v37 = vadd.f32 %v5747_v8, %v12378_v61  ;;  %v4592_v13 = vld [vmem:[#allocation16 + $0xa90] sm:$0xff] }
 0x5be   : > { %6815 = vst [vmem:[%s12383_s18 + $0x60] sm:$0xff] %v9223_v47  ;;  %6814 = vst [vmem:[%s12383_s18 + $0x58] sm:$0xff] %v9208_v53  ;;  %9024 = vmatpush1.bf16.msra.mxu1 %v9023_v34  ;;  %v5412_v44 = vpop.f32.mrb[92].mxu1  ;;  %v4603_v47 = vld [vmem:[#allocation16 + $0xae8] sm:$0xff]  ;;  %v4613_v53 = vld [vmem:[#allocation16 + $0xb38] sm:$0xff] }
 0x5bf   : > { %6816 = vst [vmem:[%s12383_s18 + $0x68] sm:$0xff] %v9224_v37  ;;  %v9209_v51 = vadd.f32 %v5412_v44, %v12366_v52  ;;  %v5751_v60 = vpop.f32.mrb[116].mxu0  ;;  %v5414_v14 = vpop.f32.mrb[93].mxu1  ;;  %9026 = vmatprep.subr.bf16.mxu1 %v9025_v2  ;;  %v9031_v2 = vpack.c.bf16 %v4592_v13, %v4582_v3  ;;  %v9033_v37 = vpack.c.bf16 %v4613_v53, %v4603_v47  ;;  %v4602_v44 = vld [vmem:[#allocation16 + $0xae0] sm:$0xff] }
 0x5c0   : > { %v9225_v1 = vadd.f32 %v5751_v60, %v12370_v20  ;;  %v9210_v6 = vadd.f32 %v5414_v14, %v12374_v36  ;;  %v5753_v34 = vpop.f32.mrb[117].mxu0 }
 0x5c1   : > { %6823 = vst [vmem:[%s12383_s18 + $0xa0] sm:$0xff] %v9209_v51  ;;  %v9226_v41 = vadd.f32 %v5753_v34, %v12378_v61  ;;  %v4612_v51 = vld [vmem:[#allocation16 + $0xb30] sm:$0xff] }
 0x5c2   : > { %6825 = vst [vmem:[%s12383_s18 + $0xb0] sm:$0xff] %v9225_v1  ;;  %6824 = vst [vmem:[%s12383_s18 + $0xa8] sm:$0xff] %v9210_v6  ;;  %9028 = vmatpush1.bf16.msra.mxu1 %v9027_v9  ;;  %v5418_v4 = vpop.f32.mrb[94].mxu1  ;;  %v4623_v1 = vld [vmem:[#allocation16 + $0xb88] sm:$0xff]  ;;  %v4633_v6 = vld [vmem:[#allocation16 + $0xbd8] sm:$0xff]  ;;  %v9035_v13 = vpack.c.bf16 %v4612_v51, %v4602_v44 }
 0x5c3   : > { %6826 = vst [vmem:[%s12383_s18 + $0xb8] sm:$0xff] %v9226_v41  ;;  %v9211_v8 = vadd.f32 %v5418_v4, %v12366_v52  ;;  %v5757_v12 = vpop.f32.mrb[118].mxu0  ;;  %v5420_v48 = vpop.f32.mrb[95].mxu1  ;;  %9030 = vmatprep.subr.bf16.mxu1 %v9029_v30  ;;  %v9037_v41 = vpack.c.bf16 %v4633_v6, %v4623_v1  ;;  %v4622_v4 = vld [vmem:[#allocation16 + $0xb80] sm:$0xff] }
 0x5c4   : > { %v9227_v60 = vadd.f32 %v5757_v12, %v12370_v20  ;;  %v9212_v14 = vadd.f32 %v5420_v48, %v12374_v36  ;;  %v5759_v9 = vpop.f32.mrb[119].mxu0  ;;  %v4643_v12 = vld [vmem:[#allocation16 + $0xc28] sm:$0xff]  ;;  %v4653_v48 = vld [vmem:[#allocation16 + $0xc78] sm:$0xff]  ;;  %v4642_v6 = vld [vmem:[#allocation16 + $0xc20] sm:$0xff] }
 0x5c5   : > { %6833 = vst [vmem:[%s12383_s18 + $0xf0] sm:$0xff] %v9211_v8  ;;  %v9228_v3 = vadd.f32 %v5759_v9, %v12378_v61  ;;  %6529 = vmatmul.mubr.f32.vlgmr.msra.gmra.mrb[120].mxu1 %v11813_v24  ;;  %v4632_v24 = vld [vmem:[#allocation16 + $0xbd0] sm:$0xff]  ;;  %v9041_v1 = vpack.c.bf16 %v4653_v48, %v4643_v12 }
 0x5c6   : > { %6835 = vst [vmem:[%s12383_s18 + $0x100] sm:$0xff] %v9227_v60  ;;  %6834 = vst [vmem:[%s12383_s18 + $0xf8] sm:$0xff] %v9212_v14  ;;  %6534 = vmatprep.mubr.f32.mxu1 %v11827_v5  ;;  %9032 = vmatpush1.bf16.msra.mxu1 %v9031_v2  ;;  %v5424_v30 = vpop.f32.mrb[96].mxu1  ;;  %v9039_v51 = vpack.c.bf16 %v4632_v24, %v4622_v4 }
 0x5c7   : > { %6836 = vst [vmem:[%s12383_s18 + $0x108] sm:$0xff] %v9228_v3  ;;  %v9213_v34 = vadd.f32 %v5424_v30, %v12366_v52  ;;  %v5763_v47 = vpop.f32.mrb[120].mxu0  ;;  %v5426_v53 = vpop.f32.mrb[97].mxu1  ;;  %9034 = vmatprep.subr.bf16.mxu1 %v9033_v37 }
 0x5c8   : > { %v9229_v8 = vadd.f32 %v5763_v47, %v12370_v20  ;;  %v9214_v5 = vadd.f32 %v5426_v53, %v12374_v36  ;;  %v5765_v2 = vpop.f32.mrb[121].mxu0 }
 0x5c9   : > { %6843 = vst [vmem:[%s12383_s18 + $0x140] sm:$0xff] %v9213_v34  ;;  %v9230_v44 = vadd.f32 %v5765_v2, %v12378_v61  ;;  %6535 = vmatmul.mubr.f32.gmra.mrb[122].mxu1 %v11832_v33  ;;  %v4652_v33 = vld [vmem:[#allocation16 + $0xc70] sm:$0xff]  ;;  %v4673_v34 = vld [vmem:[#allocation16 + $0xd18] sm:$0xff]  ;;  %v4662_v2 = vld [vmem:[#allocation16 + $0xcc0] sm:$0xff] }
 0x5ca   : > { %6845 = vst [vmem:[%s12383_s18 + $0x150] sm:$0xff] %v9229_v8  ;;  %6844 = vst [vmem:[%s12383_s18 + $0x148] sm:$0xff] %v9214_v5  ;;  %6540 = vmatprep.mubr.f32.mxu1 %v11844_v25  ;;  %9036 = vmatpush1.bf16.msra.mxu1 %v9035_v13  ;;  %v5430_v37 = vpop.f32.mrb[98].mxu1  ;;  %v4663_v13 = vld [vmem:[#allocation16 + $0xcc8] sm:$0xff] }
 0x5cb   : > { %6846 = vst [vmem:[%s12383_s18 + $0x158] sm:$0xff] %v9230_v44  ;;  %v9215_v60 = vadd.f32 %v5430_v37, %v12366_v52  ;;  %v5769_v14 = vpop.f32.mrb[122].mxu0  ;;  %v5432_v9 = vpop.f32.mrb[99].mxu1  ;;  %9038 = vmatprep.subr.bf16.mxu1 %v9037_v41  ;;  %v9043_v41 = vpack.c.bf16 %v4652_v33, %v4642_v6  ;;  %v9045_v5 = vpack.c.bf16 %v4673_v34, %v4663_v13  ;;  %v4683_v44 = vld [vmem:[#allocation16 + $0xd68] sm:$0xff]  ;;  %v4693_v37 = vld [vmem:[#allocation16 + $0xdb8] sm:$0xff] }
 0x5cc   : > { %v9231_v3 = vadd.f32 %v5769_v14, %v12370_v20  ;;  %v9216_v25 = vadd.f32 %v5432_v9, %v12374_v36  ;;  %v5771_v30 = vpop.f32.mrb[123].mxu0  ;;  %v9049_v33 = vpack.c.bf16 %v4693_v37, %v4683_v44  ;;  %v4703_v13 = vld [vmem:[#allocation16 + $0xe08] sm:$0xff]  ;;  %v4713_v34 = vld [vmem:[#allocation16 + $0xe58] sm:$0xff] }
 0x5cd   : > { %6853 = vst [vmem:[%s12383_s18 + $0x190] sm:$0xff] %v9215_v60  ;;  %v9232_v47 = vadd.f32 %v5771_v30, %v12378_v61  ;;  %6541 = vmatmul.mubr.f32.gmra.mrb[124].mxu1 %v12875_v42  ;;  %v4672_v42 = vld [vmem:[#allocation16 + $0xd10] sm:$0xff]  ;;  %v4763_v44 = vld [vmem:[#allocation16 + $0xfe8] sm:$0xff]  ;;  %v12892_v37 = vld [vmem:[#allocation59_spill] sm:$0xff] }
 0x5ce   : > { %6855 = vst [vmem:[%s12383_s18 + $0x1a0] sm:$0xff] %v9231_v3  ;;  %6854 = vst [vmem:[%s12383_s18 + $0x198] sm:$0xff] %v9216_v25  ;;  %6546 = vmatprep.mubr.f32.mxu1 %v12876_v28  ;;  %9040 = vmatpush1.bf16.msra.mxu1 %v9039_v51  ;;  %v5436_v53 = vpop.f32.mrb[100].mxu1  ;;  %v9047_v14 = vpack.c.bf16 %v4672_v42, %v4662_v2  ;;  %v4682_v3 = vld [vmem:[#allocation16 + $0xd60] sm:$0xff] }
 0x5cf   : > { %6856 = vst [vmem:[%s12383_s18 + $0x1a8] sm:$0xff] %v9232_v47  ;;  %v9217_v4 = vadd.f32 %v5436_v53, %v12366_v52  ;;  %v5775_v24 = vpop.f32.mrb[124].mxu0  ;;  %v5438_v8 = vpop.f32.mrb[101].mxu1  ;;  %9042 = vmatprep.subr.bf16.mxu1 %v9041_v1  ;;  %v9053_v53 = vpack.c.bf16 %v4713_v34, %v4703_v13  ;;  %v12890_v2 = vld [vmem:[#allocation56_spill] sm:$0xff]  ;;  %v12891_v42 = vld [vmem:[#allocation55_spill] sm:$0xff] }
 0x5d0   : > { %v9233_v12 = vadd.f32 %v5775_v24, %v12370_v20  ;;  %v9218_v28 = vadd.f32 %v5438_v8, %v12374_v36  ;;  %v5777_v48 = vpop.f32.mrb[125].mxu0  ;;  %v4722_v24 = vld [vmem:[#allocation16 + $0xea0] sm:$0xff]  ;;  %v4732_v8 = vld [vmem:[#allocation16 + $0xef0] sm:$0xff] }
 0x5d1   : > { %6863 = vst [vmem:[%s12383_s18 + $0x1e0] sm:$0xff] %v9217_v4  ;;  %v9234_v51 = vadd.f32 %v5777_v48, %v12378_v61  ;;  %6547 = vmatmul.mubr.f32.gmra.mrb[126].mxu1 %v12877_v35  ;;  %v4692_v35 = vld [vmem:[#allocation16 + $0xdb0] sm:$0xff]  ;;  %v4733_v4 = vld [vmem:[#allocation16 + $0xef8] sm:$0xff]  ;;  %v4742_v48 = vld [vmem:[#allocation16 + $0xf40] sm:$0xff] }
 0x5d2   : > { %6865 = vst [vmem:[%s12383_s18 + $0x1f0] sm:$0xff] %v9233_v12  ;;  %6864 = vst [vmem:[%s12383_s18 + $0x1e8] sm:$0xff] %v9218_v28  ;;  %6552 = vmatprep.mubr.f32.mxu1 %v12878_v22  ;;  %9044 = vmatpush1.bf16.msra.mxu1 %v9043_v41  ;;  %v5442_v60 = vpop.f32.mrb[102].mxu1  ;;  %v4712_v41 = vld [vmem:[#allocation16 + $0xe50] sm:$0xff]  ;;  %v9059_v12 = vpack.c.bf16 %v4732_v8, %v4722_v24 }
 0x5d3   : > { %6866 = vst [vmem:[%s12383_s18 + $0x1f8] sm:$0xff] %v9234_v51  ;;  %v9219_v9 = vadd.f32 %v5442_v60, %v12366_v52  ;;  %v5781_v1 = vpop.f32.mrb[126].mxu0  ;;  %v5444_v6 = vpop.f32.mrb[103].mxu1  ;;  %9046 = vmatprep.subr.bf16.mxu1 %v9045_v5  ;;  %v9051_v52 = vpack.c.bf16 %v4692_v35, %v4682_v3  ;;  %v4753_v5 = vld [vmem:[#allocation16 + $0xf98] sm:$0xff]  ;;  %v4782_v35 = vld [vmem:[#allocation16 + $0x1080] sm:$0xff] }
 0x5d4   : > { %v9235_v25 = vadd.f32 %v5781_v1, %v12370_v20  ;;  %v9220_v22 = vadd.f32 %v5444_v6, %v12374_v36  ;;  %v5783_v30 = vpop.f32.mrb[127].mxu0  ;;  %v4702_v20 = vld [vmem:[#allocation16 + $0xe00] sm:$0xff]  ;;  %v4723_v36 = vld [vmem:[#allocation16 + $0xea8] sm:$0xff]  ;;  %v4793_v6 = vld [vmem:[#allocation16 + $0x10d8] sm:$0xff] }
 0x5d5   : > { %6873 = vst [vmem:[%s12383_s18 + $0x230] sm:$0xff] %v9219_v9  ;;  %v9236_v47 = vadd.f32 %v5783_v30, %v12378_v61  ;;  %6553 = vmatmul.mubr.f32.gmra.mrb[128].mxu1 %v12879_v56  ;;  %v9055_v61 = vpack.c.bf16 %v4712_v41, %v4702_v20  ;;  %v9057_v56 = vpack.c.bf16 %v4733_v4, %v4723_v36  ;;  %v4772_v9 = vld [vmem:[#allocation16 + $0x1030] sm:$0xff]  ;;  %v4783_v1 = vld [vmem:[#allocation16 + $0x1088] sm:$0xff]  ;;  %v4813_v30 = vld [vmem:[#allocation16 + $0x1178] sm:$0xff] }
 0x5d6   : > { %6875 = vst [vmem:[%s12383_s18 + $0x240] sm:$0xff] %v9235_v25  ;;  %6874 = vst [vmem:[%s12383_s18 + $0x238] sm:$0xff] %v9220_v22  ;;  %6558 = vmatprep.mubr.f32.mxu1 %v12880_v11  ;;  %9048 = vmatpush1.bf16.msra.mxu1 %v9047_v14  ;;  %v4743_v11 = vld [vmem:[#allocation16 + $0xf48] sm:$0xff]  ;;  %v4762_v14 = vld [vmem:[#allocation16 + $0xfe0] sm:$0xff]  ;;  %v9069_v3 = vpack.c.bf16 %v4793_v6, %v4783_v1 }
 0x5d7   : > { %6876 = vst [vmem:[%s12383_s18 + $0x248] sm:$0xff] %v9236_v47  ;;  %9050 = vmatprep.subr.bf16.mxu1 %v9049_v33  ;;  %v9061_v28 = vpack.c.bf16 %v4753_v5, %v4743_v11  ;;  %v9067_v33 = vpack.c.bf16 %v4772_v9, %v4762_v14  ;;  %v4792_v25 = vld [vmem:[#allocation16 + $0x10d0] sm:$0xff]  ;;  %v4803_v22 = vld [vmem:[#allocation16 + $0x1128] sm:$0xff]  ;;  %v4822_v36 = vld [vmem:[#allocation16 + $0x11c0] sm:$0xff] }
 0x5d8   : > { %v9071_v13 = vpack.c.bf16 %v4792_v25, %v4782_v35  ;;  %v9073_v34 = vpack.c.bf16 %v4813_v30, %v4803_v22  ;;  %v4812_v47 = vld [vmem:[#allocation16 + $0x1170] sm:$0xff]  ;;  %v4842_v11 = vld [vmem:[#allocation16 + $0x1260] sm:$0xff]  ;;  %v4903_v9 = vld [vmem:[#allocation16 + $0x1448] sm:$0xff] }
 0x5d9   : > { %6559 = vmatmul.mubr.f32.gmra.mrb[130].mxu1 %v12881_v50  ;;  %v4752_v50 = vld [vmem:[#allocation16 + $0xf90] sm:$0xff]  ;;  %v4913_v1 = vld [vmem:[#allocation16 + $0x1498] sm:$0xff]  ;;  %v4923_v25 = vld [vmem:[#allocation16 + $0x14e8] sm:$0xff] }
 0x5da   : > { %6564 = vmatprep.mubr.f32.mxu1 %v12882_v45  ;;  %9052 = vmatpush1.bf16.msra.mxu1 %v9051_v52  ;;  %v4773_v45 = vld [vmem:[#allocation16 + $0x1038] sm:$0xff]  ;;  %v9063_v51 = vpack.c.bf16 %v4752_v50, %v4742_v48  ;;  %v4823_v52 = vld [vmem:[#allocation16 + $0x11c8] sm:$0xff]  ;;  %v4832_v4 = vld [vmem:[#allocation16 + $0x1210] sm:$0xff] }
 0x5db   : > { %9054 = vmatprep.subr.bf16.mxu1 %v9053_v53  ;;  %v9065_v60 = vpack.c.bf16 %v4773_v45, %v4763_v44  ;;  %v4833_v53 = vld [vmem:[#allocation16 + $0x1218] sm:$0xff]  ;;  %v9079_v24 = vpack.c.bf16 %v4832_v4, %v4822_v36  ;;  %v4852_v5 = vld [vmem:[#allocation16 + $0x12b0] sm:$0xff]  ;;  %v4862_v48 = vld [vmem:[#allocation16 + $0x1300] sm:$0xff] }
 0x5dc   : > { %v9077_v41 = vpack.c.bf16 %v4833_v53, %v4823_v52  ;;  %v4872_v50 = vld [vmem:[#allocation16 + $0x1350] sm:$0xff]  ;;  %v4883_v44 = vld [vmem:[#allocation16 + $0x13a8] sm:$0xff]  ;;  %v4893_v45 = vld [vmem:[#allocation16 + $0x13f8] sm:$0xff] }
 0x5dd   : > { %6565 = vmatmul.mubr.f32.gmra.mrb[132].mxu1 %v12890_v2  ;;  %v4863_v2 = vld [vmem:[#allocation16 + $0x1308] sm:$0xff]  ;;  %v4892_v14 = vld [vmem:[#allocation16 + $0x13f0] sm:$0xff]  ;;  %v4933_v22 = vld [vmem:[#allocation16 + $0x1538] sm:$0xff] }
 0x5de   : > { %6570 = vmatprep.mubr.f32.mxu1 %v12891_v42  ;;  %9056 = vmatpush1.bf16.msra.mxu1 %v9055_v61  ;;  %v4843_v61 = vld [vmem:[#allocation16 + $0x1268] sm:$0xff]  ;;  %v4873_v42 = vld [vmem:[#allocation16 + $0x1358] sm:$0xff]  ;;  %v4912_v35 = vld [vmem:[#allocation16 + $0x1490] sm:$0xff] }
 0x5df   : > { %9058 = vmatprep.subr.bf16.mxu1 %v9057_v56  ;;  %v4853_v56 = vld [vmem:[#allocation16 + $0x12b8] sm:$0xff]  ;;  %v4952_v36 = vld [vmem:[#allocation16 + $0x15d0] sm:$0xff]  ;;  %v4963_v4 = vld [vmem:[#allocation16 + $0x1628] sm:$0xff] }
 0x5e0   : > { %v9081_v8 = vpack.c.bf16 %v4853_v56, %v4843_v61  ;;  %v4953_v52 = vld [vmem:[#allocation16 + $0x15d8] sm:$0xff] }
 0x5e1   : > { %6571 = vmatmul.mubr.f32.gmra.mrb[134].mxu1 %v12892_v37  ;;  %v9087_v37 = vpack.c.bf16 %v4872_v50, %v4862_v48  ;;  %v4973_v61 = vld [vmem:[#allocation16 + $0x1678] sm:$0xff]  ;;  %v5002_v50 = vld [vmem:[#allocation16 + $0x1760] sm:$0xff] }
 0x5e2   : > { %9060 = vmatpush1.bf16.msra.mxu1 %v9059_v12  ;;  %6641 = vmatprep.mubr.f32.mxu1 %v12886_v17  ;;  %v4802_v17 = vld [vmem:[#allocation16 + $0x1120] sm:$0xff]  ;;  %v9083_v12 = vpack.c.bf16 %v4852_v5, %v4842_v11  ;;  %v4983_v11 = vld [vmem:[#allocation16 + $0x16c8] sm:$0xff] }
 0x5e3   : > { %9062 = vmatprep.subr.bf16.mxu1 %v9061_v28  ;;  %v9075_v20 = vpack.c.bf16 %v4812_v47, %v4802_v17  ;;  %v9085_v28 = vpack.c.bf16 %v4873_v42, %v4863_v2  ;;  %v4932_v17 = vld [vmem:[#allocation16 + $0x1530] sm:$0xff]  ;;  %v4943_v47 = vld [vmem:[#allocation16 + $0x1588] sm:$0xff]  ;;  %v4982_v42 = vld [vmem:[#allocation16 + $0x16c0] sm:$0xff] }
 0x5e6   : > { %9064 = vmatpush1.bf16.msra.mxu1 %v9063_v51  ;;  %v9089_v51 = vpack.c.bf16 %v4893_v45, %v4883_v44  ;;  %v5023_v44 = vld [vmem:[#allocation16 + $0x1808] sm:$0xff] }
 0x5e7   : > { %9066 = vmatprep.subr.bf16.mxu1 %v9065_v60  ;;  %v4882_v60 = vld [vmem:[#allocation16 + $0x13a0] sm:$0xff] }
 0x5e8   : > { %v9091_v6 = vpack.c.bf16 %v4892_v14, %v4882_v60  ;;  %v5043_v60 = vld [vmem:[#allocation16 + $0x18a8] sm:$0xff] }
 0x5ea   : > { %9068 = vmatpush1.bf16.msra.mxu1 %v9067_v33  ;;  %v9093_v33 = vpack.c.bf16 %v4913_v1, %v4903_v9  ;;  %v5042_v1 = vld [vmem:[#allocation16 + $0x18a0] sm:$0xff] }
 0x5eb   : > { %9070 = vmatprep.subr.bf16.mxu1 %v9069_v3  ;;  %v4902_v3 = vld [vmem:[#allocation16 + $0x1440] sm:$0xff] }
 0x5ec   : > { %v9095_v30 = vpack.c.bf16 %v4912_v35, %v4902_v3 }
 0x5ee   : > { %9072 = vmatpush1.bf16.msra.mxu1 %v9071_v13  ;;  %v9097_v13 = vpack.c.bf16 %v4933_v22, %v4923_v25 }
 0x5ef   : > { %9074 = vmatprep.subr.bf16.mxu1 %v9073_v34  ;;  %v4922_v34 = vld [vmem:[#allocation16 + $0x14e0] sm:$0xff] }
 0x5f0   : > { %v9099_v53 = vpack.c.bf16 %v4932_v17, %v4922_v34 }
 0x5f2   : > { %9076 = vmatpush1.bf16.msra.mxu1 %v9075_v20  ;;  %v9101_v20 = vpack.c.bf16 %v4953_v52, %v4943_v47 }
 0x5f3   : > { %9078 = vmatprep.subr.bf16.mxu1 %v9077_v41  ;;  %v4942_v41 = vld [vmem:[#allocation16 + $0x1580] sm:$0xff] }
 0x5f4   : > { %v9103_v56 = vpack.c.bf16 %v4952_v36, %v4942_v41 }
 0x5f6   : > { %9080 = vmatpush1.bf16.msra.mxu1 %v9079_v24  ;;  %v9105_v24 = vpack.c.bf16 %v4973_v61, %v4963_v4 }
 0x5f7   : > { %9082 = vmatprep.subr.bf16.mxu1 %v9081_v8  ;;  %v4962_v8 = vld [vmem:[#allocation16 + $0x1620] sm:$0xff] }
 0x5fa   : > { %9084 = vmatpush1.bf16.msra.mxu1 %v9083_v12  ;;  %v5003_v12 = vld [vmem:[#allocation16 + $0x1768] sm:$0xff] }
 0x5fb   : > { %9086 = vmatprep.subr.bf16.mxu1 %v9085_v28 }
 0x5fe   : > { %9088 = vmatpush1.bf16.msra.mxu1 %v9087_v37 }
 0x5ff   : > { %9090 = vmatprep.subr.bf16.mxu1 %v9089_v51  ;;  %v5022_v51 = vld [vmem:[#allocation16 + $0x1800] sm:$0xff] }
 0x602   : > { %9092 = vmatpush1.bf16.msra.mxu1 %v9091_v6 }
 0x603   : > { %9094 = vmatprep.subr.bf16.mxu1 %v9093_v33 }
 0x605   : > { %6642 = vmatmul.mubr.f32.vlgmr.msra.gmra.mrb[120].mxu1 %v12045_v59  ;;  %v4972_v59 = vld [vmem:[#allocation16 + $0x1670] sm:$0xff] }
 0x606   : > { %6647 = vmatprep.mubr.f32.mxu1 %v12052_v39  ;;  %9096 = vmatpush1.bf16.msra.mxu1 %v9095_v30  ;;  %v4993_v39 = vld [vmem:[#allocation16 + $0x1718] sm:$0xff]  ;;  %v9107_v5 = vpack.c.bf16 %v4972_v59, %v4962_v8 }
 0x607   : > { %9098 = vmatprep.subr.bf16.mxu1 %v9097_v13  ;;  %v9109_v2 = vpack.c.bf16 %v4993_v39, %v4983_v11 }
 0x609   : > { %6648 = vmatmul.mubr.f32.gmra.mrb[122].mxu1 %v12064_v40  ;;  %v4992_v40 = vld [vmem:[#allocation16 + $0x1710] sm:$0xff] }
 0x60a   : > { %6653 = vmatprep.mubr.f32.mxu1 %v12070_v31  ;;  %9100 = vmatpush1.bf16.msra.mxu1 %v9099_v53  ;;  %v5013_v31 = vld [vmem:[#allocation16 + $0x17b8] sm:$0xff]  ;;  %v9111_v28 = vpack.c.bf16 %v4992_v40, %v4982_v42 }
 0x60b   : > { %9102 = vmatprep.subr.bf16.mxu1 %v9101_v20  ;;  %v9113_v48 = vpack.c.bf16 %v5013_v31, %v5003_v12 }
 0x60d   : > { %6654 = vmatmul.mubr.f32.gmra.mrb[124].mxu1 %v12091_v32  ;;  %v5012_v32 = vld [vmem:[#allocation16 + $0x17b0] sm:$0xff] }
 0x60e   : > { %6659 = vmatprep.mubr.f32.mxu1 %v12097_v29  ;;  %9104 = vmatpush1.bf16.msra.mxu1 %v9103_v56  ;;  %v5033_v29 = vld [vmem:[#allocation16 + $0x1858] sm:$0xff]  ;;  %v9115_v45 = vpack.c.bf16 %v5012_v32, %v5002_v50 }
 0x60f   : > { %9106 = vmatprep.subr.bf16.mxu1 %v9105_v24  ;;  %v9117_v37 = vpack.c.bf16 %v5033_v29, %v5023_v44 }
 0x611   : > { %6660 = vmatmul.mubr.f32.gmra.mrb[126].mxu1 %v12107_v26  ;;  %v5032_v26 = vld [vmem:[#allocation16 + $0x1850] sm:$0xff] }
 0x612   : > { %6665 = vmatprep.mubr.f32.mxu1 %v12113_v16  ;;  %9108 = vmatpush1.bf16.msra.mxu1 %v9107_v5  ;;  %v5053_v16 = vld [vmem:[#allocation16 + $0x18f8] sm:$0xff]  ;;  %v9119_v14 = vpack.c.bf16 %v5032_v26, %v5022_v51 }
 0x613   : > { %9110 = vmatprep.subr.bf16.mxu1 %v9109_v2  ;;  %v9121_v9 = vpack.c.bf16 %v5053_v16, %v5043_v60 }
 0x615   : > { %6666 = vmatmul.mubr.f32.gmra.mrb[128].mxu1 %v12123_v38  ;;  %v5052_v38 = vld [vmem:[#allocation16 + $0x18f0] sm:$0xff] }
 0x616   : > { %6671 = vmatprep.mubr.f32.mxu1 %v12129_v19  ;;  %9112 = vmatpush1.bf16.msra.mxu1 %v9111_v28  ;;  %v9123_v19 = vpack.c.bf16 %v5052_v38, %v5042_v1 }
 0x617   : > { %9114 = vmatprep.subr.bf16.mxu1 %v9113_v48 }
 0x619   : > { %6672 = vmatmul.mubr.f32.gmra.mrb[130].mxu1 %v12139_v18  ;;  %v12893_v18 = vld [vmem:[#allocation25_spill] sm:$0xff] }
 0x61a   : > { %6677 = vmatprep.mubr.f32.mxu1 %v12145_v0  ;;  %9116 = vmatpush1.bf16.msra.mxu1 %v9115_v45  ;;  %v5084_v0 = vsub.s32 6, %v12893_v18 }
 0x61b   : > { %9118 = vmatprep.subr.bf16.mxu1 %v9117_v37 }
 0x61d   : > { %6678 = vmatmul.mubr.f32.gmra.mrb[132].mxu1 %v12156_v43  ;;  %v5080_v43 = vsub.s32 5, %v12893_v18 }
 0x61e   : > { %6683 = vmatprep.mubr.f32.mxu1 %v12160_v23  ;;  %9120 = vmatpush1.bf16.msra.mxu1 %v9119_v14  ;;  %v5088_v23 = vsub.s32 7, %v12893_v18 }
 0x61f   : > { %9122 = vmatprep.subr.bf16.mxu1 %v9121_v9 }
 0x621   : > { %6684 = vmatmul.mubr.f32.gmra.mrb[134].mxu1 %v12166_v46  ;;  %v12894_v46 = vld [vmem:[#allocation48_spill] sm:$0xff] }
 0x622   : > { %9124 = vmatpush1.bf16.msra.mxu1 %v9123_v19  ;;  %6754 = vmatprep.mubr.f32.mxu1 %v12818_v55 }
 0x625   : > { %6755 = vmatmul.mubr.f32.vlgmr.msra.gmra.mrb[120].mxu1 %v12180_v7  ;;  %v12501_v7 = vrot.slane %v12361_v15, %v12894_v46 }
 0x626   : > { %6760 = vmatprep.mubr.f32.mxu1 %v12818_v55 }
 0x629   : > { %6761 = vmatmul.mubr.f32.gmra.mrb[122].mxu1 %v12187_v49  ;;  %v12504_v49 = vrot.slane %v12361_v15, %v5084_v0 }
 0x62a   : > { %6766 = vmatprep.mubr.f32.mxu1 %v12818_v55 }
 0x62d   : > { %6767 = vmatmul.mubr.f32.gmra.mrb[124].mxu1 %v12201_v21  ;;  %v12510_v21 = vrot.slane %v12361_v15, %v5088_v23 }
 0x62e   : > { %6772 = vmatprep.mubr.f32.mxu1 %v12818_v55 }
 0x631   : > { %6773 = vmatmul.mubr.f32.gmra.mrb[126].mxu1 %v12211_v63 }
 0x632   : > { %6778 = vmatprep.mubr.f32.mxu1 %v12818_v55 }
 0x635   : > { %6779 = vmatmul.mubr.f32.gmra.mrb[128].mxu1 %v12225_v10 }
 0x636   : > { %6784 = vmatprep.mubr.f32.mxu1 %v12818_v55 }
 0x639   : > { %6785 = vmatmul.mubr.f32.gmra.mrb[130].mxu1 %v12235_v57 }
 0x63a   : > { %6790 = vmatprep.mubr.f32.mxu1 %v12818_v55 }
 0x63d   : > { %6791 = vmatmul.mubr.f32.gmra.mrb[132].mxu1 %v12249_v54 }
 0x63e   : > { %6796 = vmatprep.mubr.f32.mxu1 %v12818_v55  ;;  %v12507_v55 = vrot.slane %v12361_v15, %v5080_v43 }
 0x641   : > { %6797 = vmatmul.mubr.f32.gmra.mrb[134].mxu1 %v12259_v62 }
 0x658   : > { %v6078_v63 = vpop.f32.mrb[104].mxu1 }
 0x659   : > { %v9237_v10 = vadd.f32 %v6078_v63, %v12501_v7  ;;  %v6417_v57 = vpop.f32.mrb[128].mxu0  ;;  %v6080_v54 = vpop.f32.mrb[105].mxu1 }
 0x65a   : > { %v9253_v62 = vadd.f32 %v6417_v57, %v12504_v49  ;;  %v9238_v6 = vadd.f32 %v6080_v54, %v12507_v55  ;;  %v6419_v33 = vpop.f32.mrb[129].mxu0 }
 0x65b   : > { %6807 = vst [vmem:[%s12383_s18 + $0x20] sm:$0xff] %v9237_v10  ;;  %v9254_v3 = vadd.f32 %v6419_v33, %v12510_v21  ;;  %v5055_v33 = vld [vmem:[#allocation18 + $0x8] sm:$0x3] }
 0x65c   : > { %6809 = vst [vmem:[%s12383_s18 + $0x30] sm:$0xff] %v9253_v62  ;;  %6808 = vst [vmem:[%s12383_s18 + $0x28] sm:$0xff] %v9238_v6  ;;  %v6084_v15 = vpop.f32.mrb[106].mxu1 }
 0x65d   : > { %6810 = vst [vmem:[%s12383_s18 + $0x38] sm:$0xff] %v9254_v3  ;;  %v9239_v35 = vadd.f32 %v6084_v15, %v12501_v7  ;;  %v6423_v25 = vpop.f32.mrb[130].mxu0  ;;  %v6086_v22 = vpop.f32.mrb[107].mxu1  ;;  %v5097_v3 = vrot.slane %v5055_v33, %v12888_v58 }
 0x65e   : > { %v9255_v30 = vadd.f32 %v6423_v25, %v12504_v49  ;;  %v9240_v13 = vadd.f32 %v6086_v22, %v12507_v55  ;;  %v6425_v34 = vpop.f32.mrb[131].mxu0 }
 0x65f   : > { %6817 = vst [vmem:[%s12383_s18 + $0x70] sm:$0xff] %v9239_v35  ;;  %v9256_v17 = vadd.f32 %v6425_v34, %v12510_v21 }
 0x660   : > { %6819 = vst [vmem:[%s12383_s18 + $0x80] sm:$0xff] %v9255_v30  ;;  %6818 = vst [vmem:[%s12383_s18 + $0x78] sm:$0xff] %v9240_v13  ;;  %v6090_v47 = vpop.f32.mrb[108].mxu1 }
 0x661   : > { %6820 = vst [vmem:[%s12383_s18 + $0x88] sm:$0xff] %v9256_v17  ;;  %v9241_v52 = vadd.f32 %v6090_v47, %v12501_v7  ;;  %v6429_v53 = vpop.f32.mrb[132].mxu0  ;;  %v6092_v20 = vpop.f32.mrb[109].mxu1 }
 0x662   : > { %v9257_v41 = vadd.f32 %v6429_v53, %v12504_v49  ;;  %v9242_v36 = vadd.f32 %v6092_v20, %v12507_v55  ;;  %v6431_v4 = vpop.f32.mrb[133].mxu0 }
 0x663   : > { %6827 = vst [vmem:[%s12383_s18 + $0xc0] sm:$0xff] %v9241_v52  ;;  %v9258_v61 = vadd.f32 %v6431_v4, %v12510_v21 }
 0x664   : > { %6829 = vst [vmem:[%s12383_s18 + $0xd0] sm:$0xff] %v9257_v41  ;;  %6828 = vst [vmem:[%s12383_s18 + $0xc8] sm:$0xff] %v9242_v36  ;;  %v6096_v56 = vpop.f32.mrb[110].mxu1 }
 0x665   : > { %6830 = vst [vmem:[%s12383_s18 + $0xd8] sm:$0xff] %v9258_v61  ;;  %v9243_v24 = vadd.f32 %v6096_v56, %v12501_v7  ;;  %v6435_v8 = vpop.f32.mrb[134].mxu0  ;;  %v6098_v59 = vpop.f32.mrb[111].mxu1 }
 0x666   : > { %v9259_v11 = vadd.f32 %v6435_v8, %v12504_v49  ;;  %v9244_v39 = vadd.f32 %v6098_v59, %v12507_v55  ;;  %v6437_v5 = vpop.f32.mrb[135].mxu0 }
 0x667   : > { %6837 = vst [vmem:[%s12383_s18 + $0x110] sm:$0xff] %v9243_v24  ;;  %v9260_v2 = vadd.f32 %v6437_v5, %v12510_v21 }
 0x668   : > { %6839 = vst [vmem:[%s12383_s18 + $0x120] sm:$0xff] %v9259_v11  ;;  %6838 = vst [vmem:[%s12383_s18 + $0x118] sm:$0xff] %v9244_v39  ;;  %v6102_v42 = vpop.f32.mrb[112].mxu1 }
 0x669   : > { %6840 = vst [vmem:[%s12383_s18 + $0x128] sm:$0xff] %v9260_v2  ;;  %v9245_v40 = vadd.f32 %v6102_v42, %v12501_v7  ;;  %v6441_v12 = vpop.f32.mrb[136].mxu0  ;;  %v6104_v31 = vpop.f32.mrb[113].mxu1 }
 0x66a   : > { %v9261_v28 = vadd.f32 %v6441_v12, %v12504_v49  ;;  %v9246_v48 = vadd.f32 %v6104_v31, %v12507_v55  ;;  %v6443_v50 = vpop.f32.mrb[137].mxu0 }
 0x66b   : > { %6847 = vst [vmem:[%s12383_s18 + $0x160] sm:$0xff] %v9245_v40  ;;  %v9262_v32 = vadd.f32 %v6443_v50, %v12510_v21 }
 0x66c   : > { %6849 = vst [vmem:[%s12383_s18 + $0x170] sm:$0xff] %v9261_v28  ;;  %6848 = vst [vmem:[%s12383_s18 + $0x168] sm:$0xff] %v9246_v48  ;;  %v6108_v44 = vpop.f32.mrb[114].mxu1 }
 0x66d   : > { %6850 = vst [vmem:[%s12383_s18 + $0x178] sm:$0xff] %v9262_v32  ;;  %v9247_v29 = vadd.f32 %v6108_v44, %v12501_v7  ;;  %v6447_v45 = vpop.f32.mrb[138].mxu0  ;;  %v6110_v37 = vpop.f32.mrb[115].mxu1 }
 0x66e   : > { %v9263_v51 = vadd.f32 %v6447_v45, %v12504_v49  ;;  %v9248_v26 = vadd.f32 %v6110_v37, %v12507_v55  ;;  %v6449_v60 = vpop.f32.mrb[139].mxu0 }
 0x66f   : > { %6857 = vst [vmem:[%s12383_s18 + $0x1b0] sm:$0xff] %v9247_v29  ;;  %v9264_v16 = vadd.f32 %v6449_v60, %v12510_v21 }
 0x670   : > { %6859 = vst [vmem:[%s12383_s18 + $0x1c0] sm:$0xff] %v9263_v51  ;;  %6858 = vst [vmem:[%s12383_s18 + $0x1b8] sm:$0xff] %v9248_v26  ;;  %v6114_v14 = vpop.f32.mrb[116].mxu1 }
 0x671   : > { %6860 = vst [vmem:[%s12383_s18 + $0x1c8] sm:$0xff] %v9264_v16  ;;  %v9249_v9 = vadd.f32 %v6114_v14, %v12501_v7  ;;  %v6453_v1 = vpop.f32.mrb[140].mxu0  ;;  %v6116_v38 = vpop.f32.mrb[117].mxu1 }
 0x672   : > { %v9265_v19 = vadd.f32 %v6453_v1, %v12504_v49  ;;  %v9250_v18 = vadd.f32 %v6116_v38, %v12507_v55  ;;  %v6455_v0 = vpop.f32.mrb[141].mxu0 }
 0x673   : > { %6867 = vst [vmem:[%s12383_s18 + $0x200] sm:$0xff] %v9249_v9  ;;  %v9266_v43 = vadd.f32 %v6455_v0, %v12510_v21 }
 0x674   : > { %6869 = vst [vmem:[%s12383_s18 + $0x210] sm:$0xff] %v9265_v19  ;;  %6868 = vst [vmem:[%s12383_s18 + $0x208] sm:$0xff] %v9250_v18  ;;  %v6120_v23 = vpop.f32.mrb[118].mxu1 }
 0x675   : > { %6870 = vst [vmem:[%s12383_s18 + $0x218] sm:$0xff] %v9266_v43  ;;  %v9251_v46 = vadd.f32 %v6120_v23, %v12501_v7  ;;  %v6459_v63 = vpop.f32.mrb[142].mxu0  ;;  %v6122_v10 = vpop.f32.mrb[119].mxu1  ;;  %v5093_v7 = vrot.slane %v5055_v33, %v12887_v27 }
 0x676   : > { %v9267_v57 = vadd.f32 %v6459_v63, %v12504_v49  ;;  %v9252_v54 = vadd.f32 %v6122_v10, %v12507_v55  ;;  %v6461_v62 = vpop.f32.mrb[143].mxu0 }
 0x677   : > { %6877 = vst [vmem:[%s12383_s18 + $0x250] sm:$0xff] %v9251_v46  ;;  %v9268_v6 = vadd.f32 %v6461_v62, %v12510_v21 }
 0x678   : > { %6879 = vst [vmem:[%s12383_s18 + $0x260] sm:$0xff] %v9267_v57  ;;  %6878 = vst [vmem:[%s12383_s18 + $0x258] sm:$0xff] %v9252_v54 }
 0x679   : > { %6880 = vst [vmem:[%s12383_s18 + $0x268] sm:$0xff] %v9268_v6 }
 0x6f8   : > { %v6756_v15 = vpop.f32.mrb[120].mxu1 }
 0x6f9   : > { %v9269_v49 = vadd.f32 %v6756_v15, %v5093_v7  ;;  %v6758_v35 = vpop.f32.mrb[121].mxu1 }
 0x6fa   : > { %v9270_v55 = vadd.f32 %v6758_v35, %v5097_v3 }
 0x6fb   : > { %6811 = vst [vmem:[%s12383_s18 + $0x40] sm:$0xff] %v9269_v49 }
 0x6fc   : > { %6812 = vst [vmem:[%s12383_s18 + $0x48] sm:$0xff] %v9270_v55  ;;  %v6762_v25 = vpop.f32.mrb[122].mxu1 }
 0x6fd   : > { %v9271_v21 = vadd.f32 %v6762_v25, %v5093_v7  ;;  %v6764_v22 = vpop.f32.mrb[123].mxu1 }
 0x6fe   : > { %v9272_v30 = vadd.f32 %v6764_v22, %v5097_v3 }
 0x6ff   : > { %6821 = vst [vmem:[%s12383_s18 + $0x90] sm:$0xff] %v9271_v21 }
 0x700   : > { %6822 = vst [vmem:[%s12383_s18 + $0x98] sm:$0xff] %v9272_v30  ;;  %v6768_v13 = vpop.f32.mrb[124].mxu1 }
 0x701   : > { %v9273_v27 = vadd.f32 %v6768_v13, %v5093_v7  ;;  %v6770_v58 = vpop.f32.mrb[125].mxu1 }
 0x702   : > { %v9274_v34 = vadd.f32 %v6770_v58, %v5097_v3 }
 0x703   : > { %6831 = vst [vmem:[%s12383_s18 + $0xe0] sm:$0xff] %v9273_v27 }
 0x704   : > { %6832 = vst [vmem:[%s12383_s18 + $0xe8] sm:$0xff] %v9274_v34  ;;  %v6774_v17 = vpop.f32.mrb[126].mxu1 }
 0x705   : > { %v9275_v47 = vadd.f32 %v6774_v17, %v5093_v7  ;;  %v6776_v52 = vpop.f32.mrb[127].mxu1 }
 0x706   : > { %v9276_v53 = vadd.f32 %v6776_v52, %v5097_v3 }
 0x707   : > { %6841 = vst [vmem:[%s12383_s18 + $0x130] sm:$0xff] %v9275_v47 }
 0x708   : > { %6842 = vst [vmem:[%s12383_s18 + $0x138] sm:$0xff] %v9276_v53  ;;  %v6780_v20 = vpop.f32.mrb[128].mxu1 }
 0x709   : > { %v9277_v41 = vadd.f32 %v6780_v20, %v5093_v7  ;;  %v6782_v36 = vpop.f32.mrb[129].mxu1 }
 0x70a   : > { %v9278_v4 = vadd.f32 %v6782_v36, %v5097_v3 }
 0x70b   : > { %6851 = vst [vmem:[%s12383_s18 + $0x180] sm:$0xff] %v9277_v41 }
 0x70c   : > { %6852 = vst [vmem:[%s12383_s18 + $0x188] sm:$0xff] %v9278_v4  ;;  %v6786_v61 = vpop.f32.mrb[130].mxu1 }
 0x70d   : > { %v9279_v56 = vadd.f32 %v6786_v61, %v5093_v7  ;;  %v6788_v24 = vpop.f32.mrb[131].mxu1 }
 0x70e   : > { %v9280_v8 = vadd.f32 %v6788_v24, %v5097_v3 }
 0x70f   : > { %6861 = vst [vmem:[%s12383_s18 + $0x1d0] sm:$0xff] %v9279_v56 }
 0x710   : > { %6862 = vst [vmem:[%s12383_s18 + $0x1d8] sm:$0xff] %v9280_v8  ;;  %v6792_v59 = vpop.f32.mrb[132].mxu1 }
 0x711   : > { %v9281_v11 = vadd.f32 %v6792_v59, %v5093_v7  ;;  %v6794_v39 = vpop.f32.mrb[133].mxu1 }
 0x712   : > { %v9282_v5 = vadd.f32 %v6794_v39, %v5097_v3 }
 0x713   : > { %6871 = vst [vmem:[%s12383_s18 + $0x220] sm:$0xff] %v9281_v11 }
 0x714   : > { %6872 = vst [vmem:[%s12383_s18 + $0x228] sm:$0xff] %v9282_v5  ;;  %v6798_v2 = vpop.f32.mrb[134].mxu1 }
 0x715   : > { %v9283_v42 = vadd.f32 %v6798_v2, %v5093_v7  ;;  %v6800_v40 = vpop.f32.mrb[135].mxu1 }
 0x716   : > { %v9284_v12 = vadd.f32 %v6800_v40, %v5097_v3 }
 0x717   : > { %6881 = vst [vmem:[%s12383_s18 + $0x270] sm:$0xff] %v9283_v42 }
 0x718   : > { %6882 = vst [vmem:[%s12383_s18 + $0x278] sm:$0xff] %v9284_v12 }
 0x719 PF: > { %s28_s21 = sadd.s32 1, %s10025_s21  }
 0x71a   : > { %p25_p7 = scmp.ge.s32.totalorder %s28_s21, 4  }
 0x71c   :  { %27 = sbr.rel (!%p25_p7) target bundleno = 8 (0x8), region = 143 }
 0x723   :  { %6907 = vsyncpa [#allocation3], 1 }
 0x724   :  { %6909 = vsyncpa [#allocation3 + $0x1], 1 }
 0x725   :  { %6910 = vsyncpa [#allocation5], 1 }
 0x726   :  { %6911 = vsyncpa [#allocation8], 1 }
 0x727   :  { %6912 = vsyncpa [#allocation11], 1 }
 0x728   :  { %6913 = vsyncpa [#allocation14], 1 }
 0x729   :  { %6914 = vsyncpa [#allocation17], 1 }

</bundles_post_ra>
